<compile_context>
chip_gen: v5e
topology: v5e:2x2
jax: 0.10.0
libtpu: 0.0.40
codegen_flags: <defaults>
</compile_context>

<pallas_src>
import functools

import jax
import jax.numpy as jnp
from jax.experimental import pallas as pl
from jax.experimental.pallas import tpu as pltpu


def _round_up(v, m):
    return ((v + m - 1) // m) * m


def _reservoir_block_kernel(x_proj_ref, adj_ref, w_rec0_ref, *rest,
                            num_layers, leak, time_block):
    """One block of `time_block` timesteps of the multi-layer graph-ESN recurrence."""
    if num_layers > 1:
        w_in_r_ref, w_rec_r_ref = rest[0], rest[1]
        out_ref, state_ref, state_bf_ref = rest[2], rest[3], rest[4]
    else:
        w_in_r_ref = w_rec_r_ref = None
        out_ref, state_ref, state_bf_ref = rest[0], rest[1], rest[2]

    tb = pl.program_id(0)

    # Zero initial state (module default when initial_state is None) — only once.
    @pl.when(tb == 0)
    def _init():
        state_ref[...] = jnp.zeros_like(state_ref)
        state_bf_ref[...] = jnp.zeros_like(state_bf_ref)

    leak_f = jnp.float32(leak)
    keep_f = jnp.float32(1.0 - leak)
    mm_dtype = adj_ref.dtype                       # matmul operand dtype (bf16)
    adj = adj_ref[...]                             # (Np, Np), resident

    # TODO(synk): for L > ~4 switch this static unroll to lax.fori_loop with
    # dynamic indexing into the stacked weight/state refs (bounds vreg live ranges).
    for i in range(time_block):                    # static unroll over time sub-block
        # ---- hoisted aggregations: adj @ state_old[l] for every layer -------
        # They depend only on the previous step's states, so they are off the
        # serial intra-step layer chain and stream back-to-back on the MXU.
        aggr = [jnp.dot(adj, state_bf_ref[l], preferred_element_type=jnp.float32)
                for l in range(num_layers)]

        # ---- layer 0: input projection was hoisted to the wrapper -----------
        pre0 = (x_proj_ref[i].astype(jnp.float32)
                + jnp.dot(aggr[0].astype(mm_dtype), w_rec0_ref[...],
                          preferred_element_type=jnp.float32))
        new0 = leak_f * jnp.tanh(pre0) + keep_f * state_ref[0]
        state_ref[0] = new0
        state_bf_ref[0] = new0.astype(mm_dtype)    # single f32->bf16 cast per layer

        # ---- layers 1..L-1: two accumulated dots (no lane concat) -----------
        for l in range(1, num_layers):
            pre = (jnp.dot(state_bf_ref[l - 1], w_in_r_ref[l - 1],
                           preferred_element_type=jnp.float32)
                   + jnp.dot(aggr[l].astype(mm_dtype), w_rec_r_ref[l - 1],
                             preferred_element_type=jnp.float32))
            new = leak_f * jnp.tanh(pre) + keep_f * state_ref[l]
            state_ref[l] = new
            state_bf_ref[l] = new.astype(mm_dtype)

    # Write the last layer's state out only on the final grid step.
    @pl.when(tb == pl.num_programs(0) - 1)
    def _finalize():
        out_ref[...] = state_ref[num_layers - 1]


def dynamic_graph_reservoir(adj, x, w_in0, w_in_rest, w_rec, leakage,
                            matmul_dtype=jnp.bfloat16, time_block=8):
    """Pallas-backed forward pass. Returns the final state of the last layer.

    adj       : (N, N)      dense adjacency, adj[i, j] = weight of edge j -> i
    x         : (T, N, F)   input graph signal
    w_in0     : (H, F)      layer-0 input weight (PyTorch layout, used as x @ W^T)
    w_in_rest : (L-1, H, H) input weights of layers 1..L-1
    w_rec     : (L, H, H)   recurrent weights
    leakage   : python float
    """
    T, N, F_in = x.shape
    L, H, _ = w_rec.shape
    assert w_in0.shape == (H, F_in)
    assert w_in_rest.shape == (L - 1, H, H)

    Hp = _round_up(H, 128)     # lane-dense hidden dim
    Np = _round_up(N, 128)     # lane-dense adjacency / full 128-wide MXU passes
    mm_bytes = jnp.dtype(matmul_dtype).itemsize

    # Time block: largest divisor of T that respects the requested block size
    # and an 8 MiB x_proj double-buffer budget.
    divisors = [d for d in range(1, T + 1) if T % d == 0]
    candidates = [d for d in divisors
                  if d <= max(1, time_block)
                  and 2 * d * Np * Hp * mm_bytes <= (8 << 20)]
    tb = max(candidates) if candidates else 1
    grid_t = T // tb

    # Hoist the layer-0 input projection out of the time recurrence: one
    # (T*N, F) x (F, H) matmul in f32 in the wrapper, streamed to the kernel
    # in bf16 (it is the only per-step HBM traffic).
    # TODO(synk): for very large N with tiny F this hoist multiplies streamed
    # bytes by Hp/F; add a switch to stream raw x and do the F-contraction
    # in-kernel when the step becomes DMA-exposed.
    x_proj = jnp.einsum("tnf,hf->tnh",
                        x.astype(jnp.float32), w_in0.astype(jnp.float32))
    x_proj = jnp.pad(x_proj, ((0, 0), (0, Np - N), (0, Hp - H)))
    x_proj = x_proj.astype(matmul_dtype)                                # (T, Np, Hp)

    # Padded adjacency (padded rows/cols are zero -> padded nodes stay inert).
    # TODO(synk): row-block tiling of a very large adjacency (v7x 64 MiB VMEM
    # tops out around Np ~4k resident) via an inner pltpu.emit_pipeline.
    adj_p = jnp.pad(adj.astype(jnp.float32),
                    ((0, Np - N), (0, Np - N))).astype(matmul_dtype)    # (Np, Np)

    # Layer-0 recurrent weight, pre-transposed + padded.
    w_rec0 = jnp.pad(jnp.transpose(w_rec[0]).astype(jnp.float32),
                     ((0, Hp - H), (0, Hp - H))).astype(matmul_dtype)   # (Hp, Hp)

    # Layers 1..L-1: two stacked weight tensors (no concat; the kernel does two
    # dots accumulated in f32 instead of one 2*Hp-contraction dot).
    extra_inputs = []
    extra_specs = []
    Lm1 = L - 1
    if L > 1:
        w_in_t = jnp.transpose(w_in_rest, (0, 2, 1)).astype(jnp.float32)
        w_rec_t = jnp.transpose(w_rec[1:], (0, 2, 1)).astype(jnp.float32)
        w_in_t = jnp.pad(w_in_t, ((0, 0), (0, Hp - H), (0, Hp - H))).astype(matmul_dtype)
        w_rec_t = jnp.pad(w_rec_t, ((0, 0), (0, Hp - H), (0, Hp - H))).astype(matmul_dtype)
        extra_inputs = [w_in_t, w_rec_t]
        extra_specs = [pl.BlockSpec((Lm1, Hp, Hp), lambda t: (0, 0, 0)),
                       pl.BlockSpec((Lm1, Hp, Hp), lambda t: (0, 0, 0))]

    # Generation-aware VMEM budget (v7x: 64 MiB physical, v5e/v6e: 128 MiB).
    try:
        vmem_cap = int(pltpu.get_tpu_info().vmem_capacity_bytes)
    except Exception:
        vmem_cap = 64 << 20
    vmem_cap_use = int(vmem_cap * 0.875)           # leave headroom for the compiler

    vmem_est = (2 * tb * Np * Hp * mm_bytes        # streamed x_proj double buffer (bf16)
                + Np * Np * mm_bytes               # adj (resident)
                + Hp * Hp * mm_bytes               # w_rec0
                + 2 * Lm1 * Hp * Hp * mm_bytes     # stacked w_in / w_rec (layers 1..L-1)
                + L * Np * Hp * 4                  # f32 state scratch
                + L * Np * Hp * mm_bytes           # bf16 state mirror
                + L * Np * Hp * 4                  # per-step aggr temporaries
                + 2 * Np * Hp * 4)                 # output buffers
    vmem_limit = int(min(vmem_cap_use, max(32 << 20, 2 * vmem_est)))

    kernel = functools.partial(_reservoir_block_kernel,
                               num_layers=L, leak=float(leakage), time_block=tb)

    out_padded = pl.pallas_call(
        kernel,
        out_shape=jax.ShapeDtypeStruct((Np, Hp), jnp.float32),
        grid=(grid_t,),
        in_specs=[
            pl.BlockSpec((tb, Np, Hp), lambda t: (t, 0, 0)),   # x_proj, streamed over T
            pl.BlockSpec((Np, Np), lambda t: (0, 0)),          # adj, resident
            pl.BlockSpec((Hp, Hp), lambda t: (0, 0)),          # w_rec0, resident
        ] + extra_specs,                                       # stacked weights, resident
        out_specs=pl.BlockSpec((Np, Hp), lambda t: (0, 0)),    # written on final step
        scratch_shapes=[pltpu.VMEM((L, Np, Hp), jnp.float32),  # per-layer f32 state
                        pltpu.VMEM((L, Np, Hp), matmul_dtype)],  # bf16 state mirror
        compiler_params=pltpu.CompilerParams(
            dimension_semantics=("arbitrary",),                # serial recurrence over T
            vmem_limit_bytes=vmem_limit),
    )(x_proj, adj_p, w_rec0, *extra_inputs)

    # TODO(synk): optional graph `pooling`, `fully` layer concat, node masks,
    # per-timestep edge_index lists, categorical (embedding) inputs, and a
    # v7x two-TensorCore hidden-dim split (core_map) are glue-level variants
    # not exercised here.
    return out_padded[:N, :H]


def _reference(adj, x, w_in0, w_in_rest, w_rec, leakage, matmul_dtype=jnp.float32):
    """Pure-JAX reference matching the PyTorch module semantics.

    With matmul_dtype=bf16 it mirrors the kernel's mixed precision (bf16 MXU
    operands incl. the streamed input projection, f32 accumulation, f32
    tanh/blend).
    """
    T, N, _ = x.shape
    L, H, _ = w_rec.shape

    def mm(a, b):
        return jnp.dot(a.astype(matmul_dtype), b.astype(matmul_dtype),
                       preferred_element_type=jnp.float32)

    x_proj = jnp.einsum("tnf,hf->tnh",
                        x.astype(jnp.float32), w_in0.astype(jnp.float32))
    x_proj = x_proj.astype(matmul_dtype).astype(jnp.float32)

    state = [jnp.zeros((N, H), jnp.float32) for _ in range(L)]
    for t in range(T):
        aggr = [mm(adj, state[l]) for l in range(L)]
        state[0] = (leakage * jnp.tanh(x_proj[t] + mm(aggr[0], w_rec[0].T))
                    + (1.0 - leakage) * state[0])
        for l in range(1, L):
            state[l] = (leakage * jnp.tanh(mm(state[l - 1], w_in_rest[l - 1].T)
                                           + mm(aggr[l], w_rec[l].T))
                        + (1.0 - leakage) * state[l])
    return state[-1]


if __name__ == "__main__":
    # Small deterministic problem: T=8 timesteps, N=16 nodes, F=4 input feats,
    # H=32 hidden units, L=2 reservoir layers.
    T, N, F_in, H, L = 8, 16, 4, 32, 2
    leakage = 0.8

    key = jax.random.PRNGKey(0)
    k_x, k_in0, k_in, k_rec = jax.random.split(key, 4)

    # Input graph signal (time x nodes x in_features).
    x = jax.random.normal(k_x, (T, N, F_in), dtype=jnp.float32)

    # Fixed ring adjacency: node i receives from neighbours (i-1, i+1) mod N.
    idx = jnp.arange(N)
    adj = (jnp.zeros((N, N), jnp.float32)
           .at[idx, (idx - 1) % N].set(1.0)
           .at[idx, (idx + 1) % N].set(1.0))

    # Deterministic reservoir weights (bias=False).
    w_in0 = jax.random.uniform(k_in0, (H, F_in), minval=-1.0, maxval=1.0)
    w_in_rest = jax.random.uniform(k_in, (L - 1, H, H), minval=-1.0, maxval=1.0)
    w_rec = 0.1 * jax.random.uniform(k_rec, (L, H, H), minval=-1.0, maxval=1.0)

    out = dynamic_graph_reservoir(adj, x, w_in0, w_in_rest, w_rec, leakage)
    out = jax.block_until_ready(out)
    assert out.shape == (N, H)

    # Tight check vs. a reference that mirrors the kernel's bf16-MXU / f32-acc
    # numerics, plus a loose sanity check vs. the pure-f32 reference.
    ref_mixed = _reference(adj, x, w_in0, w_in_rest, w_rec, leakage,
                           matmul_dtype=jnp.bfloat16)
    ref_f32 = _reference(adj, x, w_in0, w_in_rest, w_rec, leakage,
                         matmul_dtype=jnp.float32)
    assert jnp.allclose(out, ref_mixed, atol=2e-3, rtol=2e-3), "mismatch vs bf16 reference"
    assert jnp.allclose(out, ref_f32, atol=1e-1, rtol=1e-1), "mismatch vs f32 reference"

    print("KERNEL_OK")
</pallas_src>

<mosaic_0001>
module attributes {stable_mosaic.version = 11 : i64} {
  func.func @_reservoir_block_kernel(%arg0: i32, %arg1: memref<8x128x128xbf16, #tpu.memory_space<vmem>>, %arg2: memref<128x128xbf16, #tpu.memory_space<vmem>>, %arg3: memref<128x128xbf16, #tpu.memory_space<vmem>>, %arg4: memref<1x128x128xbf16, #tpu.memory_space<vmem>>, %arg5: memref<1x128x128xbf16, #tpu.memory_space<vmem>>, %arg6: memref<128x128xf32, #tpu.memory_space<vmem>>, %arg7: memref<2x128x128xf32, #tpu.memory_space<vmem>>, %arg8: memref<2x128x128xbf16, #tpu.memory_space<vmem>>) attributes {dimension_semantics = [#tpu.dimension_semantics<arbitrary>], iteration_bounds = array<i64: 1>, scalar_prefetch = 0 : i64, scratch_operands = 2 : i64, tpu.core_type = #tpu.core_type<tc>, window_params = [{transform_indices = @transform_0, window_bounds = array<i64: 8, 128, 128>}, {pipeline_mode = #tpu.pipeline_mode<synchronous>, transform_indices = @transform_1, window_bounds = array<i64: 128, 128>}, {pipeline_mode = #tpu.pipeline_mode<synchronous>, transform_indices = @transform_2, window_bounds = array<i64: 128, 128>}, {pipeline_mode = #tpu.pipeline_mode<synchronous>, transform_indices = @transform_3, window_bounds = array<i64: 1, 128, 128>}, {pipeline_mode = #tpu.pipeline_mode<synchronous>, transform_indices = @transform_4, window_bounds = array<i64: 1, 128, 128>}, {pipeline_mode = #tpu.pipeline_mode<synchronous>, transform_indices = @transform_5, window_bounds = array<i64: 128, 128>}]} {
    %c0_i32 = arith.constant 0 : i32
    %0 = arith.cmpi eq, %arg0, %c0_i32 : i32
    %1 = arith.extui %0 : i1 to i32
    %c0_i32_0 = arith.constant 0 : i32
    %2 = arith.cmpi ne, %1, %c0_i32_0 : i32
    scf.if %2 {
      %cst_372 = arith.constant 0.000000e+00 : f32
      %431 = vector.broadcast %cst_372 : f32 to vector<2x128x128xf32>
      %c0_373 = arith.constant 0 : index
      %c0_374 = arith.constant 0 : index
      %c0_375 = arith.constant 0 : index
      %432 = vector.load %arg7[%c0_373, %c0_374, %c0_375] : memref<2x128x128xf32, #tpu.memory_space<vmem>>, vector<2x128x128xf32>
      tpu.vector_store %arg7[%c0_373, %c0_374, %c0_375], %431 {strides = array<i32>} : memref<2x128x128xf32, #tpu.memory_space<vmem>>, vector<2x128x128xf32>,
      %cst_376 = arith.constant 0.000000e+00 : bf16
      %433 = vector.broadcast %cst_376 : bf16 to vector<2x128x128xbf16>
      %c0_377 = arith.constant 0 : index
      %c0_378 = arith.constant 0 : index
      %c0_379 = arith.constant 0 : index
      %434 = vector.load %arg8[%c0_377, %c0_378, %c0_379] : memref<2x128x128xbf16, #tpu.memory_space<vmem>>, vector<2x128x128xbf16>
      tpu.vector_store %arg8[%c0_377, %c0_378, %c0_379], %433 {strides = array<i32>} : memref<2x128x128xbf16, #tpu.memory_space<vmem>>, vector<2x128x128xbf16>,
    } else {
    }
    %c0 = arith.constant 0 : index
    %c0_1 = arith.constant 0 : index
    %3 = vector.load %arg2[%c0, %c0_1] : memref<128x128xbf16, #tpu.memory_space<vmem>>, vector<128x128xbf16>
    %c0_2 = arith.constant 0 : index
    %c0_3 = arith.constant 0 : index
    %c0_4 = arith.constant 0 : index
    %4 = vector.load %arg8[%c0_2, %c0_3, %c0_4] : memref<2x128x128xbf16, #tpu.memory_space<vmem>>, vector<1x128x128xbf16>
    %5 = vector.shape_cast %4 : vector<1x128x128xbf16> to vector<128x128xbf16>
    %cst = arith.constant dense<0.000000e+00> : vector<128x128xf32>
    %6 = tpu.matmul %3, %5, %cst {dimension_numbers = #tpu.dot_dimension_numbers<[1], [0], [0], [1], [0, 0, 1, 1], [], []>} : vector<128x128xbf16>, vector<128x128xbf16>, vector<128x128xf32> -> vector<128x128xf32>
    %c1 = arith.constant 1 : index
    %c0_5 = arith.constant 0 : index
    %c0_6 = arith.constant 0 : index
    %7 = vector.load %arg8[%c1, %c0_5, %c0_6] : memref<2x128x128xbf16, #tpu.memory_space<vmem>>, vector<1x128x128xbf16>
    %8 = vector.shape_cast %7 : vector<1x128x128xbf16> to vector<128x128xbf16>
    %cst_7 = arith.constant dense<0.000000e+00> : vector<128x128xf32>
    %9 = tpu.matmul %3, %8, %cst_7 {dimension_numbers = #tpu.dot_dimension_numbers<[1], [0], [0], [1], [0, 0, 1, 1], [], []>} : vector<128x128xbf16>, vector<128x128xbf16>, vector<128x128xf32> -> vector<128x128xf32>
    %c0_8 = arith.constant 0 : index
    %c0_9 = arith.constant 0 : index
    %c0_10 = arith.constant 0 : index
    %10 = vector.load %arg1[%c0_8, %c0_9, %c0_10] : memref<8x128x128xbf16, #tpu.memory_space<vmem>>, vector<1x128x128xbf16>
    %11 = vector.shape_cast %10 : vector<1x128x128xbf16> to vector<128x128xbf16>
    %12 = arith.extf %11 : vector<128x128xbf16> to vector<128x128xf32>
    %13 = arith.truncf %6 : vector<128x128xf32> to vector<128x128xbf16>
    %c0_11 = arith.constant 0 : index
    %c0_12 = arith.constant 0 : index
    %14 = vector.load %arg3[%c0_11, %c0_12] : memref<128x128xbf16, #tpu.memory_space<vmem>>, vector<128x128xbf16>
    %cst_13 = arith.constant dense<0.000000e+00> : vector<128x128xf32>
    %15 = tpu.matmul %13, %14, %cst_13 {dimension_numbers = #tpu.dot_dimension_numbers<[1], [0], [0], [1], [0, 0, 1, 1], [], []>} : vector<128x128xbf16>, vector<128x128xbf16>, vector<128x128xf32> -> vector<128x128xf32>
    %16 = arith.addf %12, %15 : vector<128x128xf32>
    %17 = math.tanh %16 : vector<128x128xf32>
    %cst_14 = arith.constant 8.000000e-01 : f32
    %18 = vector.broadcast %cst_14 : f32 to vector<128x128xf32>
    %19 = arith.mulf %18, %17 : vector<128x128xf32>
    %c0_15 = arith.constant 0 : index
    %c0_16 = arith.constant 0 : index
    %c0_17 = arith.constant 0 : index
    %20 = vector.load %arg7[%c0_15, %c0_16, %c0_17] : memref<2x128x128xf32, #tpu.memory_space<vmem>>, vector<1x128x128xf32>
    %21 = vector.shape_cast %20 : vector<1x128x128xf32> to vector<128x128xf32>
    %cst_18 = arith.constant 2.000000e-01 : f32
    %22 = vector.broadcast %cst_18 : f32 to vector<128x128xf32>
    %23 = arith.mulf %22, %21 : vector<128x128xf32>
    %24 = arith.addf %19, %23 : vector<128x128xf32>
    %c0_19 = arith.constant 0 : index
    %c0_20 = arith.constant 0 : index
    %c0_21 = arith.constant 0 : index
    %25 = vector.load %arg7[%c0_19, %c0_20, %c0_21] : memref<2x128x128xf32, #tpu.memory_space<vmem>>, vector<1x128x128xf32>
    %26 = vector.shape_cast %25 : vector<1x128x128xf32> to vector<128x128xf32>
    %27 = vector.shape_cast %24 : vector<128x128xf32> to vector<1x128x128xf32>
    tpu.vector_store %arg7[%c0_19, %c0_20, %c0_21], %27 {strides = array<i32>} : memref<2x128x128xf32, #tpu.memory_space<vmem>>, vector<1x128x128xf32>,
    %28 = arith.truncf %24 : vector<128x128xf32> to vector<128x128xbf16>
    %c0_22 = arith.constant 0 : index
    %c0_23 = arith.constant 0 : index
    %c0_24 = arith.constant 0 : index
    %29 = vector.load %arg8[%c0_22, %c0_23, %c0_24] : memref<2x128x128xbf16, #tpu.memory_space<vmem>>, vector<1x128x128xbf16>
    %30 = vector.shape_cast %29 : vector<1x128x128xbf16> to vector<128x128xbf16>
    %31 = vector.shape_cast %28 : vector<128x128xbf16> to vector<1x128x128xbf16>
    tpu.vector_store %arg8[%c0_22, %c0_23, %c0_24], %31 {strides = array<i32>} : memref<2x128x128xbf16, #tpu.memory_space<vmem>>, vector<1x128x128xbf16>,
    %c0_25 = arith.constant 0 : index
    %c0_26 = arith.constant 0 : index
    %c0_27 = arith.constant 0 : index
    %32 = vector.load %arg8[%c0_25, %c0_26, %c0_27] : memref<2x128x128xbf16, #tpu.memory_space<vmem>>, vector<1x128x128xbf16>
    %33 = vector.shape_cast %32 : vector<1x128x128xbf16> to vector<128x128xbf16>
    %c0_28 = arith.constant 0 : index
    %c0_29 = arith.constant 0 : index
    %c0_30 = arith.constant 0 : index
    %34 = vector.load %arg4[%c0_28, %c0_29, %c0_30] : memref<1x128x128xbf16, #tpu.memory_space<vmem>>, vector<1x128x128xbf16>
    %35 = vector.shape_cast %34 : vector<1x128x128xbf16> to vector<128x128xbf16>
    %cst_31 = arith.constant dense<0.000000e+00> : vector<128x128xf32>
    %36 = tpu.matmul %33, %35, %cst_31 {dimension_numbers = #tpu.dot_dimension_numbers<[1], [0], [0], [1], [0, 0, 1, 1], [], []>} : vector<128x128xbf16>, vector<128x128xbf16>, vector<128x128xf32> -> vector<128x128xf32>
    %37 = arith.truncf %9 : vector<128x128xf32> to vector<128x128xbf16>
    %c0_32 = arith.constant 0 : index
    %c0_33 = arith.constant 0 : index
    %c0_34 = arith.constant 0 : index
    %38 = vector.load %arg5[%c0_32, %c0_33, %c0_34] : memref<1x128x128xbf16, #tpu.memory_space<vmem>>, vector<1x128x128xbf16>
    %39 = vector.shape_cast %38 : vector<1x128x128xbf16> to vector<128x128xbf16>
    %cst_35 = arith.constant dense<0.000000e+00> : vector<128x128xf32>
    %40 = tpu.matmul %37, %39, %cst_35 {dimension_numbers = #tpu.dot_dimension_numbers<[1], [0], [0], [1], [0, 0, 1, 1], [], []>} : vector<128x128xbf16>, vector<128x128xbf16>, vector<128x128xf32> -> vector<128x128xf32>
    %41 = arith.addf %36, %40 : vector<128x128xf32>
    %42 = math.tanh %41 : vector<128x128xf32>
    %cst_36 = arith.constant 8.000000e-01 : f32
    %43 = vector.broadcast %cst_36 : f32 to vector<128x128xf32>
    %44 = arith.mulf %43, %42 : vector<128x128xf32>
    %c1_37 = arith.constant 1 : index
    %c0_38 = arith.constant 0 : index
    %c0_39 = arith.constant 0 : index
    %45 = vector.load %arg7[%c1_37, %c0_38, %c0_39] : memref<2x128x128xf32, #tpu.memory_space<vmem>>, vector<1x128x128xf32>
    %46 = vector.shape_cast %45 : vector<1x128x128xf32> to vector<128x128xf32>
    %cst_40 = arith.constant 2.000000e-01 : f32
    %47 = vector.broadcast %cst_40 : f32 to vector<128x128xf32>
    %48 = arith.mulf %47, %46 : vector<128x128xf32>
    %49 = arith.addf %44, %48 : vector<128x128xf32>
    %c1_41 = arith.constant 1 : index
    %c0_42 = arith.constant 0 : index
    %c0_43 = arith.constant 0 : index
    %50 = vector.load %arg7[%c1_41, %c0_42, %c0_43] : memref<2x128x128xf32, #tpu.memory_space<vmem>>, vector<1x128x128xf32>
    %51 = vector.shape_cast %50 : vector<1x128x128xf32> to vector<128x128xf32>
    %52 = vector.shape_cast %49 : vector<128x128xf32> to vector<1x128x128xf32>
    tpu.vector_store %arg7[%c1_41, %c0_42, %c0_43], %52 {strides = array<i32>} : memref<2x128x128xf32, #tpu.memory_space<vmem>>, vector<1x128x128xf32>,
    %53 = arith.truncf %49 : vector<128x128xf32> to vector<128x128xbf16>
    %c1_44 = arith.constant 1 : index
    %c0_45 = arith.constant 0 : index
    %c0_46 = arith.constant 0 : index
    %54 = vector.load %arg8[%c1_44, %c0_45, %c0_46] : memref<2x128x128xbf16, #tpu.memory_space<vmem>>, vector<1x128x128xbf16>
    %55 = vector.shape_cast %54 : vector<1x128x128xbf16> to vector<128x128xbf16>
    %56 = vector.shape_cast %53 : vector<128x128xbf16> to vector<1x128x128xbf16>
    tpu.vector_store %arg8[%c1_44, %c0_45, %c0_46], %56 {strides = array<i32>} : memref<2x128x128xbf16, #tpu.memory_space<vmem>>, vector<1x128x128xbf16>,
    %c0_47 = arith.constant 0 : index
    %c0_48 = arith.constant 0 : index
    %c0_49 = arith.constant 0 : index
    %57 = vector.load %arg8[%c0_47, %c0_48, %c0_49] : memref<2x128x128xbf16, #tpu.memory_space<vmem>>, vector<1x128x128xbf16>
    %58 = vector.shape_cast %57 : vector<1x128x128xbf16> to vector<128x128xbf16>
    %cst_50 = arith.constant dense<0.000000e+00> : vector<128x128xf32>
    %59 = tpu.matmul %3, %58, %cst_50 {dimension_numbers = #tpu.dot_dimension_numbers<[1], [0], [0], [1], [0, 0, 1, 1], [], []>} : vector<128x128xbf16>, vector<128x128xbf16>, vector<128x128xf32> -> vector<128x128xf32>
    %c1_51 = arith.constant 1 : index
    %c0_52 = arith.constant 0 : index
    %c0_53 = arith.constant 0 : index
    %60 = vector.load %arg8[%c1_51, %c0_52, %c0_53] : memref<2x128x128xbf16, #tpu.memory_space<vmem>>, vector<1x128x128xbf16>
    %61 = vector.shape_cast %60 : vector<1x128x128xbf16> to vector<128x128xbf16>
    %cst_54 = arith.constant dense<0.000000e+00> : vector<128x128xf32>
    %62 = tpu.matmul %3, %61, %cst_54 {dimension_numbers = #tpu.dot_dimension_numbers<[1], [0], [0], [1], [0, 0, 1, 1], [], []>} : vector<128x128xbf16>, vector<128x128xbf16>, vector<128x128xf32> -> vector<128x128xf32>
    %c1_55 = arith.constant 1 : index
    %c0_56 = arith.constant 0 : index
    %c0_57 = arith.constant 0 : index
    %63 = vector.load %arg1[%c1_55, %c0_56, %c0_57] : memref<8x128x128xbf16, #tpu.memory_space<vmem>>, vector<1x128x128xbf16>
    %64 = vector.shape_cast %63 : vector<1x128x128xbf16> to vector<128x128xbf16>
    %65 = arith.extf %64 : vector<128x128xbf16> to vector<128x128xf32>
    %66 = arith.truncf %59 : vector<128x128xf32> to vector<128x128xbf16>
    %c0_58 = arith.constant 0 : index
    %c0_59 = arith.constant 0 : index
    %67 = vector.load %arg3[%c0_58, %c0_59] : memref<128x128xbf16, #tpu.memory_space<vmem>>, vector<128x128xbf16>
    %cst_60 = arith.constant dense<0.000000e+00> : vector<128x128xf32>
    %68 = tpu.matmul %66, %67, %cst_60 {dimension_numbers = #tpu.dot_dimension_numbers<[1], [0], [0], [1], [0, 0, 1, 1], [], []>} : vector<128x128xbf16>, vector<128x128xbf16>, vector<128x128xf32> -> vector<128x128xf32>
    %69 = arith.addf %65, %68 : vector<128x128xf32>
    %70 = math.tanh %69 : vector<128x128xf32>
    %cst_61 = arith.constant 8.000000e-01 : f32
    %71 = vector.broadcast %cst_61 : f32 to vector<128x128xf32>
    %72 = arith.mulf %71, %70 : vector<128x128xf32>
    %c0_62 = arith.constant 0 : index
    %c0_63 = arith.constant 0 : index
    %c0_64 = arith.constant 0 : index
    %73 = vector.load %arg7[%c0_62, %c0_63, %c0_64] : memref<2x128x128xf32, #tpu.memory_space<vmem>>, vector<1x128x128xf32>
    %74 = vector.shape_cast %73 : vector<1x128x128xf32> to vector<128x128xf32>
    %cst_65 = arith.constant 2.000000e-01 : f32
    %75 = vector.broadcast %cst_65 : f32 to vector<128x128xf32>
    %76 = arith.mulf %75, %74 : vector<128x128xf32>
    %77 = arith.addf %72, %76 : vector<128x128xf32>
    %c0_66 = arith.constant 0 : index
    %c0_67 = arith.constant 0 : index
    %c0_68 = arith.constant 0 : index
    %78 = vector.load %arg7[%c0_66, %c0_67, %c0_68] : memref<2x128x128xf32, #tpu.memory_space<vmem>>, vector<1x128x128xf32>
    %79 = vector.shape_cast %78 : vector<1x128x128xf32> to vector<128x128xf32>
    %80 = vector.shape_cast %77 : vector<128x128xf32> to vector<1x128x128xf32>
    tpu.vector_store %arg7[%c0_66, %c0_67, %c0_68], %80 {strides = array<i32>} : memref<2x128x128xf32, #tpu.memory_space<vmem>>, vector<1x128x128xf32>,
    %81 = arith.truncf %77 : vector<128x128xf32> to vector<128x128xbf16>
    %c0_69 = arith.constant 0 : index
    %c0_70 = arith.constant 0 : index
    %c0_71 = arith.constant 0 : index
    %82 = vector.load %arg8[%c0_69, %c0_70, %c0_71] : memref<2x128x128xbf16, #tpu.memory_space<vmem>>, vector<1x128x128xbf16>
    %83 = vector.shape_cast %82 : vector<1x128x128xbf16> to vector<128x128xbf16>
    %84 = vector.shape_cast %81 : vector<128x128xbf16> to vector<1x128x128xbf16>
    tpu.vector_store %arg8[%c0_69, %c0_70, %c0_71], %84 {strides = array<i32>} : memref<2x128x128xbf16, #tpu.memory_space<vmem>>, vector<1x128x128xbf16>,
    %c0_72 = arith.constant 0 : index
    %c0_73 = arith.constant 0 : index
    %c0_74 = arith.constant 0 : index
    %85 = vector.load %arg8[%c0_72, %c0_73, %c0_74] : memref<2x128x128xbf16, #tpu.memory_space<vmem>>, vector<1x128x128xbf16>
    %86 = vector.shape_cast %85 : vector<1x128x128xbf16> to vector<128x128xbf16>
    %c0_75 = arith.constant 0 : index
    %c0_76 = arith.constant 0 : index
    %c0_77 = arith.constant 0 : index
    %87 = vector.load %arg4[%c0_75, %c0_76, %c0_77] : memref<1x128x128xbf16, #tpu.memory_space<vmem>>, vector<1x128x128xbf16>
    %88 = vector.shape_cast %87 : vector<1x128x128xbf16> to vector<128x128xbf16>
    %cst_78 = arith.constant dense<0.000000e+00> : vector<128x128xf32>
    %89 = tpu.matmul %86, %88, %cst_78 {dimension_numbers = #tpu.dot_dimension_numbers<[1], [0], [0], [1], [0, 0, 1, 1], [], []>} : vector<128x128xbf16>, vector<128x128xbf16>, vector<128x128xf32> -> vector<128x128xf32>
    %90 = arith.truncf %62 : vector<128x128xf32> to vector<128x128xbf16>
    %c0_79 = arith.constant 0 : index
    %c0_80 = arith.constant 0 : index
    %c0_81 = arith.constant 0 : index
    %91 = vector.load %arg5[%c0_79, %c0_80, %c0_81] : memref<1x128x128xbf16, #tpu.memory_space<vmem>>, vector<1x128x128xbf16>
    %92 = vector.shape_cast %91 : vector<1x128x128xbf16> to vector<128x128xbf16>
    %cst_82 = arith.constant dense<0.000000e+00> : vector<128x128xf32>
    %93 = tpu.matmul %90, %92, %cst_82 {dimension_numbers = #tpu.dot_dimension_numbers<[1], [0], [0], [1], [0, 0, 1, 1], [], []>} : vector<128x128xbf16>, vector<128x128xbf16>, vector<128x128xf32> -> vector<128x128xf32>
    %94 = arith.addf %89, %93 : vector<128x128xf32>
    %95 = math.tanh %94 : vector<128x128xf32>
    %cst_83 = arith.constant 8.000000e-01 : f32
    %96 = vector.broadcast %cst_83 : f32 to vector<128x128xf32>
    %97 = arith.mulf %96, %95 : vector<128x128xf32>
    %c1_84 = arith.constant 1 : index
    %c0_85 = arith.constant 0 : index
    %c0_86 = arith.constant 0 : index
    %98 = vector.load %arg7[%c1_84, %c0_85, %c0_86] : memref<2x128x128xf32, #tpu.memory_space<vmem>>, vector<1x128x128xf32>
    %99 = vector.shape_cast %98 : vector<1x128x128xf32> to vector<128x128xf32>
    %cst_87 = arith.constant 2.000000e-01 : f32
    %100 = vector.broadcast %cst_87 : f32 to vector<128x128xf32>
    %101 = arith.mulf %100, %99 : vector<128x128xf32>
    %102 = arith.addf %97, %101 : vector<128x128xf32>
    %c1_88 = arith.constant 1 : index
    %c0_89 = arith.constant 0 : index
    %c0_90 = arith.constant 0 : index
    %103 = vector.load %arg7[%c1_88, %c0_89, %c0_90] : memref<2x128x128xf32, #tpu.memory_space<vmem>>, vector<1x128x128xf32>
    %104 = vector.shape_cast %103 : vector<1x128x128xf32> to vector<128x128xf32>
    %105 = vector.shape_cast %102 : vector<128x128xf32> to vector<1x128x128xf32>
    tpu.vector_store %arg7[%c1_88, %c0_89, %c0_90], %105 {strides = array<i32>} : memref<2x128x128xf32, #tpu.memory_space<vmem>>, vector<1x128x128xf32>,
    %106 = arith.truncf %102 : vector<128x128xf32> to vector<128x128xbf16>
    %c1_91 = arith.constant 1 : index
    %c0_92 = arith.constant 0 : index
    %c0_93 = arith.constant 0 : index
    %107 = vector.load %arg8[%c1_91, %c0_92, %c0_93] : memref<2x128x128xbf16, #tpu.memory_space<vmem>>, vector<1x128x128xbf16>
    %108 = vector.shape_cast %107 : vector<1x128x128xbf16> to vector<128x128xbf16>
    %109 = vector.shape_cast %106 : vector<128x128xbf16> to vector<1x128x128xbf16>
    tpu.vector_store %arg8[%c1_91, %c0_92, %c0_93], %109 {strides = array<i32>} : memref<2x128x128xbf16, #tpu.memory_space<vmem>>, vector<1x128x128xbf16>,
    %c0_94 = arith.constant 0 : index
    %c0_95 = arith.constant 0 : index
    %c0_96 = arith.constant 0 : index
    %110 = vector.load %arg8[%c0_94, %c0_95, %c0_96] : memref<2x128x128xbf16, #tpu.memory_space<vmem>>, vector<1x128x128xbf16>
    %111 = vector.shape_cast %110 : vector<1x128x128xbf16> to vector<128x128xbf16>
    %cst_97 = arith.constant dense<0.000000e+00> : vector<128x128xf32>
    %112 = tpu.matmul %3, %111, %cst_97 {dimension_numbers = #tpu.dot_dimension_numbers<[1], [0], [0], [1], [0, 0, 1, 1], [], []>} : vector<128x128xbf16>, vector<128x128xbf16>, vector<128x128xf32> -> vector<128x128xf32>
    %c1_98 = arith.constant 1 : index
    %c0_99 = arith.constant 0 : index
    %c0_100 = arith.constant 0 : index
    %113 = vector.load %arg8[%c1_98, %c0_99, %c0_100] : memref<2x128x128xbf16, #tpu.memory_space<vmem>>, vector<1x128x128xbf16>
    %114 = vector.shape_cast %113 : vector<1x128x128xbf16> to vector<128x128xbf16>
    %cst_101 = arith.constant dense<0.000000e+00> : vector<128x128xf32>
    %115 = tpu.matmul %3, %114, %cst_101 {dimension_numbers = #tpu.dot_dimension_numbers<[1], [0], [0], [1], [0, 0, 1, 1], [], []>} : vector<128x128xbf16>, vector<128x128xbf16>, vector<128x128xf32> -> vector<128x128xf32>
    %c2 = arith.constant 2 : index
    %c0_102 = arith.constant 0 : index
    %c0_103 = arith.constant 0 : index
    %116 = vector.load %arg1[%c2, %c0_102, %c0_103] : memref<8x128x128xbf16, #tpu.memory_space<vmem>>, vector<1x128x128xbf16>
    %117 = vector.shape_cast %116 : vector<1x128x128xbf16> to vector<128x128xbf16>
    %118 = arith.extf %117 : vector<128x128xbf16> to vector<128x128xf32>
    %119 = arith.truncf %112 : vector<128x128xf32> to vector<128x128xbf16>
    %c0_104 = arith.constant 0 : index
    %c0_105 = arith.constant 0 : index
    %120 = vector.load %arg3[%c0_104, %c0_105] : memref<128x128xbf16, #tpu.memory_space<vmem>>, vector<128x128xbf16>
    %cst_106 = arith.constant dense<0.000000e+00> : vector<128x128xf32>
    %121 = tpu.matmul %119, %120, %cst_106 {dimension_numbers = #tpu.dot_dimension_numbers<[1], [0], [0], [1], [0, 0, 1, 1], [], []>} : vector<128x128xbf16>, vector<128x128xbf16>, vector<128x128xf32> -> vector<128x128xf32>
    %122 = arith.addf %118, %121 : vector<128x128xf32>
    %123 = math.tanh %122 : vector<128x128xf32>
    %cst_107 = arith.constant 8.000000e-01 : f32
    %124 = vector.broadcast %cst_107 : f32 to vector<128x128xf32>
    %125 = arith.mulf %124, %123 : vector<128x128xf32>
    %c0_108 = arith.constant 0 : index
    %c0_109 = arith.constant 0 : index
    %c0_110 = arith.constant 0 : index
    %126 = vector.load %arg7[%c0_108, %c0_109, %c0_110] : memref<2x128x128xf32, #tpu.memory_space<vmem>>, vector<1x128x128xf32>
    %127 = vector.shape_cast %126 : vector<1x128x128xf32> to vector<128x128xf32>
    %cst_111 = arith.constant 2.000000e-01 : f32
    %128 = vector.broadcast %cst_111 : f32 to vector<128x128xf32>
    %129 = arith.mulf %128, %127 : vector<128x128xf32>
    %130 = arith.addf %125, %129 : vector<128x128xf32>
    %c0_112 = arith.constant 0 : index
    %c0_113 = arith.constant 0 : index
    %c0_114 = arith.constant 0 : index
    %131 = vector.load %arg7[%c0_112, %c0_113, %c0_114] : memref<2x128x128xf32, #tpu.memory_space<vmem>>, vector<1x128x128xf32>
    %132 = vector.shape_cast %131 : vector<1x128x128xf32> to vector<128x128xf32>
    %133 = vector.shape_cast %130 : vector<128x128xf32> to vector<1x128x128xf32>
    tpu.vector_store %arg7[%c0_112, %c0_113, %c0_114], %133 {strides = array<i32>} : memref<2x128x128xf32, #tpu.memory_space<vmem>>, vector<1x128x128xf32>,
    %134 = arith.truncf %130 : vector<128x128xf32> to vector<128x128xbf16>
    %c0_115 = arith.constant 0 : index
    %c0_116 = arith.constant 0 : index
    %c0_117 = arith.constant 0 : index
    %135 = vector.load %arg8[%c0_115, %c0_116, %c0_117] : memref<2x128x128xbf16, #tpu.memory_space<vmem>>, vector<1x128x128xbf16>
    %136 = vector.shape_cast %135 : vector<1x128x128xbf16> to vector<128x128xbf16>
    %137 = vector.shape_cast %134 : vector<128x128xbf16> to vector<1x128x128xbf16>
    tpu.vector_store %arg8[%c0_115, %c0_116, %c0_117], %137 {strides = array<i32>} : memref<2x128x128xbf16, #tpu.memory_space<vmem>>, vector<1x128x128xbf16>,
    %c0_118 = arith.constant 0 : index
    %c0_119 = arith.constant 0 : index
    %c0_120 = arith.constant 0 : index
    %138 = vector.load %arg8[%c0_118, %c0_119, %c0_120] : memref<2x128x128xbf16, #tpu.memory_space<vmem>>, vector<1x128x128xbf16>
    %139 = vector.shape_cast %138 : vector<1x128x128xbf16> to vector<128x128xbf16>
    %c0_121 = arith.constant 0 : index
    %c0_122 = arith.constant 0 : index
    %c0_123 = arith.constant 0 : index
    %140 = vector.load %arg4[%c0_121, %c0_122, %c0_123] : memref<1x128x128xbf16, #tpu.memory_space<vmem>>, vector<1x128x128xbf16>
    %141 = vector.shape_cast %140 : vector<1x128x128xbf16> to vector<128x128xbf16>
    %cst_124 = arith.constant dense<0.000000e+00> : vector<128x128xf32>
    %142 = tpu.matmul %139, %141, %cst_124 {dimension_numbers = #tpu.dot_dimension_numbers<[1], [0], [0], [1], [0, 0, 1, 1], [], []>} : vector<128x128xbf16>, vector<128x128xbf16>, vector<128x128xf32> -> vector<128x128xf32>
    %143 = arith.truncf %115 : vector<128x128xf32> to vector<128x128xbf16>
    %c0_125 = arith.constant 0 : index
    %c0_126 = arith.constant 0 : index
    %c0_127 = arith.constant 0 : index
    %144 = vector.load %arg5[%c0_125, %c0_126, %c0_127] : memref<1x128x128xbf16, #tpu.memory_space<vmem>>, vector<1x128x128xbf16>
    %145 = vector.shape_cast %144 : vector<1x128x128xbf16> to vector<128x128xbf16>
    %cst_128 = arith.constant dense<0.000000e+00> : vector<128x128xf32>
    %146 = tpu.matmul %143, %145, %cst_128 {dimension_numbers = #tpu.dot_dimension_numbers<[1], [0], [0], [1], [0, 0, 1, 1], [], []>} : vector<128x128xbf16>, vector<128x128xbf16>, vector<128x128xf32> -> vector<128x128xf32>
    %147 = arith.addf %142, %146 : vector<128x128xf32>
    %148 = math.tanh %147 : vector<128x128xf32>
    %cst_129 = arith.constant 8.000000e-01 : f32
    %149 = vector.broadcast %cst_129 : f32 to vector<128x128xf32>
    %150 = arith.mulf %149, %148 : vector<128x128xf32>
    %c1_130 = arith.constant 1 : index
    %c0_131 = arith.constant 0 : index
    %c0_132 = arith.constant 0 : index
    %151 = vector.load %arg7[%c1_130, %c0_131, %c0_132] : memref<2x128x128xf32, #tpu.memory_space<vmem>>, vector<1x128x128xf32>
    %152 = vector.shape_cast %151 : vector<1x128x128xf32> to vector<128x128xf32>
    %cst_133 = arith.constant 2.000000e-01 : f32
    %153 = vector.broadcast %cst_133 : f32 to vector<128x128xf32>
    %154 = arith.mulf %153, %152 : vector<128x128xf32>
    %155 = arith.addf %150, %154 : vector<128x128xf32>
    %c1_134 = arith.constant 1 : index
    %c0_135 = arith.constant 0 : index
    %c0_136 = arith.constant 0 : index
    %156 = vector.load %arg7[%c1_134, %c0_135, %c0_136] : memref<2x128x128xf32, #tpu.memory_space<vmem>>, vector<1x128x128xf32>
    %157 = vector.shape_cast %156 : vector<1x128x128xf32> to vector<128x128xf32>
    %158 = vector.shape_cast %155 : vector<128x128xf32> to vector<1x128x128xf32>
    tpu.vector_store %arg7[%c1_134, %c0_135, %c0_136], %158 {strides = array<i32>} : memref<2x128x128xf32, #tpu.memory_space<vmem>>, vector<1x128x128xf32>,
    %159 = arith.truncf %155 : vector<128x128xf32> to vector<128x128xbf16>
    %c1_137 = arith.constant 1 : index
    %c0_138 = arith.constant 0 : index
    %c0_139 = arith.constant 0 : index
    %160 = vector.load %arg8[%c1_137, %c0_138, %c0_139] : memref<2x128x128xbf16, #tpu.memory_space<vmem>>, vector<1x128x128xbf16>
    %161 = vector.shape_cast %160 : vector<1x128x128xbf16> to vector<128x128xbf16>
    %162 = vector.shape_cast %159 : vector<128x128xbf16> to vector<1x128x128xbf16>
    tpu.vector_store %arg8[%c1_137, %c0_138, %c0_139], %162 {strides = array<i32>} : memref<2x128x128xbf16, #tpu.memory_space<vmem>>, vector<1x128x128xbf16>,
    %c0_140 = arith.constant 0 : index
    %c0_141 = arith.constant 0 : index
    %c0_142 = arith.constant 0 : index
    %163 = vector.load %arg8[%c0_140, %c0_141, %c0_142] : memref<2x128x128xbf16, #tpu.memory_space<vmem>>, vector<1x128x128xbf16>
    %164 = vector.shape_cast %163 : vector<1x128x128xbf16> to vector<128x128xbf16>
    %cst_143 = arith.constant dense<0.000000e+00> : vector<128x128xf32>
    %165 = tpu.matmul %3, %164, %cst_143 {dimension_numbers = #tpu.dot_dimension_numbers<[1], [0], [0], [1], [0, 0, 1, 1], [], []>} : vector<128x128xbf16>, vector<128x128xbf16>, vector<128x128xf32> -> vector<128x128xf32>
    %c1_144 = arith.constant 1 : index
    %c0_145 = arith.constant 0 : index
    %c0_146 = arith.constant 0 : index
    %166 = vector.load %arg8[%c1_144, %c0_145, %c0_146] : memref<2x128x128xbf16, #tpu.memory_space<vmem>>, vector<1x128x128xbf16>
    %167 = vector.shape_cast %166 : vector<1x128x128xbf16> to vector<128x128xbf16>
    %cst_147 = arith.constant dense<0.000000e+00> : vector<128x128xf32>
    %168 = tpu.matmul %3, %167, %cst_147 {dimension_numbers = #tpu.dot_dimension_numbers<[1], [0], [0], [1], [0, 0, 1, 1], [], []>} : vector<128x128xbf16>, vector<128x128xbf16>, vector<128x128xf32> -> vector<128x128xf32>
    %c3 = arith.constant 3 : index
    %c0_148 = arith.constant 0 : index
    %c0_149 = arith.constant 0 : index
    %169 = vector.load %arg1[%c3, %c0_148, %c0_149] : memref<8x128x128xbf16, #tpu.memory_space<vmem>>, vector<1x128x128xbf16>
    %170 = vector.shape_cast %169 : vector<1x128x128xbf16> to vector<128x128xbf16>
    %171 = arith.extf %170 : vector<128x128xbf16> to vector<128x128xf32>
    %172 = arith.truncf %165 : vector<128x128xf32> to vector<128x128xbf16>
    %c0_150 = arith.constant 0 : index
    %c0_151 = arith.constant 0 : index
    %173 = vector.load %arg3[%c0_150, %c0_151] : memref<128x128xbf16, #tpu.memory_space<vmem>>, vector<128x128xbf16>
    %cst_152 = arith.constant dense<0.000000e+00> : vector<128x128xf32>
    %174 = tpu.matmul %172, %173, %cst_152 {dimension_numbers = #tpu.dot_dimension_numbers<[1], [0], [0], [1], [0, 0, 1, 1], [], []>} : vector<128x128xbf16>, vector<128x128xbf16>, vector<128x128xf32> -> vector<128x128xf32>
    %175 = arith.addf %171, %174 : vector<128x128xf32>
    %176 = math.tanh %175 : vector<128x128xf32>
    %cst_153 = arith.constant 8.000000e-01 : f32
    %177 = vector.broadcast %cst_153 : f32 to vector<128x128xf32>
    %178 = arith.mulf %177, %176 : vector<128x128xf32>
    %c0_154 = arith.constant 0 : index
    %c0_155 = arith.constant 0 : index
    %c0_156 = arith.constant 0 : index
    %179 = vector.load %arg7[%c0_154, %c0_155, %c0_156] : memref<2x128x128xf32, #tpu.memory_space<vmem>>, vector<1x128x128xf32>
    %180 = vector.shape_cast %179 : vector<1x128x128xf32> to vector<128x128xf32>
    %cst_157 = arith.constant 2.000000e-01 : f32
    %181 = vector.broadcast %cst_157 : f32 to vector<128x128xf32>
    %182 = arith.mulf %181, %180 : vector<128x128xf32>
    %183 = arith.addf %178, %182 : vector<128x128xf32>
    %c0_158 = arith.constant 0 : index
    %c0_159 = arith.constant 0 : index
    %c0_160 = arith.constant 0 : index
    %184 = vector.load %arg7[%c0_158, %c0_159, %c0_160] : memref<2x128x128xf32, #tpu.memory_space<vmem>>, vector<1x128x128xf32>
    %185 = vector.shape_cast %184 : vector<1x128x128xf32> to vector<128x128xf32>
    %186 = vector.shape_cast %183 : vector<128x128xf32> to vector<1x128x128xf32>
    tpu.vector_store %arg7[%c0_158, %c0_159, %c0_160], %186 {strides = array<i32>} : memref<2x128x128xf32, #tpu.memory_space<vmem>>, vector<1x128x128xf32>,
    %187 = arith.truncf %183 : vector<128x128xf32> to vector<128x128xbf16>
    %c0_161 = arith.constant 0 : index
    %c0_162 = arith.constant 0 : index
    %c0_163 = arith.constant 0 : index
    %188 = vector.load %arg8[%c0_161, %c0_162, %c0_163] : memref<2x128x128xbf16, #tpu.memory_space<vmem>>, vector<1x128x128xbf16>
    %189 = vector.shape_cast %188 : vector<1x128x128xbf16> to vector<128x128xbf16>
    %190 = vector.shape_cast %187 : vector<128x128xbf16> to vector<1x128x128xbf16>
    tpu.vector_store %arg8[%c0_161, %c0_162, %c0_163], %190 {strides = array<i32>} : memref<2x128x128xbf16, #tpu.memory_space<vmem>>, vector<1x128x128xbf16>,
    %c0_164 = arith.constant 0 : index
    %c0_165 = arith.constant 0 : index
    %c0_166 = arith.constant 0 : index
    %191 = vector.load %arg8[%c0_164, %c0_165, %c0_166] : memref<2x128x128xbf16, #tpu.memory_space<vmem>>, vector<1x128x128xbf16>
    %192 = vector.shape_cast %191 : vector<1x128x128xbf16> to vector<128x128xbf16>
    %c0_167 = arith.constant 0 : index
    %c0_168 = arith.constant 0 : index
    %c0_169 = arith.constant 0 : index
    %193 = vector.load %arg4[%c0_167, %c0_168, %c0_169] : memref<1x128x128xbf16, #tpu.memory_space<vmem>>, vector<1x128x128xbf16>
    %194 = vector.shape_cast %193 : vector<1x128x128xbf16> to vector<128x128xbf16>
    %cst_170 = arith.constant dense<0.000000e+00> : vector<128x128xf32>
    %195 = tpu.matmul %192, %194, %cst_170 {dimension_numbers = #tpu.dot_dimension_numbers<[1], [0], [0], [1], [0, 0, 1, 1], [], []>} : vector<128x128xbf16>, vector<128x128xbf16>, vector<128x128xf32> -> vector<128x128xf32>
    %196 = arith.truncf %168 : vector<128x128xf32> to vector<128x128xbf16>
    %c0_171 = arith.constant 0 : index
    %c0_172 = arith.constant 0 : index
    %c0_173 = arith.constant 0 : index
    %197 = vector.load %arg5[%c0_171, %c0_172, %c0_173] : memref<1x128x128xbf16, #tpu.memory_space<vmem>>, vector<1x128x128xbf16>
    %198 = vector.shape_cast %197 : vector<1x128x128xbf16> to vector<128x128xbf16>
    %cst_174 = arith.constant dense<0.000000e+00> : vector<128x128xf32>
    %199 = tpu.matmul %196, %198, %cst_174 {dimension_numbers = #tpu.dot_dimension_numbers<[1], [0], [0], [1], [0, 0, 1, 1], [], []>} : vector<128x128xbf16>, vector<128x128xbf16>, vector<128x128xf32> -> vector<128x128xf32>
    %200 = arith.addf %195, %199 : vector<128x128xf32>
    %201 = math.tanh %200 : vector<128x128xf32>
    %cst_175 = arith.constant 8.000000e-01 : f32
    %202 = vector.broadcast %cst_175 : f32 to vector<128x128xf32>
    %203 = arith.mulf %202, %201 : vector<128x128xf32>
    %c1_176 = arith.constant 1 : index
    %c0_177 = arith.constant 0 : index
    %c0_178 = arith.constant 0 : index
    %204 = vector.load %arg7[%c1_176, %c0_177, %c0_178] : memref<2x128x128xf32, #tpu.memory_space<vmem>>, vector<1x128x128xf32>
    %205 = vector.shape_cast %204 : vector<1x128x128xf32> to vector<128x128xf32>
    %cst_179 = arith.constant 2.000000e-01 : f32
    %206 = vector.broadcast %cst_179 : f32 to vector<128x128xf32>
    %207 = arith.mulf %206, %205 : vector<128x128xf32>
    %208 = arith.addf %203, %207 : vector<128x128xf32>
    %c1_180 = arith.constant 1 : index
    %c0_181 = arith.constant 0 : index
    %c0_182 = arith.constant 0 : index
    %209 = vector.load %arg7[%c1_180, %c0_181, %c0_182] : memref<2x128x128xf32, #tpu.memory_space<vmem>>, vector<1x128x128xf32>
    %210 = vector.shape_cast %209 : vector<1x128x128xf32> to vector<128x128xf32>
    %211 = vector.shape_cast %208 : vector<128x128xf32> to vector<1x128x128xf32>
    tpu.vector_store %arg7[%c1_180, %c0_181, %c0_182], %211 {strides = array<i32>} : memref<2x128x128xf32, #tpu.memory_space<vmem>>, vector<1x128x128xf32>,
    %212 = arith.truncf %208 : vector<128x128xf32> to vector<128x128xbf16>
    %c1_183 = arith.constant 1 : index
    %c0_184 = arith.constant 0 : index
    %c0_185 = arith.constant 0 : index
    %213 = vector.load %arg8[%c1_183, %c0_184, %c0_185] : memref<2x128x128xbf16, #tpu.memory_space<vmem>>, vector<1x128x128xbf16>
    %214 = vector.shape_cast %213 : vector<1x128x128xbf16> to vector<128x128xbf16>
    %215 = vector.shape_cast %212 : vector<128x128xbf16> to vector<1x128x128xbf16>
    tpu.vector_store %arg8[%c1_183, %c0_184, %c0_185], %215 {strides = array<i32>} : memref<2x128x128xbf16, #tpu.memory_space<vmem>>, vector<1x128x128xbf16>,
    %c0_186 = arith.constant 0 : index
    %c0_187 = arith.constant 0 : index
    %c0_188 = arith.constant 0 : index
    %216 = vector.load %arg8[%c0_186, %c0_187, %c0_188] : memref<2x128x128xbf16, #tpu.memory_space<vmem>>, vector<1x128x128xbf16>
    %217 = vector.shape_cast %216 : vector<1x128x128xbf16> to vector<128x128xbf16>
    %cst_189 = arith.constant dense<0.000000e+00> : vector<128x128xf32>
    %218 = tpu.matmul %3, %217, %cst_189 {dimension_numbers = #tpu.dot_dimension_numbers<[1], [0], [0], [1], [0, 0, 1, 1], [], []>} : vector<128x128xbf16>, vector<128x128xbf16>, vector<128x128xf32> -> vector<128x128xf32>
    %c1_190 = arith.constant 1 : index
    %c0_191 = arith.constant 0 : index
    %c0_192 = arith.constant 0 : index
    %219 = vector.load %arg8[%c1_190, %c0_191, %c0_192] : memref<2x128x128xbf16, #tpu.memory_space<vmem>>, vector<1x128x128xbf16>
    %220 = vector.shape_cast %219 : vector<1x128x128xbf16> to vector<128x128xbf16>
    %cst_193 = arith.constant dense<0.000000e+00> : vector<128x128xf32>
    %221 = tpu.matmul %3, %220, %cst_193 {dimension_numbers = #tpu.dot_dimension_numbers<[1], [0], [0], [1], [0, 0, 1, 1], [], []>} : vector<128x128xbf16>, vector<128x128xbf16>, vector<128x128xf32> -> vector<128x128xf32>
    %c4 = arith.constant 4 : index
    %c0_194 = arith.constant 0 : index
    %c0_195 = arith.constant 0 : index
    %222 = vector.load %arg1[%c4, %c0_194, %c0_195] : memref<8x128x128xbf16, #tpu.memory_space<vmem>>, vector<1x128x128xbf16>
    %223 = vector.shape_cast %222 : vector<1x128x128xbf16> to vector<128x128xbf16>
    %224 = arith.extf %223 : vector<128x128xbf16> to vector<128x128xf32>
    %225 = arith.truncf %218 : vector<128x128xf32> to vector<128x128xbf16>
    %c0_196 = arith.constant 0 : index
    %c0_197 = arith.constant 0 : index
    %226 = vector.load %arg3[%c0_196, %c0_197] : memref<128x128xbf16, #tpu.memory_space<vmem>>, vector<128x128xbf16>
    %cst_198 = arith.constant dense<0.000000e+00> : vector<128x128xf32>
    %227 = tpu.matmul %225, %226, %cst_198 {dimension_numbers = #tpu.dot_dimension_numbers<[1], [0], [0], [1], [0, 0, 1, 1], [], []>} : vector<128x128xbf16>, vector<128x128xbf16>, vector<128x128xf32> -> vector<128x128xf32>
    %228 = arith.addf %224, %227 : vector<128x128xf32>
    %229 = math.tanh %228 : vector<128x128xf32>
    %cst_199 = arith.constant 8.000000e-01 : f32
    %230 = vector.broadcast %cst_199 : f32 to vector<128x128xf32>
    %231 = arith.mulf %230, %229 : vector<128x128xf32>
    %c0_200 = arith.constant 0 : index
    %c0_201 = arith.constant 0 : index
    %c0_202 = arith.constant 0 : index
    %232 = vector.load %arg7[%c0_200, %c0_201, %c0_202] : memref<2x128x128xf32, #tpu.memory_space<vmem>>, vector<1x128x128xf32>
    %233 = vector.shape_cast %232 : vector<1x128x128xf32> to vector<128x128xf32>
    %cst_203 = arith.constant 2.000000e-01 : f32
    %234 = vector.broadcast %cst_203 : f32 to vector<128x128xf32>
    %235 = arith.mulf %234, %233 : vector<128x128xf32>
    %236 = arith.addf %231, %235 : vector<128x128xf32>
    %c0_204 = arith.constant 0 : index
    %c0_205 = arith.constant 0 : index
    %c0_206 = arith.constant 0 : index
    %237 = vector.load %arg7[%c0_204, %c0_205, %c0_206] : memref<2x128x128xf32, #tpu.memory_space<vmem>>, vector<1x128x128xf32>
    %238 = vector.shape_cast %237 : vector<1x128x128xf32> to vector<128x128xf32>
    %239 = vector.shape_cast %236 : vector<128x128xf32> to vector<1x128x128xf32>
    tpu.vector_store %arg7[%c0_204, %c0_205, %c0_206], %239 {strides = array<i32>} : memref<2x128x128xf32, #tpu.memory_space<vmem>>, vector<1x128x128xf32>,
    %240 = arith.truncf %236 : vector<128x128xf32> to vector<128x128xbf16>
    %c0_207 = arith.constant 0 : index
    %c0_208 = arith.constant 0 : index
    %c0_209 = arith.constant 0 : index
    %241 = vector.load %arg8[%c0_207, %c0_208, %c0_209] : memref<2x128x128xbf16, #tpu.memory_space<vmem>>, vector<1x128x128xbf16>
    %242 = vector.shape_cast %241 : vector<1x128x128xbf16> to vector<128x128xbf16>
    %243 = vector.shape_cast %240 : vector<128x128xbf16> to vector<1x128x128xbf16>
    tpu.vector_store %arg8[%c0_207, %c0_208, %c0_209], %243 {strides = array<i32>} : memref<2x128x128xbf16, #tpu.memory_space<vmem>>, vector<1x128x128xbf16>,
    %c0_210 = arith.constant 0 : index
    %c0_211 = arith.constant 0 : index
    %c0_212 = arith.constant 0 : index
    %244 = vector.load %arg8[%c0_210, %c0_211, %c0_212] : memref<2x128x128xbf16, #tpu.memory_space<vmem>>, vector<1x128x128xbf16>
    %245 = vector.shape_cast %244 : vector<1x128x128xbf16> to vector<128x128xbf16>
    %c0_213 = arith.constant 0 : index
    %c0_214 = arith.constant 0 : index
    %c0_215 = arith.constant 0 : index
    %246 = vector.load %arg4[%c0_213, %c0_214, %c0_215] : memref<1x128x128xbf16, #tpu.memory_space<vmem>>, vector<1x128x128xbf16>
    %247 = vector.shape_cast %246 : vector<1x128x128xbf16> to vector<128x128xbf16>
    %cst_216 = arith.constant dense<0.000000e+00> : vector<128x128xf32>
    %248 = tpu.matmul %245, %247, %cst_216 {dimension_numbers = #tpu.dot_dimension_numbers<[1], [0], [0], [1], [0, 0, 1, 1], [], []>} : vector<128x128xbf16>, vector<128x128xbf16>, vector<128x128xf32> -> vector<128x128xf32>
    %249 = arith.truncf %221 : vector<128x128xf32> to vector<128x128xbf16>
    %c0_217 = arith.constant 0 : index
    %c0_218 = arith.constant 0 : index
    %c0_219 = arith.constant 0 : index
    %250 = vector.load %arg5[%c0_217, %c0_218, %c0_219] : memref<1x128x128xbf16, #tpu.memory_space<vmem>>, vector<1x128x128xbf16>
    %251 = vector.shape_cast %250 : vector<1x128x128xbf16> to vector<128x128xbf16>
    %cst_220 = arith.constant dense<0.000000e+00> : vector<128x128xf32>
    %252 = tpu.matmul %249, %251, %cst_220 {dimension_numbers = #tpu.dot_dimension_numbers<[1], [0], [0], [1], [0, 0, 1, 1], [], []>} : vector<128x128xbf16>, vector<128x128xbf16>, vector<128x128xf32> -> vector<128x128xf32>
    %253 = arith.addf %248, %252 : vector<128x128xf32>
    %254 = math.tanh %253 : vector<128x128xf32>
    %cst_221 = arith.constant 8.000000e-01 : f32
    %255 = vector.broadcast %cst_221 : f32 to vector<128x128xf32>
    %256 = arith.mulf %255, %254 : vector<128x128xf32>
    %c1_222 = arith.constant 1 : index
    %c0_223 = arith.constant 0 : index
    %c0_224 = arith.constant 0 : index
    %257 = vector.load %arg7[%c1_222, %c0_223, %c0_224] : memref<2x128x128xf32, #tpu.memory_space<vmem>>, vector<1x128x128xf32>
    %258 = vector.shape_cast %257 : vector<1x128x128xf32> to vector<128x128xf32>
    %cst_225 = arith.constant 2.000000e-01 : f32
    %259 = vector.broadcast %cst_225 : f32 to vector<128x128xf32>
    %260 = arith.mulf %259, %258 : vector<128x128xf32>
    %261 = arith.addf %256, %260 : vector<128x128xf32>
    %c1_226 = arith.constant 1 : index
    %c0_227 = arith.constant 0 : index
    %c0_228 = arith.constant 0 : index
    %262 = vector.load %arg7[%c1_226, %c0_227, %c0_228] : memref<2x128x128xf32, #tpu.memory_space<vmem>>, vector<1x128x128xf32>
    %263 = vector.shape_cast %262 : vector<1x128x128xf32> to vector<128x128xf32>
    %264 = vector.shape_cast %261 : vector<128x128xf32> to vector<1x128x128xf32>
    tpu.vector_store %arg7[%c1_226, %c0_227, %c0_228], %264 {strides = array<i32>} : memref<2x128x128xf32, #tpu.memory_space<vmem>>, vector<1x128x128xf32>,
    %265 = arith.truncf %261 : vector<128x128xf32> to vector<128x128xbf16>
    %c1_229 = arith.constant 1 : index
    %c0_230 = arith.constant 0 : index
    %c0_231 = arith.constant 0 : index
    %266 = vector.load %arg8[%c1_229, %c0_230, %c0_231] : memref<2x128x128xbf16, #tpu.memory_space<vmem>>, vector<1x128x128xbf16>
    %267 = vector.shape_cast %266 : vector<1x128x128xbf16> to vector<128x128xbf16>
    %268 = vector.shape_cast %265 : vector<128x128xbf16> to vector<1x128x128xbf16>
    tpu.vector_store %arg8[%c1_229, %c0_230, %c0_231], %268 {strides = array<i32>} : memref<2x128x128xbf16, #tpu.memory_space<vmem>>, vector<1x128x128xbf16>,
    %c0_232 = arith.constant 0 : index
    %c0_233 = arith.constant 0 : index
    %c0_234 = arith.constant 0 : index
    %269 = vector.load %arg8[%c0_232, %c0_233, %c0_234] : memref<2x128x128xbf16, #tpu.memory_space<vmem>>, vector<1x128x128xbf16>
    %270 = vector.shape_cast %269 : vector<1x128x128xbf16> to vector<128x128xbf16>
    %cst_235 = arith.constant dense<0.000000e+00> : vector<128x128xf32>
    %271 = tpu.matmul %3, %270, %cst_235 {dimension_numbers = #tpu.dot_dimension_numbers<[1], [0], [0], [1], [0, 0, 1, 1], [], []>} : vector<128x128xbf16>, vector<128x128xbf16>, vector<128x128xf32> -> vector<128x128xf32>
    %c1_236 = arith.constant 1 : index
    %c0_237 = arith.constant 0 : index
    %c0_238 = arith.constant 0 : index
    %272 = vector.load %arg8[%c1_236, %c0_237, %c0_238] : memref<2x128x128xbf16, #tpu.memory_space<vmem>>, vector<1x128x128xbf16>
    %273 = vector.shape_cast %272 : vector<1x128x128xbf16> to vector<128x128xbf16>
    %cst_239 = arith.constant dense<0.000000e+00> : vector<128x128xf32>
    %274 = tpu.matmul %3, %273, %cst_239 {dimension_numbers = #tpu.dot_dimension_numbers<[1], [0], [0], [1], [0, 0, 1, 1], [], []>} : vector<128x128xbf16>, vector<128x128xbf16>, vector<128x128xf32> -> vector<128x128xf32>
    %c5 = arith.constant 5 : index
    %c0_240 = arith.constant 0 : index
    %c0_241 = arith.constant 0 : index
    %275 = vector.load %arg1[%c5, %c0_240, %c0_241] : memref<8x128x128xbf16, #tpu.memory_space<vmem>>, vector<1x128x128xbf16>
    %276 = vector.shape_cast %275 : vector<1x128x128xbf16> to vector<128x128xbf16>
    %277 = arith.extf %276 : vector<128x128xbf16> to vector<128x128xf32>
    %278 = arith.truncf %271 : vector<128x128xf32> to vector<128x128xbf16>
    %c0_242 = arith.constant 0 : index
    %c0_243 = arith.constant 0 : index
    %279 = vector.load %arg3[%c0_242, %c0_243] : memref<128x128xbf16, #tpu.memory_space<vmem>>, vector<128x128xbf16>
    %cst_244 = arith.constant dense<0.000000e+00> : vector<128x128xf32>
    %280 = tpu.matmul %278, %279, %cst_244 {dimension_numbers = #tpu.dot_dimension_numbers<[1], [0], [0], [1], [0, 0, 1, 1], [], []>} : vector<128x128xbf16>, vector<128x128xbf16>, vector<128x128xf32> -> vector<128x128xf32>
    %281 = arith.addf %277, %280 : vector<128x128xf32>
    %282 = math.tanh %281 : vector<128x128xf32>
    %cst_245 = arith.constant 8.000000e-01 : f32
    %283 = vector.broadcast %cst_245 : f32 to vector<128x128xf32>
    %284 = arith.mulf %283, %282 : vector<128x128xf32>
    %c0_246 = arith.constant 0 : index
    %c0_247 = arith.constant 0 : index
    %c0_248 = arith.constant 0 : index
    %285 = vector.load %arg7[%c0_246, %c0_247, %c0_248] : memref<2x128x128xf32, #tpu.memory_space<vmem>>, vector<1x128x128xf32>
    %286 = vector.shape_cast %285 : vector<1x128x128xf32> to vector<128x128xf32>
    %cst_249 = arith.constant 2.000000e-01 : f32
    %287 = vector.broadcast %cst_249 : f32 to vector<128x128xf32>
    %288 = arith.mulf %287, %286 : vector<128x128xf32>
    %289 = arith.addf %284, %288 : vector<128x128xf32>
    %c0_250 = arith.constant 0 : index
    %c0_251 = arith.constant 0 : index
    %c0_252 = arith.constant 0 : index
    %290 = vector.load %arg7[%c0_250, %c0_251, %c0_252] : memref<2x128x128xf32, #tpu.memory_space<vmem>>, vector<1x128x128xf32>
    %291 = vector.shape_cast %290 : vector<1x128x128xf32> to vector<128x128xf32>
    %292 = vector.shape_cast %289 : vector<128x128xf32> to vector<1x128x128xf32>
    tpu.vector_store %arg7[%c0_250, %c0_251, %c0_252], %292 {strides = array<i32>} : memref<2x128x128xf32, #tpu.memory_space<vmem>>, vector<1x128x128xf32>,
    %293 = arith.truncf %289 : vector<128x128xf32> to vector<128x128xbf16>
    %c0_253 = arith.constant 0 : index
    %c0_254 = arith.constant 0 : index
    %c0_255 = arith.constant 0 : index
    %294 = vector.load %arg8[%c0_253, %c0_254, %c0_255] : memref<2x128x128xbf16, #tpu.memory_space<vmem>>, vector<1x128x128xbf16>
    %295 = vector.shape_cast %294 : vector<1x128x128xbf16> to vector<128x128xbf16>
    %296 = vector.shape_cast %293 : vector<128x128xbf16> to vector<1x128x128xbf16>
    tpu.vector_store %arg8[%c0_253, %c0_254, %c0_255], %296 {strides = array<i32>} : memref<2x128x128xbf16, #tpu.memory_space<vmem>>, vector<1x128x128xbf16>,
    %c0_256 = arith.constant 0 : index
    %c0_257 = arith.constant 0 : index
    %c0_258 = arith.constant 0 : index
    %297 = vector.load %arg8[%c0_256, %c0_257, %c0_258] : memref<2x128x128xbf16, #tpu.memory_space<vmem>>, vector<1x128x128xbf16>
    %298 = vector.shape_cast %297 : vector<1x128x128xbf16> to vector<128x128xbf16>
    %c0_259 = arith.constant 0 : index
    %c0_260 = arith.constant 0 : index
    %c0_261 = arith.constant 0 : index
    %299 = vector.load %arg4[%c0_259, %c0_260, %c0_261] : memref<1x128x128xbf16, #tpu.memory_space<vmem>>, vector<1x128x128xbf16>
    %300 = vector.shape_cast %299 : vector<1x128x128xbf16> to vector<128x128xbf16>
    %cst_262 = arith.constant dense<0.000000e+00> : vector<128x128xf32>
    %301 = tpu.matmul %298, %300, %cst_262 {dimension_numbers = #tpu.dot_dimension_numbers<[1], [0], [0], [1], [0, 0, 1, 1], [], []>} : vector<128x128xbf16>, vector<128x128xbf16>, vector<128x128xf32> -> vector<128x128xf32>
    %302 = arith.truncf %274 : vector<128x128xf32> to vector<128x128xbf16>
    %c0_263 = arith.constant 0 : index
    %c0_264 = arith.constant 0 : index
    %c0_265 = arith.constant 0 : index
    %303 = vector.load %arg5[%c0_263, %c0_264, %c0_265] : memref<1x128x128xbf16, #tpu.memory_space<vmem>>, vector<1x128x128xbf16>
    %304 = vector.shape_cast %303 : vector<1x128x128xbf16> to vector<128x128xbf16>
    %cst_266 = arith.constant dense<0.000000e+00> : vector<128x128xf32>
    %305 = tpu.matmul %302, %304, %cst_266 {dimension_numbers = #tpu.dot_dimension_numbers<[1], [0], [0], [1], [0, 0, 1, 1], [], []>} : vector<128x128xbf16>, vector<128x128xbf16>, vector<128x128xf32> -> vector<128x128xf32>
    %306 = arith.addf %301, %305 : vector<128x128xf32>
    %307 = math.tanh %306 : vector<128x128xf32>
    %cst_267 = arith.constant 8.000000e-01 : f32
    %308 = vector.broadcast %cst_267 : f32 to vector<128x128xf32>
    %309 = arith.mulf %308, %307 : vector<128x128xf32>
    %c1_268 = arith.constant 1 : index
    %c0_269 = arith.constant 0 : index
    %c0_270 = arith.constant 0 : index
    %310 = vector.load %arg7[%c1_268, %c0_269, %c0_270] : memref<2x128x128xf32, #tpu.memory_space<vmem>>, vector<1x128x128xf32>
    %311 = vector.shape_cast %310 : vector<1x128x128xf32> to vector<128x128xf32>
    %cst_271 = arith.constant 2.000000e-01 : f32
    %312 = vector.broadcast %cst_271 : f32 to vector<128x128xf32>
    %313 = arith.mulf %312, %311 : vector<128x128xf32>
    %314 = arith.addf %309, %313 : vector<128x128xf32>
    %c1_272 = arith.constant 1 : index
    %c0_273 = arith.constant 0 : index
    %c0_274 = arith.constant 0 : index
    %315 = vector.load %arg7[%c1_272, %c0_273, %c0_274] : memref<2x128x128xf32, #tpu.memory_space<vmem>>, vector<1x128x128xf32>
    %316 = vector.shape_cast %315 : vector<1x128x128xf32> to vector<128x128xf32>
    %317 = vector.shape_cast %314 : vector<128x128xf32> to vector<1x128x128xf32>
    tpu.vector_store %arg7[%c1_272, %c0_273, %c0_274], %317 {strides = array<i32>} : memref<2x128x128xf32, #tpu.memory_space<vmem>>, vector<1x128x128xf32>,
    %318 = arith.truncf %314 : vector<128x128xf32> to vector<128x128xbf16>
    %c1_275 = arith.constant 1 : index
    %c0_276 = arith.constant 0 : index
    %c0_277 = arith.constant 0 : index
    %319 = vector.load %arg8[%c1_275, %c0_276, %c0_277] : memref<2x128x128xbf16, #tpu.memory_space<vmem>>, vector<1x128x128xbf16>
    %320 = vector.shape_cast %319 : vector<1x128x128xbf16> to vector<128x128xbf16>
    %321 = vector.shape_cast %318 : vector<128x128xbf16> to vector<1x128x128xbf16>
    tpu.vector_store %arg8[%c1_275, %c0_276, %c0_277], %321 {strides = array<i32>} : memref<2x128x128xbf16, #tpu.memory_space<vmem>>, vector<1x128x128xbf16>,
    %c0_278 = arith.constant 0 : index
    %c0_279 = arith.constant 0 : index
    %c0_280 = arith.constant 0 : index
    %322 = vector.load %arg8[%c0_278, %c0_279, %c0_280] : memref<2x128x128xbf16, #tpu.memory_space<vmem>>, vector<1x128x128xbf16>
    %323 = vector.shape_cast %322 : vector<1x128x128xbf16> to vector<128x128xbf16>
    %cst_281 = arith.constant dense<0.000000e+00> : vector<128x128xf32>
    %324 = tpu.matmul %3, %323, %cst_281 {dimension_numbers = #tpu.dot_dimension_numbers<[1], [0], [0], [1], [0, 0, 1, 1], [], []>} : vector<128x128xbf16>, vector<128x128xbf16>, vector<128x128xf32> -> vector<128x128xf32>
    %c1_282 = arith.constant 1 : index
    %c0_283 = arith.constant 0 : index
    %c0_284 = arith.constant 0 : index
    %325 = vector.load %arg8[%c1_282, %c0_283, %c0_284] : memref<2x128x128xbf16, #tpu.memory_space<vmem>>, vector<1x128x128xbf16>
    %326 = vector.shape_cast %325 : vector<1x128x128xbf16> to vector<128x128xbf16>
    %cst_285 = arith.constant dense<0.000000e+00> : vector<128x128xf32>
    %327 = tpu.matmul %3, %326, %cst_285 {dimension_numbers = #tpu.dot_dimension_numbers<[1], [0], [0], [1], [0, 0, 1, 1], [], []>} : vector<128x128xbf16>, vector<128x128xbf16>, vector<128x128xf32> -> vector<128x128xf32>
    %c6 = arith.constant 6 : index
    %c0_286 = arith.constant 0 : index
    %c0_287 = arith.constant 0 : index
    %328 = vector.load %arg1[%c6, %c0_286, %c0_287] : memref<8x128x128xbf16, #tpu.memory_space<vmem>>, vector<1x128x128xbf16>
    %329 = vector.shape_cast %328 : vector<1x128x128xbf16> to vector<128x128xbf16>
    %330 = arith.extf %329 : vector<128x128xbf16> to vector<128x128xf32>
    %331 = arith.truncf %324 : vector<128x128xf32> to vector<128x128xbf16>
    %c0_288 = arith.constant 0 : index
    %c0_289 = arith.constant 0 : index
    %332 = vector.load %arg3[%c0_288, %c0_289] : memref<128x128xbf16, #tpu.memory_space<vmem>>, vector<128x128xbf16>
    %cst_290 = arith.constant dense<0.000000e+00> : vector<128x128xf32>
    %333 = tpu.matmul %331, %332, %cst_290 {dimension_numbers = #tpu.dot_dimension_numbers<[1], [0], [0], [1], [0, 0, 1, 1], [], []>} : vector<128x128xbf16>, vector<128x128xbf16>, vector<128x128xf32> -> vector<128x128xf32>
    %334 = arith.addf %330, %333 : vector<128x128xf32>
    %335 = math.tanh %334 : vector<128x128xf32>
    %cst_291 = arith.constant 8.000000e-01 : f32
    %336 = vector.broadcast %cst_291 : f32 to vector<128x128xf32>
    %337 = arith.mulf %336, %335 : vector<128x128xf32>
    %c0_292 = arith.constant 0 : index
    %c0_293 = arith.constant 0 : index
    %c0_294 = arith.constant 0 : index
    %338 = vector.load %arg7[%c0_292, %c0_293, %c0_294] : memref<2x128x128xf32, #tpu.memory_space<vmem>>, vector<1x128x128xf32>
    %339 = vector.shape_cast %338 : vector<1x128x128xf32> to vector<128x128xf32>
    %cst_295 = arith.constant 2.000000e-01 : f32
    %340 = vector.broadcast %cst_295 : f32 to vector<128x128xf32>
    %341 = arith.mulf %340, %339 : vector<128x128xf32>
    %342 = arith.addf %337, %341 : vector<128x128xf32>
    %c0_296 = arith.constant 0 : index
    %c0_297 = arith.constant 0 : index
    %c0_298 = arith.constant 0 : index
    %343 = vector.load %arg7[%c0_296, %c0_297, %c0_298] : memref<2x128x128xf32, #tpu.memory_space<vmem>>, vector<1x128x128xf32>
    %344 = vector.shape_cast %343 : vector<1x128x128xf32> to vector<128x128xf32>
    %345 = vector.shape_cast %342 : vector<128x128xf32> to vector<1x128x128xf32>
    tpu.vector_store %arg7[%c0_296, %c0_297, %c0_298], %345 {strides = array<i32>} : memref<2x128x128xf32, #tpu.memory_space<vmem>>, vector<1x128x128xf32>,
    %346 = arith.truncf %342 : vector<128x128xf32> to vector<128x128xbf16>
    %c0_299 = arith.constant 0 : index
    %c0_300 = arith.constant 0 : index
    %c0_301 = arith.constant 0 : index
    %347 = vector.load %arg8[%c0_299, %c0_300, %c0_301] : memref<2x128x128xbf16, #tpu.memory_space<vmem>>, vector<1x128x128xbf16>
    %348 = vector.shape_cast %347 : vector<1x128x128xbf16> to vector<128x128xbf16>
    %349 = vector.shape_cast %346 : vector<128x128xbf16> to vector<1x128x128xbf16>
    tpu.vector_store %arg8[%c0_299, %c0_300, %c0_301], %349 {strides = array<i32>} : memref<2x128x128xbf16, #tpu.memory_space<vmem>>, vector<1x128x128xbf16>,
    %c0_302 = arith.constant 0 : index
    %c0_303 = arith.constant 0 : index
    %c0_304 = arith.constant 0 : index
    %350 = vector.load %arg8[%c0_302, %c0_303, %c0_304] : memref<2x128x128xbf16, #tpu.memory_space<vmem>>, vector<1x128x128xbf16>
    %351 = vector.shape_cast %350 : vector<1x128x128xbf16> to vector<128x128xbf16>
    %c0_305 = arith.constant 0 : index
    %c0_306 = arith.constant 0 : index
    %c0_307 = arith.constant 0 : index
    %352 = vector.load %arg4[%c0_305, %c0_306, %c0_307] : memref<1x128x128xbf16, #tpu.memory_space<vmem>>, vector<1x128x128xbf16>
    %353 = vector.shape_cast %352 : vector<1x128x128xbf16> to vector<128x128xbf16>
    %cst_308 = arith.constant dense<0.000000e+00> : vector<128x128xf32>
    %354 = tpu.matmul %351, %353, %cst_308 {dimension_numbers = #tpu.dot_dimension_numbers<[1], [0], [0], [1], [0, 0, 1, 1], [], []>} : vector<128x128xbf16>, vector<128x128xbf16>, vector<128x128xf32> -> vector<128x128xf32>
    %355 = arith.truncf %327 : vector<128x128xf32> to vector<128x128xbf16>
    %c0_309 = arith.constant 0 : index
    %c0_310 = arith.constant 0 : index
    %c0_311 = arith.constant 0 : index
    %356 = vector.load %arg5[%c0_309, %c0_310, %c0_311] : memref<1x128x128xbf16, #tpu.memory_space<vmem>>, vector<1x128x128xbf16>
    %357 = vector.shape_cast %356 : vector<1x128x128xbf16> to vector<128x128xbf16>
    %cst_312 = arith.constant dense<0.000000e+00> : vector<128x128xf32>
    %358 = tpu.matmul %355, %357, %cst_312 {dimension_numbers = #tpu.dot_dimension_numbers<[1], [0], [0], [1], [0, 0, 1, 1], [], []>} : vector<128x128xbf16>, vector<128x128xbf16>, vector<128x128xf32> -> vector<128x128xf32>
    %359 = arith.addf %354, %358 : vector<128x128xf32>
    %360 = math.tanh %359 : vector<128x128xf32>
    %cst_313 = arith.constant 8.000000e-01 : f32
    %361 = vector.broadcast %cst_313 : f32 to vector<128x128xf32>
    %362 = arith.mulf %361, %360 : vector<128x128xf32>
    %c1_314 = arith.constant 1 : index
    %c0_315 = arith.constant 0 : index
    %c0_316 = arith.constant 0 : index
    %363 = vector.load %arg7[%c1_314, %c0_315, %c0_316] : memref<2x128x128xf32, #tpu.memory_space<vmem>>, vector<1x128x128xf32>
    %364 = vector.shape_cast %363 : vector<1x128x128xf32> to vector<128x128xf32>
    %cst_317 = arith.constant 2.000000e-01 : f32
    %365 = vector.broadcast %cst_317 : f32 to vector<128x128xf32>
    %366 = arith.mulf %365, %364 : vector<128x128xf32>
    %367 = arith.addf %362, %366 : vector<128x128xf32>
    %c1_318 = arith.constant 1 : index
    %c0_319 = arith.constant 0 : index
    %c0_320 = arith.constant 0 : index
    %368 = vector.load %arg7[%c1_318, %c0_319, %c0_320] : memref<2x128x128xf32, #tpu.memory_space<vmem>>, vector<1x128x128xf32>
    %369 = vector.shape_cast %368 : vector<1x128x128xf32> to vector<128x128xf32>
    %370 = vector.shape_cast %367 : vector<128x128xf32> to vector<1x128x128xf32>
    tpu.vector_store %arg7[%c1_318, %c0_319, %c0_320], %370 {strides = array<i32>} : memref<2x128x128xf32, #tpu.memory_space<vmem>>, vector<1x128x128xf32>,
    %371 = arith.truncf %367 : vector<128x128xf32> to vector<128x128xbf16>
    %c1_321 = arith.constant 1 : index
    %c0_322 = arith.constant 0 : index
    %c0_323 = arith.constant 0 : index
    %372 = vector.load %arg8[%c1_321, %c0_322, %c0_323] : memref<2x128x128xbf16, #tpu.memory_space<vmem>>, vector<1x128x128xbf16>
    %373 = vector.shape_cast %372 : vector<1x128x128xbf16> to vector<128x128xbf16>
    %374 = vector.shape_cast %371 : vector<128x128xbf16> to vector<1x128x128xbf16>
    tpu.vector_store %arg8[%c1_321, %c0_322, %c0_323], %374 {strides = array<i32>} : memref<2x128x128xbf16, #tpu.memory_space<vmem>>, vector<1x128x128xbf16>,
    %c0_324 = arith.constant 0 : index
    %c0_325 = arith.constant 0 : index
    %c0_326 = arith.constant 0 : index
    %375 = vector.load %arg8[%c0_324, %c0_325, %c0_326] : memref<2x128x128xbf16, #tpu.memory_space<vmem>>, vector<1x128x128xbf16>
    %376 = vector.shape_cast %375 : vector<1x128x128xbf16> to vector<128x128xbf16>
    %cst_327 = arith.constant dense<0.000000e+00> : vector<128x128xf32>
    %377 = tpu.matmul %3, %376, %cst_327 {dimension_numbers = #tpu.dot_dimension_numbers<[1], [0], [0], [1], [0, 0, 1, 1], [], []>} : vector<128x128xbf16>, vector<128x128xbf16>, vector<128x128xf32> -> vector<128x128xf32>
    %c1_328 = arith.constant 1 : index
    %c0_329 = arith.constant 0 : index
    %c0_330 = arith.constant 0 : index
    %378 = vector.load %arg8[%c1_328, %c0_329, %c0_330] : memref<2x128x128xbf16, #tpu.memory_space<vmem>>, vector<1x128x128xbf16>
    %379 = vector.shape_cast %378 : vector<1x128x128xbf16> to vector<128x128xbf16>
    %cst_331 = arith.constant dense<0.000000e+00> : vector<128x128xf32>
    %380 = tpu.matmul %3, %379, %cst_331 {dimension_numbers = #tpu.dot_dimension_numbers<[1], [0], [0], [1], [0, 0, 1, 1], [], []>} : vector<128x128xbf16>, vector<128x128xbf16>, vector<128x128xf32> -> vector<128x128xf32>
    %c7 = arith.constant 7 : index
    %c0_332 = arith.constant 0 : index
    %c0_333 = arith.constant 0 : index
    %381 = vector.load %arg1[%c7, %c0_332, %c0_333] : memref<8x128x128xbf16, #tpu.memory_space<vmem>>, vector<1x128x128xbf16>
    %382 = vector.shape_cast %381 : vector<1x128x128xbf16> to vector<128x128xbf16>
    %383 = arith.extf %382 : vector<128x128xbf16> to vector<128x128xf32>
    %384 = arith.truncf %377 : vector<128x128xf32> to vector<128x128xbf16>
    %c0_334 = arith.constant 0 : index
    %c0_335 = arith.constant 0 : index
    %385 = vector.load %arg3[%c0_334, %c0_335] : memref<128x128xbf16, #tpu.memory_space<vmem>>, vector<128x128xbf16>
    %cst_336 = arith.constant dense<0.000000e+00> : vector<128x128xf32>
    %386 = tpu.matmul %384, %385, %cst_336 {dimension_numbers = #tpu.dot_dimension_numbers<[1], [0], [0], [1], [0, 0, 1, 1], [], []>} : vector<128x128xbf16>, vector<128x128xbf16>, vector<128x128xf32> -> vector<128x128xf32>
    %387 = arith.addf %383, %386 : vector<128x128xf32>
    %388 = math.tanh %387 : vector<128x128xf32>
    %cst_337 = arith.constant 8.000000e-01 : f32
    %389 = vector.broadcast %cst_337 : f32 to vector<128x128xf32>
    %390 = arith.mulf %389, %388 : vector<128x128xf32>
    %c0_338 = arith.constant 0 : index
    %c0_339 = arith.constant 0 : index
    %c0_340 = arith.constant 0 : index
    %391 = vector.load %arg7[%c0_338, %c0_339, %c0_340] : memref<2x128x128xf32, #tpu.memory_space<vmem>>, vector<1x128x128xf32>
    %392 = vector.shape_cast %391 : vector<1x128x128xf32> to vector<128x128xf32>
    %cst_341 = arith.constant 2.000000e-01 : f32
    %393 = vector.broadcast %cst_341 : f32 to vector<128x128xf32>
    %394 = arith.mulf %393, %392 : vector<128x128xf32>
    %395 = arith.addf %390, %394 : vector<128x128xf32>
    %c0_342 = arith.constant 0 : index
    %c0_343 = arith.constant 0 : index
    %c0_344 = arith.constant 0 : index
    %396 = vector.load %arg7[%c0_342, %c0_343, %c0_344] : memref<2x128x128xf32, #tpu.memory_space<vmem>>, vector<1x128x128xf32>
    %397 = vector.shape_cast %396 : vector<1x128x128xf32> to vector<128x128xf32>
    %398 = vector.shape_cast %395 : vector<128x128xf32> to vector<1x128x128xf32>
    tpu.vector_store %arg7[%c0_342, %c0_343, %c0_344], %398 {strides = array<i32>} : memref<2x128x128xf32, #tpu.memory_space<vmem>>, vector<1x128x128xf32>,
    %399 = arith.truncf %395 : vector<128x128xf32> to vector<128x128xbf16>
    %c0_345 = arith.constant 0 : index
    %c0_346 = arith.constant 0 : index
    %c0_347 = arith.constant 0 : index
    %400 = vector.load %arg8[%c0_345, %c0_346, %c0_347] : memref<2x128x128xbf16, #tpu.memory_space<vmem>>, vector<1x128x128xbf16>
    %401 = vector.shape_cast %400 : vector<1x128x128xbf16> to vector<128x128xbf16>
    %402 = vector.shape_cast %399 : vector<128x128xbf16> to vector<1x128x128xbf16>
    tpu.vector_store %arg8[%c0_345, %c0_346, %c0_347], %402 {strides = array<i32>} : memref<2x128x128xbf16, #tpu.memory_space<vmem>>, vector<1x128x128xbf16>,
    %c0_348 = arith.constant 0 : index
    %c0_349 = arith.constant 0 : index
    %c0_350 = arith.constant 0 : index
    %403 = vector.load %arg8[%c0_348, %c0_349, %c0_350] : memref<2x128x128xbf16, #tpu.memory_space<vmem>>, vector<1x128x128xbf16>
    %404 = vector.shape_cast %403 : vector<1x128x128xbf16> to vector<128x128xbf16>
    %c0_351 = arith.constant 0 : index
    %c0_352 = arith.constant 0 : index
    %c0_353 = arith.constant 0 : index
    %405 = vector.load %arg4[%c0_351, %c0_352, %c0_353] : memref<1x128x128xbf16, #tpu.memory_space<vmem>>, vector<1x128x128xbf16>
    %406 = vector.shape_cast %405 : vector<1x128x128xbf16> to vector<128x128xbf16>
    %cst_354 = arith.constant dense<0.000000e+00> : vector<128x128xf32>
    %407 = tpu.matmul %404, %406, %cst_354 {dimension_numbers = #tpu.dot_dimension_numbers<[1], [0], [0], [1], [0, 0, 1, 1], [], []>} : vector<128x128xbf16>, vector<128x128xbf16>, vector<128x128xf32> -> vector<128x128xf32>
    %408 = arith.truncf %380 : vector<128x128xf32> to vector<128x128xbf16>
    %c0_355 = arith.constant 0 : index
    %c0_356 = arith.constant 0 : index
    %c0_357 = arith.constant 0 : index
    %409 = vector.load %arg5[%c0_355, %c0_356, %c0_357] : memref<1x128x128xbf16, #tpu.memory_space<vmem>>, vector<1x128x128xbf16>
    %410 = vector.shape_cast %409 : vector<1x128x128xbf16> to vector<128x128xbf16>
    %cst_358 = arith.constant dense<0.000000e+00> : vector<128x128xf32>
    %411 = tpu.matmul %408, %410, %cst_358 {dimension_numbers = #tpu.dot_dimension_numbers<[1], [0], [0], [1], [0, 0, 1, 1], [], []>} : vector<128x128xbf16>, vector<128x128xbf16>, vector<128x128xf32> -> vector<128x128xf32>
    %412 = arith.addf %407, %411 : vector<128x128xf32>
    %413 = math.tanh %412 : vector<128x128xf32>
    %cst_359 = arith.constant 8.000000e-01 : f32
    %414 = vector.broadcast %cst_359 : f32 to vector<128x128xf32>
    %415 = arith.mulf %414, %413 : vector<128x128xf32>
    %c1_360 = arith.constant 1 : index
    %c0_361 = arith.constant 0 : index
    %c0_362 = arith.constant 0 : index
    %416 = vector.load %arg7[%c1_360, %c0_361, %c0_362] : memref<2x128x128xf32, #tpu.memory_space<vmem>>, vector<1x128x128xf32>
    %417 = vector.shape_cast %416 : vector<1x128x128xf32> to vector<128x128xf32>
    %cst_363 = arith.constant 2.000000e-01 : f32
    %418 = vector.broadcast %cst_363 : f32 to vector<128x128xf32>
    %419 = arith.mulf %418, %417 : vector<128x128xf32>
    %420 = arith.addf %415, %419 : vector<128x128xf32>
    %c1_364 = arith.constant 1 : index
    %c0_365 = arith.constant 0 : index
    %c0_366 = arith.constant 0 : index
    %421 = vector.load %arg7[%c1_364, %c0_365, %c0_366] : memref<2x128x128xf32, #tpu.memory_space<vmem>>, vector<1x128x128xf32>
    %422 = vector.shape_cast %421 : vector<1x128x128xf32> to vector<128x128xf32>
    %423 = vector.shape_cast %420 : vector<128x128xf32> to vector<1x128x128xf32>
    tpu.vector_store %arg7[%c1_364, %c0_365, %c0_366], %423 {strides = array<i32>} : memref<2x128x128xf32, #tpu.memory_space<vmem>>, vector<1x128x128xf32>,
    %424 = arith.truncf %420 : vector<128x128xf32> to vector<128x128xbf16>
    %c1_367 = arith.constant 1 : index
    %c0_368 = arith.constant 0 : index
    %c0_369 = arith.constant 0 : index
    %425 = vector.load %arg8[%c1_367, %c0_368, %c0_369] : memref<2x128x128xbf16, #tpu.memory_space<vmem>>, vector<1x128x128xbf16>
    %426 = vector.shape_cast %425 : vector<1x128x128xbf16> to vector<128x128xbf16>
    %427 = vector.shape_cast %424 : vector<128x128xbf16> to vector<1x128x128xbf16>
    tpu.vector_store %arg8[%c1_367, %c0_368, %c0_369], %427 {strides = array<i32>} : memref<2x128x128xbf16, #tpu.memory_space<vmem>>, vector<1x128x128xbf16>,
    %c0_i32_370 = arith.constant 0 : i32
    %428 = arith.cmpi eq, %arg0, %c0_i32_370 : i32
    %429 = arith.extui %428 : i1 to i32
    %c0_i32_371 = arith.constant 0 : i32
    %430 = arith.cmpi ne, %429, %c0_i32_371 : i32
    scf.if %430 {
      %c1_372 = arith.constant 1 : index
      %c0_373 = arith.constant 0 : index
      %c0_374 = arith.constant 0 : index
      %431 = vector.load %arg7[%c1_372, %c0_373, %c0_374] : memref<2x128x128xf32, #tpu.memory_space<vmem>>, vector<1x128x128xf32>
      %432 = vector.shape_cast %431 : vector<1x128x128xf32> to vector<128x128xf32>
      %c0_375 = arith.constant 0 : index
      %c0_376 = arith.constant 0 : index
      %433 = vector.load %arg6[%c0_375, %c0_376] : memref<128x128xf32, #tpu.memory_space<vmem>>, vector<128x128xf32>
      tpu.vector_store %arg6[%c0_375, %c0_376], %432 {strides = array<i32>} : memref<128x128xf32, #tpu.memory_space<vmem>>, vector<128x128xf32>,
    } else {
    }
    return
  }
  func.func @transform_0(%arg0: i32) -> (i32, i32, i32) {
    %c0_i32 = arith.constant 0 : i32
    %c0_i32_0 = arith.constant 0 : i32
    %c0_i32_1 = arith.constant 0 : i32
    return %arg0, %c0_i32, %c0_i32_0 : i32, i32, i32
  }
  func.func @transform_1(%arg0: i32) -> (i32, i32) {
    %c0_i32 = arith.constant 0 : i32
    %c0_i32_0 = arith.constant 0 : i32
    %c0_i32_1 = arith.constant 0 : i32
    return %c0_i32, %c0_i32_0 : i32, i32
  }
  func.func @transform_2(%arg0: i32) -> (i32, i32) {
    %c0_i32 = arith.constant 0 : i32
    %c0_i32_0 = arith.constant 0 : i32
    %c0_i32_1 = arith.constant 0 : i32
    return %c0_i32, %c0_i32_0 : i32, i32
  }
  func.func @transform_3(%arg0: i32) -> (i32, i32, i32) {
    %c0_i32 = arith.constant 0 : i32
    %c0_i32_0 = arith.constant 0 : i32
    %c0_i32_1 = arith.constant 0 : i32
    %c0_i32_2 = arith.constant 0 : i32
    return %c0_i32, %c0_i32_0, %c0_i32_1 : i32, i32, i32
  }
  func.func @transform_4(%arg0: i32) -> (i32, i32, i32) {
    %c0_i32 = arith.constant 0 : i32
    %c0_i32_0 = arith.constant 0 : i32
    %c0_i32_1 = arith.constant 0 : i32
    %c0_i32_2 = arith.constant 0 : i32
    return %c0_i32, %c0_i32_0, %c0_i32_1 : i32, i32, i32
  }
  func.func @transform_5(%arg0: i32) -> (i32, i32) {
    %c0_i32 = arith.constant 0 : i32
    %c0_i32_0 = arith.constant 0 : i32
    %c0_i32_1 = arith.constant 0 : i32
    return %c0_i32, %c0_i32_0 : i32, i32
  }
}

</mosaic_0001>

<bundles_post_ra>
// kernel: tpu_custom_call.1
= control target key start
LH: loop header
LB: loop body
LE: loop exit
PB: predicated region body
PF: predicated region fallthrough
CT: control target
= control target key end

     0   :  { %10 = vsyncpa [#allocation5], 0  ;;  %s12783_s0 = inlined_call_operand.hbm [shape: bf16[8,128,128], index: 0, kind: input, shape index: {}]   ;;  %s12784_s1 = inlined_call_operand.hbm [shape: bf16[128,128], index: 1, kind: input, shape index: {}]   ;;  %s12785_s2 = inlined_call_operand.hbm [shape: bf16[128,128], index: 2, kind: input, shape index: {}]   ;;  %s12786_s3 = inlined_call_operand.hbm [shape: bf16[1,128,128], index: 3, kind: input, shape index: {}]   ;;  %s12787_s4 = inlined_call_operand.hbm [shape: bf16[1,128,128], index: 4, kind: input, shape index: {}]   ;;  %s12788_s5 = inlined_call_operand.hbm [shape: f32[128,128], index: 5, kind: output, shape index: {}]  }
   0x1   :  { %11 = vsyncpa [#allocation8], 0 }
   0x2   :  { %12 = vsyncpa [#allocation11], 0 }
   0x3   :  { %13 = vsyncpa [#allocation6], 0  ;;  %s31_s20 = sshll.u32 %s12784_s1, 4  ;;  %s11620_s21 = smov [#allocation7]   ;;  %s32_s20 = int_to_ptr.hbm [resolvable:$true] %s31_s20 }
   0x4   :  { %s33_s22 = sshll.u32 %s11620_s21, 4  ;;  %s57_s25 = sshll.u32 %s12786_s3, 4  ;;  %s34_s22 = int_to_ptr.vmem [resolvable:$true] %s33_s22  ;;  %s58_s25 = int_to_ptr.hbm [resolvable:$true] %s57_s25 }
   0x5   :  { %s11621_s26 = smov 64   ;;  %s11622_s27 = smov 4  }
   0x6   :  { %39 = dma.hbm_to_vmem [thread:$0]  %s32_s20, 1024, %s34_s22, [#allocation8], %s11621_s26, %s11621_s26, %s11622_s27  }
   0x7   :  { %s11623_s28 = smov [#allocation10]   ;;  %s18_s7 = sshll.u32 %s12783_s0, 4  ;;  %s19_s7 = int_to_ptr.hbm [resolvable:$true] %s18_s7 }
   0x8   :  { %s59_s29 = sshll.u32 %s11623_s28, 4  ;;  %s44_s9 = sshll.u32 %s12785_s2, 4  ;;  %s60_s29 = int_to_ptr.vmem [resolvable:$true] %s59_s29  ;;  %s45_s9 = int_to_ptr.hbm [resolvable:$true] %s44_s9 }
   0x9   :  { %65 = dma.hbm_to_vmem [thread:$0]  %s58_s25, 1024, %s60_s29, [#allocation11], %s11621_s26, %s11621_s26, %s11622_s27  }
   0xa   :  { %s11624_s10 = smov [#allocation4]   ;;  %s11625_s3 = smov [#allocation9]  }
   0xb   :  { %s20_s11 = sshll.u32 %s11624_s10, 4  ;;  %s46_s12 = sshll.u32 %s11625_s3, 4  ;;  %s21_s11 = int_to_ptr.vmem [resolvable:$true] %s20_s11  ;;  %s47_s12 = int_to_ptr.vmem [resolvable:$true] %s46_s12 }
   0xc   :  { %26 = dma.hbm_to_vmem [thread:$0]  %s19_s7, 8192, %s21_s11, [#allocation5], %s11621_s26, %s11621_s26, %s11622_s27  }
   0xd   :  { %s70_s15 = sshll.u32 %s12787_s4, 4  ;;  %s11626_s0 = smov [#allocation12]   ;;  %s71_s15 = int_to_ptr.hbm [resolvable:$true] %s70_s15 }
   0xe   :  { %52 = dma.hbm_to_vmem [thread:$0]  %s45_s9, 1024, %s47_s12, [#allocation8], %s11621_s26, %s11621_s26, %s11622_s27  }
   0xf   :  { %s72_s16 = sshll.u32 %s11626_s0, 4  ;;  %s73_s16 = int_to_ptr.vmem [resolvable:$true] %s72_s16 }
  0x10   :  { %78 = dma.hbm_to_vmem [thread:$0]  %s71_s15, 1024, %s73_s16, [#allocation11], %s11621_s26, %s11621_s26, %s11622_s27  }
  0x11   :  { %11612 = dma.done.wait [#allocation5], 8192  }
  0x12   :  { %11613 = vsyncadd [#allocation5], 4294959104 }
  0x13   :  { %11614 = dma.done.wait [#allocation8], 2048  }
  0x14   :  { %11615 = vsyncadd [#allocation8], 4294965248 }
  0x15   :  { %11616 = dma.done.wait [#allocation11], 2048  }
  0x16   :  { %11617 = vsyncadd [#allocation11], 4294965248  ;;  %v11627_v0 = vmov 0   ;;  %v11676_v9 = vld [vmem:[#allocation7] sm:$0xff]  ;;  %v11679_v10 = vld [vmem:[#allocation7 + $0x8] sm:$0xff]  ;;  %s11628_s2 = smov [#allocation13]  }
  0x17   :  { %150 = vst [vmem:[#allocation3 + $0x38] sm:$0xf] %v11627_v0  ;;  %v11682_v11 = vld [vmem:[#allocation7 + $0x10] sm:$0xff]  ;;  %v11685_v12 = vld [vmem:[#allocation7 + $0x18] sm:$0xff]  ;;  %v11688_v13 = vld [vmem:[#allocation7 + $0x20] sm:$0xff]  ;;  %s7872_s4 = sshll.u32 %s11628_s2, 4  ;;  %s7873_s4 = int_to_ptr.vmem [resolvable:$true] %s7872_s4 }
  0x18   :  { %151 = vst [vmem:[#allocation3 + $0x3c] sm:$0xf] %v11627_v0  ;;  %v9488_v14 = vld [vmem:[#allocation9 + $0x38] sm:$0xff]  ;;  %v9487_v15 = vld [vmem:[#allocation9 + $0x30] sm:$0xff]  ;;  %v11691_v16 = vld [vmem:[#allocation7 + $0x28] sm:$0xff]  ;;  %s7874_s19 = sshll.u32 %s12788_s5, 4  ;;  %s7875_s19 = int_to_ptr.hbm [resolvable:$true] %s7874_s19 }
  0x19   :  { %136 = vst [vmem:[#allocation3] sm:$0xf] %v11627_v0  ;;  %563 = vmatpush.bf16.msra.mxu2 %v9488_v14  ;;  %v9486_v17 = vld [vmem:[#allocation9 + $0x28] sm:$0xff]  ;;  %v9485_v19 = vld [vmem:[#allocation9 + $0x20] sm:$0xff]  ;;  %v9484_v21 = vld [vmem:[#allocation9 + $0x18] sm:$0xff]  ;;  %s11629_s20 = smov 128  }
  0x1a   :  { %137 = vst [vmem:[#allocation3 + $0x4] sm:$0xf] %v11627_v0  ;;  %v9483_v22 = vld [vmem:[#allocation9 + $0x10] sm:$0xff]  ;;  %v9482_v25 = vld [vmem:[#allocation9 + $0x8] sm:$0xff]  ;;  %v9481_v27 = vld [vmem:[#allocation9] sm:$0xff]  ;;  %s11630_s21 = smov 8  }
  0x1b   :  { %138 = vst [vmem:[#allocation3 + $0x8] sm:$0xf] %v11627_v0  ;;  %v11694_v24 = vld [vmem:[#allocation7 + $0x30] sm:$0xff]  ;;  %v11697_v31 = vld [vmem:[#allocation7 + $0x38] sm:$0xff]  ;;  %v9510_v54 = vld [vmem:[#allocation12 + $0x28] sm:$0xff] }
  0x1c   :  { %139 = vst [vmem:[#allocation3 + $0xc] sm:$0xf] %v11627_v0  ;;  %v9512_v51 = vld [vmem:[#allocation12 + $0x38] sm:$0xff]  ;;  %v9511_v52 = vld [vmem:[#allocation12 + $0x30] sm:$0xff]  ;;  %v9509_v55 = vld [vmem:[#allocation12 + $0x20] sm:$0xff] }
  0x1d   :  { %140 = vst [vmem:[#allocation3 + $0x10] sm:$0xf] %v11627_v0  ;;  %564 = vmatpush.bf16.msra.mxu2 %v9487_v15  ;;  %860 = vmatpush.bf16.msra.mxu3 %v9512_v51  ;;  %v9504_v58 = vld [vmem:[#allocation10 + $0x38] sm:$0xff]  ;;  %v9503_v61 = vld [vmem:[#allocation10 + $0x30] sm:$0xff] }
  0x1e   :  { %141 = vst [vmem:[#allocation3 + $0x14] sm:$0xf] %v11627_v0  ;;  %v9508_v59 = vld [vmem:[#allocation12 + $0x18] sm:$0xff]  ;;  %v9507_v62 = vld [vmem:[#allocation12 + $0x10] sm:$0xff] }
  0x1f   :  { %v9472_v1 = vld [vmem:[#allocation3 + $0x38] sm:$0xff]  ;;  %142 = vst [vmem:[#allocation3 + $0x18] sm:$0xf] %v11627_v0  ;;  %v9499_v14 = vld [vmem:[#allocation10 + $0x10] sm:$0xff] }
  0x20   :  { %143 = vst [vmem:[#allocation3 + $0x1c] sm:$0xf] %v11627_v0  ;;  %296 = vmatpush.bf16.msra.mxu0 %v9472_v1  ;;  %v9506_v1 = vld [vmem:[#allocation12 + $0x8] sm:$0xff] }
  0x21   :  { %144 = vst [vmem:[#allocation3 + $0x20] sm:$0xf] %v11627_v0  ;;  %v9465_v8 = vld [vmem:[#allocation3] sm:$0xff]  ;;  %565 = vmatpush.bf16.msra.mxu2 %v9486_v17  ;;  %861 = vmatpush.bf16.msra.mxu3 %v9511_v52  ;;  %v9498_v17 = vld [vmem:[#allocation10 + $0x8] sm:$0xff] }
  0x22   :  { %145 = vst [vmem:[#allocation3 + $0x24] sm:$0xf] %v11627_v0 }
  0x23   :  { %146 = vst [vmem:[#allocation3 + $0x28] sm:$0xf] %v11627_v0  ;;  %v9466_v7 = vld [vmem:[#allocation3 + $0x8] sm:$0xff] }
  0x24   :  { %147 = vst [vmem:[#allocation3 + $0x2c] sm:$0xf] %v11627_v0 }
  0x25   :  { %148 = vst [vmem:[#allocation3 + $0x30] sm:$0xf] %v11627_v0  ;;  %v9467_v6 = vld [vmem:[#allocation3 + $0x10] sm:$0xff]  ;;  %566 = vmatpush.bf16.msra.mxu2 %v9485_v19  ;;  %862 = vmatpush.bf16.msra.mxu3 %v9510_v54  ;;  %v9850_v19 = vld [vmem:[#allocation4] sm:$0xff]  }
  0x26   :  { %149 = vst [vmem:[#allocation3 + $0x34] sm:$0xf] %v11627_v0 }
  0x27   :  { %152 = vst [vmem:[#allocation3 + $0x40] sm:$0xf] %v11627_v0  ;;  %v9468_v5 = vld [vmem:[#allocation3 + $0x18] sm:$0xff] }
  0x28   :  { %153 = vst [vmem:[#allocation3 + $0x44] sm:$0xf] %v11627_v0 }
  0x29   :  { %154 = vst [vmem:[#allocation3 + $0x48] sm:$0xf] %v11627_v0  ;;  %v9469_v4 = vld [vmem:[#allocation3 + $0x20] sm:$0xff]  ;;  %567 = vmatpush.bf16.msra.mxu2 %v9484_v21  ;;  %863 = vmatpush.bf16.msra.mxu3 %v9509_v55 }
  0x2a   :  { %155 = vst [vmem:[#allocation3 + $0x4c] sm:$0xf] %v11627_v0 }
  0x2b   :  { %156 = vst [vmem:[#allocation3 + $0x50] sm:$0xf] %v11627_v0  ;;  %v9470_v3 = vld [vmem:[#allocation3 + $0x28] sm:$0xff] }
  0x2c   :  { %157 = vst [vmem:[#allocation3 + $0x54] sm:$0xf] %v11627_v0 }
  0x2d   :  { %158 = vst [vmem:[#allocation3 + $0x58] sm:$0xf] %v11627_v0  ;;  %v9471_v2 = vld [vmem:[#allocation3 + $0x30] sm:$0xff]  ;;  %568 = vmatpush.bf16.msra.mxu2 %v9483_v22  ;;  %864 = vmatpush.bf16.msra.mxu3 %v9508_v59 }
  0x2e   :  { %159 = vst [vmem:[#allocation3 + $0x5c] sm:$0xf] %v11627_v0  ;;  %297 = vmatpush.bf16.msra.mxu0 %v9471_v2 }
  0x2f   :  { %160 = vst [vmem:[#allocation3 + $0x60] sm:$0xf] %v11627_v0  ;;  %v9473_v32 = vld [vmem:[#allocation3 + $0x40] sm:$0xff] }
  0x30   :  { %161 = vst [vmem:[#allocation3 + $0x64] sm:$0xf] %v11627_v0 }
  0x31   :  { %162 = vst [vmem:[#allocation3 + $0x68] sm:$0xf] %v11627_v0  ;;  %569 = vmatpush.bf16.msra.mxu2 %v9482_v25  ;;  %v9474_v30 = vld [vmem:[#allocation3 + $0x48] sm:$0xff]  ;;  %865 = vmatpush.bf16.msra.mxu3 %v9507_v62 }
  0x32   :  { %163 = vst [vmem:[#allocation3 + $0x6c] sm:$0xf] %v11627_v0  ;;  %298 = vmatpush.bf16.msra.mxu0 %v9470_v3  ;;  %v9501_v3 = vld [vmem:[#allocation10 + $0x20] sm:$0xff] }
  0x33   :  { %164 = vst [vmem:[#allocation3 + $0x70] sm:$0xf] %v11627_v0  ;;  %v9475_v29 = vld [vmem:[#allocation3 + $0x50] sm:$0xff] }
  0x34   :  { %165 = vst [vmem:[#allocation3 + $0x74] sm:$0xf] %v11627_v0 }
  0x35   :  { %166 = vst [vmem:[#allocation3 + $0x78] sm:$0xf] %v11627_v0  ;;  %v9476_v28 = vld [vmem:[#allocation3 + $0x58] sm:$0xff]  ;;  %570 = vmatpush.bf16.msra.mxu2 %v9481_v27  ;;  %866 = vmatpush.bf16.msra.mxu3 %v9506_v1 }
  0x36   :  { %167 = vst [vmem:[#allocation3 + $0x7c] sm:$0xf] %v11627_v0  ;;  %299 = vmatpush.bf16.msra.mxu0 %v9469_v4  ;;  %v9502_v0 = vld [vmem:[#allocation10 + $0x28] sm:$0xff] }
  0x37   :  { %v9477_v26 = vld [vmem:[#allocation3 + $0x60] sm:$0xff] }
  0x39   :  { %v9478_v23 = vld [vmem:[#allocation3 + $0x68] sm:$0xff] }
  0x3a   :  { %300 = vmatpush.bf16.msra.mxu0 %v9468_v5  ;;  %v9505_v5 = vld [vmem:[#allocation12] sm:$0xff] }
  0x3b   :  { %v9479_v20 = vld [vmem:[#allocation3 + $0x70] sm:$0xff]  ;;  %867 = vmatpush.bf16.msra.mxu3 %v9505_v5 }
  0x3d   :  { %v9480_v18 = vld [vmem:[#allocation3 + $0x78] sm:$0xff] }
  0x3e   :  { %301 = vmatpush.bf16.msra.mxu0 %v9467_v6  ;;  %410 = vmatpush.bf16.msra.mxu1 %v9480_v18  ;;  %v9497_v18 = vld [vmem:[#allocation10] sm:$0xff] }
  0x42   :  { %302 = vmatpush.bf16.msra.mxu0 %v9466_v7  ;;  %411 = vmatpush.bf16.msra.mxu1 %v9479_v20  ;;  %v9500_v7 = vld [vmem:[#allocation10 + $0x18] sm:$0xff] }
  0x46   :  { %303 = vmatpush.bf16.msra.mxu0 %v9465_v8  ;;  %412 = vmatpush.bf16.msra.mxu1 %v9478_v23  ;;  %v9851_v23 = vunpack.c.l.bf16 %v9850_v19 }
  0x49   :  { %304 = vmatmul.bf16.vlgmr.msra.gmra.mxu0 %v11676_v9 }
  0x4a   :  { %413 = vmatpush.bf16.msra.mxu1 %v9477_v26  ;;  %1005 = vmatpush.bf16.msrb.mxu0 %v9504_v58  ;;  %v9852_v26 = vunpack.c.h.bf16 %v9850_v19 }
  0x4e   :  { %414 = vmatpush.bf16.msra.mxu1 %v9476_v28  ;;  %1006 = vmatpush.bf16.msrb.mxu0 %v9503_v61 }
  0x52   :  { %415 = vmatpush.bf16.msra.mxu1 %v9475_v29  ;;  %1007 = vmatpush.bf16.msrb.mxu0 %v9502_v0 }
  0x56   :  { %416 = vmatpush.bf16.msra.mxu1 %v9474_v30  ;;  %1008 = vmatpush.bf16.msrb.mxu0 %v9501_v3  ;;  %v10745_v30 = vld [vmem:[#allocation4 + $0x8] sm:$0xff]  }
  0x59   :  { %309 = vmatmul.bf16.gmra.mxu0 %v11679_v10 }
  0x5a   :  { %417 = vmatpush.bf16.msra.mxu1 %v9473_v32  ;;  %1009 = vmatpush.bf16.msrb.mxu0 %v9500_v7 }
  0x5d   :  { %418 = vmatmul.bf16.vlgmr.msra.gmra.mxu1 %v11676_v9 }
  0x5e   :  { %1010 = vmatpush.bf16.msrb.mxu0 %v9499_v14 }
  0x62   :  { %1011 = vmatpush.bf16.msrb.mxu0 %v9498_v17 }
  0x66   :  { %1012 = vmatpush.bf16.msrb.mxu0 %v9497_v18 }
  0x69   :  { %314 = vmatmul.bf16.gmra.mxu0 %v11682_v11 }
  0x6d   :  { %423 = vmatmul.bf16.gmra.mxu1 %v11679_v10 }
  0x79   :  { %319 = vmatmul.bf16.gmra.mxu0 %v11685_v12 }
  0x7d   :  { %428 = vmatmul.bf16.gmra.mxu1 %v11682_v11 }
  0x89   :  { %324 = vmatmul.bf16.gmra.mxu0 %v11688_v13 }
  0x8d   :  { %433 = vmatmul.bf16.gmra.mxu1 %v11685_v12 }
  0x99   :  { %329 = vmatmul.bf16.gmra.mxu0 %v11691_v16 }
  0x9d   :  { %438 = vmatmul.bf16.gmra.mxu1 %v11688_v13 }
  0xa9   :  { %334 = vmatmul.bf16.gmra.mxu0 %v11694_v24 }
  0xad   :  { %443 = vmatmul.bf16.gmra.mxu1 %v11691_v16 }
  0xb9   :  { %339 = vmatmul.bf16.gmra.mxu0 %v11697_v31 }
  0xbd   :  { %448 = vmatmul.bf16.gmra.mxu1 %v11694_v24 }
  0xc6   :  { %v305_v33 = vpop.f32.mrf.mxu0 }
  0xcd   :  { %453 = vmatmul.bf16.gmra.mxu1 %v11697_v31 }
  0xce   :  { %v307_v34 = vpop.f32.mrf.mxu0 }
  0xcf   :  { %v491_v35 = vpack.c.bf16 %v307_v34, %v305_v33 }
  0xd1   :  { %571 = vmatmul.bf16.vlgmr.msra.gmra.mxu2 %v491_v35 }
  0xd6   :  { %v310_v36 = vpop.f32.mrf.mxu0 }
  0xda   :  { %v419_v63 = vpop.f32.mrf.mxu1 }
  0xde   :  { %v312_v37 = vpop.f32.mrf.mxu0 }
  0xdf   :  { %v492_v38 = vpack.c.bf16 %v312_v37, %v310_v36  ;;  %v9855_v37 = vunpack.c.l.bf16 %v10745_v30 }
  0xe1   :  { %576 = vmatmul.bf16.gmra.mxu2 %v492_v38 }
  0xe2   :  { %v421_v6 = vpop.f32.mrf.mxu1 }
  0xe3   :  { %v788_v8 = vpack.c.bf16 %v421_v6, %v419_v63  ;;  %v10747_v63 = vld [vmem:[#allocation4 + $0x18] sm:$0xff]  }
  0xe4   :  { %v9863_v5 = vunpack.c.l.bf16 %v10747_v63 }
  0xe5   :  { %868 = vmatmul.bf16.vlgmr.msra.gmra.mxu3 %v788_v8 }
  0xe6   :  { %v315_v39 = vpop.f32.mrf.mxu0 }
  0xea   :  { %v424_v15 = vpop.f32.mrf.mxu1 }
  0xee   :  { %v317_v40 = vpop.f32.mrf.mxu0 }
  0xef   :  { %v493_v41 = vpack.c.bf16 %v317_v40, %v315_v39 }
  0xf1   :  { %581 = vmatmul.bf16.gmra.mxu2 %v493_v41 }
  0xf2   :  { %v426_v20 = vpop.f32.mrf.mxu1 }
  0xf3   :  { %v789_v21 = vpack.c.bf16 %v426_v20, %v424_v15  ;;  %v9864_v15 = vunpack.c.h.bf16 %v10747_v63 }
  0xf5   :  { %873 = vmatmul.bf16.gmra.mxu3 %v789_v21  ;;  %v10748_v21 = vld [vmem:[#allocation4 + $0x20] sm:$0xff]  }
  0xf6   :  { %v320_v42 = vpop.f32.mrf.mxu0 }
  0xfa   :  { %v429_v27 = vpop.f32.mrf.mxu1 }
  0xfe   :  { %v322_v43 = vpop.f32.mrf.mxu0 }
  0xff   :  { %v494_v44 = vpack.c.bf16 %v322_v43, %v320_v42  ;;  %v9856_v42 = vunpack.c.h.bf16 %v10745_v30 }
 0x101   :  { %586 = vmatmul.bf16.gmra.mxu2 %v494_v44 }
 0x102   :  { %v431_v32 = vpop.f32.mrf.mxu1 }
 0x103   :  { %v790_v34 = vpack.c.bf16 %v431_v32, %v429_v27 }
 0x105   :  { %878 = vmatmul.bf16.gmra.mxu3 %v790_v34  ;;  %v9868_v34 = vunpack.c.h.bf16 %v10748_v21 }
 0x106   :  { %v325_v45 = vpop.f32.mrf.mxu0 }
 0x10a   :  { %v434_v43 = vpop.f32.mrf.mxu1 }
 0x10e   :  { %v327_v46 = vpop.f32.mrf.mxu0 }
 0x10f   :  { %v495_v47 = vpack.c.bf16 %v327_v46, %v325_v45 }
 0x111   :  { %591 = vmatmul.bf16.gmra.mxu2 %v495_v47  ;;  %v10746_v47 = vld [vmem:[#allocation4 + $0x10] sm:$0xff]  }
 0x112   :  { %v9860_v58 = vunpack.c.h.bf16 %v10746_v47 }
 0x116   :  { %v330_v48 = vpop.f32.mrf.mxu0 }
 0x11e   :  { %v332_v49 = vpop.f32.mrf.mxu0 }
 0x11f   :  { %v496_v50 = vpack.c.bf16 %v332_v49, %v330_v48  ;;  %v436_v48 = vpop.f32.mrf.mxu1 }
 0x121   :  { %596 = vmatmul.bf16.gmra.mxu2 %v496_v50  ;;  %v791_v50 = vpack.c.bf16 %v436_v48, %v434_v43 }
 0x123   :  { %883 = vmatmul.bf16.gmra.mxu3 %v791_v50 }
 0x126   :  { %v335_v53 = vpop.f32.mrf.mxu0 }
 0x127   :  { %v439_v59 = vpop.f32.mrf.mxu1 }
 0x12e   :  { %v337_v56 = vpop.f32.mrf.mxu0 }
 0x12f   :  { %v497_v57 = vpack.c.bf16 %v337_v56, %v335_v53  ;;  %v9859_v53 = vunpack.c.l.bf16 %v10746_v47  ;;  %v441_v0 = vpop.f32.mrf.mxu1 }
 0x131   :  { %601 = vmatmul.bf16.gmra.mxu2 %v497_v57 }
 0x136   :  { %v340_v60 = vpop.f32.mrf.mxu0 }
 0x137   :  { %v444_v17 = vpop.f32.mrf.mxu1 }
 0x13e   :  { %v342_v2 = vpop.f32.mrf.mxu0 }
 0x13f   :  { %v498_v4 = vpack.c.bf16 %v342_v2, %v340_v60  ;;  %v792_v2 = vpack.c.bf16 %v441_v0, %v439_v59  ;;  %v10750_v59 = vld [vmem:[#allocation4 + $0x30] sm:$0xff]  }
 0x141   :  { %606 = vmatmul.bf16.gmra.mxu2 %v498_v4  ;;  %888 = vmatmul.bf16.gmra.mxu3 %v792_v2 }
 0x154   :  { %v572_v22 = vpop.f32.mrf.mxu2 }
 0x155   :  { %v612_v25 = vadd.f32 %v9851_v23, %v572_v22  ;;  %v446_v22 = vpop.f32.mrf.mxu1 }
 0x157   :  { %10924 = vtanh.f32 %v612_v25  ;;  %v793_v25 = vpack.c.bf16 %v446_v22, %v444_v17 }
 0x159   :  { %893 = vmatmul.bf16.gmra.mxu3 %v793_v25 }
 0x15c   :  { %v574_v28 = vpop.f32.mrf.mxu2 }
 0x15d   :  { %v613_v29 = vadd.f32 %v9852_v26, %v574_v28  ;;  %v10925_v33 = vpop.eup %10924  ;;  %v9867_v28 = vunpack.c.l.bf16 %v10748_v21 }
 0x15e   :  { %v11708_v38 = vmul.f32 0.8, %v10925_v33 }
 0x15f   :  { %10926 = vtanh.f32 %v613_v29 }
 0x164   :  { %v577_v35 = vpop.f32.mrf.mxu2 }
 0x165   :  { %v10927_v36 = vpop.eup %10926  ;;  %v614_v41 = vadd.f32 %v9855_v37, %v577_v35  ;;  %v449_v35 = vpop.f32.mrf.mxu1 }
 0x166   :  { %v11710_v39 = vmul.f32 0.8, %v10927_v36 }
 0x167   :  { %10928 = vtanh.f32 %v614_v41  ;;  %v10749_v41 = vld [vmem:[#allocation4 + $0x28] sm:$0xff]  }
 0x168   :  { %v9884_v40 = vpack.c.bf16 %v11710_v39, %v11708_v38  ;;  %v9871_v47 = vunpack.c.l.bf16 %v10749_v41 }
 0x16a   :  { %9885 = vst [vmem:[#allocation3] sm:$0xff] %v9884_v40  }
 0x16c   :  { %v579_v44 = vpop.f32.mrf.mxu2 }
 0x16d   :  { %v615_v45 = vadd.f32 %v9856_v42, %v579_v44  ;;  %v10929_v49 = vpop.eup %10928  ;;  %v451_v42 = vpop.f32.mrf.mxu1 }
 0x16e   :  { %v11714_v54 = vmul.f32 0.8, %v10929_v49  ;;  %v794_v44 = vpack.c.bf16 %v451_v42, %v449_v35  ;;  %v869_v35 = vpop.f32.mrf.mxu3 }
 0x16f   :  { %10930 = vtanh.f32 %v615_v45 }
 0x170   :  { %898 = vmatmul.bf16.gmra.mxu3 %v794_v44 }
 0x171   :  { %v9489_v46 = vld [vmem:[#allocation3] sm:$0xff] }
 0x172   :  { %1013 = vmatmul.bf16.vlgmr.msrb.gmra.mxu0 %v9489_v46 }
 0x174   :  { %v582_v51 = vpop.f32.mrf.mxu2 }
 0x175   :  { %v10931_v52 = vpop.eup %10930  ;;  %v616_v57 = vadd.f32 %v9859_v53, %v582_v51  ;;  %v454_v53 = vpop.f32.mrf.mxu1 }
 0x176   :  { %v11716_v55 = vmul.f32 0.8, %v10931_v52  ;;  %v9872_v52 = vunpack.c.h.bf16 %v10749_v41 }
 0x177   :  { %10932 = vtanh.f32 %v616_v57 }
 0x178   :  { %v9889_v56 = vpack.c.bf16 %v11716_v55, %v11714_v54 }
 0x17a   :  { %10752 = vst [vmem:[#allocation3 + $0x8] sm:$0xff] %v9889_v56  }
 0x17c   :  { %v584_v60 = vpop.f32.mrf.mxu2 }
 0x17d   :  { %v617_v61 = vadd.f32 %v9860_v58, %v584_v60  ;;  %v10933_v1 = vpop.eup %10932  ;;  %v456_v60 = vpop.f32.mrf.mxu1 }
 0x17e   :  { %v11720_v6 = vmul.f32 0.8, %v10933_v1  ;;  %v9875_v1 = vunpack.c.l.bf16 %v10750_v59 }
 0x17f   :  { %10934 = vtanh.f32 %v617_v61 }
 0x181   :  { %v9490_v62 = vld [vmem:[#allocation3 + $0x8] sm:$0xff] }
 0x182   :  { %1018 = vmatmul.bf16.gmra.mxu0 %v9490_v62  ;;  %v795_v62 = vpack.c.bf16 %v456_v60, %v454_v53 }
 0x184   :  { %v587_v3 = vpop.f32.mrf.mxu2  ;;  %903 = vmatmul.bf16.gmra.mxu3 %v795_v62 }
 0x185   :  { %v10935_v4 = vpop.eup %10934  ;;  %v618_v14 = vadd.f32 %v9863_v5, %v587_v3 }
 0x186   :  { %v11722_v7 = vmul.f32 0.8, %v10935_v4 }
 0x187   :  { %10936 = vtanh.f32 %v618_v14 }
 0x188   :  { %v9894_v8 = vpack.c.bf16 %v11722_v7, %v11720_v6 }
 0x18a   :  { %10753 = vst [vmem:[#allocation3 + $0x10] sm:$0xff] %v9894_v8   ;;  %v9876_v8 = vunpack.c.h.bf16 %v10750_v59 }
 0x18c   :  { %v589_v18 = vpop.f32.mrf.mxu2 }
 0x18d   :  { %v619_v19 = vadd.f32 %v9864_v15, %v589_v18  ;;  %v10937_v23 = vpop.eup %10936  ;;  %v10751_v18 = vld [vmem:[#allocation4 + $0x38] sm:$0xff]  }
 0x18e   :  { %v11726_v29 = vmul.f32 0.8, %v10937_v23  ;;  %v9879_v22 = vunpack.c.l.bf16 %v10751_v18 }
 0x18f   :  { %10938 = vtanh.f32 %v619_v19 }
 0x191   :  { %v9491_v20 = vld [vmem:[#allocation3 + $0x10] sm:$0xff] }
 0x192   :  { %1023 = vmatmul.bf16.gmra.mxu0 %v9491_v20 }
 0x194   :  { %v592_v26 = vpop.f32.mrf.mxu2 }
 0x195   :  { %v10939_v27 = vpop.eup %10938  ;;  %v620_v33 = vadd.f32 %v9867_v28, %v592_v26  ;;  %v9880_v28 = vunpack.c.h.bf16 %v10751_v18 }
 0x196   :  { %v11728_v30 = vmul.f32 0.8, %v10939_v27 }
 0x197   :  { %10940 = vtanh.f32 %v620_v33 }
 0x198   :  { %v9899_v32 = vpack.c.bf16 %v11728_v30, %v11726_v29 }
 0x19a   :  { %10754 = vst [vmem:[#allocation3 + $0x18] sm:$0xff] %v9899_v32  }
 0x19c   :  { %v594_v36 = vpop.f32.mrf.mxu2 }
 0x19d   :  { %v621_v37 = vadd.f32 %v9868_v34, %v594_v36  ;;  %v10941_v43 = vpop.eup %10940 }
 0x19e   :  { %v11732_v48 = vmul.f32 0.8, %v10941_v43  ;;  %v871_v43 = vpop.f32.mrf.mxu3 }
 0x19f   :  { %10942 = vtanh.f32 %v621_v37 }
 0x1a1   :  { %v9492_v40 = vld [vmem:[#allocation3 + $0x18] sm:$0xff] }
 0x1a2   :  { %1028 = vmatmul.bf16.gmra.mxu0 %v9492_v40 }
 0x1a4   :  { %v597_v45 = vpop.f32.mrf.mxu2 }
 0x1a5   :  { %v10943_v46 = vpop.eup %10942  ;;  %v622_v51 = vadd.f32 %v9871_v47, %v597_v45 }
 0x1a6   :  { %v11734_v49 = vmul.f32 0.8, %v10943_v46  ;;  %v874_v47 = vpop.f32.mrf.mxu3 }
 0x1a7   :  { %10944 = vtanh.f32 %v622_v51 }
 0x1a8   :  { %v9904_v50 = vpack.c.bf16 %v11734_v49, %v11732_v48 }
 0x1aa   :  { %10755 = vst [vmem:[#allocation3 + $0x20] sm:$0xff] %v9904_v50  }
 0x1ac   :  { %v599_v56 = vpop.f32.mrf.mxu2 }
 0x1ad   :  { %v623_v57 = vadd.f32 %v9872_v52, %v599_v56  ;;  %v10945_v61 = vpop.eup %10944  ;;  %v9516_v56 = vld [vmem:[#allocation3 + $0x18] sm:$0xff] }
 0x1ae   :  { %v11738_v2 = vmul.f32 0.8, %v10945_v61  ;;  %v876_v53 = vpop.f32.mrf.mxu3  ;;  %v9514_v61 = vld [vmem:[#allocation3 + $0x8] sm:$0xff] }
 0x1af   :  { %10946 = vtanh.f32 %v623_v57 }
 0x1b1   :  { %v9493_v58 = vld [vmem:[#allocation3 + $0x20] sm:$0xff] }
 0x1b2   :  { %1033 = vmatmul.bf16.gmra.mxu0 %v9493_v58  ;;  %v9517_v51 = vld [vmem:[#allocation3 + $0x20] sm:$0xff]  ;;  %v9515_v58 = vld [vmem:[#allocation3 + $0x10] sm:$0xff] }
 0x1b4   :  { %v602_v63 = vpop.f32.mrf.mxu2 }
 0x1b5   :  { %v10947_v0 = vpop.eup %10946  ;;  %v624_v5 = vadd.f32 %v9875_v1, %v602_v63  ;;  %v9513_v63 = vld [vmem:[#allocation3] sm:$0xff] }
 0x1b6   :  { %v11740_v3 = vmul.f32 0.8, %v10947_v0  ;;  %v879_v62 = vpop.f32.mrf.mxu3 }
 0x1b7   :  { %10948 = vtanh.f32 %v624_v5 }
 0x1b8   :  { %v9909_v4 = vpack.c.bf16 %v11740_v3, %v11738_v2 }
 0x1ba   :  { %10756 = vst [vmem:[#allocation3 + $0x28] sm:$0xff] %v9909_v4  }
 0x1bc   :  { %v604_v14 = vpop.f32.mrf.mxu2 }
 0x1bd   :  { %v625_v15 = vadd.f32 %v9876_v8, %v604_v14  ;;  %v10949_v19 = vpop.eup %10948 }
 0x1be   :  { %v11744_v23 = vmul.f32 0.8, %v10949_v19 }
 0x1bf   :  { %10950 = vtanh.f32 %v625_v15  ;;  %v881_v15 = vpop.f32.mrf.mxu3 }
 0x1c1   :  { %v9494_v17 = vld [vmem:[#allocation3 + $0x28] sm:$0xff] }
 0x1c2   :  { %1038 = vmatmul.bf16.gmra.mxu0 %v9494_v17  ;;  %v9518_v50 = vld [vmem:[#allocation3 + $0x28] sm:$0xff] }
 0x1c4   :  { %v607_v20 = vpop.f32.mrf.mxu2 }
 0x1c5   :  { %v10951_v21 = vpop.eup %10950  ;;  %v626_v27 = vadd.f32 %v9879_v22, %v607_v20 }
 0x1c6   :  { %v11746_v25 = vmul.f32 0.8, %v10951_v21 }
 0x1c7   :  { %10952 = vtanh.f32 %v626_v27  ;;  %v884_v20 = vpop.f32.mrf.mxu3 }
 0x1c8   :  { %v9914_v26 = vpack.c.bf16 %v11746_v25, %v11744_v23 }
 0x1ca   :  { %10757 = vst [vmem:[#allocation3 + $0x30] sm:$0xff] %v9914_v26  }
 0x1cc   :  { %v609_v32 = vpop.f32.mrf.mxu2 }
 0x1cd   :  { %v627_v33 = vadd.f32 %v9880_v28, %v609_v32  ;;  %v10953_v36 = vpop.eup %10952 }
 0x1ce   :  { %v11750_v40 = vmul.f32 0.8, %v10953_v36 }
 0x1cf   :  { %10954 = vtanh.f32 %v627_v33 }
 0x1d1   :  { %v9495_v34 = vld [vmem:[#allocation3 + $0x30] sm:$0xff] }
 0x1d2   :  { %1043 = vmatmul.bf16.gmra.mxu0 %v9495_v34  ;;  %v9519_v46 = vld [vmem:[#allocation3 + $0x30] sm:$0xff] }
 0x1d5   :  { %v10955_v37 = vpop.eup %10954 }
 0x1d6   :  { %v11752_v41 = vmul.f32 0.8, %v10955_v37 }
 0x1d8   :  { %v9919_v42 = vpack.c.bf16 %v11752_v41, %v11750_v40 }
 0x1da   :  { %10758 = vst [vmem:[#allocation3 + $0x38] sm:$0xff] %v9919_v42  }
 0x1e1   :  { %v9496_v44 = vld [vmem:[#allocation3 + $0x38] sm:$0xff] }
 0x1e2   :  { %v9520_v45 = vld [vmem:[#allocation3 + $0x38] sm:$0xff]  ;;  %1048 = vmatmul.bf16.gmra.mxu0 %v9496_v44 }
 0x1e3   :  { %1247 = vmatpush.bf16.msrb.mxu1 %v9520_v45 }
 0x1e7   :  { %1248 = vmatpush.bf16.msrb.mxu1 %v9519_v46 }
 0x1eb   :  { %1249 = vmatpush.bf16.msrb.mxu1 %v9518_v50 }
 0x1ef   :  { %1250 = vmatpush.bf16.msrb.mxu1 %v9517_v51  ;;  %v1014_v52 = vpop.f32.mrf.mxu0 }
 0x1f0   :  { %v1015_v57 = vadd.f32 %v1014_v52, %v869_v35  ;;  %v886_v35 = vpop.f32.mrf.mxu3 }
 0x1f2   :  { %10956 = vtanh.f32 %v1015_v57 }
 0x1f3   :  { %1251 = vmatpush.bf16.msrb.mxu1 %v9516_v56 }
 0x1f7   :  { %1252 = vmatpush.bf16.msrb.mxu1 %v9515_v58  ;;  %v1016_v59 = vpop.f32.mrf.mxu0 }
 0x1f8   :  { %v1017_v60 = vadd.f32 %v1016_v59, %v871_v43  ;;  %v10957_v0 = vpop.eup %10956  ;;  %v889_v46 = vpop.f32.mrf.mxu3 }
 0x1f9   :  { %v11756_v5 = vmul.f32 0.8, %v10957_v0 }
 0x1fa   :  { %10958 = vtanh.f32 %v1017_v60 }
 0x1fb   :  { %1253 = vmatpush.bf16.msrb.mxu1 %v9514_v61 }
 0x1ff   :  { %1254 = vmatpush.bf16.msrb.mxu1 %v9513_v63  ;;  %v1019_v1 = vpop.f32.mrf.mxu0 }
 0x200   :  { %v10959_v4 = vpop.eup %10958  ;;  %v1020_v17 = vadd.f32 %v1019_v1, %v874_v47 }
 0x201   :  { %v11758_v8 = vmul.f32 0.8, %v10959_v4 }
 0x202   :  { %1255 = vmatmul.bf16.vlgmr.msrb.gmra.mxu1 %v11676_v9  ;;  %10960 = vtanh.f32 %v1020_v17 }
 0x203   :  { %v9924_v14 = vpack.c.bf16 %v11758_v8, %v11756_v5 }
 0x205   :  { %9925 = vst [vmem:[#allocation3 + $0x40] sm:$0xff] %v9924_v14  }
 0x207   :  { %v1021_v18 = vpop.f32.mrf.mxu0 }
 0x208   :  { %v1022_v19 = vadd.f32 %v1021_v18, %v876_v53  ;;  %v10961_v21 = vpop.eup %10960  ;;  %v891_v53 = vpop.f32.mrf.mxu3 }
 0x209   :  { %v11763_v27 = vmul.f32 0.8, %v10961_v21 }
 0x20a   :  { %10962 = vtanh.f32 %v1022_v19 }
 0x20f   :  { %v1024_v22 = vpop.f32.mrf.mxu0 }
 0x210   :  { %v10963_v26 = vpop.eup %10962  ;;  %v1025_v33 = vadd.f32 %v1024_v22, %v879_v62  ;;  %v894_v63 = vpop.f32.mrf.mxu3 }
 0x211   :  { %v11765_v28 = vmul.f32 0.8, %v10963_v26 }
 0x212   :  { %1260 = vmatmul.bf16.gmra.mxu1 %v11679_v10  ;;  %10964 = vtanh.f32 %v1025_v33 }
 0x213   :  { %v9929_v32 = vpack.c.bf16 %v11765_v28, %v11763_v27 }
 0x215   :  { %10759 = vst [vmem:[#allocation3 + $0x48] sm:$0xff] %v9929_v32   ;;  %v9536_v32 = vld [vmem:[#allocation9 + $0x38] sm:$0xff] }
 0x216   :  { %1514 = vmatpush.bf16.msrb.mxu3 %v9536_v32 }
 0x217   :  { %v1026_v34 = vpop.f32.mrf.mxu0 }
 0x218   :  { %v1027_v36 = vadd.f32 %v1026_v34, %v881_v15  ;;  %v10965_v37 = vpop.eup %10964  ;;  %v896_v14 = vpop.f32.mrf.mxu3  ;;  %v9535_v34 = vld [vmem:[#allocation9 + $0x30] sm:$0xff] }
 0x219   :  { %v11770_v44 = vmul.f32 0.8, %v10965_v37 }
 0x21a   :  { %10966 = vtanh.f32 %v1027_v36  ;;  %1515 = vmatpush.bf16.msrb.mxu3 %v9535_v34 }
 0x21f   :  { %v1029_v42 = vpop.f32.mrf.mxu0 }
 0x220   :  { %v10967_v43 = vpop.eup %10966  ;;  %v1030_v50 = vadd.f32 %v1029_v42, %v884_v20  ;;  %v899_v33 = vpop.f32.mrf.mxu3  ;;  %v9534_v42 = vld [vmem:[#allocation9 + $0x28] sm:$0xff] }
 0x221   :  { %v11772_v45 = vmul.f32 0.8, %v10967_v43  ;;  %1516 = vmatpush.bf16.msrb.mxu3 %v9534_v42 }
 0x222   :  { %1265 = vmatmul.bf16.gmra.mxu1 %v11682_v11  ;;  %10968 = vtanh.f32 %v1030_v50 }
 0x223   :  { %v9934_v47 = vpack.c.bf16 %v11772_v45, %v11770_v44 }
 0x225   :  { %10760 = vst [vmem:[#allocation3 + $0x50] sm:$0xff] %v9934_v47  }
 0x227   :  { %v1031_v51 = vpop.f32.mrf.mxu0 }
 0x228   :  { %v1032_v52 = vadd.f32 %v1031_v51, %v886_v35  ;;  %v10969_v56 = vpop.eup %10968  ;;  %v901_v50 = vpop.f32.mrf.mxu3 }
 0x229   :  { %v11777_v59 = vmul.f32 0.8, %v10969_v56 }
 0x22a   :  { %10970 = vtanh.f32 %v1032_v52  ;;  %v9533_v52 = vld [vmem:[#allocation9 + $0x20] sm:$0xff] }
 0x22b   :  { %1517 = vmatpush.bf16.msrb.mxu3 %v9533_v52 }
 0x22f   :  { %v1034_v57 = vpop.f32.mrf.mxu0 }
 0x230   :  { %v10971_v58 = vpop.eup %10970  ;;  %v1035_v62 = vadd.f32 %v1034_v57, %v889_v46 }
 0x231   :  { %v11779_v60 = vmul.f32 0.8, %v10971_v58  ;;  %v9531_v58 = vld [vmem:[#allocation9 + $0x10] sm:$0xff] }
 0x232   :  { %1270 = vmatmul.bf16.gmra.mxu1 %v11685_v12  ;;  %10972 = vtanh.f32 %v1035_v62 }
 0x233   :  { %v9939_v61 = vpack.c.bf16 %v11779_v60, %v11777_v59 }
 0x235   :  { %10761 = vst [vmem:[#allocation3 + $0x58] sm:$0xff] %v9939_v61   ;;  %v904_v61 = vpop.f32.mrf.mxu3 }
 0x237   :  { %v1036_v0 = vpop.f32.mrf.mxu0 }
 0x238   :  { %v1037_v1 = vadd.f32 %v1036_v0, %v891_v53  ;;  %v10973_v4 = vpop.eup %10972  ;;  %v9532_v53 = vld [vmem:[#allocation9 + $0x18] sm:$0xff] }
 0x239   :  { %v11784_v18 = vmul.f32 0.8, %v10973_v4  ;;  %1518 = vmatpush.bf16.msrb.mxu3 %v9532_v53 }
 0x23a   :  { %10974 = vtanh.f32 %v1037_v1 }
 0x23d   :  { %1519 = vmatpush.bf16.msrb.mxu3 %v9531_v58  ;;  %v9523_v58 = vld [vmem:[#allocation3 + $0x50] sm:$0xff] }
 0x23f   :  { %v1039_v15 = vpop.f32.mrf.mxu0 }
 0x240   :  { %v10975_v17 = vpop.eup %10974  ;;  %v1040_v21 = vadd.f32 %v1039_v15, %v894_v63  ;;  %v9530_v63 = vld [vmem:[#allocation9 + $0x8] sm:$0xff] }
 0x241   :  { %v11786_v19 = vmul.f32 0.8, %v10975_v17  ;;  %1520 = vmatpush.bf16.msrb.mxu3 %v9530_v63 }
 0x242   :  { %1275 = vmatmul.bf16.gmra.mxu1 %v11688_v13  ;;  %10976 = vtanh.f32 %v1040_v21  ;;  %v906_v21 = vpop.f32.mrf.mxu3 }
 0x243   :  { %v9944_v20 = vpack.c.bf16 %v11786_v19, %v11784_v18 }
 0x245   :  { %10762 = vst [vmem:[#allocation3 + $0x60] sm:$0xff] %v9944_v20   ;;  %v9529_v20 = vld [vmem:[#allocation9] sm:$0xff] }
 0x246   :  { %1521 = vmatpush.bf16.msrb.mxu3 %v9529_v20 }
 0x247   :  { %v1041_v22 = vpop.f32.mrf.mxu0 }
 0x248   :  { %v1042_v26 = vadd.f32 %v1041_v22, %v896_v14  ;;  %v10977_v35 = vpop.eup %10976 }
 0x249   :  { %v11791_v43 = vmul.f32 0.8, %v10977_v35 }
 0x24a   :  { %10978 = vtanh.f32 %v1042_v26 }
 0x24c   :  { %v9525_v53 = vld [vmem:[#allocation3 + $0x60] sm:$0xff] }
 0x24f   :  { %v1044_v36 = vpop.f32.mrf.mxu0 }
 0x250   :  { %v10979_v37 = vpop.eup %10978  ;;  %v1045_v51 = vadd.f32 %v1044_v36, %v899_v33 }
 0x251   :  { %v11793_v46 = vmul.f32 0.8, %v10979_v37 }
 0x252   :  { %1280 = vmatmul.bf16.gmra.mxu1 %v11691_v16  ;;  %10980 = vtanh.f32 %v1045_v51 }
 0x253   :  { %v9949_v47 = vpack.c.bf16 %v11793_v46, %v11791_v43 }
 0x255   :  { %10763 = vst [vmem:[#allocation3 + $0x68] sm:$0xff] %v9949_v47  }
 0x257   :  { %v1046_v56 = vpop.f32.mrf.mxu0 }
 0x258   :  { %v1047_v57 = vadd.f32 %v1046_v56, %v901_v50  ;;  %v10981_v62 = vpop.eup %10980  ;;  %v9524_v56 = vld [vmem:[#allocation3 + $0x58] sm:$0xff] }
 0x259   :  { %v11798_v4 = vmul.f32 0.8, %v10981_v62 }
 0x25a   :  { %10982 = vtanh.f32 %v1047_v57 }
 0x25c   :  { %v9526_v50 = vld [vmem:[#allocation3 + $0x68] sm:$0xff] }
 0x25f   :  { %v1049_v0 = vpop.f32.mrf.mxu0 }
 0x260   :  { %v10983_v1 = vpop.eup %10982  ;;  %v1050_v17 = vadd.f32 %v1049_v0, %v904_v61  ;;  %v9522_v61 = vld [vmem:[#allocation3 + $0x48] sm:$0xff]  ;;  %v9521_v0 = vld [vmem:[#allocation3 + $0x40] sm:$0xff] }
 0x261   :  { %v11800_v14 = vmul.f32 0.8, %v10983_v1 }
 0x262   :  { %1285 = vmatmul.bf16.gmra.mxu1 %v11694_v24  ;;  %10984 = vtanh.f32 %v1050_v17 }
 0x263   :  { %v9954_v15 = vpack.c.bf16 %v11800_v14, %v11798_v4 }
 0x265   :  { %10764 = vst [vmem:[#allocation3 + $0x70] sm:$0xff] %v9954_v15  }
 0x267   :  { %v1051_v22 = vpop.f32.mrf.mxu0 }
 0x268   :  { %v1052_v26 = vadd.f32 %v1051_v22, %v906_v21  ;;  %v10985_v32 = vpop.eup %10984 }
 0x269   :  { %v11805_v34 = vmul.f32 0.8, %v10985_v32 }
 0x26a   :  { %10986 = vtanh.f32 %v1052_v26 }
 0x26c   :  { %v9527_v47 = vld [vmem:[#allocation3 + $0x70] sm:$0xff] }
 0x270   :  { %v10987_v33 = vpop.eup %10986 }
 0x271   :  { %v11807_v35 = vmul.f32 0.8, %v10987_v33 }
 0x272   :  { %1290 = vmatmul.bf16.gmra.mxu1 %v11697_v31 }
 0x273   :  { %v9959_v36 = vpack.c.bf16 %v11807_v35, %v11805_v34 }
 0x275   :  { %10765 = vst [vmem:[#allocation3 + $0x78] sm:$0xff] %v9959_v36  }
 0x27c   :  { %v9528_v37 = vld [vmem:[#allocation3 + $0x78] sm:$0xff] }
 0x27d   :  { %1360 = vmatpush.bf16.msrb.mxu2 %v9528_v37 }
 0x27f   :  { %v1256_v42 = vpop.f32.mrf.mxu1 }
 0x281   :  { %1361 = vmatpush.bf16.msrb.mxu2 %v9527_v47 }
 0x285   :  { %1362 = vmatpush.bf16.msrb.mxu2 %v9526_v50  ;;  %v9560_v50 = vld [vmem:[#allocation12 + $0x38] sm:$0xff] }
 0x286   :  { %1811 = vmatpush.bf16.msra.mxu0 %v9560_v50 }
 0x287   :  { %v1258_v51 = vpop.f32.mrf.mxu1 }
 0x288   :  { %v1442_v52 = vpack.c.bf16 %v1258_v51, %v1256_v42  ;;  %v9552_v51 = vld [vmem:[#allocation10 + $0x38] sm:$0xff] }
 0x289   :  { %1363 = vmatpush.bf16.msrb.mxu2 %v9525_v53  ;;  %1956 = vmatpush.bf16.msra.mxu1 %v9552_v51  ;;  %v9558_v53 = vld [vmem:[#allocation12 + $0x28] sm:$0xff]  ;;  %v1627_v51 = vmul.f32 0.2, %v11708_v38  ;;  %v10767_v38 = vld [vmem:[#allocation4 + $0x50] sm:$0xff]  }
 0x28a   :  { %1522 = vmatmul.bf16.vlgmr.msrb.gmra.mxu3 %v1442_v52  ;;  %v9559_v52 = vld [vmem:[#allocation12 + $0x30] sm:$0xff] }
 0x28b   :  { %1812 = vmatpush.bf16.msra.mxu0 %v9559_v52 }
 0x28d   :  { %1364 = vmatpush.bf16.msrb.mxu2 %v9524_v56  ;;  %v9550_v56 = vld [vmem:[#allocation10 + $0x28] sm:$0xff] }
 0x28f   :  { %v1261_v57 = vpop.f32.mrf.mxu1  ;;  %1813 = vmatpush.bf16.msra.mxu0 %v9558_v53 }
 0x291   :  { %1365 = vmatpush.bf16.msrb.mxu2 %v9523_v58 }
 0x295   :  { %1366 = vmatpush.bf16.msrb.mxu2 %v9522_v61  ;;  %v9549_v61 = vld [vmem:[#allocation10 + $0x20] sm:$0xff] }
 0x297   :  { %v1263_v62 = vpop.f32.mrf.mxu1 }
 0x298   :  { %v1443_v63 = vpack.c.bf16 %v1263_v62, %v1261_v57  ;;  %v9556_v62 = vld [vmem:[#allocation12 + $0x18] sm:$0xff] }
 0x299   :  { %1367 = vmatpush.bf16.msrb.mxu2 %v9521_v0  ;;  %v9547_v0 = vld [vmem:[#allocation10 + $0x10] sm:$0xff] }
 0x29a   :  { %1527 = vmatmul.bf16.gmra.mxu3 %v1443_v63  ;;  %v9555_v63 = vld [vmem:[#allocation12 + $0x10] sm:$0xff] }
 0x29c   :  { %1368 = vmatmul.bf16.vlgmr.msrb.gmra.mxu2 %v11676_v9 }
 0x29f   :  { %v1266_v1 = vpop.f32.mrf.mxu1 }
 0x2a7   :  { %v1268_v15 = vpop.f32.mrf.mxu1 }
 0x2a8   :  { %v1444_v17 = vpack.c.bf16 %v1268_v15, %v1266_v1  ;;  %v9554_v1 = vld [vmem:[#allocation12 + $0x8] sm:$0xff] }
 0x2a9   :  { %v9546_v15 = vld [vmem:[#allocation10 + $0x8] sm:$0xff] }
 0x2aa   :  { %1532 = vmatmul.bf16.gmra.mxu3 %v1444_v17  ;;  %v9553_v17 = vld [vmem:[#allocation12] sm:$0xff] }
 0x2ac   :  { %1373 = vmatmul.bf16.gmra.mxu2 %v11679_v10 }
 0x2af   :  { %v1271_v20 = vpop.f32.mrf.mxu1 }
 0x2b7   :  { %v1273_v21 = vpop.f32.mrf.mxu1 }
 0x2b8   :  { %v1445_v22 = vpack.c.bf16 %v1273_v21, %v1271_v20  ;;  %v9962_v20 = vld [vmem:[#allocation4 + $0x40] sm:$0xff]  }
 0x2b9   :  { %v9545_v21 = vld [vmem:[#allocation10] sm:$0xff] }
 0x2ba   :  { %1537 = vmatmul.bf16.gmra.mxu3 %v1445_v22  ;;  %v9963_v22 = vunpack.c.l.bf16 %v9962_v20 }
 0x2bc   :  { %1378 = vmatmul.bf16.gmra.mxu2 %v11682_v11 }
 0x2bf   :  { %v1276_v26 = vpop.f32.mrf.mxu1 }
 0x2c7   :  { %v1278_v32 = vpop.f32.mrf.mxu1 }
 0x2c8   :  { %v1446_v33 = vpack.c.bf16 %v1278_v32, %v1276_v26 }
 0x2ca   :  { %1542 = vmatmul.bf16.gmra.mxu3 %v1446_v33 }
 0x2cc   :  { %1383 = vmatmul.bf16.gmra.mxu2 %v11685_v12  ;;  %v9551_v12 = vld [vmem:[#allocation10 + $0x30] sm:$0xff] }
 0x2cd   :  { %1957 = vmatpush.bf16.msra.mxu1 %v9551_v12 }
 0x2cf   :  { %v1281_v36 = vpop.f32.mrf.mxu1 }
 0x2d1   :  { %1958 = vmatpush.bf16.msra.mxu1 %v9550_v56 }
 0x2d5   :  { %1959 = vmatpush.bf16.msra.mxu1 %v9549_v61 }
 0x2d7   :  { %v1283_v9 = vpop.f32.mrf.mxu1 }
 0x2d8   :  { %v1447_v37 = vpack.c.bf16 %v1283_v9, %v1281_v36  ;;  %v10766_v9 = vld [vmem:[#allocation4 + $0x48] sm:$0xff]  }
 0x2da   :  { %1547 = vmatmul.bf16.gmra.mxu3 %v1447_v37 }
 0x2dc   :  { %1388 = vmatmul.bf16.gmra.mxu2 %v11688_v13  ;;  %v9557_v13 = vld [vmem:[#allocation12 + $0x20] sm:$0xff] }
 0x2dd   :  { %1814 = vmatpush.bf16.msra.mxu0 %v9557_v13 }
 0x2df   :  { %v1286_v42 = vpop.f32.mrf.mxu1 }
 0x2e1   :  { %1815 = vmatpush.bf16.msra.mxu0 %v9556_v62 }
 0x2e5   :  { %1816 = vmatpush.bf16.msra.mxu0 %v9555_v63  ;;  %v9971_v63 = vunpack.c.l.bf16 %v10767_v38 }
 0x2e7   :  { %v1288_v10 = vpop.f32.mrf.mxu1 }
 0x2e8   :  { %v1448_v47 = vpack.c.bf16 %v1288_v10, %v1286_v42  ;;  %v9967_v42 = vunpack.c.l.bf16 %v10766_v9 }
 0x2e9   :  { %1817 = vmatpush.bf16.msra.mxu0 %v9554_v1 }
 0x2ea   :  { %1552 = vmatmul.bf16.gmra.mxu3 %v1448_v47 }
 0x2ec   :  { %1393 = vmatmul.bf16.gmra.mxu2 %v11691_v16  ;;  %v9548_v16 = vld [vmem:[#allocation10 + $0x18] sm:$0xff] }
 0x2ed   :  { %1960 = vmatpush.bf16.msra.mxu1 %v9548_v16  ;;  %1818 = vmatpush.bf16.msra.mxu0 %v9553_v17 }
 0x2ef   :  { %v1291_v11 = vpop.f32.mrf.mxu1 }
 0x2f1   :  { %1961 = vmatpush.bf16.msra.mxu1 %v9547_v0 }
 0x2f5   :  { %1962 = vmatpush.bf16.msra.mxu1 %v9546_v15 }
 0x2f7   :  { %v1293_v57 = vpop.f32.mrf.mxu1 }
 0x2f8   :  { %v1449_v58 = vpack.c.bf16 %v1293_v57, %v1291_v11  ;;  %v1628_v11 = vmul.f32 0.2, %v11710_v39  ;;  %v9968_v57 = vunpack.c.h.bf16 %v10766_v9 }
 0x2f9   :  { %1963 = vmatpush.bf16.msra.mxu1 %v9545_v21  ;;  %v1630_v21 = vmul.f32 0.2, %v11716_v55 }
 0x2fa   :  { %1557 = vmatmul.bf16.gmra.mxu3 %v1449_v58 }
 0x2fc   :  { %1398 = vmatmul.bf16.gmra.mxu2 %v11694_v24  ;;  %v9964_v24 = vunpack.c.h.bf16 %v9962_v20  ;;  %v1629_v20 = vmul.f32 0.2, %v11714_v54  ;;  %v10768_v54 = vld [vmem:[#allocation4 + $0x58] sm:$0xff]  }
 0x30c   :  { %1403 = vmatmul.bf16.gmra.mxu2 %v11697_v31 }
 0x30d   :  { %v1523_v26 = vpop.f32.mrf.mxu3 }
 0x30e   :  { %v1563_v32 = vadd.f32 %v9963_v22, %v1523_v26 }
 0x310   :  { %10988 = vtanh.f32 %v1563_v32 }
 0x315   :  { %v1525_v33 = vpop.f32.mrf.mxu3 }
 0x316   :  { %v1564_v36 = vadd.f32 %v9964_v24, %v1525_v33  ;;  %v10989_v37 = vpop.eup %10988 }
 0x317   :  { %v1595_v10 = vmul.f32 0.8, %v10989_v37 }
 0x318   :  { %10990 = vtanh.f32 %v1564_v36  ;;  %v9972_v36 = vunpack.c.h.bf16 %v10767_v38 }
 0x319   :  { %v11822_v53 = vadd.f32 %v1627_v51, %v1595_v10 }
 0x31d   :  { %v1528_v47 = vpop.f32.mrf.mxu3 }
 0x31e   :  { %v10991_v50 = vpop.eup %10990  ;;  %v1565_v12 = vadd.f32 %v9967_v42, %v1528_v47 }
 0x31f   :  { %v1596_v52 = vmul.f32 0.8, %v10991_v50  ;;  %v1369_v56 = vpop.f32.mrf.mxu2  ;;  %v9975_v50 = vunpack.c.l.bf16 %v10768_v54 }
 0x320   :  { %10992 = vtanh.f32 %v1565_v12 }
 0x321   :  { %v11824_v31 = vadd.f32 %v1628_v11, %v1596_v52 }
 0x323   :  { %v9996_v13 = vpack.c.bf16 %v11824_v31, %v11822_v53 }
 0x325   :  { %9997 = vst [vmem:[#allocation3] sm:$0xff] %v9996_v13   ;;  %v1530_v58 = vpop.f32.mrf.mxu3 }
 0x326   :  { %v1566_v61 = vadd.f32 %v9968_v57, %v1530_v58  ;;  %v10993_v16 = vpop.eup %10992  ;;  %v1632_v57 = vmul.f32 0.2, %v11722_v7 }
 0x327   :  { %v1371_v62 = vpop.f32.mrf.mxu2  ;;  %v1597_v1 = vmul.f32 0.8, %v10993_v16  ;;  %v9976_v16 = vunpack.c.h.bf16 %v10768_v54 }
 0x328   :  { %10994 = vtanh.f32 %v1566_v61  ;;  %v1739_v39 = vpack.c.bf16 %v1371_v62, %v1369_v56  ;;  %v1631_v56 = vmul.f32 0.2, %v11720_v6  ;;  %v10769_v6 = vld [vmem:[#allocation4 + $0x60] sm:$0xff]  }
 0x329   :  { %v11830_v32 = vadd.f32 %v1629_v20, %v1597_v1 }
 0x32a   :  { %1819 = vmatmul.bf16.vlgmr.msra.gmra.mxu0 %v1739_v39 }
 0x32c   :  { %v9537_v0 = vld [vmem:[#allocation3] sm:$0xff] }
 0x32d   :  { %v1533_v15 = vpop.f32.mrf.mxu3  ;;  %1964 = vmatmul.bf16.vlgmr.msra.gmra.mxu1 %v9537_v0 }
 0x32e   :  { %v10995_v17 = vpop.eup %10994  ;;  %v1567_v26 = vadd.f32 %v9971_v63, %v1533_v15 }
 0x32f   :  { %v1598_v22 = vmul.f32 0.8, %v10995_v17  ;;  %v1374_v33 = vpop.f32.mrf.mxu2  ;;  %v9979_v17 = vunpack.c.l.bf16 %v10769_v6 }
 0x330   :  { %10996 = vtanh.f32 %v1567_v26 }
 0x331   :  { %v11832_v24 = vadd.f32 %v1630_v21, %v1598_v22 }
 0x333   :  { %v10001_v9 = vpack.c.bf16 %v11832_v24, %v11830_v32 }
 0x335   :  { %10773 = vst [vmem:[#allocation3 + $0x8] sm:$0xff] %v10001_v9   ;;  %v1535_v37 = vpop.f32.mrf.mxu3 }
 0x336   :  { %v1568_v42 = vadd.f32 %v9972_v36, %v1535_v37  ;;  %v10997_v47 = vpop.eup %10996  ;;  %v1634_v36 = vmul.f32 0.2, %v11728_v30 }
 0x337   :  { %v1376_v10 = vpop.f32.mrf.mxu2  ;;  %v1599_v11 = vmul.f32 0.8, %v10997_v47  ;;  %v9980_v47 = vunpack.c.h.bf16 %v10769_v6 }
 0x338   :  { %10998 = vtanh.f32 %v1568_v42  ;;  %v1740_v55 = vpack.c.bf16 %v1376_v10, %v1374_v33  ;;  %v1633_v33 = vmul.f32 0.2, %v11726_v29  ;;  %v10770_v29 = vld [vmem:[#allocation4 + $0x68] sm:$0xff]  }
 0x339   :  { %v11838_v61 = vadd.f32 %v1631_v56, %v1599_v11 }
 0x33a   :  { %1824 = vmatmul.bf16.gmra.mxu0 %v1740_v55 }
 0x33c   :  { %v9538_v51 = vld [vmem:[#allocation3 + $0x8] sm:$0xff] }
 0x33d   :  { %v1538_v52 = vpop.f32.mrf.mxu3  ;;  %1969 = vmatmul.bf16.gmra.mxu1 %v9538_v51 }
 0x33e   :  { %v10999_v12 = vpop.eup %10998  ;;  %v1569_v58 = vadd.f32 %v9975_v50, %v1538_v52 }
 0x33f   :  { %v1600_v13 = vmul.f32 0.8, %v10999_v12  ;;  %v1379_v38 = vpop.f32.mrf.mxu2  ;;  %v9983_v12 = vunpack.c.l.bf16 %v10770_v29 }
 0x340   :  { %11000 = vtanh.f32 %v1569_v58 }
 0x341   :  { %v11840_v62 = vadd.f32 %v1632_v57, %v1600_v13 }
 0x343   :  { %v10006_v39 = vpack.c.bf16 %v11840_v62, %v11838_v61 }
 0x345   :  { %10774 = vst [vmem:[#allocation3 + $0x10] sm:$0xff] %v10006_v39   ;;  %v1540_v63 = vpop.f32.mrf.mxu3 }
 0x346   :  { %v1570_v0 = vadd.f32 %v9976_v16, %v1540_v63  ;;  %v11001_v15 = vpop.eup %11000  ;;  %v1636_v16 = vmul.f32 0.2, %v11734_v49 }
 0x347   :  { %v1381_v1 = vpop.f32.mrf.mxu2  ;;  %v1601_v21 = vmul.f32 0.8, %v11001_v15  ;;  %v9984_v15 = vunpack.c.h.bf16 %v10770_v29 }
 0x348   :  { %11002 = vtanh.f32 %v1570_v0  ;;  %v1741_v7 = vpack.c.bf16 %v1381_v1, %v1379_v38  ;;  %v1635_v38 = vmul.f32 0.2, %v11732_v48  ;;  %v10771_v48 = vld [vmem:[#allocation4 + $0x70] sm:$0xff]  }
 0x349   :  { %v11846_v42 = vadd.f32 %v1633_v33, %v1601_v21 }
 0x34a   :  { %1829 = vmatmul.bf16.gmra.mxu0 %v1741_v7 }
 0x34c   :  { %v9539_v20 = vld [vmem:[#allocation3 + $0x10] sm:$0xff] }
 0x34d   :  { %v1543_v22 = vpop.f32.mrf.mxu3  ;;  %1974 = vmatmul.bf16.gmra.mxu1 %v9539_v20 }
 0x34e   :  { %v11003_v26 = vpop.eup %11002  ;;  %v1571_v37 = vadd.f32 %v9979_v17, %v1543_v22 }
 0x34f   :  { %v1602_v9 = vmul.f32 0.8, %v11003_v26  ;;  %v1384_v54 = vpop.f32.mrf.mxu2  ;;  %v9987_v26 = vunpack.c.l.bf16 %v10771_v48 }
 0x350   :  { %11004 = vtanh.f32 %v1571_v37 }
 0x351   :  { %v11848_v10 = vadd.f32 %v1634_v36, %v1602_v9 }
 0x353   :  { %v10011_v55 = vpack.c.bf16 %v11848_v10, %v11846_v42 }
 0x355   :  { %10775 = vst [vmem:[#allocation3 + $0x18] sm:$0xff] %v10011_v55   ;;  %v1545_v50 = vpop.f32.mrf.mxu3 }
 0x356   :  { %v1572_v51 = vadd.f32 %v9980_v47, %v1545_v50  ;;  %v11005_v52 = vpop.eup %11004  ;;  %v1638_v47 = vmul.f32 0.2, %v11740_v3 }
 0x357   :  { %v1386_v11 = vpop.f32.mrf.mxu2  ;;  %v1603_v57 = vmul.f32 0.8, %v11005_v52  ;;  %v9988_v52 = vunpack.c.h.bf16 %v10771_v48 }
 0x358   :  { %11006 = vtanh.f32 %v1572_v51  ;;  %v1742_v30 = vpack.c.bf16 %v1386_v11, %v1384_v54  ;;  %v1637_v54 = vmul.f32 0.2, %v11738_v2  ;;  %v10772_v2 = vld [vmem:[#allocation4 + $0x78] sm:$0xff]  }
 0x359   :  { %v11854_v0 = vadd.f32 %v1635_v38, %v1603_v57 }
 0x35a   :  { %1834 = vmatmul.bf16.gmra.mxu0 %v1742_v30 }
 0x35c   :  { %v9540_v56 = vld [vmem:[#allocation3 + $0x18] sm:$0xff] }
 0x35d   :  { %v1548_v13 = vpop.f32.mrf.mxu3  ;;  %1979 = vmatmul.bf16.gmra.mxu1 %v9540_v56 }
 0x35e   :  { %v11007_v58 = vpop.eup %11006  ;;  %v1573_v63 = vadd.f32 %v9983_v12, %v1548_v13 }
 0x35f   :  { %v1604_v39 = vmul.f32 0.8, %v11007_v58  ;;  %v1389_v6 = vpop.f32.mrf.mxu2  ;;  %v9991_v58 = vunpack.c.l.bf16 %v10772_v2 }
 0x360   :  { %11008 = vtanh.f32 %v1573_v63 }
 0x361   :  { %v11856_v1 = vadd.f32 %v1636_v16, %v1604_v39 }
 0x363   :  { %v10016_v7 = vpack.c.bf16 %v11856_v1, %v11854_v0 }
 0x365   :  { %10776 = vst [vmem:[#allocation3 + $0x20] sm:$0xff] %v10016_v7   ;;  %v1550_v17 = vpop.f32.mrf.mxu3 }
 0x366   :  { %v1574_v20 = vadd.f32 %v9984_v15, %v1550_v17  ;;  %v11009_v22 = vpop.eup %11008  ;;  %v1640_v15 = vmul.f32 0.2, %v11746_v25 }
 0x367   :  { %v1391_v21 = vpop.f32.mrf.mxu2  ;;  %v1605_v36 = vmul.f32 0.8, %v11009_v22  ;;  %v9992_v22 = vunpack.c.h.bf16 %v10772_v2 }
 0x368   :  { %11010 = vtanh.f32 %v1574_v20  ;;  %v1743_v49 = vpack.c.bf16 %v1391_v21, %v1389_v6  ;;  %v1639_v6 = vmul.f32 0.2, %v11744_v23 }
 0x369   :  { %v11862_v51 = vadd.f32 %v1637_v54, %v1605_v36 }
 0x36a   :  { %1839 = vmatmul.bf16.gmra.mxu0 %v1743_v49 }
 0x36c   :  { %v9541_v33 = vld [vmem:[#allocation3 + $0x20] sm:$0xff] }
 0x36d   :  { %v1553_v9 = vpop.f32.mrf.mxu3  ;;  %1984 = vmatmul.bf16.gmra.mxu1 %v9541_v33 }
 0x36e   :  { %v11011_v37 = vpop.eup %11010  ;;  %v1575_v50 = vadd.f32 %v9987_v26, %v1553_v9 }
 0x36f   :  { %v1606_v55 = vmul.f32 0.8, %v11011_v37  ;;  %v1394_v29 = vpop.f32.mrf.mxu2 }
 0x370   :  { %11012 = vtanh.f32 %v1575_v50 }
 0x371   :  { %v11864_v11 = vadd.f32 %v1638_v47, %v1606_v55  ;;  %v1641_v47 = vmul.f32 0.2, %v11750_v40  ;;  %v1642_v55 = vmul.f32 0.2, %v11752_v41 }
 0x373   :  { %v10021_v30 = vpack.c.bf16 %v11864_v11, %v11862_v51 }
 0x375   :  { %10777 = vst [vmem:[#allocation3 + $0x28] sm:$0xff] %v10021_v30   ;;  %v1555_v12 = vpop.f32.mrf.mxu3 }
 0x376   :  { %v1576_v56 = vadd.f32 %v9988_v52, %v1555_v12  ;;  %v11013_v13 = vpop.eup %11012 }
 0x377   :  { %v1396_v57 = vpop.f32.mrf.mxu2  ;;  %v1607_v16 = vmul.f32 0.8, %v11013_v13 }
 0x378   :  { %11014 = vtanh.f32 %v1576_v56  ;;  %v1744_v3 = vpack.c.bf16 %v1396_v57, %v1394_v29 }
 0x379   :  { %v11870_v20 = vadd.f32 %v1639_v6, %v1607_v16  ;;  %v9564_v16 = vld [vmem:[#allocation3 + $0x18] sm:$0xff] }
 0x37a   :  { %1844 = vmatmul.bf16.gmra.mxu0 %v1744_v3  ;;  %v9565_v3 = vld [vmem:[#allocation3 + $0x20] sm:$0xff] }
 0x37c   :  { %v9542_v38 = vld [vmem:[#allocation3 + $0x28] sm:$0xff] }
 0x37d   :  { %v1558_v39 = vpop.f32.mrf.mxu3  ;;  %1989 = vmatmul.bf16.gmra.mxu1 %v9542_v38  ;;  %v9566_v41 = vld [vmem:[#allocation3 + $0x28] sm:$0xff] }
 0x37e   :  { %v11015_v63 = vpop.eup %11014  ;;  %v1577_v17 = vadd.f32 %v9991_v58, %v1558_v39 }
 0x37f   :  { %v1608_v7 = vmul.f32 0.8, %v11015_v63  ;;  %v1399_v48 = vpop.f32.mrf.mxu2  ;;  %v9563_v63 = vld [vmem:[#allocation3 + $0x10] sm:$0xff] }
 0x380   :  { %11016 = vtanh.f32 %v1577_v17  ;;  %v9562_v17 = vld [vmem:[#allocation3 + $0x8] sm:$0xff] }
 0x381   :  { %v11872_v21 = vadd.f32 %v1640_v15, %v1608_v7 }
 0x383   :  { %v10026_v49 = vpack.c.bf16 %v11872_v21, %v11870_v20 }
 0x385   :  { %10778 = vst [vmem:[#allocation3 + $0x30] sm:$0xff] %v10026_v49   ;;  %v1560_v26 = vpop.f32.mrf.mxu3 }
 0x386   :  { %v1578_v33 = vadd.f32 %v9992_v22, %v1560_v26  ;;  %v11017_v23 = vpop.eup %11016  ;;  %v9561_v22 = vld [vmem:[#allocation3] sm:$0xff] }
 0x387   :  { %v1401_v36 = vpop.f32.mrf.mxu2  ;;  %v1609_v37 = vmul.f32 0.8, %v11017_v23  ;;  %v2053_v23 = vmul.f32 0.2, %v11756_v5 }
 0x388   :  { %11018 = vtanh.f32 %v1578_v33  ;;  %v1745_v9 = vpack.c.bf16 %v1401_v36, %v1399_v48 }
 0x389   :  { %v11878_v29 = vadd.f32 %v1641_v47, %v1609_v37  ;;  %v11886_v37 = vld [vmem:[#allocation7] sm:$0xff] }
 0x38a   :  { %1849 = vmatmul.bf16.gmra.mxu0 %v1745_v9  ;;  %v2054_v9 = vmul.f32 0.2, %v11758_v8 }
 0x38c   :  { %v9543_v25 = vld [vmem:[#allocation3 + $0x30] sm:$0xff] }
 0x38d   :  { %1994 = vmatmul.bf16.gmra.mxu1 %v9543_v25  ;;  %v9567_v40 = vld [vmem:[#allocation3 + $0x30] sm:$0xff] }
 0x38e   :  { %v11019_v54 = vpop.eup %11018 }
 0x38f   :  { %v1610_v50 = vmul.f32 0.8, %v11019_v54  ;;  %v1404_v30 = vpop.f32.mrf.mxu2 }
 0x391   :  { %v11880_v52 = vadd.f32 %v1642_v55, %v1610_v50 }
 0x393   :  { %v10031_v12 = vpack.c.bf16 %v11880_v52, %v11878_v29 }
 0x395   :  { %10779 = vst [vmem:[#allocation3 + $0x38] sm:$0xff] %v10031_v12  }
 0x397   :  { %v1406_v56 = vpop.f32.mrf.mxu2 }
 0x398   :  { %v1746_v57 = vpack.c.bf16 %v1406_v56, %v1404_v30 }
 0x39a   :  { %1854 = vmatmul.bf16.gmra.mxu0 %v1746_v57 }
 0x39c   :  { %v9544_v2 = vld [vmem:[#allocation3 + $0x38] sm:$0xff] }
 0x39d   :  { %v9568_v13 = vld [vmem:[#allocation3 + $0x38] sm:$0xff]  ;;  %1999 = vmatmul.bf16.gmra.mxu1 %v9544_v2 }
 0x39e   :  { %2197 = vmatpush.bf16.msra.mxu2 %v9568_v13 }
 0x3a2   :  { %2198 = vmatpush.bf16.msra.mxu2 %v9567_v40  ;;  %v2055_v40 = vmul.f32 0.2, %v11763_v27 }
 0x3a6   :  { %2199 = vmatpush.bf16.msra.mxu2 %v9566_v41  ;;  %v2056_v41 = vmul.f32 0.2, %v11765_v28 }
 0x3a7   :  { %v1820_v58 = vpop.f32.mrf.mxu0 }
 0x3aa   :  { %2200 = vmatpush.bf16.msra.mxu2 %v9565_v3  ;;  %v1965_v38 = vpop.f32.mrf.mxu1 }
 0x3ab   :  { %v1966_v39 = vadd.f32 %v1965_v38, %v1820_v58  ;;  %v11897_v58 = vld [vmem:[#allocation7 + $0x8] sm:$0xff] }
 0x3ad   :  { %11020 = vtanh.f32 %v1966_v39 }
 0x3ae   :  { %2201 = vmatpush.bf16.msra.mxu2 %v9564_v16 }
 0x3af   :  { %v1822_v6 = vpop.f32.mrf.mxu0 }
 0x3b2   :  { %2202 = vmatpush.bf16.msra.mxu2 %v9563_v63  ;;  %v1967_v15 = vpop.f32.mrf.mxu1 }
 0x3b3   :  { %v1968_v7 = vadd.f32 %v1967_v15, %v1822_v6  ;;  %v11021_v48 = vpop.eup %11020 }
 0x3b4   :  { %v2021_v26 = vmul.f32 0.8, %v11021_v48 }
 0x3b5   :  { %11022 = vtanh.f32 %v1968_v7 }
 0x3b6   :  { %2203 = vmatpush.bf16.msra.mxu2 %v9562_v17  ;;  %v11889_v47 = vadd.f32 %v2053_v23, %v2021_v26  ;;  %v2058_v26 = vmul.f32 0.2, %v11772_v45 }
 0x3b7   :  { %v1825_v49 = vpop.f32.mrf.mxu0 }
 0x3ba   :  { %2204 = vmatpush.bf16.msra.mxu2 %v9561_v22  ;;  %v1970_v33 = vpop.f32.mrf.mxu1 }
 0x3bb   :  { %v11023_v36 = vpop.eup %11022  ;;  %v1971_v54 = vadd.f32 %v1970_v33, %v1825_v49  ;;  %v2057_v49 = vmul.f32 0.2, %v11770_v44 }
 0x3bc   :  { %v2022_v25 = vmul.f32 0.8, %v11023_v36  ;;  %v11908_v36 = vld [vmem:[#allocation7 + $0x10] sm:$0xff] }
 0x3bd   :  { %2205 = vmatmul.bf16.vlgmr.msra.gmra.mxu2 %v11886_v37  ;;  %11024 = vtanh.f32 %v1971_v54 }
 0x3be   :  { %v11891_v55 = vadd.f32 %v2054_v9, %v2022_v25 }
 0x3bf   :  { %v1827_v30 = vpop.f32.mrf.mxu0 }
 0x3c0   :  { %v10036_v50 = vpack.c.bf16 %v11891_v55, %v11889_v47 }
 0x3c2   :  { %10037 = vst [vmem:[#allocation3 + $0x40] sm:$0xff] %v10036_v50   ;;  %v1972_v12 = vpop.f32.mrf.mxu1 }
 0x3c3   :  { %v1973_v5 = vadd.f32 %v1972_v12, %v1827_v30  ;;  %v11025_v8 = vpop.eup %11024 }
 0x3c4   :  { %v2023_v57 = vmul.f32 0.8, %v11025_v8 }
 0x3c5   :  { %11026 = vtanh.f32 %v1973_v5 }
 0x3c6   :  { %v11900_v16 = vadd.f32 %v2055_v40, %v2023_v57  ;;  %v2059_v57 = vmul.f32 0.2, %v11777_v59  ;;  %v11919_v40 = vld [vmem:[#allocation7 + $0x18] sm:$0xff] }
 0x3c7   :  { %v1830_v56 = vpop.f32.mrf.mxu0 }
 0x3ca   :  { %v1975_v2 = vpop.f32.mrf.mxu1 }
 0x3cb   :  { %v11027_v13 = vpop.eup %11026  ;;  %v1976_v38 = vadd.f32 %v1975_v2, %v1830_v56  ;;  %v2060_v2 = vmul.f32 0.2, %v11779_v60 }
 0x3cc   :  { %v2024_v3 = vmul.f32 0.8, %v11027_v13 }
 0x3cd   :  { %2210 = vmatmul.bf16.gmra.mxu2 %v11897_v58  ;;  %11028 = vtanh.f32 %v1976_v38 }
 0x3ce   :  { %v11902_v39 = vadd.f32 %v2056_v41, %v2024_v3 }
 0x3cf   :  { %v1832_v6 = vpop.f32.mrf.mxu0 }
 0x3d0   :  { %v10041_v63 = vpack.c.bf16 %v11902_v39, %v11900_v16 }
 0x3d2   :  { %10780 = vst [vmem:[#allocation3 + $0x48] sm:$0xff] %v10041_v63   ;;  %v1977_v15 = vpop.f32.mrf.mxu1 }
 0x3d3   :  { %v1978_v27 = vadd.f32 %v1977_v15, %v1832_v6  ;;  %v11029_v28 = vpop.eup %11028 }
 0x3d4   :  { %v2025_v17 = vmul.f32 0.8, %v11029_v28 }
 0x3d5   :  { %11030 = vtanh.f32 %v1978_v27 }
 0x3d6   :  { %v11911_v9 = vadd.f32 %v2057_v49, %v2025_v17 }
 0x3d7   :  { %v1835_v7 = vpop.f32.mrf.mxu0 }
 0x3da   :  { %v1980_v48 = vpop.f32.mrf.mxu1 }
 0x3db   :  { %v11031_v22 = vpop.eup %11030  ;;  %v1981_v23 = vadd.f32 %v1980_v48, %v1835_v7  ;;  %v2061_v48 = vmul.f32 0.2, %v11784_v18 }
 0x3dc   :  { %v2026_v33 = vmul.f32 0.8, %v11031_v22  ;;  %v2062_v22 = vmul.f32 0.2, %v11786_v19 }
 0x3dd   :  { %2215 = vmatmul.bf16.gmra.mxu2 %v11908_v36  ;;  %11032 = vtanh.f32 %v1981_v23 }
 0x3de   :  { %v11913_v25 = vadd.f32 %v2058_v26, %v2026_v33  ;;  %v11930_v26 = vld [vmem:[#allocation7 + $0x20] sm:$0xff] }
 0x3df   :  { %v1837_v50 = vpop.f32.mrf.mxu0 }
 0x3e0   :  { %v10046_v54 = vpack.c.bf16 %v11913_v25, %v11911_v9 }
 0x3e2   :  { %10781 = vst [vmem:[#allocation3 + $0x50] sm:$0xff] %v10046_v54   ;;  %v1982_v30 = vpop.f32.mrf.mxu1 }
 0x3e3   :  { %v1983_v44 = vadd.f32 %v1982_v30, %v1837_v50  ;;  %v11033_v45 = vpop.eup %11032 }
 0x3e4   :  { %v2027_v5 = vmul.f32 0.8, %v11033_v45 }
 0x3e5   :  { %11034 = vtanh.f32 %v1983_v44 }
 0x3e6   :  { %v11922_v3 = vadd.f32 %v2059_v57, %v2027_v5  ;;  %v2063_v57 = vmul.f32 0.2, %v11791_v43  ;;  %v9582_v43 = vld [vmem:[#allocation9 + $0x28] sm:$0xff] }
 0x3e7   :  { %v1840_v12 = vpop.f32.mrf.mxu0 }
 0x3ea   :  { %v1985_v8 = vpop.f32.mrf.mxu1 }
 0x3eb   :  { %v11035_v56 = vpop.eup %11034  ;;  %v1986_v41 = vadd.f32 %v1985_v8, %v1840_v12  ;;  %v9584_v12 = vld [vmem:[#allocation9 + $0x38] sm:$0xff] }
 0x3ec   :  { %v2028_v13 = vmul.f32 0.8, %v11035_v56  ;;  %2464 = vmatpush.bf16.msrb.mxu0 %v9584_v12  ;;  %v9579_v12 = vld [vmem:[#allocation9 + $0x10] sm:$0xff] }
 0x3ed   :  { %2220 = vmatmul.bf16.gmra.mxu2 %v11919_v40  ;;  %11036 = vtanh.f32 %v1986_v41  ;;  %v11941_v41 = vld [vmem:[#allocation7 + $0x28] sm:$0xff] }
 0x3ee   :  { %v11924_v38 = vadd.f32 %v2060_v2, %v2028_v13  ;;  %v2064_v2 = vmul.f32 0.2, %v11793_v46 }
 0x3ef   :  { %v1842_v6 = vpop.f32.mrf.mxu0 }
 0x3f0   :  { %v10051_v63 = vpack.c.bf16 %v11924_v38, %v11922_v3 }
 0x3f2   :  { %10782 = vst [vmem:[#allocation3 + $0x58] sm:$0xff] %v10051_v63   ;;  %v1987_v15 = vpop.f32.mrf.mxu1 }
 0x3f3   :  { %v1988_v59 = vadd.f32 %v1987_v15, %v1842_v6  ;;  %v11037_v60 = vpop.eup %11036  ;;  %v9583_v6 = vld [vmem:[#allocation9 + $0x30] sm:$0xff] }
 0x3f4   :  { %v2029_v28 = vmul.f32 0.8, %v11037_v60  ;;  %2465 = vmatpush.bf16.msrb.mxu0 %v9583_v6 }
 0x3f5   :  { %11038 = vtanh.f32 %v1988_v59 }
 0x3f6   :  { %v11933_v23 = vadd.f32 %v2061_v48, %v2029_v28  ;;  %v9580_v48 = vld [vmem:[#allocation9 + $0x18] sm:$0xff] }
 0x3f7   :  { %v1845_v27 = vpop.f32.mrf.mxu0 }
 0x3f8   :  { %2466 = vmatpush.bf16.msrb.mxu0 %v9582_v43  ;;  %v2068_v43 = vmul.f32 0.2, %v11807_v35 }
 0x3fa   :  { %v1990_v7 = vpop.f32.mrf.mxu1 }
 0x3fb   :  { %v11039_v17 = vpop.eup %11038  ;;  %v1991_v33 = vadd.f32 %v1990_v7, %v1845_v27  ;;  %v9581_v7 = vld [vmem:[#allocation9 + $0x20] sm:$0xff] }
 0x3fc   :  { %v2030_v49 = vmul.f32 0.8, %v11039_v17  ;;  %2467 = vmatpush.bf16.msrb.mxu0 %v9581_v7 }
 0x3fd   :  { %2225 = vmatmul.bf16.gmra.mxu2 %v11930_v26  ;;  %11040 = vtanh.f32 %v1991_v33 }
 0x3fe   :  { %v11935_v54 = vadd.f32 %v2062_v22, %v2030_v49 }
 0x3ff   :  { %v1847_v30 = vpop.f32.mrf.mxu0 }
 0x400   :  { %v10056_v50 = vpack.c.bf16 %v11935_v54, %v11933_v23  ;;  %2468 = vmatpush.bf16.msrb.mxu0 %v9580_v48 }
 0x402   :  { %10783 = vst [vmem:[#allocation3 + $0x60] sm:$0xff] %v10056_v50   ;;  %v1992_v44 = vpop.f32.mrf.mxu1 }
 0x403   :  { %v1993_v18 = vadd.f32 %v1992_v44, %v1847_v30  ;;  %v11041_v19 = vpop.eup %11040  ;;  %v2065_v30 = vmul.f32 0.2, %v11798_v4  ;;  %v2066_v44 = vmul.f32 0.2, %v11800_v14 }
 0x404   :  { %v2031_v5 = vmul.f32 0.8, %v11041_v19  ;;  %v11952_v19 = vld [vmem:[#allocation7 + $0x30] sm:$0xff]  ;;  %2469 = vmatpush.bf16.msrb.mxu0 %v9579_v12  ;;  %v9570_v12 = vld [vmem:[#allocation3 + $0x48] sm:$0xff] }
 0x405   :  { %11042 = vtanh.f32 %v1993_v18 }
 0x406   :  { %v11944_v15 = vadd.f32 %v2063_v57, %v2031_v5 }
 0x407   :  { %v1850_v45 = vpop.f32.mrf.mxu0 }
 0x409   :  { %v9573_v35 = vld [vmem:[#allocation3 + $0x60] sm:$0xff] }
 0x40a   :  { %v1995_v8 = vpop.f32.mrf.mxu1 }
 0x40b   :  { %v11043_v56 = vpop.eup %11042  ;;  %v1996_v63 = vadd.f32 %v1995_v8, %v1850_v45 }
 0x40c   :  { %v2032_v13 = vmul.f32 0.8, %v11043_v56  ;;  %v9578_v56 = vld [vmem:[#allocation9 + $0x8] sm:$0xff] }
 0x40d   :  { %2230 = vmatmul.bf16.gmra.mxu2 %v11941_v41  ;;  %11044 = vtanh.f32 %v1996_v63  ;;  %2470 = vmatpush.bf16.msrb.mxu0 %v9578_v56  ;;  %v9569_v56 = vld [vmem:[#allocation3 + $0x40] sm:$0xff] }
 0x40e   :  { %v11946_v59 = vadd.f32 %v2064_v2, %v2032_v13  ;;  %v9577_v13 = vld [vmem:[#allocation9] sm:$0xff] }
 0x40f   :  { %v1852_v27 = vpop.f32.mrf.mxu0 }
 0x410   :  { %v10061_v60 = vpack.c.bf16 %v11946_v59, %v11944_v15 }
 0x411   :  { %2471 = vmatpush.bf16.msrb.mxu0 %v9577_v13 }
 0x412   :  { %10784 = vst [vmem:[#allocation3 + $0x68] sm:$0xff] %v10061_v60   ;;  %v1997_v46 = vpop.f32.mrf.mxu1 }
 0x413   :  { %v1998_v28 = vadd.f32 %v1997_v46, %v1852_v27  ;;  %v11045_v17 = vpop.eup %11044  ;;  %v2067_v27 = vmul.f32 0.2, %v11805_v34 }
 0x414   :  { %v2033_v49 = vmul.f32 0.8, %v11045_v17 }
 0x415   :  { %11046 = vtanh.f32 %v1998_v28  ;;  %v11963_v28 = vld [vmem:[#allocation7 + $0x38] sm:$0xff] }
 0x416   :  { %v11955_v5 = vadd.f32 %v2065_v30, %v2033_v49 }
 0x417   :  { %v1855_v22 = vpop.f32.mrf.mxu0 }
 0x419   :  { %v9574_v34 = vld [vmem:[#allocation3 + $0x68] sm:$0xff] }
 0x41a   :  { %v2000_v33 = vpop.f32.mrf.mxu1 }
 0x41b   :  { %v11047_v50 = vpop.eup %11046  ;;  %v2001_v45 = vadd.f32 %v2000_v33, %v1855_v22 }
 0x41c   :  { %v2034_v18 = vmul.f32 0.8, %v11047_v50 }
 0x41d   :  { %2235 = vmatmul.bf16.gmra.mxu2 %v11952_v19  ;;  %11048 = vtanh.f32 %v2001_v45 }
 0x41e   :  { %v11957_v8 = vadd.f32 %v2066_v44, %v2034_v18  ;;  %v9572_v44 = vld [vmem:[#allocation3 + $0x58] sm:$0xff]  ;;  %v9571_v18 = vld [vmem:[#allocation3 + $0x50] sm:$0xff] }
 0x41f   :  { %v1857_v4 = vpop.f32.mrf.mxu0 }
 0x420   :  { %v10066_v57 = vpack.c.bf16 %v11957_v8, %v11955_v5 }
 0x422   :  { %10785 = vst [vmem:[#allocation3 + $0x70] sm:$0xff] %v10066_v57   ;;  %v2002_v14 = vpop.f32.mrf.mxu1 }
 0x423   :  { %v2003_v2 = vadd.f32 %v2002_v14, %v1857_v4  ;;  %v11049_v63 = vpop.eup %11048 }
 0x424   :  { %v2035_v6 = vmul.f32 0.8, %v11049_v63 }
 0x425   :  { %11050 = vtanh.f32 %v2003_v2 }
 0x426   :  { %v11966_v7 = vadd.f32 %v2067_v27, %v2035_v6 }
 0x429   :  { %v9575_v49 = vld [vmem:[#allocation3 + $0x70] sm:$0xff] }
 0x42b   :  { %v11051_v60 = vpop.eup %11050 }
 0x42c   :  { %v2036_v46 = vmul.f32 0.8, %v11051_v60 }
 0x42d   :  { %2240 = vmatmul.bf16.gmra.mxu2 %v11963_v28 }
 0x42e   :  { %v11968_v17 = vadd.f32 %v2068_v43, %v2036_v46 }
 0x430   :  { %v10071_v48 = vpack.c.bf16 %v11968_v17, %v11966_v7 }
 0x432   :  { %10786 = vst [vmem:[#allocation3 + $0x78] sm:$0xff] %v10071_v48  }
 0x439   :  { %v9576_v22 = vld [vmem:[#allocation3 + $0x78] sm:$0xff] }
 0x43a   :  { %2310 = vmatpush.bf16.msra.mxu3 %v9576_v22 }
 0x43e   :  { %2311 = vmatpush.bf16.msra.mxu3 %v9575_v49 }
 0x440   :  { %v2206_v33 = vpop.f32.mrf.mxu2 }
 0x442   :  { %2312 = vmatpush.bf16.msra.mxu3 %v9574_v34 }
 0x446   :  { %2313 = vmatpush.bf16.msra.mxu3 %v9573_v35  ;;  %v9608_v35 = vld [vmem:[#allocation12 + $0x38] sm:$0xff] }
 0x447   :  { %2761 = vmatpush.bf16.msrb.mxu1 %v9608_v35 }
 0x448   :  { %v2208_v50 = vpop.f32.mrf.mxu2 }
 0x449   :  { %v2392_v30 = vpack.c.bf16 %v2208_v50, %v2206_v33  ;;  %v9600_v50 = vld [vmem:[#allocation10 + $0x38] sm:$0xff] }
 0x44a   :  { %2314 = vmatpush.bf16.msra.mxu3 %v9572_v44  ;;  %2906 = vmatpush.bf16.msrb.mxu2 %v9600_v50  ;;  %v9607_v44 = vld [vmem:[#allocation12 + $0x30] sm:$0xff] }
 0x44b   :  { %2472 = vmatmul.bf16.vlgmr.msrb.gmra.mxu0 %v2392_v30  ;;  %2762 = vmatpush.bf16.msrb.mxu1 %v9607_v44  ;;  %v10787_v44 = vld [vmem:[#allocation4 + $0x88] sm:$0xff]  }
 0x44e   :  { %2315 = vmatpush.bf16.msra.mxu3 %v9571_v18  ;;  %v9599_v18 = vld [vmem:[#allocation10 + $0x30] sm:$0xff] }
 0x44f   :  { %2907 = vmatpush.bf16.msrb.mxu2 %v9599_v18 }
 0x450   :  { %v2211_v45 = vpop.f32.mrf.mxu2 }
 0x452   :  { %2316 = vmatpush.bf16.msra.mxu3 %v9570_v12  ;;  %v9606_v12 = vld [vmem:[#allocation12 + $0x28] sm:$0xff] }
 0x453   :  { %2763 = vmatpush.bf16.msrb.mxu1 %v9606_v12 }
 0x456   :  { %2317 = vmatpush.bf16.msra.mxu3 %v9569_v56  ;;  %v9598_v56 = vld [vmem:[#allocation10 + $0x28] sm:$0xff] }
 0x457   :  { %2908 = vmatpush.bf16.msrb.mxu2 %v9598_v56 }
 0x458   :  { %v2213_v57 = vpop.f32.mrf.mxu2 }
 0x459   :  { %v2393_v4 = vpack.c.bf16 %v2213_v57, %v2211_v45  ;;  %2318 = vmatmul.bf16.vlgmr.msra.gmra.mxu3 %v11886_v37  ;;  %v9605_v57 = vld [vmem:[#allocation12 + $0x20] sm:$0xff] }
 0x45a   :  { %2764 = vmatpush.bf16.msrb.mxu1 %v9605_v57 }
 0x45b   :  { %2477 = vmatmul.bf16.gmra.mxu0 %v2393_v4  ;;  %v9597_v4 = vld [vmem:[#allocation10 + $0x20] sm:$0xff] }
 0x45c   :  { %2909 = vmatpush.bf16.msrb.mxu2 %v9597_v4  ;;  %v2577_v4 = vmul.f32 0.2, %v11822_v53 }
 0x460   :  { %v2216_v14 = vpop.f32.mrf.mxu2 }
 0x468   :  { %v2218_v2 = vpop.f32.mrf.mxu2 }
 0x469   :  { %v2394_v13 = vpack.c.bf16 %v2218_v2, %v2216_v14  ;;  %2323 = vmatmul.bf16.gmra.mxu3 %v11897_v58  ;;  %v9604_v2 = vld [vmem:[#allocation12 + $0x18] sm:$0xff] }
 0x46a   :  { %2765 = vmatpush.bf16.msrb.mxu1 %v9604_v2  ;;  %v2578_v2 = vmul.f32 0.2, %v11824_v31 }
 0x46b   :  { %2482 = vmatmul.bf16.gmra.mxu0 %v2394_v13  ;;  %v9596_v13 = vld [vmem:[#allocation10 + $0x18] sm:$0xff] }
 0x46c   :  { %2910 = vmatpush.bf16.msrb.mxu2 %v9596_v13 }
 0x470   :  { %v2221_v63 = vpop.f32.mrf.mxu2 }
 0x478   :  { %v2223_v6 = vpop.f32.mrf.mxu2 }
 0x479   :  { %v2395_v60 = vpack.c.bf16 %v2223_v6, %v2221_v63  ;;  %2328 = vmatmul.bf16.gmra.mxu3 %v11908_v36  ;;  %v9603_v6 = vld [vmem:[#allocation12 + $0x10] sm:$0xff] }
 0x47a   :  { %2766 = vmatpush.bf16.msrb.mxu1 %v9603_v6 }
 0x47b   :  { %2487 = vmatmul.bf16.gmra.mxu0 %v2395_v60  ;;  %v9595_v60 = vld [vmem:[#allocation10 + $0x10] sm:$0xff] }
 0x47c   :  { %2911 = vmatpush.bf16.msrb.mxu2 %v9595_v60  ;;  %v10080_v60 = vunpack.c.h.bf16 %v10787_v44 }
 0x480   :  { %v2226_v27 = vpop.f32.mrf.mxu2 }
 0x488   :  { %v2228_v43 = vpop.f32.mrf.mxu2 }
 0x489   :  { %v2396_v46 = vpack.c.bf16 %v2228_v43, %v2226_v27  ;;  %2333 = vmatmul.bf16.gmra.mxu3 %v11919_v40  ;;  %v9602_v27 = vld [vmem:[#allocation12 + $0x8] sm:$0xff] }
 0x48a   :  { %v9594_v43 = vld [vmem:[#allocation10 + $0x8] sm:$0xff]  ;;  %2767 = vmatpush.bf16.msrb.mxu1 %v9602_v27 }
 0x48b   :  { %2492 = vmatmul.bf16.gmra.mxu0 %v2396_v46  ;;  %2912 = vmatpush.bf16.msrb.mxu2 %v9594_v43  ;;  %v10074_v46 = vld [vmem:[#allocation4 + $0x80] sm:$0xff]  }
 0x48c   :  { %v10076_v35 = vunpack.c.h.bf16 %v10074_v46 }
 0x490   :  { %v2231_v48 = vpop.f32.mrf.mxu2 }
 0x498   :  { %v2233_v22 = vpop.f32.mrf.mxu2 }
 0x499   :  { %v2397_v49 = vpack.c.bf16 %v2233_v22, %v2231_v48  ;;  %2338 = vmatmul.bf16.gmra.mxu3 %v11930_v26  ;;  %v9601_v48 = vld [vmem:[#allocation12] sm:$0xff] }
 0x49a   :  { %v9593_v22 = vld [vmem:[#allocation10] sm:$0xff]  ;;  %2768 = vmatpush.bf16.msrb.mxu1 %v9601_v48 }
 0x49b   :  { %2497 = vmatmul.bf16.gmra.mxu0 %v2397_v49  ;;  %2913 = vmatpush.bf16.msrb.mxu2 %v9593_v22  ;;  %v10075_v49 = vunpack.c.l.bf16 %v10074_v46  ;;  %v10788_v22 = vld [vmem:[#allocation4 + $0x90] sm:$0xff]  }
 0x49c   :  { %v10083_v31 = vunpack.c.l.bf16 %v10788_v22 }
 0x4a0   :  { %v2236_v33 = vpop.f32.mrf.mxu2 }
 0x4a8   :  { %v2238_v34 = vpop.f32.mrf.mxu2 }
 0x4a9   :  { %v2398_v30 = vpack.c.bf16 %v2238_v34, %v2236_v33  ;;  %2343 = vmatmul.bf16.gmra.mxu3 %v11941_v41 }
 0x4ab   :  { %2502 = vmatmul.bf16.gmra.mxu0 %v2398_v30 }
 0x4b0   :  { %v2241_v45 = vpop.f32.mrf.mxu2 }
 0x4b8   :  { %v2243_v14 = vpop.f32.mrf.mxu2 }
 0x4b9   :  { %v2399_v63 = vpack.c.bf16 %v2243_v14, %v2241_v45  ;;  %2348 = vmatmul.bf16.gmra.mxu3 %v11952_v19  ;;  %v10079_v45 = vunpack.c.l.bf16 %v10787_v44  ;;  %v2579_v44 = vmul.f32 0.2, %v11830_v32 }
 0x4bb   :  { %2507 = vmatmul.bf16.gmra.mxu0 %v2399_v63 }
 0x4c8   :  { %v2473_v33 = vpop.f32.mrf.mxu0 }
 0x4c9   :  { %v2513_v34 = vadd.f32 %v10075_v49, %v2473_v33  ;;  %2353 = vmatmul.bf16.gmra.mxu3 %v11963_v28 }
 0x4cb   :  { %11052 = vtanh.f32 %v2513_v34 }
 0x4d0   :  { %v2475_v50 = vpop.f32.mrf.mxu0 }
 0x4d1   :  { %v2514_v30 = vadd.f32 %v10076_v35, %v2475_v50  ;;  %v11053_v18 = vpop.eup %11052 }
 0x4d2   :  { %v2545_v12 = vmul.f32 0.8, %v11053_v18 }
 0x4d3   :  { %11054 = vtanh.f32 %v2514_v30 }
 0x4d4   :  { %v11982_v63 = vadd.f32 %v2577_v4, %v2545_v12  ;;  %v10084_v4 = vunpack.c.h.bf16 %v10788_v22  ;;  %v2581_v22 = vmul.f32 0.2, %v11838_v61 }
 0x4d8   :  { %v2478_v56 = vpop.f32.mrf.mxu0 }
 0x4d9   :  { %v11055_v57 = vpop.eup %11054  ;;  %v2515_v13 = vadd.f32 %v10079_v45, %v2478_v56  ;;  %v2580_v45 = vmul.f32 0.2, %v11832_v24 }
 0x4da   :  { %v2546_v14 = vmul.f32 0.8, %v11055_v57 }
 0x4db   :  { %11056 = vtanh.f32 %v2515_v13 }
 0x4dc   :  { %v11984_v6 = vadd.f32 %v2578_v2, %v2546_v14  ;;  %v2319_v43 = vpop.f32.mrf.mxu3 }
 0x4de   :  { %v10108_v27 = vpack.c.bf16 %v11984_v6, %v11982_v63 }
 0x4e0   :  { %10109 = vst [vmem:[#allocation3] sm:$0xff] %v10108_v27   ;;  %v2480_v46 = vpop.f32.mrf.mxu0  ;;  %v10789_v27 = vld [vmem:[#allocation4 + $0x98] sm:$0xff]  }
 0x4e1   :  { %v2516_v48 = vadd.f32 %v10080_v60, %v2480_v46  ;;  %v11057_v53 = vpop.eup %11056  ;;  %v10087_v24 = vunpack.c.l.bf16 %v10789_v27 }
 0x4e2   :  { %v2547_v35 = vmul.f32 0.8, %v11057_v53 }
 0x4e3   :  { %11058 = vtanh.f32 %v2516_v48 }
 0x4e4   :  { %v2321_v49 = vpop.f32.mrf.mxu3  ;;  %v11990_v56 = vadd.f32 %v2579_v44, %v2547_v35  ;;  %v10088_v44 = vunpack.c.h.bf16 %v10789_v27  ;;  %v2583_v27 = vmul.f32 0.2, %v11846_v42 }
 0x4e5   :  { %v2689_v33 = vpack.c.bf16 %v2321_v49, %v2319_v43 }
 0x4e7   :  { %v9585_v34 = vld [vmem:[#allocation3] sm:$0xff]  ;;  %2769 = vmatmul.bf16.vlgmr.msrb.gmra.mxu1 %v2689_v33 }
 0x4e8   :  { %v2483_v50 = vpop.f32.mrf.mxu0  ;;  %2914 = vmatmul.bf16.vlgmr.msrb.gmra.mxu2 %v9585_v34  ;;  %v2582_v34 = vmul.f32 0.2, %v11840_v62 }
 0x4e9   :  { %v11059_v30 = vpop.eup %11058  ;;  %v2517_v12 = vadd.f32 %v10083_v31, %v2483_v50 }
 0x4ea   :  { %v2548_v18 = vmul.f32 0.8, %v11059_v30 }
 0x4eb   :  { %11060 = vtanh.f32 %v2517_v12 }
 0x4ec   :  { %v11992_v57 = vadd.f32 %v2580_v45, %v2548_v18  ;;  %v2324_v2 = vpop.f32.mrf.mxu3 }
 0x4ee   :  { %v10113_v14 = vpack.c.bf16 %v11992_v57, %v11990_v56 }
 0x4f0   :  { %10794 = vst [vmem:[#allocation3 + $0x8] sm:$0xff] %v10113_v14   ;;  %v2485_v13 = vpop.f32.mrf.mxu0  ;;  %v10790_v14 = vld [vmem:[#allocation4 + $0xa0] sm:$0xff]  }
 0x4f1   :  { %v2518_v60 = vadd.f32 %v10084_v4, %v2485_v13  ;;  %v11061_v32 = vpop.eup %11060  ;;  %v10091_v62 = vunpack.c.l.bf16 %v10790_v14 }
 0x4f2   :  { %v2549_v53 = vmul.f32 0.8, %v11061_v32 }
 0x4f3   :  { %11062 = vtanh.f32 %v2518_v60 }
 0x4f4   :  { %v2326_v43 = vpop.f32.mrf.mxu3  ;;  %v11998_v50 = vadd.f32 %v2581_v22, %v2549_v53  ;;  %v10092_v22 = vunpack.c.h.bf16 %v10790_v14  ;;  %v2585_v14 = vmul.f32 0.2, %v11854_v0 }
 0x4f5   :  { %v2690_v46 = vpack.c.bf16 %v2326_v43, %v2324_v2 }
 0x4f7   :  { %v9586_v48 = vld [vmem:[#allocation3 + $0x8] sm:$0xff]  ;;  %2774 = vmatmul.bf16.gmra.mxu1 %v2690_v46 }
 0x4f8   :  { %v2488_v49 = vpop.f32.mrf.mxu0  ;;  %2919 = vmatmul.bf16.gmra.mxu2 %v9586_v48  ;;  %v2584_v48 = vmul.f32 0.2, %v11848_v10 }
 0x4f9   :  { %v11063_v33 = vpop.eup %11062  ;;  %v2519_v35 = vadd.f32 %v10087_v24, %v2488_v49 }
 0x4fa   :  { %v2550_v31 = vmul.f32 0.8, %v11063_v33 }
 0x4fb   :  { %11064 = vtanh.f32 %v2519_v35 }
 0x4fc   :  { %v12000_v30 = vadd.f32 %v2582_v34, %v2550_v31  ;;  %v2329_v45 = vpop.f32.mrf.mxu3 }
 0x4fe   :  { %v10118_v18 = vpack.c.bf16 %v12000_v30, %v11998_v50 }
 0x500   :  { %10795 = vst [vmem:[#allocation3 + $0x10] sm:$0xff] %v10118_v18   ;;  %v2490_v12 = vpop.f32.mrf.mxu0  ;;  %v10791_v18 = vld [vmem:[#allocation4 + $0xa8] sm:$0xff]  }
 0x501   :  { %v2520_v4 = vadd.f32 %v10088_v44, %v2490_v12  ;;  %v11065_v61 = vpop.eup %11064  ;;  %v10095_v10 = vunpack.c.l.bf16 %v10791_v18 }
 0x502   :  { %v2551_v32 = vmul.f32 0.8, %v11065_v61 }
 0x503   :  { %11066 = vtanh.f32 %v2520_v4 }
 0x504   :  { %v2331_v2 = vpop.f32.mrf.mxu3  ;;  %v12006_v49 = vadd.f32 %v2583_v27, %v2551_v32  ;;  %v10096_v27 = vunpack.c.h.bf16 %v10791_v18  ;;  %v2587_v18 = vmul.f32 0.2, %v11862_v51 }
 0x505   :  { %v2691_v13 = vpack.c.bf16 %v2331_v2, %v2329_v45 }
 0x507   :  { %v9587_v60 = vld [vmem:[#allocation3 + $0x10] sm:$0xff]  ;;  %2779 = vmatmul.bf16.gmra.mxu1 %v2691_v13 }
 0x508   :  { %v2493_v43 = vpop.f32.mrf.mxu0  ;;  %2924 = vmatmul.bf16.gmra.mxu2 %v9587_v60  ;;  %v2586_v60 = vmul.f32 0.2, %v11856_v1 }
 0x509   :  { %v11067_v46 = vpop.eup %11066  ;;  %v2521_v53 = vadd.f32 %v10091_v62, %v2493_v43 }
 0x50a   :  { %v2552_v24 = vmul.f32 0.8, %v11067_v46 }
 0x50b   :  { %11068 = vtanh.f32 %v2521_v53 }
 0x50c   :  { %v12008_v33 = vadd.f32 %v2584_v48, %v2552_v24  ;;  %v2334_v34 = vpop.f32.mrf.mxu3 }
 0x50e   :  { %v10123_v31 = vpack.c.bf16 %v12008_v33, %v12006_v49 }
 0x510   :  { %10796 = vst [vmem:[#allocation3 + $0x18] sm:$0xff] %v10123_v31   ;;  %v2495_v35 = vpop.f32.mrf.mxu0  ;;  %v10792_v31 = vld [vmem:[#allocation4 + $0xb0] sm:$0xff]  }
 0x511   :  { %v2522_v44 = vadd.f32 %v10092_v22, %v2495_v35  ;;  %v11069_v42 = vpop.eup %11068  ;;  %v10099_v1 = vunpack.c.l.bf16 %v10792_v31 }
 0x512   :  { %v2553_v61 = vmul.f32 0.8, %v11069_v42 }
 0x513   :  { %11070 = vtanh.f32 %v2522_v44 }
 0x514   :  { %v2336_v45 = vpop.f32.mrf.mxu3  ;;  %v12014_v43 = vadd.f32 %v2585_v14, %v2553_v61  ;;  %v10100_v14 = vunpack.c.h.bf16 %v10792_v31  ;;  %v2589_v31 = vmul.f32 0.2, %v11870_v20 }
 0x515   :  { %v2692_v12 = vpack.c.bf16 %v2336_v45, %v2334_v34 }
 0x517   :  { %v9588_v4 = vld [vmem:[#allocation3 + $0x18] sm:$0xff]  ;;  %2784 = vmatmul.bf16.gmra.mxu1 %v2692_v12 }
 0x518   :  { %v2498_v2 = vpop.f32.mrf.mxu0  ;;  %2929 = vmatmul.bf16.gmra.mxu2 %v9588_v4  ;;  %v2588_v4 = vmul.f32 0.2, %v11864_v11 }
 0x519   :  { %v11071_v13 = vpop.eup %11070  ;;  %v2523_v32 = vadd.f32 %v10095_v10, %v2498_v2 }
 0x51a   :  { %v2554_v62 = vmul.f32 0.8, %v11071_v13 }
 0x51b   :  { %11072 = vtanh.f32 %v2523_v32 }
 0x51c   :  { %v12016_v46 = vadd.f32 %v2586_v60, %v2554_v62  ;;  %v2339_v48 = vpop.f32.mrf.mxu3 }
 0x51e   :  { %v10128_v24 = vpack.c.bf16 %v12016_v46, %v12014_v43 }
 0x520   :  { %10797 = vst [vmem:[#allocation3 + $0x20] sm:$0xff] %v10128_v24   ;;  %v2500_v53 = vpop.f32.mrf.mxu0  ;;  %v10793_v24 = vld [vmem:[#allocation4 + $0xb8] sm:$0xff]  }
 0x521   :  { %v2524_v22 = vadd.f32 %v10096_v27, %v2500_v53  ;;  %v11073_v0 = vpop.eup %11072  ;;  %v10103_v11 = vunpack.c.l.bf16 %v10793_v24 }
 0x522   :  { %v2555_v42 = vmul.f32 0.8, %v11073_v0 }
 0x523   :  { %11074 = vtanh.f32 %v2524_v22 }
 0x524   :  { %v2341_v34 = vpop.f32.mrf.mxu3  ;;  %v12022_v2 = vadd.f32 %v2587_v18, %v2555_v42  ;;  %v10104_v18 = vunpack.c.h.bf16 %v10793_v24 }
 0x525   :  { %v2693_v35 = vpack.c.bf16 %v2341_v34, %v2339_v48 }
 0x527   :  { %v9589_v44 = vld [vmem:[#allocation3 + $0x20] sm:$0xff]  ;;  %2789 = vmatmul.bf16.gmra.mxu1 %v2693_v35 }
 0x528   :  { %v2503_v45 = vpop.f32.mrf.mxu0  ;;  %2934 = vmatmul.bf16.gmra.mxu2 %v9589_v44  ;;  %v2590_v44 = vmul.f32 0.2, %v11872_v21 }
 0x529   :  { %v11075_v12 = vpop.eup %11074  ;;  %v2525_v61 = vadd.f32 %v10099_v1, %v2503_v45 }
 0x52a   :  { %v2556_v10 = vmul.f32 0.8, %v11075_v12 }
 0x52b   :  { %11076 = vtanh.f32 %v2525_v61 }
 0x52c   :  { %v12024_v13 = vadd.f32 %v2588_v4, %v2556_v10  ;;  %v2344_v60 = vpop.f32.mrf.mxu3 }
 0x52e   :  { %v10133_v62 = vpack.c.bf16 %v12024_v13, %v12022_v2 }
 0x530   :  { %10798 = vst [vmem:[#allocation3 + $0x28] sm:$0xff] %v10133_v62   ;;  %v2505_v32 = vpop.f32.mrf.mxu0 }
 0x531   :  { %v2526_v27 = vadd.f32 %v10100_v14, %v2505_v32  ;;  %v11077_v51 = vpop.eup %11076 }
 0x532   :  { %v2557_v0 = vmul.f32 0.8, %v11077_v51  ;;  %v2591_v51 = vmul.f32 0.2, %v11878_v29 }
 0x533   :  { %11078 = vtanh.f32 %v2526_v27 }
 0x534   :  { %v2346_v48 = vpop.f32.mrf.mxu3  ;;  %v12030_v45 = vadd.f32 %v2589_v31, %v2557_v0 }
 0x535   :  { %v2694_v53 = vpack.c.bf16 %v2346_v48, %v2344_v60  ;;  %v2592_v48 = vmul.f32 0.2, %v11880_v52  ;;  %v9613_v52 = vld [vmem:[#allocation3 + $0x20] sm:$0xff] }
 0x537   :  { %v9590_v22 = vld [vmem:[#allocation3 + $0x28] sm:$0xff]  ;;  %2794 = vmatmul.bf16.gmra.mxu1 %v2694_v53 }
 0x538   :  { %v2508_v34 = vpop.f32.mrf.mxu0  ;;  %2939 = vmatmul.bf16.gmra.mxu2 %v9590_v22 }
 0x539   :  { %v11079_v35 = vpop.eup %11078  ;;  %v2527_v42 = vadd.f32 %v10103_v11, %v2508_v34 }
 0x53a   :  { %v2558_v1 = vmul.f32 0.8, %v11079_v35 }
 0x53b   :  { %11080 = vtanh.f32 %v2527_v42 }
 0x53c   :  { %v12032_v12 = vadd.f32 %v2590_v44, %v2558_v1  ;;  %v2349_v4 = vpop.f32.mrf.mxu3  ;;  %v9614_v44 = vld [vmem:[#allocation3 + $0x28] sm:$0xff] }
 0x53e   :  { %v10138_v10 = vpack.c.bf16 %v12032_v12, %v12030_v45 }
 0x540   :  { %10799 = vst [vmem:[#allocation3 + $0x30] sm:$0xff] %v10138_v10   ;;  %v2510_v61 = vpop.f32.mrf.mxu0 }
 0x541   :  { %v2528_v14 = vadd.f32 %v10104_v18, %v2510_v61  ;;  %v11081_v62 = vpop.eup %11080  ;;  %v9612_v18 = vld [vmem:[#allocation3 + $0x18] sm:$0xff] }
 0x542   :  { %v2559_v21 = vmul.f32 0.8, %v11081_v62  ;;  %v9610_v62 = vld [vmem:[#allocation3 + $0x8] sm:$0xff] }
 0x543   :  { %11082 = vtanh.f32 %v2528_v14 }
 0x544   :  { %v2351_v20 = vpop.f32.mrf.mxu3  ;;  %v12038_v53 = vadd.f32 %v2591_v51, %v2559_v21 }
 0x545   :  { %v2695_v60 = vpack.c.bf16 %v2351_v20, %v2349_v4  ;;  %v9611_v4 = vld [vmem:[#allocation3 + $0x10] sm:$0xff] }
 0x547   :  { %v9591_v32 = vld [vmem:[#allocation3 + $0x30] sm:$0xff]  ;;  %2799 = vmatmul.bf16.gmra.mxu1 %v2695_v60  ;;  %v9609_v60 = vld [vmem:[#allocation3] sm:$0xff] }
 0x548   :  { %2944 = vmatmul.bf16.gmra.mxu2 %v9591_v32  ;;  %v9615_v29 = vld [vmem:[#allocation3 + $0x30] sm:$0xff] }
 0x549   :  { %v11083_v27 = vpop.eup %11082 }
 0x54a   :  { %v2560_v24 = vmul.f32 0.8, %v11083_v27 }
 0x54c   :  { %v12040_v11 = vadd.f32 %v2592_v48, %v2560_v24  ;;  %v2354_v0 = vpop.f32.mrf.mxu3 }
 0x54e   :  { %v10143_v22 = vpack.c.bf16 %v12040_v11, %v12038_v53 }
 0x550   :  { %10800 = vst [vmem:[#allocation3 + $0x38] sm:$0xff] %v10143_v22   ;;  %v3003_v22 = vmul.f32 0.2, %v11889_v47 }
 0x554   :  { %v2356_v34 = vpop.f32.mrf.mxu3 }
 0x555   :  { %v2696_v35 = vpack.c.bf16 %v2356_v34, %v2354_v0  ;;  %v3004_v34 = vmul.f32 0.2, %v11891_v55 }
 0x557   :  { %v9592_v31 = vld [vmem:[#allocation3 + $0x38] sm:$0xff]  ;;  %2804 = vmatmul.bf16.gmra.mxu1 %v2696_v35 }
 0x558   :  { %v9616_v1 = vld [vmem:[#allocation3 + $0x38] sm:$0xff]  ;;  %2949 = vmatmul.bf16.gmra.mxu2 %v9592_v31 }
 0x559   :  { %3147 = vmatpush.bf16.msrb.mxu3 %v9616_v1 }
 0x55d   :  { %3148 = vmatpush.bf16.msrb.mxu3 %v9615_v29 }
 0x561   :  { %3149 = vmatpush.bf16.msrb.mxu3 %v9614_v44 }
 0x564   :  { %v2770_v42 = vpop.f32.mrf.mxu1 }
 0x565   :  { %3150 = vmatpush.bf16.msrb.mxu3 %v9613_v52 }
 0x569   :  { %3151 = vmatpush.bf16.msrb.mxu3 %v9612_v18 }
 0x56b   :  { %v2915_v10 = vpop.f32.mrf.mxu2 }
 0x56c   :  { %v2772_v61 = vpop.f32.mrf.mxu1  ;;  %v2916_v14 = vadd.f32 %v2915_v10, %v2770_v42 }
 0x56d   :  { %3152 = vmatpush.bf16.msrb.mxu3 %v9611_v4  ;;  %v3005_v4 = vmul.f32 0.2, %v11900_v16 }
 0x56e   :  { %11084 = vtanh.f32 %v2916_v14  ;;  %v3006_v14 = vmul.f32 0.2, %v11902_v39 }
 0x571   :  { %3153 = vmatpush.bf16.msrb.mxu3 %v9610_v62 }
 0x573   :  { %v2917_v20 = vpop.f32.mrf.mxu2 }
 0x574   :  { %v2918_v32 = vadd.f32 %v2917_v20, %v2772_v61  ;;  %v2775_v21 = vpop.f32.mrf.mxu1  ;;  %v11085_v27 = vpop.eup %11084 }
 0x575   :  { %3154 = vmatpush.bf16.msrb.mxu3 %v9609_v60  ;;  %v2971_v51 = vmul.f32 0.8, %v11085_v27 }
 0x576   :  { %11086 = vtanh.f32 %v2918_v32 }
 0x577   :  { %v12047_v1 = vadd.f32 %v3003_v22, %v2971_v51  ;;  %v3007_v22 = vmul.f32 0.2, %v11911_v9 }
 0x578   :  { %3155 = vmatmul.bf16.vlgmr.msrb.gmra.mxu3 %v11886_v37 }
 0x57b   :  { %v2920_v24 = vpop.f32.mrf.mxu2 }
 0x57c   :  { %v11087_v48 = vpop.eup %11086  ;;  %v2777_v35 = vpop.f32.mrf.mxu1  ;;  %v2921_v31 = vadd.f32 %v2920_v24, %v2775_v21 }
 0x57d   :  { %v2972_v0 = vmul.f32 0.8, %v11087_v48 }
 0x57e   :  { %11088 = vtanh.f32 %v2921_v31 }
 0x57f   :  { %v12049_v29 = vadd.f32 %v3004_v34, %v2972_v0  ;;  %v3008_v34 = vmul.f32 0.2, %v11913_v25 }
 0x581   :  { %v10148_v44 = vpack.c.bf16 %v12049_v29, %v12047_v1 }
 0x583   :  { %10149 = vst [vmem:[#allocation3 + $0x40] sm:$0xff] %v10148_v44   ;;  %v2922_v37 = vpop.f32.mrf.mxu2 }
 0x584   :  { %v2923_v52 = vadd.f32 %v2922_v37, %v2777_v35  ;;  %v2780_v42 = vpop.f32.mrf.mxu1  ;;  %v11089_v18 = vpop.eup %11088 }
 0x585   :  { %v2973_v47 = vmul.f32 0.8, %v11089_v18 }
 0x586   :  { %11090 = vtanh.f32 %v2923_v52 }
 0x587   :  { %v12056_v60 = vadd.f32 %v3005_v4, %v2973_v47 }
 0x588   :  { %3160 = vmatmul.bf16.gmra.mxu3 %v11897_v58 }
 0x58b   :  { %v2925_v55 = vpop.f32.mrf.mxu2 }
 0x58c   :  { %v11091_v10 = vpop.eup %11090  ;;  %v2782_v62 = vpop.f32.mrf.mxu1  ;;  %v2926_v20 = vadd.f32 %v2925_v55, %v2780_v42 }
 0x58d   :  { %v2974_v61 = vmul.f32 0.8, %v11091_v10  ;;  %v3009_v10 = vmul.f32 0.2, %v11922_v3 }
 0x58e   :  { %11092 = vtanh.f32 %v2926_v20 }
 0x58f   :  { %v12058_v32 = vadd.f32 %v3006_v14, %v2974_v61  ;;  %v3010_v61 = vmul.f32 0.2, %v11924_v38 }
 0x591   :  { %v10153_v21 = vpack.c.bf16 %v12058_v32, %v12056_v60 }
 0x593   :  { %10801 = vst [vmem:[#allocation3 + $0x48] sm:$0xff] %v10153_v21   ;;  %v2927_v58 = vpop.f32.mrf.mxu2 }
 0x594   :  { %v2928_v27 = vadd.f32 %v2927_v58, %v2782_v62  ;;  %v2785_v51 = vpop.f32.mrf.mxu1  ;;  %v11093_v24 = vpop.eup %11092 }
 0x595   :  { %v2975_v16 = vmul.f32 0.8, %v11093_v24 }
 0x596   :  { %11094 = vtanh.f32 %v2928_v27 }
 0x597   :  { %v12065_v44 = vadd.f32 %v3007_v22, %v2975_v16  ;;  %v3012_v22 = vmul.f32 0.2, %v11935_v54  ;;  %v9631_v54 = vld [vmem:[#allocation9 + $0x30] sm:$0xff] }
 0x598   :  { %3165 = vmatmul.bf16.gmra.mxu3 %v11908_v36 }
 0x59b   :  { %v2930_v39 = vpop.f32.mrf.mxu2 }
 0x59c   :  { %v11095_v48 = vpop.eup %11094  ;;  %v2787_v35 = vpop.f32.mrf.mxu1  ;;  %v2931_v31 = vadd.f32 %v2930_v39, %v2785_v51  ;;  %v3011_v39 = vmul.f32 0.2, %v11933_v23 }
 0x59d   :  { %v2976_v0 = vmul.f32 0.8, %v11095_v48 }
 0x59e   :  { %11096 = vtanh.f32 %v2931_v31 }
 0x59f   :  { %v12067_v37 = vadd.f32 %v3008_v34, %v2976_v0 }
 0x5a1   :  { %v10158_v52 = vpack.c.bf16 %v12067_v37, %v12065_v44 }
 0x5a3   :  { %10802 = vst [vmem:[#allocation3 + $0x50] sm:$0xff] %v10158_v52   ;;  %v2932_v36 = vpop.f32.mrf.mxu2 }
 0x5a4   :  { %v2933_v42 = vadd.f32 %v2932_v36, %v2787_v35  ;;  %v2790_v18 = vpop.f32.mrf.mxu1  ;;  %v11097_v47 = vpop.eup %11096 }
 0x5a5   :  { %v2977_v9 = vmul.f32 0.8, %v11097_v47 }
 0x5a6   :  { %11098 = vtanh.f32 %v2933_v42 }
 0x5a7   :  { %v12074_v20 = vadd.f32 %v3009_v10, %v2977_v9 }
 0x5a8   :  { %3170 = vmatmul.bf16.gmra.mxu3 %v11919_v40 }
 0x5ab   :  { %v2935_v25 = vpop.f32.mrf.mxu2 }
 0x5ac   :  { %v11099_v55 = vpop.eup %11098  ;;  %v2792_v14 = vpop.f32.mrf.mxu1  ;;  %v2936_v62 = vadd.f32 %v2935_v25, %v2790_v18  ;;  %v9632_v18 = vld [vmem:[#allocation9 + $0x38] sm:$0xff] }
 0x5ad   :  { %v2978_v4 = vmul.f32 0.8, %v11099_v55  ;;  %3414 = vmatpush.bf16.msra.mxu1 %v9632_v18  ;;  %v3013_v55 = vmul.f32 0.2, %v11944_v15  ;;  %v9628_v15 = vld [vmem:[#allocation9 + $0x18] sm:$0xff]  ;;  %v9625_v18 = vld [vmem:[#allocation9] sm:$0xff] }
 0x5ae   :  { %11100 = vtanh.f32 %v2936_v62 }
 0x5af   :  { %v12076_v21 = vadd.f32 %v3010_v61, %v2978_v4  ;;  %v3014_v4 = vmul.f32 0.2, %v11946_v59  ;;  %v9630_v61 = vld [vmem:[#allocation9 + $0x28] sm:$0xff] }
 0x5b1   :  { %v10163_v58 = vpack.c.bf16 %v12076_v21, %v12074_v20  ;;  %3415 = vmatpush.bf16.msra.mxu1 %v9631_v54 }
 0x5b3   :  { %10803 = vst [vmem:[#allocation3 + $0x58] sm:$0xff] %v10163_v58   ;;  %v2937_v40 = vpop.f32.mrf.mxu2 }
 0x5b4   :  { %v2938_v27 = vadd.f32 %v2937_v40, %v2792_v14  ;;  %v2795_v51 = vpop.f32.mrf.mxu1  ;;  %v11101_v24 = vpop.eup %11100 }
 0x5b5   :  { %v2979_v3 = vmul.f32 0.8, %v11101_v24  ;;  %3416 = vmatpush.bf16.msra.mxu1 %v9630_v61 }
 0x5b6   :  { %11102 = vtanh.f32 %v2938_v27  ;;  %v9629_v27 = vld [vmem:[#allocation9 + $0x20] sm:$0xff] }
 0x5b7   :  { %v12083_v35 = vadd.f32 %v3011_v39, %v2979_v3 }
 0x5b8   :  { %3175 = vmatmul.bf16.gmra.mxu3 %v11930_v26 }
 0x5b9   :  { %3417 = vmatpush.bf16.msra.mxu1 %v9629_v27 }
 0x5bb   :  { %v2940_v38 = vpop.f32.mrf.mxu2 }
 0x5bc   :  { %v11103_v16 = vpop.eup %11102  ;;  %v2797_v0 = vpop.f32.mrf.mxu1  ;;  %v2941_v34 = vadd.f32 %v2940_v38, %v2795_v51  ;;  %v9627_v38 = vld [vmem:[#allocation9 + $0x10] sm:$0xff] }
 0x5bd   :  { %v2980_v48 = vmul.f32 0.8, %v11103_v16  ;;  %3418 = vmatpush.bf16.msra.mxu1 %v9628_v15 }
 0x5be   :  { %11104 = vtanh.f32 %v2941_v34 }
 0x5bf   :  { %v12085_v31 = vadd.f32 %v3012_v22, %v2980_v48  ;;  %v9626_v22 = vld [vmem:[#allocation9 + $0x8] sm:$0xff] }
 0x5c1   :  { %v10168_v52 = vpack.c.bf16 %v12085_v31, %v12083_v35  ;;  %3419 = vmatpush.bf16.msra.mxu1 %v9627_v38 }
 0x5c3   :  { %10804 = vst [vmem:[#allocation3 + $0x60] sm:$0xff] %v10168_v52   ;;  %v2942_v26 = vpop.f32.mrf.mxu2  ;;  %v3016_v52 = vmul.f32 0.2, %v11957_v8 }
 0x5c4   :  { %v2943_v36 = vadd.f32 %v2942_v26, %v2797_v0  ;;  %v2800_v42 = vpop.f32.mrf.mxu1  ;;  %v11105_v23 = vpop.eup %11104  ;;  %v3015_v0 = vmul.f32 0.2, %v11955_v5 }
 0x5c5   :  { %v2981_v47 = vmul.f32 0.8, %v11105_v23  ;;  %3420 = vmatpush.bf16.msra.mxu1 %v9626_v22  ;;  %v12116_v22 = vld [vmem:[#allocation7] sm:$0xff] }
 0x5c6   :  { %11106 = vtanh.f32 %v2943_v36 }
 0x5c7   :  { %v12092_v62 = vadd.f32 %v3013_v55, %v2981_v47 }
 0x5c8   :  { %3180 = vmatmul.bf16.gmra.mxu3 %v11941_v41 }
 0x5c9   :  { %3421 = vmatpush.bf16.msra.mxu1 %v9625_v18 }
 0x5cb   :  { %v2945_v9 = vpop.f32.mrf.mxu2 }
 0x5cc   :  { %v11107_v25 = vpop.eup %11106  ;;  %v2946_v14 = vadd.f32 %v2945_v9, %v2800_v42  ;;  %v2802_v40 = vpop.f32.mrf.mxu1 }
 0x5cd   :  { %v2982_v10 = vmul.f32 0.8, %v11107_v25  ;;  %v3017_v25 = vmul.f32 0.2, %v11966_v7  ;;  %v9621_v7 = vld [vmem:[#allocation3 + $0x60] sm:$0xff] }
 0x5ce   :  { %11108 = vtanh.f32 %v2946_v14 }
 0x5cf   :  { %v12094_v58 = vadd.f32 %v3014_v4, %v2982_v10  ;;  %v3018_v10 = vmul.f32 0.2, %v11968_v17  ;;  %v9620_v17 = vld [vmem:[#allocation3 + $0x58] sm:$0xff] }
 0x5d1   :  { %v10173_v41 = vpack.c.bf16 %v12094_v58, %v12092_v62 }
 0x5d3   :  { %10805 = vst [vmem:[#allocation3 + $0x68] sm:$0xff] %v10173_v41   ;;  %v2947_v51 = vpop.f32.mrf.mxu2 }
 0x5d4   :  { %v2948_v24 = vadd.f32 %v2947_v51, %v2802_v40  ;;  %v11109_v59 = vpop.eup %11108  ;;  %v2805_v3 = vpop.f32.mrf.mxu1 }
 0x5d5   :  { %v2983_v16 = vmul.f32 0.8, %v11109_v59  ;;  %v9619_v59 = vld [vmem:[#allocation3 + $0x50] sm:$0xff] }
 0x5d6   :  { %11110 = vtanh.f32 %v2948_v24 }
 0x5d7   :  { %v12101_v36 = vadd.f32 %v3015_v0, %v2983_v16 }
 0x5d8   :  { %3185 = vmatmul.bf16.gmra.mxu3 %v11952_v19 }
 0x5db   :  { %v2950_v39 = vpop.f32.mrf.mxu2 }
 0x5dc   :  { %v11111_v48 = vpop.eup %11110  ;;  %v2951_v26 = vadd.f32 %v2950_v39, %v2805_v3  ;;  %v2807_v23 = vpop.f32.mrf.mxu1  ;;  %v9618_v3 = vld [vmem:[#allocation3 + $0x48] sm:$0xff]  ;;  %v9617_v39 = vld [vmem:[#allocation3 + $0x40] sm:$0xff] }
 0x5dd   :  { %v2984_v34 = vmul.f32 0.8, %v11111_v48 }
 0x5de   :  { %11112 = vtanh.f32 %v2951_v26  ;;  %v12119_v26 = vld [vmem:[#allocation7 + $0x8] sm:$0xff] }
 0x5df   :  { %v12103_v42 = vadd.f32 %v3016_v52, %v2984_v34 }
 0x5e1   :  { %v10178_v19 = vpack.c.bf16 %v12103_v42, %v12101_v36 }
 0x5e3   :  { %10806 = vst [vmem:[#allocation3 + $0x70] sm:$0xff] %v10178_v19   ;;  %v2952_v54 = vpop.f32.mrf.mxu2 }
 0x5e4   :  { %v2953_v47 = vadd.f32 %v2952_v54, %v2807_v23  ;;  %v11113_v5 = vpop.eup %11112  ;;  %v12122_v54 = vld [vmem:[#allocation7 + $0x10] sm:$0xff] }
 0x5e5   :  { %v2985_v8 = vmul.f32 0.8, %v11113_v5 }
 0x5e6   :  { %11114 = vtanh.f32 %v2953_v47 }
 0x5e7   :  { %v12110_v4 = vadd.f32 %v3017_v25, %v2985_v8 }
 0x5e8   :  { %3190 = vmatmul.bf16.gmra.mxu3 %v11963_v28  ;;  %v9622_v28 = vld [vmem:[#allocation3 + $0x68] sm:$0xff] }
 0x5ea   :  { %v9623_v27 = vld [vmem:[#allocation3 + $0x70] sm:$0xff] }
 0x5ec   :  { %v11115_v9 = vpop.eup %11114 }
 0x5ed   :  { %v2986_v55 = vmul.f32 0.8, %v11115_v9  ;;  %v12125_v9 = vld [vmem:[#allocation7 + $0x18] sm:$0xff] }
 0x5ef   :  { %v12112_v61 = vadd.f32 %v3018_v10, %v2986_v55 }
 0x5f1   :  { %v10183_v14 = vpack.c.bf16 %v12112_v61, %v12110_v4 }
 0x5f3   :  { %10807 = vst [vmem:[#allocation3 + $0x78] sm:$0xff] %v10183_v14   ;;  %v12128_v14 = vld [vmem:[#allocation7 + $0x20] sm:$0xff] }
 0x5fa   :  { %v9624_v40 = vld [vmem:[#allocation3 + $0x78] sm:$0xff] }
 0x5fb   :  { %v3156_v41 = vpop.f32.mrf.mxu3  ;;  %3260 = vmatpush.bf16.msra.mxu0 %v9624_v40 }
 0x5ff   :  { %3261 = vmatpush.bf16.msra.mxu0 %v9623_v27  ;;  %v9648_v27 = vld [vmem:[#allocation10 + $0x38] sm:$0xff] }
 0x600   :  { %3856 = vmatpush.bf16.msra.mxu3 %v9648_v27  ;;  %v12137_v27 = vld [vmem:[#allocation7 + $0x38] sm:$0xff] }
 0x603   :  { %v3158_v51 = vpop.f32.mrf.mxu3  ;;  %3262 = vmatpush.bf16.msra.mxu0 %v9622_v28 }
 0x604   :  { %v3342_v15 = vpack.c.bf16 %v3158_v51, %v3156_v41  ;;  %v9656_v41 = vld [vmem:[#allocation12 + $0x38] sm:$0xff]  ;;  %v9655_v51 = vld [vmem:[#allocation12 + $0x30] sm:$0xff] }
 0x605   :  { %3711 = vmatpush.bf16.msra.mxu2 %v9656_v41 }
 0x606   :  { %3422 = vmatmul.bf16.vlgmr.msra.gmra.mxu1 %v3342_v15  ;;  %v9647_v15 = vld [vmem:[#allocation10 + $0x30] sm:$0xff] }
 0x607   :  { %3263 = vmatpush.bf16.msra.mxu0 %v9621_v7  ;;  %3857 = vmatpush.bf16.msra.mxu3 %v9647_v15 }
 0x609   :  { %3712 = vmatpush.bf16.msra.mxu2 %v9655_v51  ;;  %v10808_v51 = vld [vmem:[#allocation4 + $0xc8] sm:$0xff]  }
 0x60b   :  { %v3161_v24 = vpop.f32.mrf.mxu3  ;;  %3264 = vmatpush.bf16.msra.mxu0 %v9620_v17  ;;  %v12131_v17 = vld [vmem:[#allocation7 + $0x28] sm:$0xff] }
 0x60f   :  { %3265 = vmatpush.bf16.msra.mxu0 %v9619_v59  ;;  %v9646_v59 = vld [vmem:[#allocation10 + $0x28] sm:$0xff] }
 0x610   :  { %3858 = vmatpush.bf16.msra.mxu3 %v9646_v59 }
 0x613   :  { %v3163_v38 = vpop.f32.mrf.mxu3  ;;  %3266 = vmatpush.bf16.msra.mxu0 %v9618_v3  ;;  %v9653_v3 = vld [vmem:[#allocation12 + $0x20] sm:$0xff] }
 0x614   :  { %v3343_v16 = vpack.c.bf16 %v3163_v38, %v3161_v24  ;;  %v9654_v24 = vld [vmem:[#allocation12 + $0x28] sm:$0xff]  ;;  %v9645_v38 = vld [vmem:[#allocation10 + $0x20] sm:$0xff] }
 0x615   :  { %3713 = vmatpush.bf16.msra.mxu2 %v9654_v24  ;;  %3859 = vmatpush.bf16.msra.mxu3 %v9645_v38  ;;  %v3527_v38 = vmul.f32 0.2, %v11982_v63 }
 0x616   :  { %3427 = vmatmul.bf16.gmra.mxu1 %v3343_v16 }
 0x617   :  { %3267 = vmatpush.bf16.msra.mxu0 %v9617_v39  ;;  %v9652_v39 = vld [vmem:[#allocation12 + $0x18] sm:$0xff] }
 0x619   :  { %3714 = vmatpush.bf16.msra.mxu2 %v9653_v3 }
 0x61a   :  { %3268 = vmatmul.bf16.vlgmr.msra.gmra.mxu0 %v12116_v22 }
 0x61b   :  { %v3166_v48 = vpop.f32.mrf.mxu3 }
 0x61d   :  { %3715 = vmatpush.bf16.msra.mxu2 %v9652_v39  ;;  %v3528_v39 = vmul.f32 0.2, %v11984_v6 }
 0x623   :  { %v3168_v0 = vpop.f32.mrf.mxu3 }
 0x624   :  { %v3344_v34 = vpack.c.bf16 %v3168_v0, %v3166_v48  ;;  %v9644_v48 = vld [vmem:[#allocation10 + $0x18] sm:$0xff] }
 0x625   :  { %3860 = vmatpush.bf16.msra.mxu3 %v9644_v48 }
 0x626   :  { %3432 = vmatmul.bf16.gmra.mxu1 %v3344_v34  ;;  %v9651_v34 = vld [vmem:[#allocation12 + $0x10] sm:$0xff] }
 0x627   :  { %3716 = vmatpush.bf16.msra.mxu2 %v9651_v34 }
 0x62a   :  { %3273 = vmatmul.bf16.gmra.mxu0 %v12119_v26 }
 0x62b   :  { %v3171_v52 = vpop.f32.mrf.mxu3 }
 0x633   :  { %v3173_v19 = vpop.f32.mrf.mxu3 }
 0x634   :  { %v3345_v18 = vpack.c.bf16 %v3173_v19, %v3171_v52  ;;  %v9643_v52 = vld [vmem:[#allocation10 + $0x10] sm:$0xff] }
 0x635   :  { %3861 = vmatpush.bf16.msra.mxu3 %v9643_v52  ;;  %v12134_v19 = vld [vmem:[#allocation7 + $0x30] sm:$0xff] }
 0x636   :  { %3437 = vmatmul.bf16.gmra.mxu1 %v3345_v18  ;;  %v9650_v18 = vld [vmem:[#allocation12 + $0x8] sm:$0xff] }
 0x637   :  { %3717 = vmatpush.bf16.msra.mxu2 %v9650_v18  ;;  %v10192_v18 = vunpack.c.h.bf16 %v10808_v51 }
 0x63a   :  { %3278 = vmatmul.bf16.gmra.mxu0 %v12122_v54 }
 0x63b   :  { %v3176_v23 = vpop.f32.mrf.mxu3 }
 0x643   :  { %v3178_v47 = vpop.f32.mrf.mxu3 }
 0x644   :  { %v3346_v5 = vpack.c.bf16 %v3178_v47, %v3176_v23  ;;  %v9642_v23 = vld [vmem:[#allocation10 + $0x8] sm:$0xff]  ;;  %v10186_v47 = vld [vmem:[#allocation4 + $0xc0] sm:$0xff]  }
 0x645   :  { %3862 = vmatpush.bf16.msra.mxu3 %v9642_v23 }
 0x646   :  { %3442 = vmatmul.bf16.gmra.mxu1 %v3346_v5  ;;  %v9649_v5 = vld [vmem:[#allocation12] sm:$0xff] }
 0x647   :  { %3718 = vmatpush.bf16.msra.mxu2 %v9649_v5 }
 0x64a   :  { %3283 = vmatmul.bf16.gmra.mxu0 %v12125_v9 }
 0x64b   :  { %v3181_v8 = vpop.f32.mrf.mxu3 }
 0x653   :  { %v3183_v25 = vpop.f32.mrf.mxu3 }
 0x654   :  { %v3347_v55 = vpack.c.bf16 %v3183_v25, %v3181_v8  ;;  %v9641_v8 = vld [vmem:[#allocation10] sm:$0xff]  ;;  %v10187_v25 = vunpack.c.l.bf16 %v10186_v47 }
 0x655   :  { %3863 = vmatpush.bf16.msra.mxu3 %v9641_v8  ;;  %v10809_v8 = vld [vmem:[#allocation4 + $0xd0] sm:$0xff]  }
 0x656   :  { %3447 = vmatmul.bf16.gmra.mxu1 %v3347_v55  ;;  %v10195_v6 = vunpack.c.l.bf16 %v10809_v8 }
 0x65a   :  { %3288 = vmatmul.bf16.gmra.mxu0 %v12128_v14 }
 0x65b   :  { %v3186_v10 = vpop.f32.mrf.mxu3 }
 0x663   :  { %v3188_v40 = vpop.f32.mrf.mxu3 }
 0x664   :  { %v3348_v28 = vpack.c.bf16 %v3188_v40, %v3186_v10  ;;  %v10188_v40 = vunpack.c.h.bf16 %v10186_v47 }
 0x666   :  { %3452 = vmatmul.bf16.gmra.mxu1 %v3348_v28 }
 0x66a   :  { %3293 = vmatmul.bf16.gmra.mxu0 %v12131_v17 }
 0x66b   :  { %v3191_v7 = vpop.f32.mrf.mxu3 }
 0x673   :  { %v3193_v16 = vpop.f32.mrf.mxu3 }
 0x674   :  { %v3349_v0 = vpack.c.bf16 %v3193_v16, %v3191_v7  ;;  %v10191_v7 = vunpack.c.l.bf16 %v10808_v51  ;;  %v3529_v51 = vmul.f32 0.2, %v11990_v56 }
 0x676   :  { %3457 = vmatmul.bf16.gmra.mxu1 %v3349_v0 }
 0x67a   :  { %3298 = vmatmul.bf16.gmra.mxu0 %v12134_v19 }
 0x683   :  { %v3423_v55 = vpop.f32.mrf.mxu1 }
 0x684   :  { %v3463_v10 = vadd.f32 %v10187_v25, %v3423_v55 }
 0x686   :  { %11116 = vtanh.f32 %v3463_v10 }
 0x68a   :  { %3303 = vmatmul.bf16.gmra.mxu0 %v12137_v27 }
 0x68b   :  { %v3425_v41 = vpop.f32.mrf.mxu1 }
 0x68c   :  { %v3464_v28 = vadd.f32 %v10188_v40, %v3425_v41  ;;  %v11117_v15 = vpop.eup %11116 }
 0x68d   :  { %v3495_v24 = vmul.f32 0.8, %v11117_v15 }
 0x68e   :  { %11118 = vtanh.f32 %v3464_v28 }
 0x68f   :  { %v12142_v0 = vadd.f32 %v3527_v38, %v3495_v24 }
 0x693   :  { %v3428_v59 = vpop.f32.mrf.mxu1 }
 0x694   :  { %v11119_v3 = vpop.eup %11118  ;;  %v3465_v48 = vadd.f32 %v10191_v7, %v3428_v59  ;;  %v3530_v7 = vmul.f32 0.2, %v11992_v57 }
 0x695   :  { %v3496_v16 = vmul.f32 0.8, %v11119_v3 }
 0x696   :  { %11120 = vtanh.f32 %v3465_v48 }
 0x697   :  { %v12144_v34 = vadd.f32 %v3528_v39, %v3496_v16  ;;  %v3269_v52 = vpop.f32.mrf.mxu0  ;;  %v10196_v16 = vunpack.c.h.bf16 %v10809_v8  ;;  %v3531_v8 = vmul.f32 0.2, %v11998_v50 }
 0x699   :  { %v10220_v23 = vpack.c.bf16 %v12144_v34, %v12142_v0 }
 0x69b   :  { %10221 = vst [vmem:[#allocation3] sm:$0xff] %v10220_v23   ;;  %v3430_v47 = vpop.f32.mrf.mxu1 }
 0x69c   :  { %v3466_v5 = vadd.f32 %v10192_v18, %v3430_v47  ;;  %v11121_v63 = vpop.eup %11120  ;;  %v10810_v18 = vld [vmem:[#allocation4 + $0xd8] sm:$0xff]  }
 0x69d   :  { %v3497_v40 = vmul.f32 0.8, %v11121_v63  ;;  %v10199_v57 = vunpack.c.l.bf16 %v10810_v18 }
 0x69e   :  { %11122 = vtanh.f32 %v3466_v5 }
 0x69f   :  { %v3271_v25 = vpop.f32.mrf.mxu0  ;;  %v12150_v59 = vadd.f32 %v3529_v51, %v3497_v40 }
 0x6a0   :  { %v3639_v55 = vpack.c.bf16 %v3271_v25, %v3269_v52 }
 0x6a2   :  { %v9633_v10 = vld [vmem:[#allocation3] sm:$0xff]  ;;  %3719 = vmatmul.bf16.vlgmr.msra.gmra.mxu2 %v3639_v55 }
 0x6a3   :  { %v3433_v41 = vpop.f32.mrf.mxu1  ;;  %3864 = vmatmul.bf16.vlgmr.msra.gmra.mxu3 %v9633_v10  ;;  %v3532_v10 = vmul.f32 0.2, %v12000_v30 }
 0x6a4   :  { %v11123_v28 = vpop.eup %11122  ;;  %v3467_v24 = vadd.f32 %v10195_v6, %v3433_v41 }
 0x6a5   :  { %v3498_v15 = vmul.f32 0.8, %v11123_v28 }
 0x6a6   :  { %11124 = vtanh.f32 %v3467_v24 }
 0x6a7   :  { %v12152_v3 = vadd.f32 %v3530_v7, %v3498_v15  ;;  %v3274_v38 = vpop.f32.mrf.mxu0  ;;  %v10200_v15 = vunpack.c.h.bf16 %v10810_v18  ;;  %v3533_v18 = vmul.f32 0.2, %v12006_v49 }
 0x6a9   :  { %v10225_v39 = vpack.c.bf16 %v12152_v3, %v12150_v59 }
 0x6ab   :  { %10815 = vst [vmem:[#allocation3 + $0x8] sm:$0xff] %v10225_v39   ;;  %v3435_v48 = vpop.f32.mrf.mxu1 }
 0x6ac   :  { %v3468_v52 = vadd.f32 %v10196_v16, %v3435_v48  ;;  %v11125_v56 = vpop.eup %11124  ;;  %v10811_v16 = vld [vmem:[#allocation4 + $0xe0] sm:$0xff]  }
 0x6ad   :  { %v3499_v63 = vmul.f32 0.8, %v11125_v56  ;;  %v10203_v30 = vunpack.c.l.bf16 %v10811_v16 }
 0x6ae   :  { %11126 = vtanh.f32 %v3468_v52 }
 0x6af   :  { %v3276_v23 = vpop.f32.mrf.mxu0  ;;  %v12158_v41 = vadd.f32 %v3531_v8, %v3499_v63 }
 0x6b0   :  { %v3640_v47 = vpack.c.bf16 %v3276_v23, %v3274_v38 }
 0x6b2   :  { %v9634_v5 = vld [vmem:[#allocation3 + $0x8] sm:$0xff]  ;;  %3724 = vmatmul.bf16.gmra.mxu2 %v3640_v47 }
 0x6b3   :  { %v3438_v25 = vpop.f32.mrf.mxu1  ;;  %3869 = vmatmul.bf16.gmra.mxu3 %v9634_v5  ;;  %v3534_v5 = vmul.f32 0.2, %v12008_v33 }
 0x6b4   :  { %v11127_v55 = vpop.eup %11126  ;;  %v3469_v40 = vadd.f32 %v10199_v57, %v3438_v25 }
 0x6b5   :  { %v3500_v6 = vmul.f32 0.8, %v11127_v55 }
 0x6b6   :  { %11128 = vtanh.f32 %v3469_v40 }
 0x6b7   :  { %v12160_v28 = vadd.f32 %v3532_v10, %v3500_v6  ;;  %v3279_v51 = vpop.f32.mrf.mxu0  ;;  %v10204_v6 = vunpack.c.h.bf16 %v10811_v16  ;;  %v3535_v16 = vmul.f32 0.2, %v12014_v43 }
 0x6b9   :  { %v10230_v7 = vpack.c.bf16 %v12160_v28, %v12158_v41 }
 0x6bb   :  { %10816 = vst [vmem:[#allocation3 + $0x10] sm:$0xff] %v10230_v7   ;;  %v3440_v24 = vpop.f32.mrf.mxu1 }
 0x6bc   :  { %v3470_v38 = vadd.f32 %v10200_v15, %v3440_v24  ;;  %v11129_v50 = vpop.eup %11128  ;;  %v10812_v15 = vld [vmem:[#allocation4 + $0xe8] sm:$0xff]  }
 0x6bd   :  { %v3501_v56 = vmul.f32 0.8, %v11129_v50  ;;  %v10207_v33 = vunpack.c.l.bf16 %v10812_v15 }
 0x6be   :  { %11130 = vtanh.f32 %v3470_v38 }
 0x6bf   :  { %v3281_v39 = vpop.f32.mrf.mxu0  ;;  %v12166_v25 = vadd.f32 %v3533_v18, %v3501_v56 }
 0x6c0   :  { %v3641_v48 = vpack.c.bf16 %v3281_v39, %v3279_v51 }
 0x6c2   :  { %v9635_v52 = vld [vmem:[#allocation3 + $0x10] sm:$0xff]  ;;  %3729 = vmatmul.bf16.gmra.mxu2 %v3641_v48 }
 0x6c3   :  { %v3443_v23 = vpop.f32.mrf.mxu1  ;;  %3874 = vmatmul.bf16.gmra.mxu3 %v9635_v52  ;;  %v3536_v52 = vmul.f32 0.2, %v12016_v46 }
 0x6c4   :  { %v11131_v47 = vpop.eup %11130  ;;  %v3471_v63 = vadd.f32 %v10203_v30, %v3443_v23 }
 0x6c5   :  { %v3502_v57 = vmul.f32 0.8, %v11131_v47 }
 0x6c6   :  { %11132 = vtanh.f32 %v3471_v63 }
 0x6c7   :  { %v12168_v55 = vadd.f32 %v3534_v5, %v3502_v57  ;;  %v3284_v8 = vpop.f32.mrf.mxu0  ;;  %v10208_v57 = vunpack.c.h.bf16 %v10812_v15  ;;  %v3537_v15 = vmul.f32 0.2, %v12022_v2 }
 0x6c9   :  { %v10235_v10 = vpack.c.bf16 %v12168_v55, %v12166_v25 }
 0x6cb   :  { %10817 = vst [vmem:[#allocation3 + $0x18] sm:$0xff] %v10235_v10   ;;  %v3445_v40 = vpop.f32.mrf.mxu1 }
 0x6cc   :  { %v3472_v51 = vadd.f32 %v10204_v6, %v3445_v40  ;;  %v11133_v49 = vpop.eup %11132  ;;  %v10813_v6 = vld [vmem:[#allocation4 + $0xf0] sm:$0xff]  }
 0x6cd   :  { %v3503_v50 = vmul.f32 0.8, %v11133_v49  ;;  %v10211_v46 = vunpack.c.l.bf16 %v10813_v6 }
 0x6ce   :  { %11134 = vtanh.f32 %v3472_v51 }
 0x6cf   :  { %v3286_v7 = vpop.f32.mrf.mxu0  ;;  %v12174_v23 = vadd.f32 %v3535_v16, %v3503_v50 }
 0x6d0   :  { %v3642_v24 = vpack.c.bf16 %v3286_v7, %v3284_v8 }
 0x6d2   :  { %v9636_v38 = vld [vmem:[#allocation3 + $0x18] sm:$0xff]  ;;  %3734 = vmatmul.bf16.gmra.mxu2 %v3642_v24 }
 0x6d3   :  { %v3448_v39 = vpop.f32.mrf.mxu1  ;;  %3879 = vmatmul.bf16.gmra.mxu3 %v9636_v38  ;;  %v3538_v38 = vmul.f32 0.2, %v12024_v13 }
 0x6d4   :  { %v11135_v48 = vpop.eup %11134  ;;  %v3473_v56 = vadd.f32 %v10207_v33, %v3448_v39 }
 0x6d5   :  { %v3504_v30 = vmul.f32 0.8, %v11135_v48 }
 0x6d6   :  { %11136 = vtanh.f32 %v3473_v56 }
 0x6d7   :  { %v12176_v47 = vadd.f32 %v3536_v52, %v3504_v30  ;;  %v3289_v18 = vpop.f32.mrf.mxu0  ;;  %v10212_v30 = vunpack.c.h.bf16 %v10813_v6  ;;  %v3539_v6 = vmul.f32 0.2, %v12030_v45 }
 0x6d9   :  { %v10240_v5 = vpack.c.bf16 %v12176_v47, %v12174_v23 }
 0x6db   :  { %10818 = vst [vmem:[#allocation3 + $0x20] sm:$0xff] %v10240_v5   ;;  %v3450_v63 = vpop.f32.mrf.mxu1 }
 0x6dc   :  { %v3474_v8 = vadd.f32 %v10208_v57, %v3450_v63  ;;  %v11137_v43 = vpop.eup %11136  ;;  %v10814_v57 = vld [vmem:[#allocation4 + $0xf8] sm:$0xff]  }
 0x6dd   :  { %v3505_v49 = vmul.f32 0.8, %v11137_v43  ;;  %v10215_v13 = vunpack.c.l.bf16 %v10814_v57 }
 0x6de   :  { %11138 = vtanh.f32 %v3474_v8 }
 0x6df   :  { %v3291_v10 = vpop.f32.mrf.mxu0  ;;  %v12182_v39 = vadd.f32 %v3537_v15, %v3505_v49 }
 0x6e0   :  { %v3643_v40 = vpack.c.bf16 %v3291_v10, %v3289_v18 }
 0x6e2   :  { %v9637_v51 = vld [vmem:[#allocation3 + $0x20] sm:$0xff]  ;;  %3739 = vmatmul.bf16.gmra.mxu2 %v3643_v40 }
 0x6e3   :  { %v3453_v7 = vpop.f32.mrf.mxu1  ;;  %3884 = vmatmul.bf16.gmra.mxu3 %v9637_v51  ;;  %v3540_v51 = vmul.f32 0.2, %v12032_v12 }
 0x6e4   :  { %v11139_v24 = vpop.eup %11138  ;;  %v3475_v50 = vadd.f32 %v10211_v46, %v3453_v7 }
 0x6e5   :  { %v3506_v33 = vmul.f32 0.8, %v11139_v24 }
 0x6e6   :  { %11140 = vtanh.f32 %v3475_v50 }
 0x6e7   :  { %v12184_v48 = vadd.f32 %v3538_v38, %v3506_v33  ;;  %v3294_v16 = vpop.f32.mrf.mxu0  ;;  %v10216_v33 = vunpack.c.h.bf16 %v10814_v57  ;;  %v3542_v57 = vmul.f32 0.2, %v12040_v11  ;;  %v9661_v11 = vld [vmem:[#allocation3 + $0x20] sm:$0xff] }
 0x6e9   :  { %v10245_v52 = vpack.c.bf16 %v12184_v48, %v12182_v39 }
 0x6eb   :  { %10819 = vst [vmem:[#allocation3 + $0x28] sm:$0xff] %v10245_v52   ;;  %v3455_v56 = vpop.f32.mrf.mxu1 }
 0x6ec   :  { %v3476_v18 = vadd.f32 %v10212_v30, %v3455_v56  ;;  %v11141_v2 = vpop.eup %11140 }
 0x6ed   :  { %v3507_v43 = vmul.f32 0.8, %v11141_v2  ;;  %v3541_v2 = vmul.f32 0.2, %v12038_v53 }
 0x6ee   :  { %11142 = vtanh.f32 %v3476_v18 }
 0x6ef   :  { %v3296_v5 = vpop.f32.mrf.mxu0  ;;  %v12190_v7 = vadd.f32 %v3539_v6, %v3507_v43 }
 0x6f0   :  { %v3644_v63 = vpack.c.bf16 %v3296_v5, %v3294_v16 }
 0x6f2   :  { %v9638_v8 = vld [vmem:[#allocation3 + $0x28] sm:$0xff]  ;;  %3744 = vmatmul.bf16.gmra.mxu2 %v3644_v63 }
 0x6f3   :  { %v3458_v10 = vpop.f32.mrf.mxu1  ;;  %3889 = vmatmul.bf16.gmra.mxu3 %v9638_v8 }
 0x6f4   :  { %v11143_v40 = vpop.eup %11142  ;;  %v3477_v49 = vadd.f32 %v10215_v13, %v3458_v10 }
 0x6f5   :  { %v3508_v46 = vmul.f32 0.8, %v11143_v40 }
 0x6f6   :  { %11144 = vtanh.f32 %v3477_v49  ;;  %v9660_v49 = vld [vmem:[#allocation3 + $0x18] sm:$0xff] }
 0x6f7   :  { %v12192_v24 = vadd.f32 %v3540_v51, %v3508_v46  ;;  %v3299_v15 = vpop.f32.mrf.mxu0  ;;  %v9662_v51 = vld [vmem:[#allocation3 + $0x28] sm:$0xff] }
 0x6f9   :  { %v10250_v38 = vpack.c.bf16 %v12192_v24, %v12190_v7 }
 0x6fb   :  { %10820 = vst [vmem:[#allocation3 + $0x30] sm:$0xff] %v10250_v38   ;;  %v3460_v50 = vpop.f32.mrf.mxu1 }
 0x6fc   :  { %v3478_v16 = vadd.f32 %v10216_v33, %v3460_v50  ;;  %v11145_v30 = vpop.eup %11144  ;;  %v9659_v33 = vld [vmem:[#allocation3 + $0x10] sm:$0xff] }
 0x6fd   :  { %v3509_v12 = vmul.f32 0.8, %v11145_v30 }
 0x6fe   :  { %11146 = vtanh.f32 %v3478_v16  ;;  %v9658_v16 = vld [vmem:[#allocation3 + $0x8] sm:$0xff] }
 0x6ff   :  { %v3301_v45 = vpop.f32.mrf.mxu0  ;;  %v12198_v63 = vadd.f32 %v3541_v2, %v3509_v12 }
 0x700   :  { %v3645_v52 = vpack.c.bf16 %v3301_v45, %v3299_v15  ;;  %v9657_v45 = vld [vmem:[#allocation3] sm:$0xff] }
 0x702   :  { %v9639_v56 = vld [vmem:[#allocation3 + $0x30] sm:$0xff]  ;;  %3749 = vmatmul.bf16.gmra.mxu2 %v3645_v52 }
 0x703   :  { %3894 = vmatmul.bf16.gmra.mxu3 %v9639_v56  ;;  %v9663_v53 = vld [vmem:[#allocation3 + $0x30] sm:$0xff] }
 0x704   :  { %v11147_v18 = vpop.eup %11146 }
 0x705   :  { %v3510_v5 = vmul.f32 0.8, %v11147_v18 }
 0x707   :  { %v12200_v13 = vadd.f32 %v3542_v57, %v3510_v5  ;;  %v3304_v8 = vpop.f32.mrf.mxu0 }
 0x709   :  { %v10255_v43 = vpack.c.bf16 %v12200_v13, %v12198_v63 }
 0x70b   :  { %10821 = vst [vmem:[#allocation3 + $0x38] sm:$0xff] %v10255_v43  }
 0x70f   :  { %v3306_v10 = vpop.f32.mrf.mxu0 }
 0x710   :  { %v3646_v40 = vpack.c.bf16 %v3306_v10, %v3304_v8  ;;  %v3953_v8 = vmul.f32 0.2, %v12047_v1  ;;  %v3954_v10 = vmul.f32 0.2, %v12049_v29 }
 0x712   :  { %v9640_v6 = vld [vmem:[#allocation3 + $0x38] sm:$0xff]  ;;  %3754 = vmatmul.bf16.gmra.mxu2 %v3646_v40 }
 0x713   :  { %v9664_v46 = vld [vmem:[#allocation3 + $0x38] sm:$0xff]  ;;  %3899 = vmatmul.bf16.gmra.mxu3 %v9640_v6 }
 0x714   :  { %4097 = vmatpush.bf16.msrb.mxu0 %v9664_v46 }
 0x718   :  { %4098 = vmatpush.bf16.msrb.mxu0 %v9663_v53 }
 0x71c   :  { %4099 = vmatpush.bf16.msrb.mxu0 %v9662_v51 }
 0x720   :  { %4100 = vmatpush.bf16.msrb.mxu0 %v9661_v11 }
 0x724   :  { %4101 = vmatpush.bf16.msrb.mxu0 %v9660_v49 }
 0x725   :  { %v3720_v15 = vpop.f32.mrf.mxu2 }
 0x726   :  { %v3865_v38 = vpop.f32.mrf.mxu3 }
 0x727   :  { %v3866_v50 = vadd.f32 %v3865_v38, %v3720_v15 }
 0x728   :  { %4102 = vmatpush.bf16.msrb.mxu0 %v9659_v33 }
 0x729   :  { %11148 = vtanh.f32 %v3866_v50  ;;  %v3955_v50 = vmul.f32 0.2, %v12056_v60 }
 0x72c   :  { %4103 = vmatpush.bf16.msrb.mxu0 %v9658_v16 }
 0x72d   :  { %v3722_v30 = vpop.f32.mrf.mxu2 }
 0x72e   :  { %v3867_v52 = vpop.f32.mrf.mxu3 }
 0x72f   :  { %v3868_v56 = vadd.f32 %v3867_v52, %v3722_v30  ;;  %v11149_v12 = vpop.eup %11148  ;;  %v3956_v30 = vmul.f32 0.2, %v12058_v32 }
 0x730   :  { %4104 = vmatpush.bf16.msrb.mxu0 %v9657_v45  ;;  %v3921_v2 = vmul.f32 0.8, %v11149_v12 }
 0x731   :  { %11150 = vtanh.f32 %v3868_v56 }
 0x732   :  { %v12207_v6 = vadd.f32 %v3953_v8, %v3921_v2 }
 0x733   :  { %4105 = vmatmul.bf16.vlgmr.msrb.gmra.mxu0 %v12116_v22 }
 0x735   :  { %v3725_v18 = vpop.f32.mrf.mxu2 }
 0x736   :  { %v3870_v5 = vpop.f32.mrf.mxu3 }
 0x737   :  { %v11151_v57 = vpop.eup %11150  ;;  %v3871_v40 = vadd.f32 %v3870_v5, %v3725_v18 }
 0x738   :  { %v3922_v43 = vmul.f32 0.8, %v11151_v57 }
 0x739   :  { %11152 = vtanh.f32 %v3871_v40 }
 0x73a   :  { %v12209_v46 = vadd.f32 %v3954_v10, %v3922_v43  ;;  %v3957_v10 = vmul.f32 0.2, %v12065_v44 }
 0x73c   :  { %v10260_v53 = vpack.c.bf16 %v12209_v46, %v12207_v6 }
 0x73d   :  { %v3727_v51 = vpop.f32.mrf.mxu2 }
 0x73e   :  { %10261 = vst [vmem:[#allocation3 + $0x40] sm:$0xff] %v10260_v53   ;;  %v3872_v11 = vpop.f32.mrf.mxu3  ;;  %v3958_v53 = vmul.f32 0.2, %v12067_v37 }
 0x73f   :  { %v3873_v49 = vadd.f32 %v3872_v11, %v3727_v51  ;;  %v11153_v1 = vpop.eup %11152 }
 0x740   :  { %v3923_v33 = vmul.f32 0.8, %v11153_v1 }
 0x741   :  { %11154 = vtanh.f32 %v3873_v49 }
 0x742   :  { %v12216_v52 = vadd.f32 %v3955_v50, %v3923_v33 }
 0x743   :  { %4110 = vmatmul.bf16.gmra.mxu0 %v12119_v26 }
 0x745   :  { %v3730_v15 = vpop.f32.mrf.mxu2 }
 0x746   :  { %v3875_v29 = vpop.f32.mrf.mxu3 }
 0x747   :  { %v11155_v38 = vpop.eup %11154  ;;  %v3876_v45 = vadd.f32 %v3875_v29, %v3730_v15 }
 0x748   :  { %v3924_v16 = vmul.f32 0.8, %v11155_v38 }
 0x749   :  { %11156 = vtanh.f32 %v3876_v45 }
 0x74a   :  { %v12218_v56 = vadd.f32 %v3956_v30, %v3924_v16  ;;  %v3959_v30 = vmul.f32 0.2, %v12074_v20 }
 0x74c   :  { %v10265_v12 = vpack.c.bf16 %v12218_v56, %v12216_v52 }
 0x74d   :  { %v3732_v18 = vpop.f32.mrf.mxu2 }
 0x74e   :  { %10822 = vst [vmem:[#allocation3 + $0x48] sm:$0xff] %v10265_v12   ;;  %v3877_v2 = vpop.f32.mrf.mxu3  ;;  %v3960_v12 = vmul.f32 0.2, %v12076_v21 }
 0x74f   :  { %v3878_v5 = vadd.f32 %v3877_v2, %v3732_v18  ;;  %v11157_v60 = vpop.eup %11156 }
 0x750   :  { %v3925_v8 = vmul.f32 0.8, %v11157_v60 }
 0x751   :  { %11158 = vtanh.f32 %v3878_v5 }
 0x752   :  { %v12225_v11 = vadd.f32 %v3957_v10, %v3925_v8 }
 0x753   :  { %4115 = vmatmul.bf16.gmra.mxu0 %v12122_v54 }
 0x755   :  { %v3735_v57 = vpop.f32.mrf.mxu2 }
 0x756   :  { %v3880_v32 = vpop.f32.mrf.mxu3 }
 0x757   :  { %v11159_v43 = vpop.eup %11158  ;;  %v3881_v51 = vadd.f32 %v3880_v32, %v3735_v57 }
 0x758   :  { %v3926_v40 = vmul.f32 0.8, %v11159_v43 }
 0x759   :  { %11160 = vtanh.f32 %v3881_v51 }
 0x75a   :  { %v12227_v49 = vadd.f32 %v3958_v53, %v3926_v40  ;;  %v3961_v53 = vmul.f32 0.2, %v12083_v35  ;;  %v9678_v35 = vld [vmem:[#allocation9 + $0x28] sm:$0xff] }
 0x75c   :  { %v10270_v1 = vpack.c.bf16 %v12227_v49, %v12225_v11 }
 0x75d   :  { %v3737_v15 = vpop.f32.mrf.mxu2 }
 0x75e   :  { %10823 = vst [vmem:[#allocation3 + $0x50] sm:$0xff] %v10270_v1   ;;  %v3882_v33 = vpop.f32.mrf.mxu3  ;;  %v3962_v1 = vmul.f32 0.2, %v12085_v31 }
 0x75f   :  { %v3883_v29 = vadd.f32 %v3882_v33, %v3737_v15  ;;  %v11161_v44 = vpop.eup %11160  ;;  %v9680_v33 = vld [vmem:[#allocation9 + $0x38] sm:$0xff] }
 0x760   :  { %v3927_v50 = vmul.f32 0.8, %v11161_v44  ;;  %4364 = vmatpush.bf16.msrb.mxu2 %v9680_v33 }
 0x761   :  { %11162 = vtanh.f32 %v3883_v29 }
 0x762   :  { %v12234_v2 = vadd.f32 %v3959_v30, %v3927_v50 }
 0x763   :  { %4120 = vmatmul.bf16.gmra.mxu0 %v12125_v9 }
 0x765   :  { %v3740_v38 = vpop.f32.mrf.mxu2 }
 0x766   :  { %v3885_v37 = vpop.f32.mrf.mxu3 }
 0x767   :  { %v11163_v16 = vpop.eup %11162  ;;  %v3886_v18 = vadd.f32 %v3885_v37, %v3740_v38  ;;  %v9679_v37 = vld [vmem:[#allocation9 + $0x30] sm:$0xff] }
 0x768   :  { %v3928_v45 = vmul.f32 0.8, %v11163_v16  ;;  %4365 = vmatpush.bf16.msrb.mxu2 %v9679_v37 }
 0x769   :  { %11164 = vtanh.f32 %v3886_v18 }
 0x76a   :  { %v12236_v5 = vadd.f32 %v3960_v12, %v3928_v45  ;;  %v9677_v12 = vld [vmem:[#allocation9 + $0x20] sm:$0xff] }
 0x76c   :  { %v10275_v60 = vpack.c.bf16 %v12236_v5, %v12234_v2  ;;  %4366 = vmatpush.bf16.msrb.mxu2 %v9678_v35  ;;  %v3965_v35 = vmul.f32 0.2, %v12101_v36 }
 0x76d   :  { %v3742_v57 = vpop.f32.mrf.mxu2 }
 0x76e   :  { %10824 = vst [vmem:[#allocation3 + $0x58] sm:$0xff] %v10275_v60   ;;  %v3887_v8 = vpop.f32.mrf.mxu3 }
 0x76f   :  { %v3888_v32 = vadd.f32 %v3887_v8, %v3742_v57  ;;  %v11165_v20 = vpop.eup %11164  ;;  %v3963_v8 = vmul.f32 0.2, %v12092_v62  ;;  %v9674_v62 = vld [vmem:[#allocation9 + $0x8] sm:$0xff] }
 0x770   :  { %v3929_v10 = vmul.f32 0.8, %v11165_v20  ;;  %4367 = vmatpush.bf16.msrb.mxu2 %v9677_v12  ;;  %v3964_v20 = vmul.f32 0.2, %v12094_v58 }
 0x771   :  { %11166 = vtanh.f32 %v3888_v32 }
 0x772   :  { %v12243_v29 = vadd.f32 %v3961_v53, %v3929_v10  ;;  %v9676_v10 = vld [vmem:[#allocation9 + $0x18] sm:$0xff] }
 0x773   :  { %4125 = vmatmul.bf16.gmra.mxu0 %v12128_v14 }
 0x774   :  { %4368 = vmatpush.bf16.msrb.mxu2 %v9676_v10 }
 0x775   :  { %v3745_v43 = vpop.f32.mrf.mxu2 }
 0x776   :  { %v3890_v21 = vpop.f32.mrf.mxu3 }
 0x777   :  { %v11167_v40 = vpop.eup %11166  ;;  %v3891_v15 = vadd.f32 %v3890_v21, %v3745_v43 }
 0x778   :  { %v3930_v51 = vmul.f32 0.8, %v11167_v40 }
 0x779   :  { %11168 = vtanh.f32 %v3891_v15 }
 0x77a   :  { %v12245_v44 = vadd.f32 %v3962_v1, %v3930_v51  ;;  %v9675_v1 = vld [vmem:[#allocation9 + $0x10] sm:$0xff] }
 0x77b   :  { %4369 = vmatpush.bf16.msrb.mxu2 %v9675_v1 }
 0x77c   :  { %v10280_v38 = vpack.c.bf16 %v12245_v44, %v12243_v29 }
 0x77d   :  { %v3747_v50 = vpop.f32.mrf.mxu2 }
 0x77e   :  { %10825 = vst [vmem:[#allocation3 + $0x60] sm:$0xff] %v10280_v38   ;;  %v3892_v16 = vpop.f32.mrf.mxu3 }
 0x77f   :  { %v3893_v30 = vadd.f32 %v3892_v16, %v3747_v50  ;;  %v11169_v31 = vpop.eup %11168  ;;  %4370 = vmatpush.bf16.msrb.mxu2 %v9674_v62  ;;  %v9673_v50 = vld [vmem:[#allocation9] sm:$0xff] }
 0x780   :  { %v3931_v18 = vmul.f32 0.8, %v11169_v31 }
 0x781   :  { %11170 = vtanh.f32 %v3893_v30 }
 0x782   :  { %v12252_v21 = vadd.f32 %v3963_v8, %v3931_v18 }
 0x783   :  { %4130 = vmatmul.bf16.gmra.mxu0 %v12131_v17  ;;  %4371 = vmatpush.bf16.msrb.mxu2 %v9673_v50 }
 0x785   :  { %v3750_v45 = vpop.f32.mrf.mxu2 }
 0x786   :  { %v3895_v60 = vpop.f32.mrf.mxu3 }
 0x787   :  { %v11171_v57 = vpop.eup %11170  ;;  %v3896_v43 = vadd.f32 %v3895_v60, %v3750_v45  ;;  %v3966_v45 = vmul.f32 0.2, %v12103_v42  ;;  %v3967_v42 = vmul.f32 0.2, %v12110_v4 }
 0x788   :  { %v3932_v32 = vmul.f32 0.8, %v11171_v57 }
 0x789   :  { %11172 = vtanh.f32 %v3896_v43 }
 0x78a   :  { %v12254_v40 = vadd.f32 %v3964_v20, %v3932_v32 }
 0x78c   :  { %v10285_v53 = vpack.c.bf16 %v12254_v40, %v12252_v21 }
 0x78d   :  { %v3752_v51 = vpop.f32.mrf.mxu2 }
 0x78e   :  { %10826 = vst [vmem:[#allocation3 + $0x68] sm:$0xff] %v10285_v53   ;;  %v3897_v15 = vpop.f32.mrf.mxu3 }
 0x78f   :  { %v3898_v33 = vadd.f32 %v3897_v15, %v3752_v51  ;;  %v11173_v58 = vpop.eup %11172  ;;  %v3968_v51 = vmul.f32 0.2, %v12112_v61  ;;  %v9669_v61 = vld [vmem:[#allocation3 + $0x60] sm:$0xff] }
 0x790   :  { %v3933_v37 = vmul.f32 0.8, %v11173_v58 }
 0x791   :  { %11174 = vtanh.f32 %v3898_v33 }
 0x792   :  { %v12261_v18 = vadd.f32 %v3965_v35, %v3933_v37 }
 0x793   :  { %4135 = vmatmul.bf16.gmra.mxu0 %v12134_v19 }
 0x795   :  { %v3755_v38 = vpop.f32.mrf.mxu2  ;;  %v9670_v4 = vld [vmem:[#allocation3 + $0x68] sm:$0xff] }
 0x796   :  { %v3900_v16 = vpop.f32.mrf.mxu3 }
 0x797   :  { %v11175_v30 = vpop.eup %11174  ;;  %v3901_v12 = vadd.f32 %v3900_v16, %v3755_v38 }
 0x798   :  { %v3934_v31 = vmul.f32 0.8, %v11175_v30  ;;  %v9668_v30 = vld [vmem:[#allocation3 + $0x58] sm:$0xff] }
 0x799   :  { %11176 = vtanh.f32 %v3901_v12  ;;  %v9666_v12 = vld [vmem:[#allocation3 + $0x48] sm:$0xff] }
 0x79a   :  { %v12263_v60 = vadd.f32 %v3966_v45, %v3934_v31  ;;  %v9667_v45 = vld [vmem:[#allocation3 + $0x50] sm:$0xff] }
 0x79c   :  { %v10290_v57 = vpack.c.bf16 %v12263_v60, %v12261_v18 }
 0x79d   :  { %v3757_v8 = vpop.f32.mrf.mxu2 }
 0x79e   :  { %10827 = vst [vmem:[#allocation3 + $0x70] sm:$0xff] %v10290_v57   ;;  %v3902_v32 = vpop.f32.mrf.mxu3 }
 0x79f   :  { %v3903_v20 = vadd.f32 %v3902_v32, %v3757_v8  ;;  %v11177_v36 = vpop.eup %11176  ;;  %v9665_v8 = vld [vmem:[#allocation3 + $0x40] sm:$0xff] }
 0x7a0   :  { %v3935_v43 = vmul.f32 0.8, %v11177_v36 }
 0x7a1   :  { %11178 = vtanh.f32 %v3903_v20 }
 0x7a2   :  { %v12270_v1 = vadd.f32 %v3967_v42, %v3935_v43 }
 0x7a3   :  { %4140 = vmatmul.bf16.gmra.mxu0 %v12137_v27 }
 0x7a5   :  { %v9671_v37 = vld [vmem:[#allocation3 + $0x70] sm:$0xff] }
 0x7a7   :  { %v11179_v10 = vpop.eup %11178 }
 0x7a8   :  { %v3936_v53 = vmul.f32 0.8, %v11179_v10 }
 0x7aa   :  { %v12272_v15 = vadd.f32 %v3968_v51, %v3936_v53 }
 0x7ac   :  { %v10295_v33 = vpack.c.bf16 %v12272_v15, %v12270_v1 }
 0x7ae   :  { %10828 = vst [vmem:[#allocation3 + $0x78] sm:$0xff] %v10295_v33  }
 0x7b0   :  { %v4106_v62 = vpop.f32.mrf.mxu0 }
 0x7b5   :  { %v9672_v58 = vld [vmem:[#allocation3 + $0x78] sm:$0xff] }
 0x7b6   :  { %4210 = vmatpush.bf16.msrb.mxu1 %v9672_v58 }
 0x7b8   :  { %v4108_v38 = vpop.f32.mrf.mxu0 }
 0x7b9   :  { %v4292_v50 = vpack.c.bf16 %v4108_v38, %v4106_v62 }
 0x7ba   :  { %4211 = vmatpush.bf16.msrb.mxu1 %v9671_v37  ;;  %v9696_v37 = vld [vmem:[#allocation10 + $0x38] sm:$0xff] }
 0x7bb   :  { %4372 = vmatmul.bf16.vlgmr.msrb.gmra.mxu2 %v4292_v50  ;;  %v9704_v50 = vld [vmem:[#allocation12 + $0x38] sm:$0xff]  ;;  %4806 = vmatpush.bf16.msra.mxu0 %v9696_v37  ;;  %v4477_v37 = vmul.f32 0.2, %v12142_v0 }
 0x7bc   :  { %4661 = vmatpush.bf16.msrb.mxu3 %v9704_v50 }
 0x7be   :  { %4212 = vmatpush.bf16.msrb.mxu1 %v9670_v4 }
 0x7c0   :  { %v4111_v16 = vpop.f32.mrf.mxu0 }
 0x7c2   :  { %4213 = vmatpush.bf16.msrb.mxu1 %v9669_v61  ;;  %v9702_v61 = vld [vmem:[#allocation12 + $0x28] sm:$0xff] }
 0x7c6   :  { %4214 = vmatpush.bf16.msrb.mxu1 %v9668_v30 }
 0x7c8   :  { %v4113_v35 = vpop.f32.mrf.mxu0 }
 0x7c9   :  { %v4293_v31 = vpack.c.bf16 %v4113_v35, %v4111_v16  ;;  %v9695_v16 = vld [vmem:[#allocation10 + $0x30] sm:$0xff]  ;;  %v9701_v35 = vld [vmem:[#allocation12 + $0x20] sm:$0xff] }
 0x7ca   :  { %4215 = vmatpush.bf16.msrb.mxu1 %v9667_v45  ;;  %4807 = vmatpush.bf16.msra.mxu0 %v9695_v16  ;;  %v9700_v45 = vld [vmem:[#allocation12 + $0x18] sm:$0xff] }
 0x7cb   :  { %4377 = vmatmul.bf16.gmra.mxu2 %v4293_v31  ;;  %v9693_v31 = vld [vmem:[#allocation10 + $0x20] sm:$0xff] }
 0x7ce   :  { %4216 = vmatpush.bf16.msrb.mxu1 %v9666_v12  ;;  %v9692_v12 = vld [vmem:[#allocation10 + $0x18] sm:$0xff] }
 0x7d0   :  { %v4116_v57 = vpop.f32.mrf.mxu0 }
 0x7d2   :  { %4217 = vmatpush.bf16.msrb.mxu1 %v9665_v8  ;;  %v9691_v8 = vld [vmem:[#allocation10 + $0x10] sm:$0xff] }
 0x7d5   :  { %4218 = vmatmul.bf16.vlgmr.msrb.gmra.mxu1 %v12116_v22 }
 0x7d8   :  { %v4118_v32 = vpop.f32.mrf.mxu0 }
 0x7d9   :  { %v4294_v20 = vpack.c.bf16 %v4118_v32, %v4116_v57  ;;  %v9699_v57 = vld [vmem:[#allocation12 + $0x10] sm:$0xff]  ;;  %v9698_v32 = vld [vmem:[#allocation12 + $0x8] sm:$0xff] }
 0x7db   :  { %4382 = vmatmul.bf16.gmra.mxu2 %v4294_v20  ;;  %v9690_v20 = vld [vmem:[#allocation10 + $0x8] sm:$0xff] }
 0x7e0   :  { %v4121_v36 = vpop.f32.mrf.mxu0 }
 0x7e5   :  { %4223 = vmatmul.bf16.gmra.mxu1 %v12119_v26 }
 0x7e8   :  { %v4123_v43 = vpop.f32.mrf.mxu0 }
 0x7e9   :  { %v4295_v10 = vpack.c.bf16 %v4123_v43, %v4121_v36  ;;  %v9697_v36 = vld [vmem:[#allocation12] sm:$0xff] }
 0x7ea   :  { %v9689_v43 = vld [vmem:[#allocation10] sm:$0xff] }
 0x7eb   :  { %4387 = vmatmul.bf16.gmra.mxu2 %v4295_v10 }
 0x7f0   :  { %v4126_v42 = vpop.f32.mrf.mxu0 }
 0x7f5   :  { %4228 = vmatmul.bf16.gmra.mxu1 %v12122_v54  ;;  %v9703_v54 = vld [vmem:[#allocation12 + $0x30] sm:$0xff] }
 0x7f6   :  { %4662 = vmatpush.bf16.msrb.mxu3 %v9703_v54  ;;  %v4478_v54 = vmul.f32 0.2, %v12144_v34 }
 0x7f8   :  { %v4128_v53 = vpop.f32.mrf.mxu0 }
 0x7f9   :  { %v4296_v51 = vpack.c.bf16 %v4128_v53, %v4126_v42 }
 0x7fa   :  { %4663 = vmatpush.bf16.msrb.mxu3 %v9702_v61 }
 0x7fb   :  { %4392 = vmatmul.bf16.gmra.mxu2 %v4296_v51 }
 0x7fe   :  { %4664 = vmatpush.bf16.msrb.mxu3 %v9701_v35 }
 0x800   :  { %v4131_v33 = vpop.f32.mrf.mxu0 }
 0x802   :  { %4665 = vmatpush.bf16.msrb.mxu3 %v9700_v45  ;;  %v10830_v45 = vld [vmem:[#allocation4 + $0x110] sm:$0xff]  }
 0x803   :  { %v10307_v34 = vunpack.c.l.bf16 %v10830_v45 }
 0x805   :  { %4233 = vmatmul.bf16.gmra.mxu1 %v12125_v9  ;;  %v9694_v9 = vld [vmem:[#allocation10 + $0x28] sm:$0xff] }
 0x806   :  { %4808 = vmatpush.bf16.msra.mxu0 %v9694_v9  ;;  %4666 = vmatpush.bf16.msrb.mxu3 %v9699_v57 }
 0x808   :  { %v4133_v62 = vpop.f32.mrf.mxu0 }
 0x809   :  { %v4297_v22 = vpack.c.bf16 %v4133_v62, %v4131_v33 }
 0x80a   :  { %4809 = vmatpush.bf16.msra.mxu0 %v9693_v31  ;;  %4667 = vmatpush.bf16.msrb.mxu3 %v9698_v32 }
 0x80b   :  { %4397 = vmatmul.bf16.gmra.mxu2 %v4297_v22  ;;  %v10829_v22 = vld [vmem:[#allocation4 + $0x108] sm:$0xff]  }
 0x80e   :  { %4810 = vmatpush.bf16.msra.mxu0 %v9692_v12  ;;  %4668 = vmatpush.bf16.msrb.mxu3 %v9697_v36  ;;  %v4479_v36 = vmul.f32 0.2, %v12150_v59 }
 0x810   :  { %v4136_v58 = vpop.f32.mrf.mxu0 }
 0x812   :  { %4811 = vmatpush.bf16.msra.mxu0 %v9691_v8 }
 0x815   :  { %4238 = vmatmul.bf16.gmra.mxu1 %v12128_v14 }
 0x816   :  { %4812 = vmatpush.bf16.msra.mxu0 %v9690_v20 }
 0x818   :  { %v4138_v38 = vpop.f32.mrf.mxu0 }
 0x819   :  { %v4298_v26 = vpack.c.bf16 %v4138_v38, %v4136_v58 }
 0x81a   :  { %4813 = vmatpush.bf16.msra.mxu0 %v9689_v43 }
 0x81b   :  { %4402 = vmatmul.bf16.gmra.mxu2 %v4298_v26 }
 0x820   :  { %v4141_v4 = vpop.f32.mrf.mxu0 }
 0x825   :  { %4243 = vmatmul.bf16.gmra.mxu1 %v12131_v17  ;;  %v10298_v17 = vld [vmem:[#allocation4 + $0x100] sm:$0xff]  }
 0x826   :  { %v10299_v10 = vunpack.c.l.bf16 %v10298_v17  ;;  %v10300_v51 = vunpack.c.h.bf16 %v10298_v17 }
 0x828   :  { %v4143_v30 = vpop.f32.mrf.mxu0 }
 0x829   :  { %v4299_v14 = vpack.c.bf16 %v4143_v30, %v4141_v4  ;;  %v10304_v30 = vunpack.c.h.bf16 %v10829_v22 }
 0x82b   :  { %4407 = vmatmul.bf16.gmra.mxu2 %v4299_v14 }
 0x835   :  { %4248 = vmatmul.bf16.gmra.mxu1 %v12134_v19  ;;  %v10303_v19 = vunpack.c.l.bf16 %v10829_v22 }
 0x83e   :  { %v4373_v42 = vpop.f32.mrf.mxu2 }
 0x83f   :  { %v4413_v53 = vadd.f32 %v10299_v10, %v4373_v42  ;;  %v4480_v10 = vmul.f32 0.2, %v12152_v3 }
 0x841   :  { %11180 = vtanh.f32 %v4413_v53 }
 0x845   :  { %4253 = vmatmul.bf16.gmra.mxu1 %v12137_v27 }
 0x846   :  { %v4375_v33 = vpop.f32.mrf.mxu2 }
 0x847   :  { %v4414_v62 = vadd.f32 %v10300_v51, %v4375_v33  ;;  %v11181_v58 = vpop.eup %11180  ;;  %v10308_v33 = vunpack.c.h.bf16 %v10830_v45 }
 0x848   :  { %v4445_v38 = vmul.f32 0.8, %v11181_v58 }
 0x849   :  { %11182 = vtanh.f32 %v4414_v62 }
 0x84a   :  { %v12286_v61 = vadd.f32 %v4477_v37, %v4445_v38  ;;  %v10831_v38 = vld [vmem:[#allocation4 + $0x118] sm:$0xff]  }
 0x84b   :  { %v10311_v3 = vunpack.c.l.bf16 %v10831_v38 }
 0x84e   :  { %v4378_v26 = vpop.f32.mrf.mxu2 }
 0x84f   :  { %v11183_v50 = vpop.eup %11182  ;;  %v4415_v16 = vadd.f32 %v10303_v19, %v4378_v26 }
 0x850   :  { %v4446_v4 = vmul.f32 0.8, %v11183_v50 }
 0x851   :  { %11184 = vtanh.f32 %v4415_v16 }
 0x852   :  { %v12288_v9 = vadd.f32 %v4478_v54, %v4446_v4  ;;  %v4219_v14 = vpop.f32.mrf.mxu1 }
 0x854   :  { %v10332_v27 = vpack.c.bf16 %v12288_v9, %v12286_v61 }
 0x856   :  { %10333 = vst [vmem:[#allocation3] sm:$0xff] %v10332_v27   ;;  %v4380_v35 = vpop.f32.mrf.mxu2 }
 0x857   :  { %v4416_v31 = vadd.f32 %v10304_v30, %v4380_v35  ;;  %v11185_v0 = vpop.eup %11184  ;;  %v4481_v30 = vmul.f32 0.2, %v12158_v41 }
 0x858   :  { %v4447_v32 = vmul.f32 0.8, %v11185_v0  ;;  %v10312_v0 = vunpack.c.h.bf16 %v10831_v38 }
 0x859   :  { %11186 = vtanh.f32 %v4416_v31 }
 0x85a   :  { %v4221_v12 = vpop.f32.mrf.mxu1  ;;  %v12294_v53 = vadd.f32 %v4479_v36, %v4447_v32  ;;  %v10832_v32 = vld [vmem:[#allocation4 + $0x120] sm:$0xff]  }
 0x85b   :  { %v4589_v57 = vpack.c.bf16 %v4221_v12, %v4219_v14  ;;  %v4482_v14 = vmul.f32 0.2, %v12160_v28  ;;  %v10315_v28 = vunpack.c.l.bf16 %v10832_v32 }
 0x85d   :  { %v9681_v8 = vld [vmem:[#allocation3] sm:$0xff]  ;;  %4669 = vmatmul.bf16.vlgmr.msrb.gmra.mxu3 %v4589_v57 }
 0x85e   :  { %v4383_v20 = vpop.f32.mrf.mxu2  ;;  %4814 = vmatmul.bf16.vlgmr.msra.gmra.mxu0 %v9681_v8 }
 0x85f   :  { %v11187_v17 = vpop.eup %11186  ;;  %v4417_v42 = vadd.f32 %v10307_v34, %v4383_v20 }
 0x860   :  { %v4448_v43 = vmul.f32 0.8, %v11187_v17 }
 0x861   :  { %11188 = vtanh.f32 %v4417_v42 }
 0x862   :  { %v12296_v51 = vadd.f32 %v4480_v10, %v4448_v43  ;;  %v4224_v22 = vpop.f32.mrf.mxu1 }
 0x864   :  { %v10337_v62 = vpack.c.bf16 %v12296_v51, %v12294_v53 }
 0x866   :  { %10836 = vst [vmem:[#allocation3 + $0x8] sm:$0xff] %v10337_v62   ;;  %v4385_v58 = vpop.f32.mrf.mxu2 }
 0x867   :  { %v4418_v19 = vadd.f32 %v10308_v33, %v4385_v58  ;;  %v11189_v59 = vpop.eup %11188  ;;  %v4483_v33 = vmul.f32 0.2, %v12166_v25 }
 0x868   :  { %v4449_v4 = vmul.f32 0.8, %v11189_v59  ;;  %v10316_v59 = vunpack.c.h.bf16 %v10832_v32 }
 0x869   :  { %11190 = vtanh.f32 %v4418_v19 }
 0x86a   :  { %v4226_v26 = vpop.f32.mrf.mxu1  ;;  %v12302_v31 = vadd.f32 %v4481_v30, %v4449_v4  ;;  %v10833_v4 = vld [vmem:[#allocation4 + $0x128] sm:$0xff]  }
 0x86b   :  { %v4590_v50 = vpack.c.bf16 %v4226_v26, %v4224_v22  ;;  %v4484_v22 = vmul.f32 0.2, %v12168_v55  ;;  %v10319_v55 = vunpack.c.l.bf16 %v10833_v4 }
 0x86d   :  { %v9682_v37 = vld [vmem:[#allocation3 + $0x8] sm:$0xff]  ;;  %4674 = vmatmul.bf16.gmra.mxu3 %v4590_v50 }
 0x86e   :  { %v4388_v54 = vpop.f32.mrf.mxu2  ;;  %4819 = vmatmul.bf16.gmra.mxu0 %v9682_v37 }
 0x86f   :  { %v11191_v16 = vpop.eup %11190  ;;  %v4419_v35 = vadd.f32 %v10311_v3, %v4388_v54 }
 0x870   :  { %v4450_v27 = vmul.f32 0.8, %v11191_v16 }
 0x871   :  { %11192 = vtanh.f32 %v4419_v35 }
 0x872   :  { %v12304_v45 = vadd.f32 %v4482_v14, %v4450_v27  ;;  %v4229_v57 = vpop.f32.mrf.mxu1 }
 0x874   :  { %v10342_v12 = vpack.c.bf16 %v12304_v45, %v12302_v31 }
 0x876   :  { %10837 = vst [vmem:[#allocation3 + $0x10] sm:$0xff] %v10342_v12   ;;  %v4390_v34 = vpop.f32.mrf.mxu2 }
 0x877   :  { %v4420_v8 = vadd.f32 %v10312_v0, %v4390_v34  ;;  %v11193_v41 = vpop.eup %11192  ;;  %v4485_v0 = vmul.f32 0.2, %v12174_v23 }
 0x878   :  { %v4451_v43 = vmul.f32 0.8, %v11193_v41  ;;  %v10320_v41 = vunpack.c.h.bf16 %v10833_v4 }
 0x879   :  { %11194 = vtanh.f32 %v4420_v8 }
 0x87a   :  { %v4231_v20 = vpop.f32.mrf.mxu1  ;;  %v12310_v19 = vadd.f32 %v4483_v33, %v4451_v43  ;;  %v10834_v43 = vld [vmem:[#allocation4 + $0x130] sm:$0xff]  }
 0x87b   :  { %v4591_v17 = vpack.c.bf16 %v4231_v20, %v4229_v57  ;;  %v4486_v57 = vmul.f32 0.2, %v12176_v47  ;;  %v10323_v47 = vunpack.c.l.bf16 %v10834_v43 }
 0x87d   :  { %v9683_v36 = vld [vmem:[#allocation3 + $0x10] sm:$0xff]  ;;  %4679 = vmatmul.bf16.gmra.mxu3 %v4591_v17 }
 0x87e   :  { %v4393_v10 = vpop.f32.mrf.mxu2  ;;  %4824 = vmatmul.bf16.gmra.mxu0 %v9683_v36 }
 0x87f   :  { %v11195_v42 = vpop.eup %11194  ;;  %v4421_v58 = vadd.f32 %v10315_v28, %v4393_v10 }
 0x880   :  { %v4452_v62 = vmul.f32 0.8, %v11195_v42 }
 0x881   :  { %11196 = vtanh.f32 %v4421_v58 }
 0x882   :  { %v12312_v38 = vadd.f32 %v4484_v22, %v4452_v62  ;;  %v4234_v50 = vpop.f32.mrf.mxu1 }
 0x884   :  { %v10347_v26 = vpack.c.bf16 %v12312_v38, %v12310_v19 }
 0x886   :  { %10838 = vst [vmem:[#allocation3 + $0x18] sm:$0xff] %v10347_v26   ;;  %v4395_v3 = vpop.f32.mrf.mxu2 }
 0x887   :  { %v4422_v37 = vadd.f32 %v10316_v59, %v4395_v3  ;;  %v11197_v25 = vpop.eup %11196  ;;  %v4487_v59 = vmul.f32 0.2, %v12182_v39 }
 0x888   :  { %v4453_v27 = vmul.f32 0.8, %v11197_v25  ;;  %v10324_v25 = vunpack.c.h.bf16 %v10834_v43 }
 0x889   :  { %11198 = vtanh.f32 %v4422_v37 }
 0x88a   :  { %v4236_v54 = vpop.f32.mrf.mxu1  ;;  %v12318_v8 = vadd.f32 %v4485_v0, %v4453_v27  ;;  %v10835_v27 = vld [vmem:[#allocation4 + $0x138] sm:$0xff]  }
 0x88b   :  { %v4592_v16 = vpack.c.bf16 %v4236_v54, %v4234_v50  ;;  %v4488_v50 = vmul.f32 0.2, %v12184_v48  ;;  %v10327_v48 = vunpack.c.l.bf16 %v10835_v27 }
 0x88d   :  { %v9684_v30 = vld [vmem:[#allocation3 + $0x18] sm:$0xff]  ;;  %4684 = vmatmul.bf16.gmra.mxu3 %v4592_v16 }
 0x88e   :  { %v4398_v14 = vpop.f32.mrf.mxu2  ;;  %4829 = vmatmul.bf16.gmra.mxu0 %v9684_v30 }
 0x88f   :  { %v11199_v35 = vpop.eup %11198  ;;  %v4423_v34 = vadd.f32 %v10319_v55, %v4398_v14 }
 0x890   :  { %v4454_v12 = vmul.f32 0.8, %v11199_v35 }
 0x891   :  { %11200 = vtanh.f32 %v4423_v34 }
 0x892   :  { %v12320_v32 = vadd.f32 %v4486_v57, %v4454_v12  ;;  %v4239_v17 = vpop.f32.mrf.mxu1 }
 0x894   :  { %v10352_v20 = vpack.c.bf16 %v12320_v32, %v12318_v8 }
 0x896   :  { %10839 = vst [vmem:[#allocation3 + $0x20] sm:$0xff] %v10352_v20   ;;  %v4400_v28 = vpop.f32.mrf.mxu2 }
 0x897   :  { %v4424_v36 = vadd.f32 %v10320_v41, %v4400_v28  ;;  %v11201_v23 = vpop.eup %11200  ;;  %v4489_v41 = vmul.f32 0.2, %v12190_v7 }
 0x898   :  { %v4455_v62 = vmul.f32 0.8, %v11201_v23  ;;  %v10328_v23 = vunpack.c.h.bf16 %v10835_v27 }
 0x899   :  { %11202 = vtanh.f32 %v4424_v36 }
 0x89a   :  { %v4241_v10 = vpop.f32.mrf.mxu1  ;;  %v12326_v37 = vadd.f32 %v4487_v59, %v4455_v62 }
 0x89b   :  { %v4593_v42 = vpack.c.bf16 %v4241_v10, %v4239_v17  ;;  %v4490_v17 = vmul.f32 0.2, %v12192_v24 }
 0x89d   :  { %v9685_v33 = vld [vmem:[#allocation3 + $0x20] sm:$0xff]  ;;  %4689 = vmatmul.bf16.gmra.mxu3 %v4593_v42 }
 0x89e   :  { %v4403_v22 = vpop.f32.mrf.mxu2  ;;  %4834 = vmatmul.bf16.gmra.mxu0 %v9685_v33 }
 0x89f   :  { %v11203_v58 = vpop.eup %11202  ;;  %v4425_v3 = vadd.f32 %v10323_v47, %v4403_v22 }
 0x8a0   :  { %v4456_v26 = vmul.f32 0.8, %v11203_v58 }
 0x8a1   :  { %11204 = vtanh.f32 %v4425_v3  ;;  %v4492_v3 = vmul.f32 0.2, %v12200_v13  ;;  %v9709_v13 = vld [vmem:[#allocation3 + $0x20] sm:$0xff] }
 0x8a2   :  { %v12328_v4 = vadd.f32 %v4488_v50, %v4456_v26  ;;  %v4244_v16 = vpop.f32.mrf.mxu1  ;;  %v4491_v26 = vmul.f32 0.2, %v12198_v63 }
 0x8a4   :  { %v10357_v54 = vpack.c.bf16 %v12328_v4, %v12326_v37 }
 0x8a6   :  { %10840 = vst [vmem:[#allocation3 + $0x28] sm:$0xff] %v10357_v54   ;;  %v4405_v55 = vpop.f32.mrf.mxu2 }
 0x8a7   :  { %v4426_v30 = vadd.f32 %v10324_v25, %v4405_v55  ;;  %v11205_v39 = vpop.eup %11204 }
 0x8a8   :  { %v4457_v12 = vmul.f32 0.8, %v11205_v39 }
 0x8a9   :  { %11206 = vtanh.f32 %v4426_v30 }
 0x8aa   :  { %v4246_v14 = vpop.f32.mrf.mxu1  ;;  %v12334_v36 = vadd.f32 %v4489_v41, %v4457_v12 }
 0x8ab   :  { %v4594_v35 = vpack.c.bf16 %v4246_v14, %v4244_v16 }
 0x8ad   :  { %v9686_v0 = vld [vmem:[#allocation3 + $0x28] sm:$0xff]  ;;  %4694 = vmatmul.bf16.gmra.mxu3 %v4594_v35 }
 0x8ae   :  { %v4408_v57 = vpop.f32.mrf.mxu2  ;;  %4839 = vmatmul.bf16.gmra.mxu0 %v9686_v0  ;;  %v9710_v35 = vld [vmem:[#allocation3 + $0x28] sm:$0xff]  ;;  %v9708_v0 = vld [vmem:[#allocation3 + $0x18] sm:$0xff] }
 0x8af   :  { %v11207_v34 = vpop.eup %11206  ;;  %v4427_v28 = vadd.f32 %v10327_v48, %v4408_v57  ;;  %v9707_v57 = vld [vmem:[#allocation3 + $0x10] sm:$0xff] }
 0x8b0   :  { %v4458_v20 = vmul.f32 0.8, %v11207_v34 }
 0x8b1   :  { %11208 = vtanh.f32 %v4427_v28  ;;  %v9705_v28 = vld [vmem:[#allocation3] sm:$0xff] }
 0x8b2   :  { %v12336_v43 = vadd.f32 %v4490_v17, %v4458_v20  ;;  %v4249_v42 = vpop.f32.mrf.mxu1  ;;  %v9706_v20 = vld [vmem:[#allocation3 + $0x8] sm:$0xff] }
 0x8b4   :  { %v10362_v10 = vpack.c.bf16 %v12336_v43, %v12334_v36 }
 0x8b6   :  { %10841 = vst [vmem:[#allocation3 + $0x30] sm:$0xff] %v10362_v10   ;;  %v4410_v47 = vpop.f32.mrf.mxu2 }
 0x8b7   :  { %v4428_v33 = vadd.f32 %v10328_v23, %v4410_v47  ;;  %v11209_v62 = vpop.eup %11208  ;;  %v12348_v47 = vld [vmem:[#allocation7] sm:$0xff] }
 0x8b8   :  { %v4459_v24 = vmul.f32 0.8, %v11209_v62 }
 0x8b9   :  { %11210 = vtanh.f32 %v4428_v33 }
 0x8ba   :  { %v4251_v7 = vpop.f32.mrf.mxu1  ;;  %v12342_v25 = vadd.f32 %v4491_v26, %v4459_v24  ;;  %v4904_v24 = vmul.f32 0.2, %v12209_v46 }
 0x8bb   :  { %v4595_v22 = vpack.c.bf16 %v4251_v7, %v4249_v42 }
 0x8bd   :  { %v9687_v58 = vld [vmem:[#allocation3 + $0x30] sm:$0xff]  ;;  %4699 = vmatmul.bf16.gmra.mxu3 %v4595_v22  ;;  %v4903_v22 = vmul.f32 0.2, %v12207_v6  ;;  %v12359_v6 = vld [vmem:[#allocation7 + $0x8] sm:$0xff] }
 0x8be   :  { %4844 = vmatmul.bf16.gmra.mxu0 %v9687_v58  ;;  %v9711_v63 = vld [vmem:[#allocation3 + $0x30] sm:$0xff] }
 0x8bf   :  { %v11211_v59 = vpop.eup %11210 }
 0x8c0   :  { %v4460_v50 = vmul.f32 0.8, %v11211_v59 }
 0x8c2   :  { %v12344_v54 = vadd.f32 %v4492_v3, %v4460_v50  ;;  %v4254_v55 = vpop.f32.mrf.mxu1 }
 0x8c4   :  { %v10367_v16 = vpack.c.bf16 %v12344_v54, %v12342_v25 }
 0x8c6   :  { %10842 = vst [vmem:[#allocation3 + $0x38] sm:$0xff] %v10367_v16  }
 0x8ca   :  { %v4256_v30 = vpop.f32.mrf.mxu1 }
 0x8cb   :  { %v4596_v27 = vpack.c.bf16 %v4256_v30, %v4254_v55 }
 0x8cd   :  { %v9688_v39 = vld [vmem:[#allocation3 + $0x38] sm:$0xff]  ;;  %4704 = vmatmul.bf16.gmra.mxu3 %v4596_v27 }
 0x8ce   :  { %v9712_v14 = vld [vmem:[#allocation3 + $0x38] sm:$0xff]  ;;  %4849 = vmatmul.bf16.gmra.mxu0 %v9688_v39 }
 0x8cf   :  { %5047 = vmatpush.bf16.msra.mxu1 %v9712_v14 }
 0x8d3   :  { %5048 = vmatpush.bf16.msra.mxu1 %v9711_v63 }
 0x8d7   :  { %5049 = vmatpush.bf16.msra.mxu1 %v9710_v35  ;;  %v4905_v35 = vmul.f32 0.2, %v12216_v52  ;;  %v12370_v52 = vld [vmem:[#allocation7 + $0x10] sm:$0xff] }
 0x8db   :  { %5050 = vmatpush.bf16.msra.mxu1 %v9709_v13  ;;  %v4815_v48 = vpop.f32.mrf.mxu0 }
 0x8df   :  { %5051 = vmatpush.bf16.msra.mxu1 %v9708_v0 }
 0x8e0   :  { %v4670_v12 = vpop.f32.mrf.mxu3 }
 0x8e1   :  { %v4816_v41 = vadd.f32 %v4815_v48, %v4670_v12  ;;  %v4906_v48 = vmul.f32 0.2, %v12218_v56 }
 0x8e3   :  { %5052 = vmatpush.bf16.msra.mxu1 %v9707_v57  ;;  %v4817_v34 = vpop.f32.mrf.mxu0  ;;  %11212 = vtanh.f32 %v4816_v41 }
 0x8e7   :  { %5053 = vmatpush.bf16.msra.mxu1 %v9706_v20 }
 0x8e8   :  { %v4672_v17 = vpop.f32.mrf.mxu3 }
 0x8e9   :  { %v4818_v23 = vadd.f32 %v4817_v34, %v4672_v17  ;;  %v11213_v42 = vpop.eup %11212 }
 0x8ea   :  { %v4871_v33 = vmul.f32 0.8, %v11213_v42 }
 0x8eb   :  { %5054 = vmatpush.bf16.msra.mxu1 %v9705_v28  ;;  %v4820_v10 = vpop.f32.mrf.mxu0  ;;  %11214 = vtanh.f32 %v4818_v23 }
 0x8ec   :  { %v12353_v50 = vadd.f32 %v4903_v22, %v4871_v33  ;;  %v4907_v33 = vmul.f32 0.2, %v12225_v11  ;;  %v12381_v11 = vld [vmem:[#allocation7 + $0x18] sm:$0xff] }
 0x8ee   :  { %5055 = vmatmul.bf16.vlgmr.msra.gmra.mxu1 %v12348_v47 }
 0x8f0   :  { %v4675_v62 = vpop.f32.mrf.mxu3 }
 0x8f1   :  { %v11215_v7 = vpop.eup %11214  ;;  %v4821_v26 = vadd.f32 %v4820_v10, %v4675_v62 }
 0x8f2   :  { %v4872_v58 = vmul.f32 0.8, %v11215_v7  ;;  %v4908_v7 = vmul.f32 0.2, %v12227_v49 }
 0x8f3   :  { %v4822_v59 = vpop.f32.mrf.mxu0  ;;  %11216 = vtanh.f32 %v4821_v26 }
 0x8f4   :  { %v12355_v3 = vadd.f32 %v4904_v24, %v4872_v58 }
 0x8f6   :  { %v10372_v16 = vpack.c.bf16 %v12355_v3, %v12353_v50 }
 0x8f8   :  { %10373 = vst [vmem:[#allocation3 + $0x40] sm:$0xff] %v10372_v16   ;;  %v4677_v55 = vpop.f32.mrf.mxu3 }
 0x8f9   :  { %v4823_v30 = vadd.f32 %v4822_v59, %v4677_v55  ;;  %v11217_v39 = vpop.eup %11216 }
 0x8fa   :  { %v4873_v46 = vmul.f32 0.8, %v11217_v39 }
 0x8fb   :  { %v4825_v27 = vpop.f32.mrf.mxu0  ;;  %11218 = vtanh.f32 %v4823_v30 }
 0x8fc   :  { %v12364_v57 = vadd.f32 %v4905_v35, %v4873_v46  ;;  %v4910_v35 = vmul.f32 0.2, %v12236_v5 }
 0x8fe   :  { %5060 = vmatmul.bf16.gmra.mxu1 %v12359_v6 }
 0x900   :  { %v4680_v14 = vpop.f32.mrf.mxu3 }
 0x901   :  { %v11219_v63 = vpop.eup %11218  ;;  %v4826_v12 = vadd.f32 %v4825_v27, %v4680_v14  ;;  %v4909_v14 = vmul.f32 0.2, %v12234_v2  ;;  %v12392_v2 = vld [vmem:[#allocation7 + $0x20] sm:$0xff] }
 0x902   :  { %v4874_v13 = vmul.f32 0.8, %v11219_v63 }
 0x903   :  { %v4827_v0 = vpop.f32.mrf.mxu0  ;;  %11220 = vtanh.f32 %v4826_v12 }
 0x904   :  { %v12366_v34 = vadd.f32 %v4906_v48, %v4874_v13 }
 0x906   :  { %v10377_v41 = vpack.c.bf16 %v12366_v34, %v12364_v57 }
 0x908   :  { %10843 = vst [vmem:[#allocation3 + $0x48] sm:$0xff] %v10377_v41   ;;  %v4682_v20 = vpop.f32.mrf.mxu3 }
 0x909   :  { %v4828_v17 = vadd.f32 %v4827_v0, %v4682_v20  ;;  %v11221_v23 = vpop.eup %11220 }
 0x90a   :  { %v4875_v56 = vmul.f32 0.8, %v11221_v23 }
 0x90b   :  { %v4830_v28 = vpop.f32.mrf.mxu0  ;;  %11222 = vtanh.f32 %v4828_v17 }
 0x90c   :  { %v12375_v24 = vadd.f32 %v4907_v33, %v4875_v56 }
 0x90e   :  { %5065 = vmatmul.bf16.gmra.mxu1 %v12370_v52 }
 0x910   :  { %v4685_v10 = vpop.f32.mrf.mxu3 }
 0x911   :  { %v11223_v42 = vpop.eup %11222  ;;  %v4831_v58 = vadd.f32 %v4830_v28, %v4685_v10 }
 0x912   :  { %v4876_v62 = vmul.f32 0.8, %v11223_v42  ;;  %v4911_v42 = vmul.f32 0.2, %v12243_v29 }
 0x913   :  { %v4832_v22 = vpop.f32.mrf.mxu0  ;;  %11224 = vtanh.f32 %v4831_v58 }
 0x914   :  { %v12377_v59 = vadd.f32 %v4908_v7, %v4876_v62  ;;  %v4912_v62 = vmul.f32 0.2, %v12245_v44  ;;  %v9726_v44 = vld [vmem:[#allocation9 + $0x28] sm:$0xff] }
 0x916   :  { %v10382_v26 = vpack.c.bf16 %v12377_v59, %v12375_v24 }
 0x918   :  { %10844 = vst [vmem:[#allocation3 + $0x50] sm:$0xff] %v10382_v26   ;;  %v4687_v16 = vpop.f32.mrf.mxu3 }
 0x919   :  { %v4833_v55 = vadd.f32 %v4832_v22, %v4687_v16  ;;  %v11225_v27 = vpop.eup %11224  ;;  %v9728_v16 = vld [vmem:[#allocation9 + $0x38] sm:$0xff] }
 0x91a   :  { %v4877_v49 = vmul.f32 0.8, %v11225_v27  ;;  %5314 = vmatpush.bf16.msra.mxu3 %v9728_v16  ;;  %v9727_v27 = vld [vmem:[#allocation9 + $0x30] sm:$0xff] }
 0x91b   :  { %v4835_v30 = vpop.f32.mrf.mxu0  ;;  %11226 = vtanh.f32 %v4833_v55 }
 0x91c   :  { %v12386_v0 = vadd.f32 %v4909_v14, %v4877_v49 }
 0x91e   :  { %5070 = vmatmul.bf16.gmra.mxu1 %v12381_v11  ;;  %5315 = vmatpush.bf16.msra.mxu3 %v9727_v27 }
 0x920   :  { %v4690_v39 = vpop.f32.mrf.mxu3 }
 0x921   :  { %v11227_v46 = vpop.eup %11226  ;;  %v4836_v48 = vadd.f32 %v4835_v30, %v4690_v39 }
 0x922   :  { %v4878_v63 = vmul.f32 0.8, %v11227_v46  ;;  %v12403_v46 = vld [vmem:[#allocation7 + $0x28] sm:$0xff]  ;;  %5316 = vmatpush.bf16.msra.mxu3 %v9726_v44  ;;  %v4916_v44 = vmul.f32 0.2, %v12263_v60 }
 0x923   :  { %v4837_v13 = vpop.f32.mrf.mxu0  ;;  %11228 = vtanh.f32 %v4836_v48  ;;  %v4913_v48 = vmul.f32 0.2, %v12252_v21 }
 0x924   :  { %v12388_v12 = vadd.f32 %v4910_v35, %v4878_v63  ;;  %v9725_v35 = vld [vmem:[#allocation9 + $0x20] sm:$0xff] }
 0x926   :  { %v10387_v41 = vpack.c.bf16 %v12388_v12, %v12386_v0  ;;  %5317 = vmatpush.bf16.msra.mxu3 %v9725_v35 }
 0x928   :  { %10845 = vst [vmem:[#allocation3 + $0x58] sm:$0xff] %v10387_v41   ;;  %v4692_v20 = vpop.f32.mrf.mxu3 }
 0x929   :  { %v4838_v17 = vadd.f32 %v4837_v13, %v4692_v20  ;;  %v11229_v23 = vpop.eup %11228  ;;  %v4914_v20 = vmul.f32 0.2, %v12254_v40 }
 0x92a   :  { %v4879_v5 = vmul.f32 0.8, %v11229_v23 }
 0x92b   :  { %v4840_v28 = vpop.f32.mrf.mxu0  ;;  %11230 = vtanh.f32 %v4838_v17 }
 0x92c   :  { %v12397_v58 = vadd.f32 %v4911_v42, %v4879_v5 }
 0x92e   :  { %5075 = vmatmul.bf16.gmra.mxu1 %v12392_v2 }
 0x930   :  { %v4695_v56 = vpop.f32.mrf.mxu3 }
 0x931   :  { %v11231_v10 = vpop.eup %11230  ;;  %v4841_v22 = vadd.f32 %v4840_v28, %v4695_v56  ;;  %v9724_v56 = vld [vmem:[#allocation9 + $0x18] sm:$0xff] }
 0x932   :  { %v4880_v33 = vmul.f32 0.8, %v11231_v10  ;;  %5318 = vmatpush.bf16.msra.mxu3 %v9724_v56 }
 0x933   :  { %v4842_v7 = vpop.f32.mrf.mxu0  ;;  %11232 = vtanh.f32 %v4841_v22 }
 0x934   :  { %v12399_v26 = vadd.f32 %v4912_v62, %v4880_v33  ;;  %v9723_v33 = vld [vmem:[#allocation9 + $0x10] sm:$0xff]  ;;  %v9722_v62 = vld [vmem:[#allocation9 + $0x8] sm:$0xff] }
 0x936   :  { %v10392_v55 = vpack.c.bf16 %v12399_v26, %v12397_v58  ;;  %5319 = vmatpush.bf16.msra.mxu3 %v9723_v33 }
 0x938   :  { %10846 = vst [vmem:[#allocation3 + $0x60] sm:$0xff] %v10392_v55   ;;  %v4697_v30 = vpop.f32.mrf.mxu3 }
 0x939   :  { %v4843_v49 = vadd.f32 %v4842_v7, %v4697_v30  ;;  %v11233_v39 = vpop.eup %11232  ;;  %v12414_v7 = vld [vmem:[#allocation7 + $0x30] sm:$0xff]  ;;  %v9721_v30 = vld [vmem:[#allocation9] sm:$0xff] }
 0x93a   :  { %v4881_v14 = vmul.f32 0.8, %v11233_v39  ;;  %5320 = vmatpush.bf16.msra.mxu3 %v9722_v62 }
 0x93b   :  { %v4845_v29 = vpop.f32.mrf.mxu0  ;;  %11234 = vtanh.f32 %v4843_v49  ;;  %v4915_v49 = vmul.f32 0.2, %v12261_v18  ;;  %v12425_v18 = vld [vmem:[#allocation7 + $0x38] sm:$0xff] }
 0x93c   :  { %v12408_v28 = vadd.f32 %v4913_v48, %v4881_v14 }
 0x93e   :  { %5080 = vmatmul.bf16.gmra.mxu1 %v12403_v46  ;;  %5321 = vmatpush.bf16.msra.mxu3 %v9721_v30 }
 0x940   :  { %v4700_v63 = vpop.f32.mrf.mxu3 }
 0x941   :  { %v11235_v13 = vpop.eup %11234  ;;  %v4846_v17 = vadd.f32 %v4845_v29, %v4700_v63 }
 0x942   :  { %v4882_v41 = vmul.f32 0.8, %v11235_v13 }
 0x943   :  { %v4847_v5 = vpop.f32.mrf.mxu0  ;;  %11236 = vtanh.f32 %v4846_v17 }
 0x944   :  { %v12410_v23 = vadd.f32 %v4914_v20, %v4882_v41 }
 0x946   :  { %v10397_v10 = vpack.c.bf16 %v12410_v23, %v12408_v28 }
 0x948   :  { %10847 = vst [vmem:[#allocation3 + $0x68] sm:$0xff] %v10397_v10   ;;  %v4702_v42 = vpop.f32.mrf.mxu3  ;;  %v4918_v10 = vmul.f32 0.2, %v12272_v15  ;;  %v9717_v15 = vld [vmem:[#allocation3 + $0x60] sm:$0xff] }
 0x949   :  { %v4848_v21 = vadd.f32 %v4847_v5, %v4702_v42  ;;  %v11237_v40 = vpop.eup %11236  ;;  %v4917_v5 = vmul.f32 0.2, %v12270_v1 }
 0x94a   :  { %v4883_v16 = vmul.f32 0.8, %v11237_v40 }
 0x94b   :  { %11238 = vtanh.f32 %v4848_v21  ;;  %v4850_v22 = vpop.f32.mrf.mxu0 }
 0x94c   :  { %v12419_v14 = vadd.f32 %v4915_v49, %v4883_v16 }
 0x94e   :  { %5085 = vmatmul.bf16.gmra.mxu1 %v12414_v7 }
 0x94f   :  { %v9718_v1 = vld [vmem:[#allocation3 + $0x68] sm:$0xff] }
 0x950   :  { %v4705_v55 = vpop.f32.mrf.mxu3 }
 0x951   :  { %v11239_v27 = vpop.eup %11238  ;;  %v4851_v39 = vadd.f32 %v4850_v22, %v4705_v55 }
 0x952   :  { %v4884_v29 = vmul.f32 0.8, %v11239_v27  ;;  %v9716_v27 = vld [vmem:[#allocation3 + $0x58] sm:$0xff] }
 0x953   :  { %11240 = vtanh.f32 %v4851_v39  ;;  %v4852_v13 = vpop.f32.mrf.mxu0  ;;  %v9714_v39 = vld [vmem:[#allocation3 + $0x48] sm:$0xff] }
 0x954   :  { %v12421_v63 = vadd.f32 %v4916_v44, %v4884_v29  ;;  %v9715_v44 = vld [vmem:[#allocation3 + $0x50] sm:$0xff] }
 0x956   :  { %v10402_v35 = vpack.c.bf16 %v12421_v63, %v12419_v14 }
 0x958   :  { %10848 = vst [vmem:[#allocation3 + $0x70] sm:$0xff] %v10402_v35   ;;  %v4707_v48 = vpop.f32.mrf.mxu3 }
 0x959   :  { %v4853_v41 = vadd.f32 %v4852_v13, %v4707_v48  ;;  %v11241_v20 = vpop.eup %11240  ;;  %v9713_v13 = vld [vmem:[#allocation3 + $0x40] sm:$0xff] }
 0x95a   :  { %v4885_v60 = vmul.f32 0.8, %v11241_v20 }
 0x95b   :  { %11242 = vtanh.f32 %v4853_v41 }
 0x95c   :  { %v12430_v42 = vadd.f32 %v4917_v5, %v4885_v60 }
 0x95e   :  { %5090 = vmatmul.bf16.gmra.mxu1 %v12425_v18 }
 0x95f   :  { %v9719_v55 = vld [vmem:[#allocation3 + $0x70] sm:$0xff] }
 0x961   :  { %v11243_v17 = vpop.eup %11242 }
 0x962   :  { %v4886_v56 = vmul.f32 0.8, %v11243_v17 }
 0x964   :  { %v12432_v33 = vadd.f32 %v4918_v10, %v4886_v56 }
 0x966   :  { %v10407_v21 = vpack.c.bf16 %v12432_v33, %v12430_v42 }
 0x968   :  { %10849 = vst [vmem:[#allocation3 + $0x78] sm:$0xff] %v10407_v21  }
 0x96b   :  { %v5056_v62 = vpop.f32.mrf.mxu1 }
 0x96f   :  { %v9720_v40 = vld [vmem:[#allocation3 + $0x78] sm:$0xff] }
 0x970   :  { %5160 = vmatpush.bf16.msra.mxu2 %v9720_v40 }
 0x973   :  { %v5058_v22 = vpop.f32.mrf.mxu1 }
 0x974   :  { %v5242_v16 = vpack.c.bf16 %v5058_v22, %v5056_v62  ;;  %5161 = vmatpush.bf16.msra.mxu2 %v9719_v55 }
 0x976   :  { %5322 = vmatmul.bf16.vlgmr.msra.gmra.mxu3 %v5242_v16 }
 0x978   :  { %5162 = vmatpush.bf16.msra.mxu2 %v9718_v1  ;;  %v9744_v1 = vld [vmem:[#allocation10 + $0x38] sm:$0xff] }
 0x979   :  { %5756 = vmatpush.bf16.msrb.mxu1 %v9744_v1 }
 0x97b   :  { %v5061_v30 = vpop.f32.mrf.mxu1 }
 0x97c   :  { %5163 = vmatpush.bf16.msra.mxu2 %v9717_v15  ;;  %v9743_v15 = vld [vmem:[#allocation10 + $0x30] sm:$0xff] }
 0x97d   :  { %5757 = vmatpush.bf16.msrb.mxu1 %v9743_v15  ;;  %v10850_v15 = vld [vmem:[#allocation4 + $0x148] sm:$0xff]  }
 0x980   :  { %5164 = vmatpush.bf16.msra.mxu2 %v9716_v27  ;;  %v9752_v27 = vld [vmem:[#allocation12 + $0x38] sm:$0xff] }
 0x981   :  { %5611 = vmatpush.bf16.msrb.mxu0 %v9752_v27 }
 0x983   :  { %v5063_v49 = vpop.f32.mrf.mxu1 }
 0x984   :  { %v5243_v29 = vpack.c.bf16 %v5063_v49, %v5061_v30  ;;  %5165 = vmatpush.bf16.msra.mxu2 %v9715_v44  ;;  %v9742_v49 = vld [vmem:[#allocation10 + $0x28] sm:$0xff]  ;;  %v9751_v44 = vld [vmem:[#allocation12 + $0x30] sm:$0xff] }
 0x985   :  { %5758 = vmatpush.bf16.msrb.mxu1 %v9742_v49  ;;  %5612 = vmatpush.bf16.msrb.mxu0 %v9751_v44  ;;  %v10415_v49 = vunpack.c.l.bf16 %v10850_v15 }
 0x986   :  { %5327 = vmatmul.bf16.gmra.mxu3 %v5243_v29 }
 0x988   :  { %5166 = vmatpush.bf16.msra.mxu2 %v9714_v39 }
 0x98b   :  { %v5066_v35 = vpop.f32.mrf.mxu1 }
 0x98c   :  { %5167 = vmatpush.bf16.msra.mxu2 %v9713_v13  ;;  %v9750_v13 = vld [vmem:[#allocation12 + $0x28] sm:$0xff] }
 0x98d   :  { %5613 = vmatpush.bf16.msrb.mxu0 %v9750_v13 }
 0x98f   :  { %5168 = vmatmul.bf16.vlgmr.msra.gmra.mxu2 %v12348_v47 }
 0x993   :  { %v5068_v48 = vpop.f32.mrf.mxu1 }
 0x994   :  { %v5244_v41 = vpack.c.bf16 %v5068_v48, %v5066_v35  ;;  %v9741_v35 = vld [vmem:[#allocation10 + $0x20] sm:$0xff]  ;;  %v9740_v48 = vld [vmem:[#allocation10 + $0x18] sm:$0xff] }
 0x995   :  { %5759 = vmatpush.bf16.msrb.mxu1 %v9741_v35  ;;  %v5427_v35 = vmul.f32 0.2, %v12286_v61 }
 0x996   :  { %5332 = vmatmul.bf16.gmra.mxu3 %v5244_v41  ;;  %v9749_v41 = vld [vmem:[#allocation12 + $0x20] sm:$0xff] }
 0x997   :  { %5614 = vmatpush.bf16.msrb.mxu0 %v9749_v41 }
 0x999   :  { %5760 = vmatpush.bf16.msrb.mxu1 %v9740_v48  ;;  %v5428_v48 = vmul.f32 0.2, %v12288_v9 }
 0x99b   :  { %v5071_v20 = vpop.f32.mrf.mxu1 }
 0x99f   :  { %5173 = vmatmul.bf16.gmra.mxu2 %v12359_v6 }
 0x9a3   :  { %v5073_v60 = vpop.f32.mrf.mxu1 }
 0x9a4   :  { %v5245_v17 = vpack.c.bf16 %v5073_v60, %v5071_v20  ;;  %v9739_v20 = vld [vmem:[#allocation10 + $0x10] sm:$0xff]  ;;  %v9748_v60 = vld [vmem:[#allocation12 + $0x18] sm:$0xff] }
 0x9a5   :  { %5761 = vmatpush.bf16.msrb.mxu1 %v9739_v20  ;;  %5615 = vmatpush.bf16.msrb.mxu0 %v9748_v60 }
 0x9a6   :  { %5337 = vmatmul.bf16.gmra.mxu3 %v5245_v17  ;;  %v9738_v17 = vld [vmem:[#allocation10 + $0x8] sm:$0xff] }
 0x9a9   :  { %5762 = vmatpush.bf16.msrb.mxu1 %v9738_v17  ;;  %v10416_v17 = vunpack.c.h.bf16 %v10850_v15  ;;  %v5430_v15 = vmul.f32 0.2, %v12296_v51 }
 0x9ab   :  { %v5076_v5 = vpop.f32.mrf.mxu1 }
 0x9af   :  { %5178 = vmatmul.bf16.gmra.mxu2 %v12370_v52 }
 0x9b3   :  { %v5078_v56 = vpop.f32.mrf.mxu1 }
 0x9b4   :  { %v5246_v10 = vpack.c.bf16 %v5078_v56, %v5076_v5  ;;  %v9747_v5 = vld [vmem:[#allocation12 + $0x10] sm:$0xff]  ;;  %v10410_v56 = vld [vmem:[#allocation4 + $0x140] sm:$0xff]  }
 0x9b5   :  { %5616 = vmatpush.bf16.msrb.mxu0 %v9747_v5 }
 0x9b6   :  { %5342 = vmatmul.bf16.gmra.mxu3 %v5246_v10  ;;  %v9737_v10 = vld [vmem:[#allocation10] sm:$0xff] }
 0x9b7   :  { %5763 = vmatpush.bf16.msrb.mxu1 %v9737_v10 }
 0x9bb   :  { %v5081_v21 = vpop.f32.mrf.mxu1 }
 0x9bf   :  { %5183 = vmatmul.bf16.gmra.mxu2 %v12381_v11 }
 0x9c3   :  { %v5083_v62 = vpop.f32.mrf.mxu1 }
 0x9c4   :  { %v5247_v40 = vpack.c.bf16 %v5083_v62, %v5081_v21  ;;  %v9746_v21 = vld [vmem:[#allocation12 + $0x8] sm:$0xff]  ;;  %v10411_v62 = vunpack.c.l.bf16 %v10410_v56 }
 0x9c5   :  { %5617 = vmatpush.bf16.msrb.mxu0 %v9746_v21 }
 0x9c6   :  { %5347 = vmatmul.bf16.gmra.mxu3 %v5247_v40 }
 0x9cb   :  { %v5086_v22 = vpop.f32.mrf.mxu1 }
 0x9cf   :  { %5188 = vmatmul.bf16.gmra.mxu2 %v12392_v2 }
 0x9d3   :  { %v5088_v16 = vpop.f32.mrf.mxu1 }
 0x9d4   :  { %v5248_v55 = vpack.c.bf16 %v5088_v16, %v5086_v22  ;;  %v9745_v22 = vld [vmem:[#allocation12] sm:$0xff] }
 0x9d5   :  { %5618 = vmatpush.bf16.msrb.mxu0 %v9745_v22 }
 0x9d6   :  { %5352 = vmatmul.bf16.gmra.mxu3 %v5248_v55  ;;  %v10412_v55 = vunpack.c.h.bf16 %v10410_v56 }
 0x9db   :  { %v5091_v30 = vpop.f32.mrf.mxu1 }
 0x9df   :  { %5193 = vmatmul.bf16.gmra.mxu2 %v12403_v46 }
 0x9e3   :  { %v5093_v29 = vpop.f32.mrf.mxu1 }
 0x9e4   :  { %v5249_v39 = vpack.c.bf16 %v5093_v29, %v5091_v30 }
 0x9e6   :  { %5357 = vmatmul.bf16.gmra.mxu3 %v5249_v39 }
 0x9ef   :  { %5198 = vmatmul.bf16.gmra.mxu2 %v12414_v7 }
 0x9f9   :  { %v5323_v40 = vpop.f32.mrf.mxu3 }
 0x9fa   :  { %v5363_v16 = vadd.f32 %v10411_v62, %v5323_v40  ;;  %v10851_v62 = vld [vmem:[#allocation4 + $0x150] sm:$0xff]  }
 0x9fb   :  { %v10419_v40 = vunpack.c.l.bf16 %v10851_v62 }
 0x9fc   :  { %11244 = vtanh.f32 %v5363_v16 }
 0x9ff   :  { %5203 = vmatmul.bf16.gmra.mxu2 %v12425_v18 }
 0xa01   :  { %v5325_v1 = vpop.f32.mrf.mxu3 }
 0xa02   :  { %v5364_v30 = vadd.f32 %v10412_v55, %v5325_v1  ;;  %v11245_v27 = vpop.eup %11244  ;;  %v5429_v1 = vmul.f32 0.2, %v12294_v53 }
 0xa03   :  { %v5395_v29 = vmul.f32 0.8, %v11245_v27 }
 0xa04   :  { %11246 = vtanh.f32 %v5364_v30 }
 0xa05   :  { %v12446_v20 = vadd.f32 %v5427_v35, %v5395_v29  ;;  %v10420_v35 = vunpack.c.h.bf16 %v10851_v62 }
 0xa09   :  { %v5328_v44 = vpop.f32.mrf.mxu3 }
 0xa0a   :  { %v11247_v39 = vpop.eup %11246  ;;  %v5365_v41 = vadd.f32 %v10415_v49, %v5328_v44 }
 0xa0b   :  { %v5396_v13 = vmul.f32 0.8, %v11247_v39 }
 0xa0c   :  { %11248 = vtanh.f32 %v5365_v41 }
 0xa0d   :  { %v12448_v60 = vadd.f32 %v5428_v48, %v5396_v13 }
 0xa0f   :  { %v10444_v5 = vpack.c.bf16 %v12448_v60, %v12446_v20 }
 0xa11   :  { %10445 = vst [vmem:[#allocation3] sm:$0xff] %v10444_v5   ;;  %v5330_v56 = vpop.f32.mrf.mxu3 }
 0xa12   :  { %v5366_v10 = vadd.f32 %v10416_v17, %v5330_v56  ;;  %v5169_v21 = vpop.f32.mrf.mxu2  ;;  %v11249_v61 = vpop.eup %11248  ;;  %v10852_v17 = vld [vmem:[#allocation4 + $0x158] sm:$0xff]  }
 0xa13   :  { %v5397_v9 = vmul.f32 0.8, %v11249_v61  ;;  %v10423_v5 = vunpack.c.l.bf16 %v10852_v17 }
 0xa14   :  { %11250 = vtanh.f32 %v5366_v10 }
 0xa15   :  { %v12454_v29 = vadd.f32 %v5429_v1, %v5397_v9 }
 0xa18   :  { %v9729_v22 = vld [vmem:[#allocation3] sm:$0xff] }
 0xa19   :  { %v5333_v16 = vpop.f32.mrf.mxu3  ;;  %5764 = vmatmul.bf16.vlgmr.msrb.gmra.mxu1 %v9729_v22  ;;  %v5432_v22 = vmul.f32 0.2, %v12304_v45 }
 0xa1a   :  { %v11251_v55 = vpop.eup %11250  ;;  %v5367_v27 = vadd.f32 %v10419_v40, %v5333_v16  ;;  %v5171_v49 = vpop.f32.mrf.mxu2 }
 0xa1b   :  { %v5398_v30 = vmul.f32 0.8, %v11251_v55  ;;  %v5539_v39 = vpack.c.bf16 %v5171_v49, %v5169_v21  ;;  %v5431_v21 = vmul.f32 0.2, %v12302_v31 }
 0xa1c   :  { %11252 = vtanh.f32 %v5367_v27 }
 0xa1d   :  { %v12456_v44 = vadd.f32 %v5430_v15, %v5398_v30  ;;  %5619 = vmatmul.bf16.vlgmr.msrb.gmra.mxu0 %v5539_v39  ;;  %v10424_v15 = vunpack.c.h.bf16 %v10852_v17 }
 0xa1f   :  { %v10449_v13 = vpack.c.bf16 %v12456_v44, %v12454_v29 }
 0xa21   :  { %10857 = vst [vmem:[#allocation3 + $0x8] sm:$0xff] %v10449_v13   ;;  %v5335_v48 = vpop.f32.mrf.mxu3 }
 0xa22   :  { %v5368_v41 = vadd.f32 %v10420_v35, %v5335_v48  ;;  %v5174_v53 = vpop.f32.mrf.mxu2  ;;  %v11253_v51 = vpop.eup %11252  ;;  %v10853_v35 = vld [vmem:[#allocation4 + $0x160] sm:$0xff]  }
 0xa23   :  { %v5399_v10 = vmul.f32 0.8, %v11253_v51  ;;  %v10427_v13 = vunpack.c.l.bf16 %v10853_v35 }
 0xa24   :  { %11254 = vtanh.f32 %v5368_v41 }
 0xa25   :  { %v12462_v55 = vadd.f32 %v5431_v21, %v5399_v10 }
 0xa28   :  { %v9730_v56 = vld [vmem:[#allocation3 + $0x8] sm:$0xff] }
 0xa29   :  { %v5338_v61 = vpop.f32.mrf.mxu3  ;;  %5769 = vmatmul.bf16.gmra.mxu1 %v9730_v56  ;;  %v5434_v56 = vmul.f32 0.2, %v12312_v38 }
 0xa2a   :  { %v11255_v40 = vpop.eup %11254  ;;  %v5369_v9 = vadd.f32 %v10423_v5, %v5338_v61  ;;  %v5176_v16 = vpop.f32.mrf.mxu2 }
 0xa2b   :  { %v5400_v62 = vmul.f32 0.8, %v11255_v40  ;;  %v5540_v30 = vpack.c.bf16 %v5176_v16, %v5174_v53  ;;  %v5433_v53 = vmul.f32 0.2, %v12310_v19 }
 0xa2c   :  { %11256 = vtanh.f32 %v5369_v9 }
 0xa2d   :  { %v12464_v1 = vadd.f32 %v5432_v22, %v5400_v62  ;;  %5624 = vmatmul.bf16.gmra.mxu0 %v5540_v30  ;;  %v10428_v22 = vunpack.c.h.bf16 %v10853_v35 }
 0xa2f   :  { %v10454_v27 = vpack.c.bf16 %v12464_v1, %v12462_v55 }
 0xa31   :  { %10858 = vst [vmem:[#allocation3 + $0x10] sm:$0xff] %v10454_v27   ;;  %v5340_v49 = vpop.f32.mrf.mxu3 }
 0xa32   :  { %v5370_v39 = vadd.f32 %v10424_v15, %v5340_v49  ;;  %v5179_v31 = vpop.f32.mrf.mxu2  ;;  %v11257_v45 = vpop.eup %11256  ;;  %v10854_v15 = vld [vmem:[#allocation4 + $0x168] sm:$0xff]  }
 0xa33   :  { %v5401_v41 = vmul.f32 0.8, %v11257_v45  ;;  %v10431_v27 = vunpack.c.l.bf16 %v10854_v15 }
 0xa34   :  { %11258 = vtanh.f32 %v5370_v39 }
 0xa35   :  { %v12470_v40 = vadd.f32 %v5433_v53, %v5401_v41 }
 0xa38   :  { %v9731_v48 = vld [vmem:[#allocation3 + $0x10] sm:$0xff] }
 0xa39   :  { %v5343_v51 = vpop.f32.mrf.mxu3  ;;  %5774 = vmatmul.bf16.gmra.mxu1 %v9731_v48  ;;  %v5436_v48 = vmul.f32 0.2, %v12320_v32 }
 0xa3a   :  { %v11259_v5 = vpop.eup %11258  ;;  %v5371_v10 = vadd.f32 %v10427_v13, %v5343_v51  ;;  %v5181_v61 = vpop.f32.mrf.mxu2 }
 0xa3b   :  { %v5402_v17 = vmul.f32 0.8, %v11259_v5  ;;  %v5541_v62 = vpack.c.bf16 %v5181_v61, %v5179_v31  ;;  %v5435_v31 = vmul.f32 0.2, %v12318_v8 }
 0xa3c   :  { %11260 = vtanh.f32 %v5371_v10 }
 0xa3d   :  { %v12472_v21 = vadd.f32 %v5434_v56, %v5402_v17  ;;  %5629 = vmatmul.bf16.gmra.mxu0 %v5541_v62  ;;  %v10432_v56 = vunpack.c.h.bf16 %v10854_v15 }
 0xa3f   :  { %v10459_v9 = vpack.c.bf16 %v12472_v21, %v12470_v40 }
 0xa41   :  { %10859 = vst [vmem:[#allocation3 + $0x18] sm:$0xff] %v10459_v9   ;;  %v5345_v16 = vpop.f32.mrf.mxu3 }
 0xa42   :  { %v5372_v30 = vadd.f32 %v10428_v22, %v5345_v16  ;;  %v5184_v19 = vpop.f32.mrf.mxu2  ;;  %v11261_v38 = vpop.eup %11260  ;;  %v10855_v22 = vld [vmem:[#allocation4 + $0x170] sm:$0xff]  }
 0xa43   :  { %v5403_v39 = vmul.f32 0.8, %v11261_v38  ;;  %v10435_v9 = vunpack.c.l.bf16 %v10855_v22 }
 0xa44   :  { %11262 = vtanh.f32 %v5372_v30 }
 0xa45   :  { %v12478_v5 = vadd.f32 %v5435_v31, %v5403_v39 }
 0xa48   :  { %v9732_v49 = vld [vmem:[#allocation3 + $0x18] sm:$0xff] }
 0xa49   :  { %v5348_v45 = vpop.f32.mrf.mxu3  ;;  %5779 = vmatmul.bf16.gmra.mxu1 %v9732_v49  ;;  %v5438_v49 = vmul.f32 0.2, %v12328_v4 }
 0xa4a   :  { %v11263_v13 = vpop.eup %11262  ;;  %v5373_v41 = vadd.f32 %v10431_v27, %v5348_v45  ;;  %v5186_v51 = vpop.f32.mrf.mxu2 }
 0xa4b   :  { %v5404_v35 = vmul.f32 0.8, %v11263_v13  ;;  %v5542_v17 = vpack.c.bf16 %v5186_v51, %v5184_v19  ;;  %v5437_v19 = vmul.f32 0.2, %v12326_v37 }
 0xa4c   :  { %11264 = vtanh.f32 %v5373_v41 }
 0xa4d   :  { %v12480_v53 = vadd.f32 %v5436_v48, %v5404_v35  ;;  %5634 = vmatmul.bf16.gmra.mxu0 %v5542_v17  ;;  %v10436_v48 = vunpack.c.h.bf16 %v10855_v22 }
 0xa4f   :  { %v10464_v10 = vpack.c.bf16 %v12480_v53, %v12478_v5 }
 0xa51   :  { %10860 = vst [vmem:[#allocation3 + $0x20] sm:$0xff] %v10464_v10   ;;  %v5350_v61 = vpop.f32.mrf.mxu3 }
 0xa52   :  { %v5374_v62 = vadd.f32 %v10432_v56, %v5350_v61  ;;  %v5189_v8 = vpop.f32.mrf.mxu2  ;;  %v11265_v32 = vpop.eup %11264  ;;  %v10856_v56 = vld [vmem:[#allocation4 + $0x178] sm:$0xff]  }
 0xa53   :  { %v5405_v30 = vmul.f32 0.8, %v11265_v32  ;;  %v10439_v10 = vunpack.c.l.bf16 %v10856_v56 }
 0xa54   :  { %11266 = vtanh.f32 %v5374_v62 }
 0xa55   :  { %v12486_v13 = vadd.f32 %v5437_v19, %v5405_v30 }
 0xa58   :  { %v9733_v16 = vld [vmem:[#allocation3 + $0x20] sm:$0xff] }
 0xa59   :  { %v5353_v38 = vpop.f32.mrf.mxu3  ;;  %5784 = vmatmul.bf16.gmra.mxu1 %v9733_v16  ;;  %v5440_v16 = vmul.f32 0.2, %v12336_v43 }
 0xa5a   :  { %v11267_v27 = vpop.eup %11266  ;;  %v5375_v39 = vadd.f32 %v10435_v9, %v5353_v38  ;;  %v5191_v45 = vpop.f32.mrf.mxu2 }
 0xa5b   :  { %v5406_v15 = vmul.f32 0.8, %v11267_v27  ;;  %v5543_v35 = vpack.c.bf16 %v5191_v45, %v5189_v8  ;;  %v5439_v8 = vmul.f32 0.2, %v12334_v36 }
 0xa5c   :  { %11268 = vtanh.f32 %v5375_v39 }
 0xa5d   :  { %v12488_v31 = vadd.f32 %v5438_v49, %v5406_v15  ;;  %5639 = vmatmul.bf16.gmra.mxu0 %v5543_v35  ;;  %v10440_v49 = vunpack.c.h.bf16 %v10856_v56 }
 0xa5f   :  { %v10469_v41 = vpack.c.bf16 %v12488_v31, %v12486_v13 }
 0xa61   :  { %10861 = vst [vmem:[#allocation3 + $0x28] sm:$0xff] %v10469_v41   ;;  %v5355_v51 = vpop.f32.mrf.mxu3 }
 0xa62   :  { %v5376_v17 = vadd.f32 %v10436_v48, %v5355_v51  ;;  %v5194_v37 = vpop.f32.mrf.mxu2  ;;  %v11269_v4 = vpop.eup %11268 }
 0xa63   :  { %v5407_v62 = vmul.f32 0.8, %v11269_v4 }
 0xa64   :  { %11270 = vtanh.f32 %v5376_v17  ;;  %v5441_v17 = vmul.f32 0.2, %v12342_v25 }
 0xa65   :  { %v12494_v27 = vadd.f32 %v5439_v8, %v5407_v62 }
 0xa68   :  { %v9734_v61 = vld [vmem:[#allocation3 + $0x28] sm:$0xff] }
 0xa69   :  { %v5358_v32 = vpop.f32.mrf.mxu3  ;;  %5789 = vmatmul.bf16.gmra.mxu1 %v9734_v61 }
 0xa6a   :  { %v11271_v9 = vpop.eup %11270  ;;  %v5377_v30 = vadd.f32 %v10439_v10, %v5358_v32  ;;  %v5196_v38 = vpop.f32.mrf.mxu2 }
 0xa6b   :  { %v5408_v22 = vmul.f32 0.8, %v11271_v9  ;;  %v5544_v15 = vpack.c.bf16 %v5196_v38, %v5194_v37  ;;  %v5442_v37 = vmul.f32 0.2, %v12344_v54  ;;  %v9758_v54 = vld [vmem:[#allocation3 + $0x28] sm:$0xff]  ;;  %v9757_v38 = vld [vmem:[#allocation3 + $0x20] sm:$0xff] }
 0xa6c   :  { %11272 = vtanh.f32 %v5377_v30 }
 0xa6d   :  { %v12496_v19 = vadd.f32 %v5440_v16, %v5408_v22  ;;  %5644 = vmatmul.bf16.gmra.mxu0 %v5544_v15 }
 0xa6f   :  { %v10474_v39 = vpack.c.bf16 %v12496_v19, %v12494_v27 }
 0xa71   :  { %10862 = vst [vmem:[#allocation3 + $0x30] sm:$0xff] %v10474_v39   ;;  %v5360_v45 = vpop.f32.mrf.mxu3 }
 0xa72   :  { %v5378_v35 = vadd.f32 %v10440_v49, %v5360_v45  ;;  %v5199_v36 = vpop.f32.mrf.mxu2  ;;  %v11273_v48 = vpop.eup %11272  ;;  %v9756_v49 = vld [vmem:[#allocation3 + $0x18] sm:$0xff]  ;;  %v9755_v45 = vld [vmem:[#allocation3 + $0x10] sm:$0xff] }
 0xa73   :  { %v5409_v41 = vmul.f32 0.8, %v11273_v48  ;;  %v9754_v48 = vld [vmem:[#allocation3 + $0x8] sm:$0xff] }
 0xa74   :  { %11274 = vtanh.f32 %v5378_v35 }
 0xa75   :  { %v12502_v10 = vadd.f32 %v5441_v17, %v5409_v41  ;;  %v9753_v41 = vld [vmem:[#allocation3] sm:$0xff] }
 0xa78   :  { %v9735_v43 = vld [vmem:[#allocation3 + $0x30] sm:$0xff] }
 0xa79   :  { %5794 = vmatmul.bf16.gmra.mxu1 %v9735_v43  ;;  %v9759_v16 = vld [vmem:[#allocation3 + $0x30] sm:$0xff] }
 0xa7a   :  { %v11275_v51 = vpop.eup %11274  ;;  %v5201_v56 = vpop.f32.mrf.mxu2 }
 0xa7b   :  { %v5410_v4 = vmul.f32 0.8, %v11275_v51  ;;  %v5545_v62 = vpack.c.bf16 %v5201_v56, %v5199_v36 }
 0xa7d   :  { %v12504_v61 = vadd.f32 %v5442_v37, %v5410_v4  ;;  %5649 = vmatmul.bf16.gmra.mxu0 %v5545_v62 }
 0xa7f   :  { %v10479_v32 = vpack.c.bf16 %v12504_v61, %v12502_v10 }
 0xa81   :  { %10863 = vst [vmem:[#allocation3 + $0x38] sm:$0xff] %v10479_v32   ;;  %v5853_v32 = vmul.f32 0.2, %v12353_v50 }
 0xa82   :  { %v5204_v9 = vpop.f32.mrf.mxu2 }
 0xa88   :  { %v9736_v8 = vld [vmem:[#allocation3 + $0x38] sm:$0xff] }
 0xa89   :  { %v9760_v22 = vld [vmem:[#allocation3 + $0x38] sm:$0xff]  ;;  %5799 = vmatmul.bf16.gmra.mxu1 %v9736_v8  ;;  %v5854_v8 = vmul.f32 0.2, %v12355_v3 }
 0xa8a   :  { %5997 = vmatpush.bf16.msrb.mxu2 %v9760_v22  ;;  %v5206_v25 = vpop.f32.mrf.mxu2 }
 0xa8b   :  { %v5546_v30 = vpack.c.bf16 %v5206_v25, %v5204_v9 }
 0xa8d   :  { %5654 = vmatmul.bf16.gmra.mxu0 %v5546_v30 }
 0xa8e   :  { %5998 = vmatpush.bf16.msrb.mxu2 %v9759_v16 }
 0xa92   :  { %5999 = vmatpush.bf16.msrb.mxu2 %v9758_v54 }
 0xa96   :  { %6000 = vmatpush.bf16.msrb.mxu2 %v9757_v38  ;;  %v5765_v15 = vpop.f32.mrf.mxu1 }
 0xa9a   :  { %6001 = vmatpush.bf16.msrb.mxu2 %v9756_v49  ;;  %v5620_v39 = vpop.f32.mrf.mxu0 }
 0xa9b   :  { %v5766_v35 = vadd.f32 %v5765_v15, %v5620_v39 }
 0xa9d   :  { %11276 = vtanh.f32 %v5766_v35 }
 0xa9e   :  { %6002 = vmatpush.bf16.msrb.mxu2 %v9755_v45  ;;  %v5767_v36 = vpop.f32.mrf.mxu1  ;;  %v5855_v45 = vmul.f32 0.2, %v12364_v57 }
 0xaa2   :  { %6003 = vmatpush.bf16.msrb.mxu2 %v9754_v48  ;;  %v5622_v43 = vpop.f32.mrf.mxu0 }
 0xaa3   :  { %v5768_v51 = vadd.f32 %v5767_v36, %v5622_v43  ;;  %v11277_v4 = vpop.eup %11276  ;;  %v5856_v36 = vmul.f32 0.2, %v12366_v34 }
 0xaa4   :  { %v5821_v37 = vmul.f32 0.8, %v11277_v4 }
 0xaa5   :  { %11278 = vtanh.f32 %v5768_v51 }
 0xaa6   :  { %6004 = vmatpush.bf16.msrb.mxu2 %v9753_v41  ;;  %v5770_v17 = vpop.f32.mrf.mxu1  ;;  %v12511_v16 = vadd.f32 %v5853_v32, %v5821_v37  ;;  %v5857_v32 = vmul.f32 0.2, %v12375_v24 }
 0xaa9   :  { %6005 = vmatmul.bf16.vlgmr.msrb.gmra.mxu2 %v12348_v47 }
 0xaaa   :  { %v5625_v56 = vpop.f32.mrf.mxu0 }
 0xaab   :  { %v11279_v62 = vpop.eup %11278  ;;  %v5771_v22 = vadd.f32 %v5770_v17, %v5625_v56 }
 0xaac   :  { %v5822_v9 = vmul.f32 0.8, %v11279_v62 }
 0xaad   :  { %11280 = vtanh.f32 %v5771_v22 }
 0xaae   :  { %v5772_v25 = vpop.f32.mrf.mxu1  ;;  %v12513_v30 = vadd.f32 %v5854_v8, %v5822_v9  ;;  %v5858_v8 = vmul.f32 0.2, %v12377_v59 }
 0xab0   :  { %v10484_v54 = vpack.c.bf16 %v12513_v30, %v12511_v16 }
 0xab2   :  { %10485 = vst [vmem:[#allocation3 + $0x40] sm:$0xff] %v10484_v54   ;;  %v5627_v47 = vpop.f32.mrf.mxu0 }
 0xab3   :  { %v5773_v38 = vadd.f32 %v5772_v25, %v5627_v47  ;;  %v11281_v49 = vpop.eup %11280 }
 0xab4   :  { %v5823_v50 = vmul.f32 0.8, %v11281_v49 }
 0xab5   :  { %11282 = vtanh.f32 %v5773_v38 }
 0xab6   :  { %v5775_v15 = vpop.f32.mrf.mxu1  ;;  %v12520_v41 = vadd.f32 %v5855_v45, %v5823_v50 }
 0xab9   :  { %6010 = vmatmul.bf16.gmra.mxu2 %v12359_v6 }
 0xaba   :  { %v5630_v3 = vpop.f32.mrf.mxu0 }
 0xabb   :  { %v11283_v39 = vpop.eup %11282  ;;  %v5776_v48 = vadd.f32 %v5775_v15, %v5630_v3 }
 0xabc   :  { %v5824_v35 = vmul.f32 0.8, %v11283_v39  ;;  %v5859_v39 = vmul.f32 0.2, %v12386_v0 }
 0xabd   :  { %11284 = vtanh.f32 %v5776_v48 }
 0xabe   :  { %v5777_v43 = vpop.f32.mrf.mxu1  ;;  %v12522_v51 = vadd.f32 %v5856_v36, %v5824_v35  ;;  %v5860_v35 = vmul.f32 0.2, %v12388_v12 }
 0xac0   :  { %v10489_v17 = vpack.c.bf16 %v12522_v51, %v12520_v41 }
 0xac2   :  { %10864 = vst [vmem:[#allocation3 + $0x48] sm:$0xff] %v10489_v17   ;;  %v5632_v6 = vpop.f32.mrf.mxu0 }
 0xac3   :  { %v5778_v4 = vadd.f32 %v5777_v43, %v5632_v6  ;;  %v11285_v56 = vpop.eup %11284 }
 0xac4   :  { %v5825_v57 = vmul.f32 0.8, %v11285_v56 }
 0xac5   :  { %11286 = vtanh.f32 %v5778_v4 }
 0xac6   :  { %v5780_v37 = vpop.f32.mrf.mxu1  ;;  %v12529_v54 = vadd.f32 %v5857_v32, %v5825_v57  ;;  %v5862_v32 = vmul.f32 0.2, %v12399_v26  ;;  %v9775_v26 = vld [vmem:[#allocation9 + $0x30] sm:$0xff] }
 0xac9   :  { %6015 = vmatmul.bf16.gmra.mxu2 %v12370_v52 }
 0xaca   :  { %v5635_v34 = vpop.f32.mrf.mxu0 }
 0xacb   :  { %v11287_v62 = vpop.eup %11286  ;;  %v5781_v22 = vadd.f32 %v5780_v37, %v5635_v34  ;;  %v5861_v34 = vmul.f32 0.2, %v12397_v58 }
 0xacc   :  { %v5826_v9 = vmul.f32 0.8, %v11287_v62 }
 0xacd   :  { %11288 = vtanh.f32 %v5781_v22 }
 0xace   :  { %v5782_v25 = vpop.f32.mrf.mxu1  ;;  %v12531_v47 = vadd.f32 %v5858_v8, %v5826_v9 }
 0xad0   :  { %v10494_v38 = vpack.c.bf16 %v12531_v47, %v12529_v54 }
 0xad2   :  { %10865 = vst [vmem:[#allocation3 + $0x50] sm:$0xff] %v10494_v38   ;;  %v5637_v52 = vpop.f32.mrf.mxu0 }
 0xad3   :  { %v5783_v15 = vadd.f32 %v5782_v25, %v5637_v52  ;;  %v11289_v50 = vpop.eup %11288 }
 0xad4   :  { %v5827_v24 = vmul.f32 0.8, %v11289_v50 }
 0xad5   :  { %11290 = vtanh.f32 %v5783_v15  ;;  %v9776_v15 = vld [vmem:[#allocation9 + $0x38] sm:$0xff] }
 0xad6   :  { %v5785_v49 = vpop.f32.mrf.mxu1  ;;  %v12538_v43 = vadd.f32 %v5859_v39, %v5827_v24  ;;  %6264 = vmatpush.bf16.msra.mxu0 %v9776_v15 }
 0xad9   :  { %6020 = vmatmul.bf16.gmra.mxu2 %v12381_v11 }
 0xada   :  { %v5640_v59 = vpop.f32.mrf.mxu0  ;;  %6265 = vmatpush.bf16.msra.mxu0 %v9775_v26 }
 0xadb   :  { %v11291_v3 = vpop.eup %11290  ;;  %v5786_v36 = vadd.f32 %v5785_v49, %v5640_v59 }
 0xadc   :  { %v5828_v45 = vmul.f32 0.8, %v11291_v3  ;;  %v5863_v3 = vmul.f32 0.2, %v12408_v28  ;;  %v9772_v28 = vld [vmem:[#allocation9 + $0x18] sm:$0xff] }
 0xadd   :  { %11292 = vtanh.f32 %v5786_v36 }
 0xade   :  { %v5787_v48 = vpop.f32.mrf.mxu1  ;;  %v12540_v17 = vadd.f32 %v5860_v35, %v5828_v45  ;;  %v5864_v45 = vmul.f32 0.2, %v12410_v23  ;;  %v9774_v35 = vld [vmem:[#allocation9 + $0x28] sm:$0xff] }
 0xadf   :  { %6266 = vmatpush.bf16.msra.mxu0 %v9774_v35 }
 0xae0   :  { %v10499_v6 = vpack.c.bf16 %v12540_v17, %v12538_v43 }
 0xae2   :  { %10866 = vst [vmem:[#allocation3 + $0x58] sm:$0xff] %v10499_v6   ;;  %v5642_v11 = vpop.f32.mrf.mxu0 }
 0xae3   :  { %v5788_v4 = vadd.f32 %v5787_v48, %v5642_v11  ;;  %v11293_v56 = vpop.eup %11292 }
 0xae4   :  { %v5829_v0 = vmul.f32 0.8, %v11293_v56 }
 0xae5   :  { %11294 = vtanh.f32 %v5788_v4  ;;  %v9773_v4 = vld [vmem:[#allocation9 + $0x20] sm:$0xff] }
 0xae6   :  { %v5790_v37 = vpop.f32.mrf.mxu1  ;;  %v12547_v22 = vadd.f32 %v5861_v34, %v5829_v0  ;;  %6267 = vmatpush.bf16.msra.mxu0 %v9773_v4 }
 0xae9   :  { %6025 = vmatmul.bf16.gmra.mxu2 %v12392_v2 }
 0xaea   :  { %v5645_v12 = vpop.f32.mrf.mxu0  ;;  %6268 = vmatpush.bf16.msra.mxu0 %v9772_v28 }
 0xaeb   :  { %v11295_v57 = vpop.eup %11294  ;;  %v5791_v9 = vadd.f32 %v5790_v37, %v5645_v12  ;;  %v9771_v12 = vld [vmem:[#allocation9 + $0x10] sm:$0xff] }
 0xaec   :  { %v5830_v62 = vmul.f32 0.8, %v11295_v57 }
 0xaed   :  { %11296 = vtanh.f32 %v5791_v9  ;;  %v5865_v9 = vmul.f32 0.2, %v12419_v14 }
 0xaee   :  { %v5792_v8 = vpop.f32.mrf.mxu1  ;;  %v12549_v25 = vadd.f32 %v5862_v32, %v5830_v62  ;;  %6269 = vmatpush.bf16.msra.mxu0 %v9771_v12  ;;  %v9770_v32 = vld [vmem:[#allocation9 + $0x8] sm:$0xff] }
 0xaf0   :  { %v10504_v38 = vpack.c.bf16 %v12549_v25, %v12547_v22 }
 0xaf2   :  { %10867 = vst [vmem:[#allocation3 + $0x60] sm:$0xff] %v10504_v38   ;;  %v5647_v2 = vpop.f32.mrf.mxu0  ;;  %v5866_v38 = vmul.f32 0.2, %v12421_v63  ;;  %6270 = vmatpush.bf16.msra.mxu0 %v9770_v32  ;;  %v12580_v32 = vld [vmem:[#allocation7] sm:$0xff] }
 0xaf3   :  { %v5793_v52 = vadd.f32 %v5792_v8, %v5647_v2  ;;  %v11297_v58 = vpop.eup %11296 }
 0xaf4   :  { %v5831_v50 = vmul.f32 0.8, %v11297_v58 }
 0xaf5   :  { %11298 = vtanh.f32 %v5793_v52 }
 0xaf6   :  { %v5795_v49 = vpop.f32.mrf.mxu1  ;;  %v12556_v48 = vadd.f32 %v5863_v3, %v5831_v50 }
 0xaf9   :  { %6030 = vmatmul.bf16.gmra.mxu2 %v12403_v46 }
 0xafa   :  { %v5650_v24 = vpop.f32.mrf.mxu0 }
 0xafb   :  { %v11299_v59 = vpop.eup %11298  ;;  %v5796_v36 = vadd.f32 %v5795_v49, %v5650_v24  ;;  %v9769_v49 = vld [vmem:[#allocation9] sm:$0xff] }
 0xafc   :  { %v5832_v39 = vmul.f32 0.8, %v11299_v59  ;;  %6271 = vmatpush.bf16.msra.mxu0 %v9769_v49  ;;  %v5867_v59 = vmul.f32 0.2, %v12430_v42  ;;  %v9765_v42 = vld [vmem:[#allocation3 + $0x60] sm:$0xff] }
 0xafd   :  { %11300 = vtanh.f32 %v5796_v36 }
 0xafe   :  { %v12558_v6 = vadd.f32 %v5864_v45, %v5832_v39  ;;  %v5797_v11 = vpop.f32.mrf.mxu1  ;;  %v5868_v39 = vmul.f32 0.2, %v12432_v33  ;;  %v9764_v33 = vld [vmem:[#allocation3 + $0x58] sm:$0xff] }
 0xb00   :  { %v10509_v46 = vpack.c.bf16 %v12558_v6, %v12556_v48 }
 0xb02   :  { %10868 = vst [vmem:[#allocation3 + $0x68] sm:$0xff] %v10509_v46   ;;  %v5652_v37 = vpop.f32.mrf.mxu0 }
 0xb03   :  { %v5798_v56 = vadd.f32 %v5797_v11, %v5652_v37  ;;  %v11301_v23 = vpop.eup %11300 }
 0xb04   :  { %v5833_v57 = vmul.f32 0.8, %v11301_v23  ;;  %v9763_v23 = vld [vmem:[#allocation3 + $0x50] sm:$0xff] }
 0xb05   :  { %11302 = vtanh.f32 %v5798_v56 }
 0xb06   :  { %v5800_v0 = vpop.f32.mrf.mxu1  ;;  %v12565_v52 = vadd.f32 %v5865_v9, %v5833_v57 }
 0xb09   :  { %6035 = vmatmul.bf16.gmra.mxu2 %v12414_v7 }
 0xb0a   :  { %v5655_v34 = vpop.f32.mrf.mxu0 }
 0xb0b   :  { %v11303_v62 = vpop.eup %11302  ;;  %v5801_v2 = vadd.f32 %v5800_v0, %v5655_v34  ;;  %v9762_v0 = vld [vmem:[#allocation3 + $0x48] sm:$0xff]  ;;  %v9761_v34 = vld [vmem:[#allocation3 + $0x40] sm:$0xff] }
 0xb0c   :  { %v5834_v8 = vmul.f32 0.8, %v11303_v62 }
 0xb0d   :  { %11304 = vtanh.f32 %v5801_v2  ;;  %v12583_v2 = vld [vmem:[#allocation7 + $0x8] sm:$0xff] }
 0xb0e   :  { %v12567_v15 = vadd.f32 %v5866_v38, %v5834_v8  ;;  %v5802_v58 = vpop.f32.mrf.mxu1 }
 0xb10   :  { %v10514_v7 = vpack.c.bf16 %v12567_v15, %v12565_v52 }
 0xb12   :  { %10869 = vst [vmem:[#allocation3 + $0x70] sm:$0xff] %v10514_v7   ;;  %v5657_v26 = vpop.f32.mrf.mxu0 }
 0xb13   :  { %v5803_v50 = vadd.f32 %v5802_v58, %v5657_v26  ;;  %v11305_v14 = vpop.eup %11304  ;;  %v12586_v26 = vld [vmem:[#allocation7 + $0x10] sm:$0xff] }
 0xb14   :  { %v5835_v63 = vmul.f32 0.8, %v11305_v14 }
 0xb15   :  { %11306 = vtanh.f32 %v5803_v50 }
 0xb16   :  { %v12574_v45 = vadd.f32 %v5867_v59, %v5835_v63 }
 0xb19   :  { %6040 = vmatmul.bf16.gmra.mxu2 %v12425_v18  ;;  %v9767_v4 = vld [vmem:[#allocation3 + $0x70] sm:$0xff]  ;;  %v9766_v18 = vld [vmem:[#allocation3 + $0x68] sm:$0xff] }
 0xb1b   :  { %v11307_v24 = vpop.eup %11306 }
 0xb1c   :  { %v5836_v3 = vmul.f32 0.8, %v11307_v24  ;;  %v12589_v24 = vld [vmem:[#allocation7 + $0x18] sm:$0xff] }
 0xb1e   :  { %v12576_v35 = vadd.f32 %v5868_v39, %v5836_v3 }
 0xb20   :  { %v10519_v36 = vpack.c.bf16 %v12576_v35, %v12574_v45 }
 0xb22   :  { %10870 = vst [vmem:[#allocation3 + $0x78] sm:$0xff] %v10519_v36   ;;  %v12592_v36 = vld [vmem:[#allocation7 + $0x20] sm:$0xff] }
 0xb29   :  { %v9768_v11 = vld [vmem:[#allocation3 + $0x78] sm:$0xff] }
 0xb2a   :  { %6110 = vmatpush.bf16.msrb.mxu3 %v9768_v11 }
 0xb2c   :  { %v6006_v46 = vpop.f32.mrf.mxu2 }
 0xb2e   :  { %6111 = vmatpush.bf16.msrb.mxu3 %v9767_v4 }
 0xb32   :  { %6112 = vmatpush.bf16.msrb.mxu3 %v9766_v18  ;;  %v9791_v18 = vld [vmem:[#allocation10 + $0x30] sm:$0xff] }
 0xb34   :  { %v6008_v37 = vpop.f32.mrf.mxu2 }
 0xb35   :  { %v6192_v28 = vpack.c.bf16 %v6008_v37, %v6006_v46  ;;  %v9792_v46 = vld [vmem:[#allocation10 + $0x38] sm:$0xff] }
 0xb36   :  { %6113 = vmatpush.bf16.msrb.mxu3 %v9765_v42  ;;  %6706 = vmatpush.bf16.msra.mxu2 %v9792_v46  ;;  %v9800_v37 = vld [vmem:[#allocation12 + $0x38] sm:$0xff]  ;;  %v12595_v42 = vld [vmem:[#allocation7 + $0x28] sm:$0xff] }
 0xb37   :  { %6272 = vmatmul.bf16.vlgmr.msra.gmra.mxu0 %v6192_v28  ;;  %6561 = vmatpush.bf16.msra.mxu1 %v9800_v37  ;;  %v10871_v37 = vld [vmem:[#allocation4 + $0x188] sm:$0xff]  }
 0xb3a   :  { %6114 = vmatpush.bf16.msrb.mxu3 %v9764_v33  ;;  %6707 = vmatpush.bf16.msra.mxu2 %v9791_v18  ;;  %v9790_v33 = vld [vmem:[#allocation10 + $0x28] sm:$0xff] }
 0xb3c   :  { %v6011_v56 = vpop.f32.mrf.mxu2 }
 0xb3e   :  { %6115 = vmatpush.bf16.msrb.mxu3 %v9763_v23  ;;  %6708 = vmatpush.bf16.msra.mxu2 %v9790_v33  ;;  %v9789_v23 = vld [vmem:[#allocation10 + $0x20] sm:$0xff]  ;;  %v10527_v33 = vunpack.c.l.bf16 %v10871_v37 }
 0xb42   :  { %6116 = vmatpush.bf16.msrb.mxu3 %v9762_v0  ;;  %6709 = vmatpush.bf16.msra.mxu2 %v9789_v23  ;;  %v9798_v0 = vld [vmem:[#allocation12 + $0x28] sm:$0xff] }
 0xb44   :  { %v6013_v12 = vpop.f32.mrf.mxu2 }
 0xb45   :  { %v6193_v57 = vpack.c.bf16 %v6013_v12, %v6011_v56  ;;  %v9799_v56 = vld [vmem:[#allocation12 + $0x30] sm:$0xff] }
 0xb46   :  { %6117 = vmatpush.bf16.msrb.mxu3 %v9761_v34  ;;  %6562 = vmatpush.bf16.msra.mxu1 %v9799_v56 }
 0xb47   :  { %6277 = vmatmul.bf16.gmra.mxu0 %v6193_v57  ;;  %v9788_v57 = vld [vmem:[#allocation10 + $0x18] sm:$0xff] }
 0xb48   :  { %6710 = vmatpush.bf16.msra.mxu2 %v9788_v57 }
 0xb49   :  { %6118 = vmatmul.bf16.vlgmr.msrb.gmra.mxu3 %v12580_v32 }
 0xb4a   :  { %6563 = vmatpush.bf16.msra.mxu1 %v9798_v0 }
 0xb4c   :  { %v6016_v62 = vpop.f32.mrf.mxu2 }
 0xb54   :  { %v6018_v9 = vpop.f32.mrf.mxu2 }
 0xb55   :  { %v6194_v8 = vpack.c.bf16 %v6018_v9, %v6016_v62  ;;  %v9797_v62 = vld [vmem:[#allocation12 + $0x20] sm:$0xff]  ;;  %v9787_v9 = vld [vmem:[#allocation10 + $0x10] sm:$0xff] }
 0xb56   :  { %6564 = vmatpush.bf16.msra.mxu1 %v9797_v62  ;;  %6711 = vmatpush.bf16.msra.mxu2 %v9787_v9 }
 0xb57   :  { %6282 = vmatmul.bf16.gmra.mxu0 %v6194_v8  ;;  %v9796_v8 = vld [vmem:[#allocation12 + $0x18] sm:$0xff] }
 0xb59   :  { %6123 = vmatmul.bf16.gmra.mxu3 %v12583_v2 }
 0xb5a   :  { %6565 = vmatpush.bf16.msra.mxu1 %v9796_v8 }
 0xb5c   :  { %v6021_v38 = vpop.f32.mrf.mxu2 }
 0xb64   :  { %v6023_v7 = vpop.f32.mrf.mxu2 }
 0xb65   :  { %v6195_v49 = vpack.c.bf16 %v6023_v7, %v6021_v38  ;;  %v12598_v38 = vld [vmem:[#allocation7 + $0x30] sm:$0xff]  ;;  %v9786_v7 = vld [vmem:[#allocation10 + $0x8] sm:$0xff] }
 0xb66   :  { %6712 = vmatpush.bf16.msra.mxu2 %v9786_v7  ;;  %v10528_v7 = vunpack.c.h.bf16 %v10871_v37  ;;  %v6380_v37 = vmul.f32 0.2, %v12456_v44 }
 0xb67   :  { %6287 = vmatmul.bf16.gmra.mxu0 %v6195_v49  ;;  %v9795_v49 = vld [vmem:[#allocation12 + $0x10] sm:$0xff] }
 0xb68   :  { %6566 = vmatpush.bf16.msra.mxu1 %v9795_v49 }
 0xb69   :  { %6128 = vmatmul.bf16.gmra.mxu3 %v12586_v26 }
 0xb6c   :  { %v6026_v58 = vpop.f32.mrf.mxu2 }
 0xb74   :  { %v6028_v50 = vpop.f32.mrf.mxu2 }
 0xb75   :  { %v6196_v14 = vpack.c.bf16 %v6028_v50, %v6026_v58  ;;  %v10522_v58 = vld [vmem:[#allocation4 + $0x180] sm:$0xff]  }
 0xb76   :  { %v9785_v50 = vld [vmem:[#allocation10] sm:$0xff] }
 0xb77   :  { %6292 = vmatmul.bf16.gmra.mxu0 %v6196_v14  ;;  %6713 = vmatpush.bf16.msra.mxu2 %v9785_v50  ;;  %v9794_v14 = vld [vmem:[#allocation12 + $0x8] sm:$0xff] }
 0xb78   :  { %6567 = vmatpush.bf16.msra.mxu1 %v9794_v14 }
 0xb79   :  { %6133 = vmatmul.bf16.gmra.mxu3 %v12589_v24 }
 0xb7c   :  { %v6031_v63 = vpop.f32.mrf.mxu2 }
 0xb84   :  { %v6033_v59 = vpop.f32.mrf.mxu2 }
 0xb85   :  { %v6197_v3 = vpack.c.bf16 %v6033_v59, %v6031_v63  ;;  %v10523_v63 = vunpack.c.l.bf16 %v10522_v58 }
 0xb87   :  { %6297 = vmatmul.bf16.gmra.mxu0 %v6197_v3  ;;  %v9793_v3 = vld [vmem:[#allocation12] sm:$0xff] }
 0xb88   :  { %6568 = vmatpush.bf16.msra.mxu1 %v9793_v3 }
 0xb89   :  { %6138 = vmatmul.bf16.gmra.mxu3 %v12592_v36 }
 0xb8c   :  { %v6036_v39 = vpop.f32.mrf.mxu2 }
 0xb94   :  { %v6038_v11 = vpop.f32.mrf.mxu2 }
 0xb95   :  { %v6198_v4 = vpack.c.bf16 %v6038_v11, %v6036_v39  ;;  %v10524_v11 = vunpack.c.h.bf16 %v10522_v58 }
 0xb97   :  { %6302 = vmatmul.bf16.gmra.mxu0 %v6198_v4  ;;  %v12601_v4 = vld [vmem:[#allocation7 + $0x38] sm:$0xff] }
 0xb99   :  { %6143 = vmatmul.bf16.gmra.mxu3 %v12595_v42 }
 0xb9c   :  { %v6041_v28 = vpop.f32.mrf.mxu2 }
 0xba4   :  { %v6043_v12 = vpop.f32.mrf.mxu2 }
 0xba5   :  { %v6199_v34 = vpack.c.bf16 %v6043_v12, %v6041_v28  ;;  %v6377_v12 = vmul.f32 0.2, %v12446_v20 }
 0xba7   :  { %6307 = vmatmul.bf16.gmra.mxu0 %v6199_v34  ;;  %v6378_v34 = vmul.f32 0.2, %v12448_v60 }
 0xba9   :  { %6148 = vmatmul.bf16.gmra.mxu3 %v12598_v38 }
 0xbb4   :  { %v6273_v59 = vpop.f32.mrf.mxu0 }
 0xbb5   :  { %v6313_v39 = vadd.f32 %v10523_v63, %v6273_v59  ;;  %v10872_v63 = vld [vmem:[#allocation4 + $0x190] sm:$0xff]  }
 0xbb6   :  { %v10531_v59 = vunpack.c.l.bf16 %v10872_v63 }
 0xbb7   :  { %11308 = vtanh.f32 %v6313_v39 }
 0xbb9   :  { %6153 = vmatmul.bf16.gmra.mxu3 %v12601_v4 }
 0xbbc   :  { %v6275_v46 = vpop.f32.mrf.mxu0 }
 0xbbd   :  { %v6314_v18 = vadd.f32 %v10524_v11, %v6275_v46  ;;  %v11309_v28 = vpop.eup %11308  ;;  %v6379_v46 = vmul.f32 0.2, %v12454_v29 }
 0xbbe   :  { %v6345_v56 = vmul.f32 0.8, %v11309_v28 }
 0xbbf   :  { %11310 = vtanh.f32 %v6314_v18 }
 0xbc0   :  { %v12606_v9 = vadd.f32 %v6377_v12, %v6345_v56  ;;  %v10532_v12 = vunpack.c.h.bf16 %v10872_v63 }
 0xbc4   :  { %v6278_v23 = vpop.f32.mrf.mxu0 }
 0xbc5   :  { %v11311_v0 = vpop.eup %11310  ;;  %v6315_v62 = vadd.f32 %v10527_v33, %v6278_v23 }
 0xbc6   :  { %v6346_v57 = vmul.f32 0.8, %v11311_v0 }
 0xbc7   :  { %11312 = vtanh.f32 %v6315_v62 }
 0xbc8   :  { %v12608_v8 = vadd.f32 %v6378_v34, %v6346_v57 }
 0xbca   :  { %v10556_v49 = vpack.c.bf16 %v12608_v8, %v12606_v9 }
 0xbcc   :  { %10557 = vst [vmem:[#allocation3] sm:$0xff] %v10556_v49   ;;  %v6280_v58 = vpop.f32.mrf.mxu0  ;;  %v6119_v14 = vpop.f32.mrf.mxu3 }
 0xbcd   :  { %v6316_v50 = vadd.f32 %v10528_v7, %v6280_v58  ;;  %v11313_v20 = vpop.eup %11312  ;;  %v10873_v7 = vld [vmem:[#allocation4 + $0x198] sm:$0xff]  }
 0xbce   :  { %v6347_v60 = vmul.f32 0.8, %v11313_v20  ;;  %v10535_v49 = vunpack.c.l.bf16 %v10873_v7 }
 0xbcf   :  { %11314 = vtanh.f32 %v6316_v50 }
 0xbd0   :  { %v12614_v56 = vadd.f32 %v6379_v46, %v6347_v60 }
 0xbd3   :  { %v9777_v3 = vld [vmem:[#allocation3] sm:$0xff] }
 0xbd4   :  { %v6283_v39 = vpop.f32.mrf.mxu0  ;;  %6714 = vmatmul.bf16.vlgmr.msra.gmra.mxu2 %v9777_v3  ;;  %v6121_v33 = vpop.f32.mrf.mxu3  ;;  %v6382_v3 = vmul.f32 0.2, %v12464_v1 }
 0xbd5   :  { %v11315_v11 = vpop.eup %11314  ;;  %v6317_v28 = vadd.f32 %v10531_v59, %v6283_v39  ;;  %v6489_v0 = vpack.c.bf16 %v6121_v33, %v6119_v14  ;;  %v6381_v14 = vmul.f32 0.2, %v12462_v55 }
 0xbd6   :  { %v6348_v18 = vmul.f32 0.8, %v11315_v11 }
 0xbd7   :  { %6569 = vmatmul.bf16.vlgmr.msra.gmra.mxu1 %v6489_v0  ;;  %11316 = vtanh.f32 %v6317_v28 }
 0xbd8   :  { %v12616_v23 = vadd.f32 %v6380_v37, %v6348_v18  ;;  %v10536_v37 = vunpack.c.h.bf16 %v10873_v7 }
 0xbda   :  { %v10561_v57 = vpack.c.bf16 %v12616_v23, %v12614_v56 }
 0xbdc   :  { %10878 = vst [vmem:[#allocation3 + $0x8] sm:$0xff] %v10561_v57   ;;  %v6285_v34 = vpop.f32.mrf.mxu0  ;;  %v6124_v29 = vpop.f32.mrf.mxu3 }
 0xbdd   :  { %v6318_v62 = vadd.f32 %v10532_v12, %v6285_v34  ;;  %v11317_v44 = vpop.eup %11316  ;;  %v10874_v12 = vld [vmem:[#allocation4 + $0x1a0] sm:$0xff]  }
 0xbde   :  { %v6349_v50 = vmul.f32 0.8, %v11317_v44  ;;  %v10539_v57 = vunpack.c.l.bf16 %v10874_v12 }
 0xbdf   :  { %11318 = vtanh.f32 %v6318_v62 }
 0xbe0   :  { %v12622_v11 = vadd.f32 %v6381_v14, %v6349_v50 }
 0xbe3   :  { %v9778_v58 = vld [vmem:[#allocation3 + $0x8] sm:$0xff] }
 0xbe4   :  { %v6288_v20 = vpop.f32.mrf.mxu0  ;;  %6719 = vmatmul.bf16.gmra.mxu2 %v9778_v58  ;;  %v6126_v39 = vpop.f32.mrf.mxu3  ;;  %v6384_v58 = vmul.f32 0.2, %v12472_v21 }
 0xbe5   :  { %v11319_v59 = vpop.eup %11318  ;;  %v6319_v60 = vadd.f32 %v10535_v49, %v6288_v20  ;;  %v6490_v18 = vpack.c.bf16 %v6126_v39, %v6124_v29  ;;  %v6383_v29 = vmul.f32 0.2, %v12470_v40 }
 0xbe6   :  { %v6350_v63 = vmul.f32 0.8, %v11319_v59 }
 0xbe7   :  { %6574 = vmatmul.bf16.gmra.mxu1 %v6490_v18  ;;  %11320 = vtanh.f32 %v6319_v60 }
 0xbe8   :  { %v12624_v46 = vadd.f32 %v6382_v3, %v6350_v63  ;;  %v10540_v3 = vunpack.c.h.bf16 %v10874_v12 }
 0xbea   :  { %v10566_v28 = vpack.c.bf16 %v12624_v46, %v12622_v11 }
 0xbec   :  { %10879 = vst [vmem:[#allocation3 + $0x10] sm:$0xff] %v10566_v28   ;;  %v6290_v33 = vpop.f32.mrf.mxu0  ;;  %v6129_v55 = vpop.f32.mrf.mxu3 }
 0xbed   :  { %v6320_v0 = vadd.f32 %v10536_v37, %v6290_v33  ;;  %v11321_v1 = vpop.eup %11320  ;;  %v10875_v37 = vld [vmem:[#allocation4 + $0x1a8] sm:$0xff]  }
 0xbee   :  { %v6351_v62 = vmul.f32 0.8, %v11321_v1  ;;  %v10543_v28 = vunpack.c.l.bf16 %v10875_v37 }
 0xbef   :  { %11322 = vtanh.f32 %v6320_v0 }
 0xbf0   :  { %v12630_v59 = vadd.f32 %v6383_v29, %v6351_v62 }
 0xbf3   :  { %v9779_v34 = vld [vmem:[#allocation3 + $0x10] sm:$0xff] }
 0xbf4   :  { %v6293_v44 = vpop.f32.mrf.mxu0  ;;  %6724 = vmatmul.bf16.gmra.mxu2 %v9779_v34  ;;  %v6131_v20 = vpop.f32.mrf.mxu3  ;;  %v6386_v34 = vmul.f32 0.2, %v12480_v53 }
 0xbf5   :  { %v11323_v49 = vpop.eup %11322  ;;  %v6321_v50 = vadd.f32 %v10539_v57, %v6293_v44  ;;  %v6491_v63 = vpack.c.bf16 %v6131_v20, %v6129_v55  ;;  %v6385_v55 = vmul.f32 0.2, %v12478_v5 }
 0xbf6   :  { %v6352_v7 = vmul.f32 0.8, %v11323_v49 }
 0xbf7   :  { %6579 = vmatmul.bf16.gmra.mxu1 %v6491_v63  ;;  %11324 = vtanh.f32 %v6321_v50 }
 0xbf8   :  { %v12632_v14 = vadd.f32 %v6384_v58, %v6352_v7  ;;  %v10544_v58 = vunpack.c.h.bf16 %v10875_v37 }
 0xbfa   :  { %v10571_v60 = vpack.c.bf16 %v12632_v14, %v12630_v59 }
 0xbfc   :  { %10880 = vst [vmem:[#allocation3 + $0x18] sm:$0xff] %v10571_v60   ;;  %v6295_v39 = vpop.f32.mrf.mxu0  ;;  %v6134_v40 = vpop.f32.mrf.mxu3 }
 0xbfd   :  { %v6322_v18 = vadd.f32 %v10540_v3, %v6295_v39  ;;  %v11325_v21 = vpop.eup %11324  ;;  %v10876_v3 = vld [vmem:[#allocation4 + $0x1b0] sm:$0xff]  }
 0xbfe   :  { %v6353_v0 = vmul.f32 0.8, %v11325_v21  ;;  %v10547_v60 = vunpack.c.l.bf16 %v10876_v3 }
 0xbff   :  { %11326 = vtanh.f32 %v6322_v18 }
 0xc00   :  { %v12638_v49 = vadd.f32 %v6385_v55, %v6353_v0 }
 0xc03   :  { %v9780_v33 = vld [vmem:[#allocation3 + $0x18] sm:$0xff] }
 0xc04   :  { %v6298_v1 = vpop.f32.mrf.mxu0  ;;  %6729 = vmatmul.bf16.gmra.mxu2 %v9780_v33  ;;  %v6136_v44 = vpop.f32.mrf.mxu3  ;;  %v6388_v33 = vmul.f32 0.2, %v12488_v31 }
 0xc05   :  { %v11327_v57 = vpop.eup %11326  ;;  %v6323_v62 = vadd.f32 %v10543_v28, %v6298_v1  ;;  %v6492_v7 = vpack.c.bf16 %v6136_v44, %v6134_v40  ;;  %v6387_v40 = vmul.f32 0.2, %v12486_v13 }
 0xc06   :  { %v6354_v12 = vmul.f32 0.8, %v11327_v57 }
 0xc07   :  { %6584 = vmatmul.bf16.gmra.mxu1 %v6492_v7  ;;  %11328 = vtanh.f32 %v6323_v62 }
 0xc08   :  { %v12640_v29 = vadd.f32 %v6386_v34, %v6354_v12  ;;  %v10548_v34 = vunpack.c.h.bf16 %v10876_v3 }
 0xc0a   :  { %v10576_v50 = vpack.c.bf16 %v12640_v29, %v12638_v49 }
 0xc0c   :  { %10881 = vst [vmem:[#allocation3 + $0x20] sm:$0xff] %v10576_v50   ;;  %v6300_v20 = vpop.f32.mrf.mxu0  ;;  %v6139_v5 = vpop.f32.mrf.mxu3 }
 0xc0d   :  { %v6324_v63 = vadd.f32 %v10544_v58, %v6300_v20  ;;  %v11329_v53 = vpop.eup %11328  ;;  %v10877_v58 = vld [vmem:[#allocation4 + $0x1b8] sm:$0xff]  }
 0xc0e   :  { %v6355_v18 = vmul.f32 0.8, %v11329_v53  ;;  %v10551_v50 = vunpack.c.l.bf16 %v10877_v58 }
 0xc0f   :  { %11330 = vtanh.f32 %v6324_v63 }
 0xc10   :  { %v12646_v57 = vadd.f32 %v6387_v40, %v6355_v18 }
 0xc13   :  { %v9781_v39 = vld [vmem:[#allocation3 + $0x20] sm:$0xff] }
 0xc14   :  { %v6303_v21 = vpop.f32.mrf.mxu0  ;;  %6734 = vmatmul.bf16.gmra.mxu2 %v9781_v39  ;;  %v6141_v1 = vpop.f32.mrf.mxu3  ;;  %v6390_v39 = vmul.f32 0.2, %v12496_v19 }
 0xc15   :  { %v11331_v28 = vpop.eup %11330  ;;  %v6325_v0 = vadd.f32 %v10547_v60, %v6303_v21  ;;  %v6493_v12 = vpack.c.bf16 %v6141_v1, %v6139_v5  ;;  %v6389_v5 = vmul.f32 0.2, %v12494_v27 }
 0xc16   :  { %v6356_v37 = vmul.f32 0.8, %v11331_v28 }
 0xc17   :  { %6589 = vmatmul.bf16.gmra.mxu1 %v6493_v12  ;;  %11332 = vtanh.f32 %v6325_v0 }
 0xc18   :  { %v12648_v55 = vadd.f32 %v6388_v33, %v6356_v37  ;;  %v10552_v33 = vunpack.c.h.bf16 %v10877_v58 }
 0xc1a   :  { %v10581_v62 = vpack.c.bf16 %v12648_v55, %v12646_v57 }
 0xc1c   :  { %10882 = vst [vmem:[#allocation3 + $0x28] sm:$0xff] %v10581_v62   ;;  %v6305_v44 = vpop.f32.mrf.mxu0  ;;  %v6144_v13 = vpop.f32.mrf.mxu3 }
 0xc1d   :  { %v6326_v7 = vadd.f32 %v10548_v34, %v6305_v44  ;;  %v11333_v31 = vpop.eup %11332 }
 0xc1e   :  { %v6357_v63 = vmul.f32 0.8, %v11333_v31 }
 0xc1f   :  { %11334 = vtanh.f32 %v6326_v7  ;;  %v6391_v7 = vmul.f32 0.2, %v12502_v10 }
 0xc20   :  { %v12654_v28 = vadd.f32 %v6389_v5, %v6357_v63 }
 0xc23   :  { %v9782_v20 = vld [vmem:[#allocation3 + $0x28] sm:$0xff] }
 0xc24   :  { %v6308_v53 = vpop.f32.mrf.mxu0  ;;  %6739 = vmatmul.bf16.gmra.mxu2 %v9782_v20  ;;  %v6146_v21 = vpop.f32.mrf.mxu3 }
 0xc25   :  { %v11335_v60 = vpop.eup %11334  ;;  %v6327_v18 = vadd.f32 %v10551_v50, %v6308_v53  ;;  %v6494_v37 = vpack.c.bf16 %v6146_v21, %v6144_v13  ;;  %v6392_v13 = vmul.f32 0.2, %v12504_v61  ;;  %v9806_v61 = vld [vmem:[#allocation3 + $0x28] sm:$0xff]  ;;  %v9805_v21 = vld [vmem:[#allocation3 + $0x20] sm:$0xff] }
 0xc26   :  { %v6358_v3 = vmul.f32 0.8, %v11335_v60 }
 0xc27   :  { %6594 = vmatmul.bf16.gmra.mxu1 %v6494_v37  ;;  %11336 = vtanh.f32 %v6327_v18  ;;  %v9804_v37 = vld [vmem:[#allocation3 + $0x18] sm:$0xff] }
 0xc28   :  { %v12656_v40 = vadd.f32 %v6390_v39, %v6358_v3 }
 0xc2a   :  { %v10586_v0 = vpack.c.bf16 %v12656_v40, %v12654_v28 }
 0xc2c   :  { %10883 = vst [vmem:[#allocation3 + $0x30] sm:$0xff] %v10586_v0   ;;  %v6310_v1 = vpop.f32.mrf.mxu0  ;;  %v6149_v27 = vpop.f32.mrf.mxu3  ;;  %v9803_v0 = vld [vmem:[#allocation3 + $0x10] sm:$0xff] }
 0xc2d   :  { %v6328_v12 = vadd.f32 %v10552_v33, %v6310_v1  ;;  %v11337_v34 = vpop.eup %11336 }
 0xc2e   :  { %v6359_v62 = vmul.f32 0.8, %v11337_v34 }
 0xc2f   :  { %11338 = vtanh.f32 %v6328_v12 }
 0xc30   :  { %v12662_v50 = vadd.f32 %v6391_v7, %v6359_v62 }
 0xc33   :  { %v9783_v19 = vld [vmem:[#allocation3 + $0x30] sm:$0xff] }
 0xc34   :  { %6744 = vmatmul.bf16.gmra.mxu2 %v9783_v19  ;;  %v6151_v58 = vpop.f32.mrf.mxu3  ;;  %v9807_v39 = vld [vmem:[#allocation3 + $0x30] sm:$0xff]  ;;  %v9801_v19 = vld [vmem:[#allocation3] sm:$0xff] }
 0xc35   :  { %v11339_v44 = vpop.eup %11338  ;;  %v6495_v63 = vpack.c.bf16 %v6151_v58, %v6149_v27  ;;  %v9802_v27 = vld [vmem:[#allocation3 + $0x8] sm:$0xff] }
 0xc36   :  { %v6360_v31 = vmul.f32 0.8, %v11339_v44 }
 0xc37   :  { %6599 = vmatmul.bf16.gmra.mxu1 %v6495_v63 }
 0xc38   :  { %v12664_v20 = vadd.f32 %v6392_v13, %v6360_v31 }
 0xc3a   :  { %v10591_v53 = vpack.c.bf16 %v12664_v20, %v12662_v50 }
 0xc3c   :  { %10884 = vst [vmem:[#allocation3 + $0x38] sm:$0xff] %v10591_v53   ;;  %v6154_v60 = vpop.f32.mrf.mxu3  ;;  %v6803_v53 = vmul.f32 0.2, %v12511_v16 }
 0xc43   :  { %v9784_v5 = vld [vmem:[#allocation3 + $0x38] sm:$0xff] }
 0xc44   :  { %v9808_v3 = vld [vmem:[#allocation3 + $0x38] sm:$0xff]  ;;  %6749 = vmatmul.bf16.gmra.mxu2 %v9784_v5  ;;  %v6156_v10 = vpop.f32.mrf.mxu3  ;;  %v6804_v5 = vmul.f32 0.2, %v12513_v30 }
 0xc45   :  { %6947 = vmatpush.bf16.msra.mxu3 %v9808_v3  ;;  %v6496_v18 = vpack.c.bf16 %v6156_v10, %v6154_v60 }
 0xc47   :  { %6604 = vmatmul.bf16.gmra.mxu1 %v6496_v18 }
 0xc49   :  { %6948 = vmatpush.bf16.msra.mxu3 %v9807_v39 }
 0xc4d   :  { %6949 = vmatpush.bf16.msra.mxu3 %v9806_v61 }
 0xc51   :  { %6950 = vmatpush.bf16.msra.mxu3 %v9805_v21 }
 0xc54   :  { %v6570_v33 = vpop.f32.mrf.mxu1 }
 0xc55   :  { %6951 = vmatpush.bf16.msra.mxu3 %v9804_v37 }
 0xc57   :  { %v6715_v1 = vpop.f32.mrf.mxu2 }
 0xc58   :  { %v6716_v12 = vadd.f32 %v6715_v1, %v6570_v33 }
 0xc59   :  { %6952 = vmatpush.bf16.msra.mxu3 %v9803_v0 }
 0xc5a   :  { %11340 = vtanh.f32 %v6716_v12  ;;  %v6805_v12 = vmul.f32 0.2, %v12520_v41 }
 0xc5c   :  { %v6572_v34 = vpop.f32.mrf.mxu1 }
 0xc5d   :  { %6953 = vmatpush.bf16.msra.mxu3 %v9802_v27 }
 0xc5f   :  { %v6717_v62 = vpop.f32.mrf.mxu2 }
 0xc60   :  { %v6718_v44 = vadd.f32 %v6717_v62, %v6572_v34  ;;  %v11341_v7 = vpop.eup %11340  ;;  %v6806_v34 = vmul.f32 0.2, %v12522_v51 }
 0xc61   :  { %6954 = vmatpush.bf16.msra.mxu3 %v9801_v19  ;;  %v6771_v13 = vmul.f32 0.8, %v11341_v7 }
 0xc62   :  { %11342 = vtanh.f32 %v6718_v44 }
 0xc63   :  { %v12671_v10 = vadd.f32 %v6803_v53, %v6771_v13 }
 0xc64   :  { %6955 = vmatmul.bf16.vlgmr.msra.gmra.mxu3 %v12580_v32  ;;  %v6575_v31 = vpop.f32.mrf.mxu1 }
 0xc67   :  { %v6720_v58 = vpop.f32.mrf.mxu2 }
 0xc68   :  { %v11343_v63 = vpop.eup %11342  ;;  %v6721_v3 = vadd.f32 %v6720_v58, %v6575_v31 }
 0xc69   :  { %v6772_v60 = vmul.f32 0.8, %v11343_v63 }
 0xc6a   :  { %11344 = vtanh.f32 %v6721_v3 }
 0xc6b   :  { %v12673_v39 = vadd.f32 %v6804_v5, %v6772_v60  ;;  %v6807_v5 = vmul.f32 0.2, %v12529_v54 }
 0xc6c   :  { %v6577_v61 = vpop.f32.mrf.mxu1 }
 0xc6d   :  { %v10596_v18 = vpack.c.bf16 %v12673_v39, %v12671_v10 }
 0xc6f   :  { %10597 = vst [vmem:[#allocation3 + $0x40] sm:$0xff] %v10596_v18   ;;  %v6722_v21 = vpop.f32.mrf.mxu2  ;;  %v6808_v18 = vmul.f32 0.2, %v12531_v47 }
 0xc70   :  { %v6723_v37 = vadd.f32 %v6722_v21, %v6577_v61  ;;  %v11345_v16 = vpop.eup %11344 }
 0xc71   :  { %v6773_v0 = vmul.f32 0.8, %v11345_v16 }
 0xc72   :  { %11346 = vtanh.f32 %v6723_v37 }
 0xc73   :  { %v12680_v62 = vadd.f32 %v6805_v12, %v6773_v0 }
 0xc74   :  { %6960 = vmatmul.bf16.gmra.mxu3 %v12583_v2  ;;  %v6580_v33 = vpop.f32.mrf.mxu1 }
 0xc77   :  { %v6725_v30 = vpop.f32.mrf.mxu2 }
 0xc78   :  { %v11347_v1 = vpop.eup %11346  ;;  %v6726_v19 = vadd.f32 %v6725_v30, %v6580_v33 }
 0xc79   :  { %v6774_v27 = vmul.f32 0.8, %v11347_v1 }
 0xc7a   :  { %11348 = vtanh.f32 %v6726_v19 }
 0xc7b   :  { %v12682_v44 = vadd.f32 %v6806_v34, %v6774_v27  ;;  %v6809_v34 = vmul.f32 0.2, %v12538_v43 }
 0xc7c   :  { %v6582_v31 = vpop.f32.mrf.mxu1 }
 0xc7d   :  { %v10601_v7 = vpack.c.bf16 %v12682_v44, %v12680_v62 }
 0xc7f   :  { %10885 = vst [vmem:[#allocation3 + $0x48] sm:$0xff] %v10601_v7   ;;  %v6727_v13 = vpop.f32.mrf.mxu2  ;;  %v6810_v7 = vmul.f32 0.2, %v12540_v17 }
 0xc80   :  { %v6728_v58 = vadd.f32 %v6727_v13, %v6582_v31  ;;  %v11349_v41 = vpop.eup %11348 }
 0xc81   :  { %v6775_v53 = vmul.f32 0.8, %v11349_v41 }
 0xc82   :  { %11350 = vtanh.f32 %v6728_v58 }
 0xc83   :  { %v12689_v21 = vadd.f32 %v6807_v5, %v6775_v53 }
 0xc84   :  { %6965 = vmatmul.bf16.gmra.mxu3 %v12586_v26  ;;  %v6585_v63 = vpop.f32.mrf.mxu1 }
 0xc87   :  { %v6730_v51 = vpop.f32.mrf.mxu2 }
 0xc88   :  { %v11351_v60 = vpop.eup %11350  ;;  %v6731_v61 = vadd.f32 %v6730_v51, %v6585_v63 }
 0xc89   :  { %v6776_v3 = vmul.f32 0.8, %v11351_v60 }
 0xc8a   :  { %11352 = vtanh.f32 %v6731_v61 }
 0xc8b   :  { %v12691_v37 = vadd.f32 %v6808_v18, %v6776_v3  ;;  %v6811_v18 = vmul.f32 0.2, %v12547_v22 }
 0xc8c   :  { %v6587_v33 = vpop.f32.mrf.mxu1 }
 0xc8d   :  { %v10606_v16 = vpack.c.bf16 %v12691_v37, %v12689_v21 }
 0xc8f   :  { %10886 = vst [vmem:[#allocation3 + $0x50] sm:$0xff] %v10606_v16   ;;  %v6732_v0 = vpop.f32.mrf.mxu2  ;;  %v6812_v16 = vmul.f32 0.2, %v12549_v25  ;;  %v9823_v25 = vld [vmem:[#allocation9 + $0x30] sm:$0xff] }
 0xc90   :  { %v6733_v30 = vadd.f32 %v6732_v0, %v6587_v33  ;;  %v11353_v54 = vpop.eup %11352 }
 0xc91   :  { %v6777_v12 = vmul.f32 0.8, %v11353_v54 }
 0xc92   :  { %11354 = vtanh.f32 %v6733_v30 }
 0xc93   :  { %v12698_v13 = vadd.f32 %v6809_v34, %v6777_v12 }
 0xc94   :  { %6970 = vmatmul.bf16.gmra.mxu3 %v12589_v24  ;;  %v6590_v1 = vpop.f32.mrf.mxu1 }
 0xc97   :  { %v6735_v47 = vpop.f32.mrf.mxu2 }
 0xc98   :  { %v11355_v27 = vpop.eup %11354  ;;  %v6736_v31 = vadd.f32 %v6735_v47, %v6590_v1 }
 0xc99   :  { %v6778_v19 = vmul.f32 0.8, %v11355_v27  ;;  %v9824_v27 = vld [vmem:[#allocation9 + $0x38] sm:$0xff] }
 0xc9a   :  { %11356 = vtanh.f32 %v6736_v31  ;;  %7214 = vmatpush.bf16.msrb.mxu1 %v9824_v27  ;;  %v9818_v27 = vld [vmem:[#allocation9 + $0x8] sm:$0xff] }
 0xc9b   :  { %v12700_v58 = vadd.f32 %v6810_v7, %v6778_v19 }
 0xc9c   :  { %v6592_v63 = vpop.f32.mrf.mxu1 }
 0xc9d   :  { %v10611_v41 = vpack.c.bf16 %v12700_v58, %v12698_v13 }
 0xc9e   :  { %7215 = vmatpush.bf16.msrb.mxu1 %v9823_v25 }
 0xc9f   :  { %10887 = vst [vmem:[#allocation3 + $0x58] sm:$0xff] %v10611_v41   ;;  %v6737_v53 = vpop.f32.mrf.mxu2  ;;  %v9822_v41 = vld [vmem:[#allocation9 + $0x28] sm:$0xff] }
 0xca0   :  { %v6738_v51 = vadd.f32 %v6737_v53, %v6592_v63  ;;  %v11357_v43 = vpop.eup %11356  ;;  %v6813_v63 = vmul.f32 0.2, %v12556_v48 }
 0xca1   :  { %v6779_v5 = vmul.f32 0.8, %v11357_v43 }
 0xca2   :  { %11358 = vtanh.f32 %v6738_v51  ;;  %v6814_v51 = vmul.f32 0.2, %v12558_v6  ;;  %7216 = vmatpush.bf16.msrb.mxu1 %v9822_v41  ;;  %v9817_v41 = vld [vmem:[#allocation9] sm:$0xff] }
 0xca3   :  { %v12707_v0 = vadd.f32 %v6811_v18, %v6779_v5 }
 0xca4   :  { %6975 = vmatmul.bf16.gmra.mxu3 %v12592_v36  ;;  %v6595_v60 = vpop.f32.mrf.mxu1 }
 0xca7   :  { %v6740_v17 = vpop.f32.mrf.mxu2 }
 0xca8   :  { %v11359_v3 = vpop.eup %11358  ;;  %v6741_v33 = vadd.f32 %v6740_v17, %v6595_v60  ;;  %v9821_v17 = vld [vmem:[#allocation9 + $0x20] sm:$0xff] }
 0xca9   :  { %v6780_v61 = vmul.f32 0.8, %v11359_v3  ;;  %7217 = vmatpush.bf16.msrb.mxu1 %v9821_v17 }
 0xcaa   :  { %11360 = vtanh.f32 %v6741_v33  ;;  %v9819_v33 = vld [vmem:[#allocation9 + $0x10] sm:$0xff] }
 0xcab   :  { %v12709_v30 = vadd.f32 %v6812_v16, %v6780_v61  ;;  %v9820_v16 = vld [vmem:[#allocation9 + $0x18] sm:$0xff] }
 0xcac   :  { %v6597_v1 = vpop.f32.mrf.mxu1 }
 0xcad   :  { %v10616_v54 = vpack.c.bf16 %v12709_v30, %v12707_v0  ;;  %7218 = vmatpush.bf16.msrb.mxu1 %v9820_v16 }
 0xcaf   :  { %10888 = vst [vmem:[#allocation3 + $0x60] sm:$0xff] %v10616_v54   ;;  %v6742_v12 = vpop.f32.mrf.mxu2 }
 0xcb0   :  { %v6743_v47 = vadd.f32 %v6742_v12, %v6597_v1  ;;  %v11361_v22 = vpop.eup %11360 }
 0xcb1   :  { %v6781_v19 = vmul.f32 0.8, %v11361_v22  ;;  %7219 = vmatpush.bf16.msrb.mxu1 %v9819_v33  ;;  %v6815_v22 = vmul.f32 0.2, %v12565_v52 }
 0xcb2   :  { %11362 = vtanh.f32 %v6743_v47 }
 0xcb3   :  { %v12716_v60 = vadd.f32 %v6813_v63, %v6781_v19 }
 0xcb4   :  { %6980 = vmatmul.bf16.gmra.mxu3 %v12595_v42  ;;  %v6600_v34 = vpop.f32.mrf.mxu1 }
 0xcb5   :  { %7220 = vmatpush.bf16.msrb.mxu1 %v9818_v27 }
 0xcb7   :  { %v6745_v7 = vpop.f32.mrf.mxu2 }
 0xcb8   :  { %v11363_v31 = vpop.eup %11362  ;;  %v6746_v43 = vadd.f32 %v6745_v7, %v6600_v34  ;;  %v6816_v34 = vmul.f32 0.2, %v12567_v15 }
 0xcb9   :  { %v6782_v53 = vmul.f32 0.8, %v11363_v31  ;;  %7221 = vmatpush.bf16.msrb.mxu1 %v9817_v41 }
 0xcba   :  { %11364 = vtanh.f32 %v6746_v43 }
 0xcbb   :  { %v12718_v5 = vadd.f32 %v6814_v51, %v6782_v53 }
 0xcbc   :  { %v6602_v18 = vpop.f32.mrf.mxu1 }
 0xcbd   :  { %v10621_v3 = vpack.c.bf16 %v12718_v5, %v12716_v60 }
 0xcbf   :  { %10889 = vst [vmem:[#allocation3 + $0x68] sm:$0xff] %v10621_v3   ;;  %v6747_v61 = vpop.f32.mrf.mxu2  ;;  %v6817_v3 = vmul.f32 0.2, %v12574_v45  ;;  %v9813_v45 = vld [vmem:[#allocation3 + $0x60] sm:$0xff] }
 0xcc0   :  { %v6748_v48 = vadd.f32 %v6747_v61, %v6602_v18  ;;  %v11365_v6 = vpop.eup %11364  ;;  %v6818_v61 = vmul.f32 0.2, %v12576_v35 }
 0xcc1   :  { %v6783_v1 = vmul.f32 0.8, %v11365_v6 }
 0xcc2   :  { %11366 = vtanh.f32 %v6748_v48 }
 0xcc3   :  { %v12725_v7 = vadd.f32 %v6815_v22, %v6783_v1  ;;  %v9812_v22 = vld [vmem:[#allocation3 + $0x58] sm:$0xff] }
 0xcc4   :  { %6985 = vmatmul.bf16.gmra.mxu3 %v12598_v38  ;;  %v6605_v54 = vpop.f32.mrf.mxu1 }
 0xcc7   :  { %v6750_v12 = vpop.f32.mrf.mxu2 }
 0xcc8   :  { %v11367_v47 = vpop.eup %11366  ;;  %v6751_v19 = vadd.f32 %v6750_v12, %v6605_v54 }
 0xcc9   :  { %v6784_v25 = vmul.f32 0.8, %v11367_v47  ;;  %v9814_v47 = vld [vmem:[#allocation3 + $0x68] sm:$0xff] }
 0xcca   :  { %11368 = vtanh.f32 %v6751_v19  ;;  %v9810_v19 = vld [vmem:[#allocation3 + $0x48] sm:$0xff] }
 0xccb   :  { %v12727_v31 = vadd.f32 %v6816_v34, %v6784_v25  ;;  %v9811_v25 = vld [vmem:[#allocation3 + $0x50] sm:$0xff] }
 0xccc   :  { %v6607_v53 = vpop.f32.mrf.mxu1 }
 0xccd   :  { %v10626_v63 = vpack.c.bf16 %v12727_v31, %v12725_v7 }
 0xccf   :  { %10890 = vst [vmem:[#allocation3 + $0x70] sm:$0xff] %v10626_v63   ;;  %v6752_v51 = vpop.f32.mrf.mxu2  ;;  %v9809_v63 = vld [vmem:[#allocation3 + $0x40] sm:$0xff] }
 0xcd0   :  { %v6753_v43 = vadd.f32 %v6752_v51, %v6607_v53  ;;  %v11369_v52 = vpop.eup %11368 }
 0xcd1   :  { %v6785_v15 = vmul.f32 0.8, %v11369_v52 }
 0xcd2   :  { %11370 = vtanh.f32 %v6753_v43 }
 0xcd3   :  { %v12734_v16 = vadd.f32 %v6817_v3, %v6785_v15 }
 0xcd4   :  { %6990 = vmatmul.bf16.gmra.mxu3 %v12601_v4 }
 0xcd6   :  { %v9815_v1 = vld [vmem:[#allocation3 + $0x70] sm:$0xff] }
 0xcd8   :  { %v11371_v17 = vpop.eup %11370 }
 0xcd9   :  { %v6786_v18 = vmul.f32 0.8, %v11371_v17 }
 0xcdb   :  { %v12736_v48 = vadd.f32 %v6818_v61, %v6786_v18 }
 0xcdd   :  { %v10631_v6 = vpack.c.bf16 %v12736_v48, %v12734_v16 }
 0xcdf   :  { %10891 = vst [vmem:[#allocation3 + $0x78] sm:$0xff] %v10631_v6  }
 0xce6   :  { %v9816_v54 = vld [vmem:[#allocation3 + $0x78] sm:$0xff] }
 0xce7   :  { %v6956_v33 = vpop.f32.mrf.mxu3  ;;  %7060 = vmatpush.bf16.msrb.mxu0 %v9816_v54 }
 0xceb   :  { %7061 = vmatpush.bf16.msrb.mxu0 %v9815_v1 }
 0xcef   :  { %v6958_v12 = vpop.f32.mrf.mxu3  ;;  %7062 = vmatpush.bf16.msrb.mxu0 %v9814_v47 }
 0xcf0   :  { %v7142_v27 = vpack.c.bf16 %v6958_v12, %v6956_v33  ;;  %v9840_v12 = vld [vmem:[#allocation10 + $0x38] sm:$0xff] }
 0xcf1   :  { %7656 = vmatpush.bf16.msrb.mxu3 %v9840_v12 }
 0xcf2   :  { %7222 = vmatmul.bf16.vlgmr.msrb.gmra.mxu1 %v7142_v27  ;;  %v9839_v27 = vld [vmem:[#allocation10 + $0x30] sm:$0xff] }
 0xcf3   :  { %7063 = vmatpush.bf16.msrb.mxu0 %v9813_v45 }
 0xcf5   :  { %7657 = vmatpush.bf16.msrb.mxu3 %v9839_v27  ;;  %v7328_v27 = vmul.f32 0.2, %v12608_v8 }
 0xcf7   :  { %v6961_v35 = vpop.f32.mrf.mxu3  ;;  %7064 = vmatpush.bf16.msrb.mxu0 %v9812_v22  ;;  %v9845_v22 = vld [vmem:[#allocation12 + $0x20] sm:$0xff] }
 0xcfb   :  { %7065 = vmatpush.bf16.msrb.mxu0 %v9811_v25 }
 0xcff   :  { %v6963_v34 = vpop.f32.mrf.mxu3  ;;  %7066 = vmatpush.bf16.msrb.mxu0 %v9810_v19  ;;  %v9836_v19 = vld [vmem:[#allocation10 + $0x18] sm:$0xff] }
 0xd00   :  { %v7143_v41 = vpack.c.bf16 %v6963_v34, %v6961_v35  ;;  %v9846_v35 = vld [vmem:[#allocation12 + $0x28] sm:$0xff]  ;;  %v9844_v34 = vld [vmem:[#allocation12 + $0x18] sm:$0xff] }
 0xd02   :  { %7227 = vmatmul.bf16.gmra.mxu1 %v7143_v41 }
 0xd03   :  { %7067 = vmatpush.bf16.msrb.mxu0 %v9809_v63  ;;  %v9843_v63 = vld [vmem:[#allocation12 + $0x10] sm:$0xff] }
 0xd06   :  { %7068 = vmatmul.bf16.vlgmr.msrb.gmra.mxu0 %v12580_v32 }
 0xd07   :  { %v6966_v53 = vpop.f32.mrf.mxu3 }
 0xd0f   :  { %v6968_v51 = vpop.f32.mrf.mxu3 }
 0xd10   :  { %v7144_v43 = vpack.c.bf16 %v6968_v51, %v6966_v53  ;;  %v9835_v53 = vld [vmem:[#allocation10 + $0x10] sm:$0xff]  ;;  %v9842_v51 = vld [vmem:[#allocation12 + $0x8] sm:$0xff] }
 0xd12   :  { %7232 = vmatmul.bf16.gmra.mxu1 %v7144_v43  ;;  %v9834_v43 = vld [vmem:[#allocation10 + $0x8] sm:$0xff] }
 0xd16   :  { %7073 = vmatmul.bf16.gmra.mxu0 %v12583_v2  ;;  %v9848_v2 = vld [vmem:[#allocation12 + $0x38] sm:$0xff] }
 0xd17   :  { %v6971_v52 = vpop.f32.mrf.mxu3  ;;  %7511 = vmatpush.bf16.msrb.mxu2 %v9848_v2 }
 0xd1f   :  { %v6973_v15 = vpop.f32.mrf.mxu3 }
 0xd20   :  { %v7145_v17 = vpack.c.bf16 %v6973_v15, %v6971_v52  ;;  %v9841_v52 = vld [vmem:[#allocation12] sm:$0xff] }
 0xd21   :  { %v9833_v15 = vld [vmem:[#allocation10] sm:$0xff] }
 0xd22   :  { %7237 = vmatmul.bf16.gmra.mxu1 %v7145_v17 }
 0xd26   :  { %7078 = vmatmul.bf16.gmra.mxu0 %v12586_v26  ;;  %v9847_v26 = vld [vmem:[#allocation12 + $0x30] sm:$0xff] }
 0xd27   :  { %v6976_v3 = vpop.f32.mrf.mxu3  ;;  %7512 = vmatpush.bf16.msrb.mxu2 %v9847_v26 }
 0xd2b   :  { %7513 = vmatpush.bf16.msrb.mxu2 %v9846_v35 }
 0xd2f   :  { %v6978_v18 = vpop.f32.mrf.mxu3  ;;  %7514 = vmatpush.bf16.msrb.mxu2 %v9845_v22 }
 0xd30   :  { %v7146_v61 = vpack.c.bf16 %v6978_v18, %v6976_v3 }
 0xd32   :  { %7242 = vmatmul.bf16.gmra.mxu1 %v7146_v61 }
 0xd33   :  { %7515 = vmatpush.bf16.msrb.mxu2 %v9844_v34 }
 0xd36   :  { %7083 = vmatmul.bf16.gmra.mxu0 %v12589_v24  ;;  %v9838_v24 = vld [vmem:[#allocation10 + $0x28] sm:$0xff] }
 0xd37   :  { %v6981_v6 = vpop.f32.mrf.mxu3  ;;  %7658 = vmatpush.bf16.msrb.mxu3 %v9838_v24  ;;  %7516 = vmatpush.bf16.msrb.mxu2 %v9843_v63 }
 0xd3b   :  { %7517 = vmatpush.bf16.msrb.mxu2 %v9842_v51 }
 0xd3f   :  { %v6983_v33 = vpop.f32.mrf.mxu3  ;;  %7518 = vmatpush.bf16.msrb.mxu2 %v9841_v52  ;;  %v7329_v52 = vmul.f32 0.2, %v12614_v56 }
 0xd40   :  { %v7147_v32 = vpack.c.bf16 %v6983_v33, %v6981_v6 }
 0xd42   :  { %7247 = vmatmul.bf16.gmra.mxu1 %v7147_v32  ;;  %v10892_v32 = vld [vmem:[#allocation4 + $0x1c8] sm:$0xff]  }
 0xd43   :  { %v10640_v22 = vunpack.c.h.bf16 %v10892_v32 }
 0xd46   :  { %7088 = vmatmul.bf16.gmra.mxu0 %v12592_v36  ;;  %v9837_v36 = vld [vmem:[#allocation10 + $0x20] sm:$0xff] }
 0xd47   :  { %v6986_v54 = vpop.f32.mrf.mxu3  ;;  %7659 = vmatpush.bf16.msrb.mxu3 %v9837_v36 }
 0xd4b   :  { %7660 = vmatpush.bf16.msrb.mxu3 %v9836_v19  ;;  %v10893_v19 = vld [vmem:[#allocation4 + $0x1d0] sm:$0xff]  }
 0xd4c   :  { %v10643_v51 = vunpack.c.l.bf16 %v10893_v19 }
 0xd4f   :  { %v6988_v1 = vpop.f32.mrf.mxu3  ;;  %7661 = vmatpush.bf16.msrb.mxu3 %v9835_v53 }
 0xd50   :  { %v7148_v47 = vpack.c.bf16 %v6988_v1, %v6986_v54 }
 0xd52   :  { %7252 = vmatmul.bf16.gmra.mxu1 %v7148_v47  ;;  %v7327_v47 = vmul.f32 0.2, %v12606_v9 }
 0xd53   :  { %7662 = vmatpush.bf16.msrb.mxu3 %v9834_v43 }
 0xd56   :  { %7093 = vmatmul.bf16.gmra.mxu0 %v12595_v42  ;;  %v10634_v42 = vld [vmem:[#allocation4 + $0x1c0] sm:$0xff]  }
 0xd57   :  { %v6991_v45 = vpop.f32.mrf.mxu3  ;;  %7663 = vmatpush.bf16.msrb.mxu3 %v9833_v15  ;;  %v10635_v17 = vunpack.c.l.bf16 %v10634_v42  ;;  %v10636_v61 = vunpack.c.h.bf16 %v10634_v42 }
 0xd5f   :  { %v6993_v25 = vpop.f32.mrf.mxu3 }
 0xd60   :  { %v7149_v41 = vpack.c.bf16 %v6993_v25, %v6991_v45 }
 0xd62   :  { %7257 = vmatmul.bf16.gmra.mxu1 %v7149_v41 }
 0xd66   :  { %7098 = vmatmul.bf16.gmra.mxu0 %v12598_v38  ;;  %v10639_v38 = vunpack.c.l.bf16 %v10892_v32 }
 0xd6f   :  { %v7223_v3 = vpop.f32.mrf.mxu1 }
 0xd70   :  { %v7263_v18 = vadd.f32 %v10635_v17, %v7223_v3  ;;  %v7330_v17 = vmul.f32 0.2, %v12616_v23 }
 0xd72   :  { %11372 = vtanh.f32 %v7263_v18 }
 0xd76   :  { %7103 = vmatmul.bf16.gmra.mxu0 %v12601_v4 }
 0xd77   :  { %v7225_v6 = vpop.f32.mrf.mxu1 }
 0xd78   :  { %v7264_v33 = vadd.f32 %v10636_v61, %v7225_v6  ;;  %v11373_v54 = vpop.eup %11372  ;;  %v10644_v6 = vunpack.c.h.bf16 %v10893_v19 }
 0xd79   :  { %v7295_v1 = vmul.f32 0.8, %v11373_v54 }
 0xd7a   :  { %11374 = vtanh.f32 %v7264_v33 }
 0xd7b   :  { %v7343_v35 = vadd.f32 %v7327_v47, %v7295_v1  ;;  %v10894_v1 = vld [vmem:[#allocation4 + $0x1d8] sm:$0xff]  }
 0xd7f   :  { %v7228_v2 = vpop.f32.mrf.mxu1 }
 0xd80   :  { %v11375_v12 = vpop.eup %11374  ;;  %v7265_v45 = vadd.f32 %v10639_v38, %v7228_v2 }
 0xd81   :  { %v7296_v26 = vmul.f32 0.8, %v11375_v12 }
 0xd82   :  { %11376 = vtanh.f32 %v7265_v45 }
 0xd83   :  { %v7344_v24 = vadd.f32 %v7328_v27, %v7296_v26  ;;  %v7069_v25 = vpop.f32.mrf.mxu0  ;;  %v10647_v26 = vunpack.c.l.bf16 %v10894_v1 }
 0xd85   :  { %v10668_v36 = vpack.c.bf16 %v7344_v24, %v7343_v35  ;;  %v7331_v35 = vmul.f32 0.2, %v12622_v11 }
 0xd87   :  { %10669 = vst [vmem:[#allocation3] sm:$0xff] %v10668_v36   ;;  %v7230_v4 = vpop.f32.mrf.mxu1 }
 0xd88   :  { %v7266_v34 = vadd.f32 %v10640_v22, %v7230_v4  ;;  %v11377_v41 = vpop.eup %11376  ;;  %v7332_v22 = vmul.f32 0.2, %v12624_v46 }
 0xd89   :  { %v7297_v43 = vmul.f32 0.8, %v11377_v41 }
 0xd8a   :  { %11378 = vtanh.f32 %v7266_v34  ;;  %v10648_v34 = vunpack.c.h.bf16 %v10894_v1 }
 0xd8b   :  { %v7071_v63 = vpop.f32.mrf.mxu0  ;;  %v7345_v18 = vadd.f32 %v7329_v52, %v7297_v43 }
 0xd8c   :  { %v7439_v53 = vpack.c.bf16 %v7071_v63, %v7069_v25 }
 0xd8e   :  { %v9825_v9 = vld [vmem:[#allocation3] sm:$0xff]  ;;  %7519 = vmatmul.bf16.vlgmr.msrb.gmra.mxu2 %v7439_v53 }
 0xd8f   :  { %v7233_v42 = vpop.f32.mrf.mxu1  ;;  %7664 = vmatmul.bf16.vlgmr.msrb.gmra.mxu3 %v9825_v9 }
 0xd90   :  { %v11379_v8 = vpop.eup %11378  ;;  %v7267_v3 = vadd.f32 %v10643_v51, %v7233_v42  ;;  %v10895_v51 = vld [vmem:[#allocation4 + $0x1e0] sm:$0xff]  }
 0xd91   :  { %v7298_v15 = vmul.f32 0.8, %v11379_v8  ;;  %v10651_v8 = vunpack.c.l.bf16 %v10895_v51 }
 0xd92   :  { %11380 = vtanh.f32 %v7267_v3 }
 0xd93   :  { %v7346_v61 = vadd.f32 %v7330_v17, %v7298_v15  ;;  %v7074_v32 = vpop.f32.mrf.mxu0  ;;  %v7333_v17 = vmul.f32 0.2, %v12630_v59 }
 0xd95   :  { %v10673_v33 = vpack.c.bf16 %v7346_v61, %v7345_v18  ;;  %v7334_v18 = vmul.f32 0.2, %v12632_v14 }
 0xd97   :  { %10899 = vst [vmem:[#allocation3 + $0x8] sm:$0xff] %v10673_v33   ;;  %v7235_v54 = vpop.f32.mrf.mxu1 }
 0xd98   :  { %v7268_v38 = vadd.f32 %v10644_v6, %v7235_v54  ;;  %v11381_v2 = vpop.eup %11380 }
 0xd99   :  { %v7299_v27 = vmul.f32 0.8, %v11381_v2 }
 0xd9a   :  { %11382 = vtanh.f32 %v7268_v38 }
 0xd9b   :  { %v7076_v12 = vpop.f32.mrf.mxu0  ;;  %v7347_v25 = vadd.f32 %v7331_v35, %v7299_v27  ;;  %v7335_v35 = vmul.f32 0.2, %v12638_v49 }
 0xd9c   :  { %v7440_v47 = vpack.c.bf16 %v7076_v12, %v7074_v32  ;;  %v10652_v32 = vunpack.c.h.bf16 %v10895_v51  ;;  %v10896_v12 = vld [vmem:[#allocation4 + $0x1e8] sm:$0xff]   ;;  %v10897_v51 = vld [vmem:[#allocation4 + $0x1f0] sm:$0xff]  }
 0xd9d   :  { %v10655_v27 = vunpack.c.l.bf16 %v10896_v12 }
 0xd9e   :  { %v9826_v56 = vld [vmem:[#allocation3 + $0x8] sm:$0xff]  ;;  %7524 = vmatmul.bf16.gmra.mxu2 %v7440_v47 }
 0xd9f   :  { %v7238_v45 = vpop.f32.mrf.mxu1  ;;  %7669 = vmatmul.bf16.gmra.mxu3 %v9826_v56 }
 0xda0   :  { %v11383_v23 = vpop.eup %11382  ;;  %v7269_v36 = vadd.f32 %v10647_v26, %v7238_v45 }
 0xda1   :  { %v7300_v24 = vmul.f32 0.8, %v11383_v23 }
 0xda2   :  { %11384 = vtanh.f32 %v7269_v36 }
 0xda3   :  { %v7348_v4 = vadd.f32 %v7332_v22, %v7300_v24  ;;  %v7079_v41 = vpop.f32.mrf.mxu0  ;;  %v7336_v22 = vmul.f32 0.2, %v12640_v29 }
 0xda5   :  { %v10678_v19 = vpack.c.bf16 %v7348_v4, %v7347_v25 }
 0xda7   :  { %10900 = vst [vmem:[#allocation3 + $0x10] sm:$0xff] %v10678_v19   ;;  %v7240_v63 = vpop.f32.mrf.mxu1 }
 0xda8   :  { %v7270_v53 = vadd.f32 %v10648_v34, %v7240_v63  ;;  %v11385_v9 = vpop.eup %11384  ;;  %v10656_v34 = vunpack.c.h.bf16 %v10896_v12 }
 0xda9   :  { %v7301_v52 = vmul.f32 0.8, %v11385_v9 }
 0xdaa   :  { %11386 = vtanh.f32 %v7270_v53 }
 0xdab   :  { %v7081_v43 = vpop.f32.mrf.mxu0  ;;  %v7349_v6 = vadd.f32 %v7333_v17, %v7301_v52  ;;  %v7338_v17 = vmul.f32 0.2, %v12648_v55 }
 0xdac   :  { %v7441_v42 = vpack.c.bf16 %v7081_v43, %v7079_v41 }
 0xdae   :  { %v9827_v11 = vld [vmem:[#allocation3 + $0x10] sm:$0xff]  ;;  %7529 = vmatmul.bf16.gmra.mxu2 %v7441_v42 }
 0xdaf   :  { %v7243_v15 = vpop.f32.mrf.mxu1  ;;  %7674 = vmatmul.bf16.gmra.mxu3 %v9827_v11 }
 0xdb0   :  { %v11387_v46 = vpop.eup %11386  ;;  %v7271_v61 = vadd.f32 %v10651_v8, %v7243_v15  ;;  %v10659_v8 = vunpack.c.l.bf16 %v10897_v51  ;;  %v7337_v15 = vmul.f32 0.2, %v12646_v57 }
 0xdb1   :  { %v7302_v3 = vmul.f32 0.8, %v11387_v46 }
 0xdb2   :  { %11388 = vtanh.f32 %v7271_v61 }
 0xdb3   :  { %v7350_v33 = vadd.f32 %v7334_v18, %v7302_v3  ;;  %v7084_v38 = vpop.f32.mrf.mxu0 }
 0xdb5   :  { %v10683_v54 = vpack.c.bf16 %v7350_v33, %v7349_v6  ;;  %v10660_v6 = vunpack.c.h.bf16 %v10897_v51 }
 0xdb7   :  { %10901 = vst [vmem:[#allocation3 + $0x18] sm:$0xff] %v10683_v54   ;;  %v7245_v1 = vpop.f32.mrf.mxu1 }
 0xdb8   :  { %v7272_v2 = vadd.f32 %v10652_v32, %v7245_v1  ;;  %v11389_v47 = vpop.eup %11388  ;;  %v10898_v1 = vld [vmem:[#allocation4 + $0x1f8] sm:$0xff]  }
 0xdb9   :  { %v7303_v45 = vmul.f32 0.8, %v11389_v47 }
 0xdba   :  { %11390 = vtanh.f32 %v7272_v2 }
 0xdbb   :  { %v7086_v26 = vpop.f32.mrf.mxu0  ;;  %v7351_v25 = vadd.f32 %v7335_v35, %v7303_v45 }
 0xdbc   :  { %v7442_v56 = vpack.c.bf16 %v7086_v26, %v7084_v38  ;;  %v10663_v26 = vunpack.c.l.bf16 %v10898_v1 }
 0xdbe   :  { %v9828_v59 = vld [vmem:[#allocation3 + $0x18] sm:$0xff]  ;;  %7534 = vmatmul.bf16.gmra.mxu2 %v7442_v56 }
 0xdbf   :  { %v7248_v23 = vpop.f32.mrf.mxu1  ;;  %7679 = vmatmul.bf16.gmra.mxu3 %v9828_v59  ;;  %v7339_v59 = vmul.f32 0.2, %v12654_v28 }
 0xdc0   :  { %v11391_v14 = vpop.eup %11390  ;;  %v7273_v36 = vadd.f32 %v10655_v27, %v7248_v23  ;;  %v7340_v23 = vmul.f32 0.2, %v12656_v40  ;;  %v7341_v40 = vmul.f32 0.2, %v12662_v50 }
 0xdc1   :  { %v7304_v24 = vmul.f32 0.8, %v11391_v14 }
 0xdc2   :  { %11392 = vtanh.f32 %v7273_v36 }
 0xdc3   :  { %v7352_v4 = vadd.f32 %v7336_v22, %v7304_v24  ;;  %v7089_v41 = vpop.f32.mrf.mxu0  ;;  %v10664_v22 = vunpack.c.h.bf16 %v10898_v1 }
 0xdc5   :  { %v10688_v19 = vpack.c.bf16 %v7352_v4, %v7351_v25 }
 0xdc7   :  { %10902 = vst [vmem:[#allocation3 + $0x20] sm:$0xff] %v10688_v19   ;;  %v7250_v63 = vpop.f32.mrf.mxu1 }
 0xdc8   :  { %v7274_v53 = vadd.f32 %v10656_v34, %v7250_v63  ;;  %v11393_v9 = vpop.eup %11392 }
 0xdc9   :  { %v7305_v11 = vmul.f32 0.8, %v11393_v9 }
 0xdca   :  { %11394 = vtanh.f32 %v7274_v53 }
 0xdcb   :  { %v7091_v43 = vpop.f32.mrf.mxu0  ;;  %v7353_v18 = vadd.f32 %v7337_v15, %v7305_v11 }
 0xdcc   :  { %v7443_v42 = vpack.c.bf16 %v7091_v43, %v7089_v41  ;;  %v7342_v43 = vmul.f32 0.2, %v12664_v20  ;;  %v7753_v20 = vmul.f32 0.2, %v12671_v10 }
 0xdce   :  { %v9829_v49 = vld [vmem:[#allocation3 + $0x20] sm:$0xff]  ;;  %7539 = vmatmul.bf16.gmra.mxu2 %v7443_v42 }
 0xdcf   :  { %v7253_v52 = vpop.f32.mrf.mxu1  ;;  %7684 = vmatmul.bf16.gmra.mxu3 %v9829_v49 }
 0xdd0   :  { %v11395_v29 = vpop.eup %11394  ;;  %v7275_v3 = vadd.f32 %v10659_v8, %v7253_v52 }
 0xdd1   :  { %v7306_v46 = vmul.f32 0.8, %v11395_v29 }
 0xdd2   :  { %11396 = vtanh.f32 %v7275_v3 }
 0xdd3   :  { %v7354_v61 = vadd.f32 %v7338_v17, %v7306_v46  ;;  %v7094_v32 = vpop.f32.mrf.mxu0 }
 0xdd5   :  { %v10693_v33 = vpack.c.bf16 %v7354_v61, %v7353_v18 }
 0xdd7   :  { %10903 = vst [vmem:[#allocation3 + $0x28] sm:$0xff] %v10693_v33   ;;  %v7255_v54 = vpop.f32.mrf.mxu1 }
 0xdd8   :  { %v7276_v38 = vadd.f32 %v10660_v6, %v7255_v54  ;;  %v11397_v2 = vpop.eup %11396 }
 0xdd9   :  { %v7307_v56 = vmul.f32 0.8, %v11397_v2 }
 0xdda   :  { %11398 = vtanh.f32 %v7276_v38 }
 0xddb   :  { %v7096_v12 = vpop.f32.mrf.mxu0  ;;  %v7355_v35 = vadd.f32 %v7339_v59, %v7307_v56 }
 0xddc   :  { %v7444_v47 = vpack.c.bf16 %v7096_v12, %v7094_v32 }
 0xdde   :  { %v9830_v57 = vld [vmem:[#allocation3 + $0x28] sm:$0xff]  ;;  %7544 = vmatmul.bf16.gmra.mxu2 %v7444_v47  ;;  %v7754_v47 = vmul.f32 0.2, %v12673_v39 }
 0xddf   :  { %v7258_v27 = vpop.f32.mrf.mxu1  ;;  %7689 = vmatmul.bf16.gmra.mxu3 %v9830_v57 }
 0xde0   :  { %v11399_v55 = vpop.eup %11398  ;;  %v7277_v14 = vadd.f32 %v10663_v26, %v7258_v27 }
 0xde1   :  { %v7308_v45 = vmul.f32 0.8, %v11399_v55 }
 0xde2   :  { %11400 = vtanh.f32 %v7277_v14 }
 0xde3   :  { %v7356_v24 = vadd.f32 %v7340_v23, %v7308_v45  ;;  %v7099_v25 = vpop.f32.mrf.mxu0  ;;  %v7755_v45 = vmul.f32 0.2, %v12680_v62 }
 0xde5   :  { %v10698_v36 = vpack.c.bf16 %v7356_v24, %v7355_v35 }
 0xde7   :  { %10904 = vst [vmem:[#allocation3 + $0x30] sm:$0xff] %v10698_v36   ;;  %v7260_v4 = vpop.f32.mrf.mxu1  ;;  %v7756_v36 = vmul.f32 0.2, %v12682_v44 }
 0xde8   :  { %v7278_v34 = vadd.f32 %v10664_v22, %v7260_v4  ;;  %v11401_v19 = vpop.eup %11400 }
 0xde9   :  { %v7309_v51 = vmul.f32 0.8, %v11401_v19 }
 0xdea   :  { %11402 = vtanh.f32 %v7278_v34 }
 0xdeb   :  { %v7101_v41 = vpop.f32.mrf.mxu0  ;;  %v7357_v42 = vadd.f32 %v7341_v40, %v7309_v51 }
 0xdec   :  { %v7445_v63 = vpack.c.bf16 %v7101_v41, %v7099_v25 }
 0xdee   :  { %v9831_v53 = vld [vmem:[#allocation3 + $0x30] sm:$0xff]  ;;  %7549 = vmatmul.bf16.gmra.mxu2 %v7445_v63 }
 0xdef   :  { %7694 = vmatmul.bf16.gmra.mxu3 %v9831_v53  ;;  %v7757_v53 = vmul.f32 0.2, %v12689_v21 }
 0xdf0   :  { %v11403_v28 = vpop.eup %11402 }
 0xdf1   :  { %v7310_v9 = vmul.f32 0.8, %v11403_v28 }
 0xdf3   :  { %v7358_v8 = vadd.f32 %v7342_v43, %v7310_v9  ;;  %v7104_v11 = vpop.f32.mrf.mxu0 }
 0xdf5   :  { %v10703_v49 = vpack.c.bf16 %v7358_v8, %v7357_v42  ;;  %v7758_v42 = vmul.f32 0.2, %v12691_v37 }
 0xdf7   :  { %10905 = vst [vmem:[#allocation3 + $0x38] sm:$0xff] %v10703_v49  }
 0xdfb   :  { %v7106_v52 = vpop.f32.mrf.mxu0 }
 0xdfc   :  { %v7446_v29 = vpack.c.bf16 %v7106_v52, %v7104_v11 }
 0xdfe   :  { %v9832_v15 = vld [vmem:[#allocation3 + $0x38] sm:$0xff]  ;;  %7554 = vmatmul.bf16.gmra.mxu2 %v7446_v29 }
 0xdff   :  { %7699 = vmatmul.bf16.gmra.mxu3 %v9832_v15 }
 0xe11   :  { %v7520_v46 = vpop.f32.mrf.mxu2 }
 0xe12   :  { %v7665_v17 = vpop.f32.mrf.mxu3 }
 0xe13   :  { %v7666_v3 = vadd.f32 %v7665_v17, %v7520_v46  ;;  %v7759_v46 = vmul.f32 0.2, %v12698_v13 }
 0xe15   :  { %11404 = vtanh.f32 %v7666_v3 }
 0xe19   :  { %v7522_v18 = vpop.f32.mrf.mxu2 }
 0xe1a   :  { %v7667_v61 = vpop.f32.mrf.mxu3 }
 0xe1b   :  { %v11405_v50 = vpop.eup %11404  ;;  %v7668_v6 = vadd.f32 %v7667_v61, %v7522_v18 }
 0xe1c   :  { %v7721_v33 = vmul.f32 0.8, %v11405_v50 }
 0xe1d   :  { %11406 = vtanh.f32 %v7668_v6  ;;  %v7760_v6 = vmul.f32 0.2, %v12700_v58 }
 0xe1e   :  { %v7769_v32 = vadd.f32 %v7753_v20, %v7721_v33 }
 0xe20   :  { %7852 = vst [vmem:[#allocation13] sm:$0xff] %v7769_v32 }
 0xe21   :  { %v7525_v54 = vpop.f32.mrf.mxu2 }
 0xe22   :  { %v7670_v38 = vpop.f32.mrf.mxu3 }
 0xe23   :  { %v11407_v1 = vpop.eup %11406  ;;  %v7671_v2 = vadd.f32 %v7670_v38, %v7525_v54 }
 0xe24   :  { %v7722_v12 = vmul.f32 0.8, %v11407_v1 }
 0xe25   :  { %11408 = vtanh.f32 %v7671_v2  ;;  %v7761_v2 = vmul.f32 0.2, %v12707_v0 }
 0xe26   :  { %v7770_v26 = vadd.f32 %v7754_v47, %v7722_v12 }
 0xe28   :  { %v10708_v57 = vpack.c.bf16 %v7770_v26, %v7769_v32  ;;  %7853 = vst [vmem:[#allocation13 + $0x8] sm:$0xff] %v7770_v26 }
 0xe29   :  { %v7527_v56 = vpop.f32.mrf.mxu2 }
 0xe2a   :  { %10709 = vst [vmem:[#allocation3 + $0x40] sm:$0xff] %v10708_v57   ;;  %v7672_v27 = vpop.f32.mrf.mxu3 }
 0xe2b   :  { %v11409_v55 = vpop.eup %11408  ;;  %v7673_v59 = vadd.f32 %v7672_v27, %v7527_v56  ;;  %v7762_v27 = vmul.f32 0.2, %v12709_v30 }
 0xe2c   :  { %v7723_v10 = vmul.f32 0.8, %v11409_v55 }
 0xe2d   :  { %11410 = vtanh.f32 %v7673_v59 }
 0xe2e   :  { %v7771_v23 = vadd.f32 %v7755_v45, %v7723_v10 }
 0xe30   :  { %7854 = vst [vmem:[#allocation13 + $0x10] sm:$0xff] %v7771_v23 }
 0xe31   :  { %v7530_v14 = vpop.f32.mrf.mxu2 }
 0xe32   :  { %v7675_v35 = vpop.f32.mrf.mxu3 }
 0xe33   :  { %v11411_v24 = vpop.eup %11410  ;;  %v7676_v22 = vadd.f32 %v7675_v35, %v7530_v14  ;;  %v7763_v35 = vmul.f32 0.2, %v12716_v60 }
 0xe34   :  { %v7724_v39 = vmul.f32 0.8, %v11411_v24 }
 0xe35   :  { %11412 = vtanh.f32 %v7676_v22 }
 0xe36   :  { %v7772_v25 = vadd.f32 %v7756_v36, %v7724_v39 }
 0xe38   :  { %v10713_v4 = vpack.c.bf16 %v7772_v25, %v7771_v23  ;;  %7855 = vst [vmem:[#allocation13 + $0x18] sm:$0xff] %v7772_v25 }
 0xe39   :  { %v7532_v34 = vpop.f32.mrf.mxu2 }
 0xe3a   :  { %10906 = vst [vmem:[#allocation3 + $0x48] sm:$0xff] %v10713_v4   ;;  %v7677_v19 = vpop.f32.mrf.mxu3  ;;  %v7764_v4 = vmul.f32 0.2, %v12718_v5 }
 0xe3b   :  { %v11413_v41 = vpop.eup %11412  ;;  %v7678_v63 = vadd.f32 %v7677_v19, %v7532_v34 }
 0xe3c   :  { %v7725_v62 = vmul.f32 0.8, %v11413_v41 }
 0xe3d   :  { %11414 = vtanh.f32 %v7678_v63 }
 0xe3e   :  { %v7773_v51 = vadd.f32 %v7757_v53, %v7725_v62 }
 0xe40   :  { %7856 = vst [vmem:[#allocation13 + $0x20] sm:$0xff] %v7773_v51 }
 0xe41   :  { %v7535_v28 = vpop.f32.mrf.mxu2 }
 0xe42   :  { %v7680_v40 = vpop.f32.mrf.mxu3 }
 0xe43   :  { %v11415_v9 = vpop.eup %11414  ;;  %v7681_v43 = vadd.f32 %v7680_v40, %v7535_v28 }
 0xe44   :  { %v7726_v44 = vmul.f32 0.8, %v11415_v9 }
 0xe45   :  { %11416 = vtanh.f32 %v7681_v43 }
 0xe46   :  { %v7774_v8 = vadd.f32 %v7758_v42, %v7726_v44  ;;  %v7766_v42 = vmul.f32 0.2, %v12727_v31 }
 0xe48   :  { %v10718_v49 = vpack.c.bf16 %v7774_v8, %v7773_v51  ;;  %7857 = vst [vmem:[#allocation13 + $0x28] sm:$0xff] %v7774_v8  ;;  %v7765_v51 = vmul.f32 0.2, %v12725_v7 }
 0xe49   :  { %v7537_v11 = vpop.f32.mrf.mxu2 }
 0xe4a   :  { %10907 = vst [vmem:[#allocation3 + $0x50] sm:$0xff] %v10718_v49   ;;  %v7682_v52 = vpop.f32.mrf.mxu3 }
 0xe4b   :  { %v11417_v29 = vpop.eup %11416  ;;  %v7683_v15 = vadd.f32 %v7682_v52, %v7537_v11 }
 0xe4c   :  { %v7727_v21 = vmul.f32 0.8, %v11417_v29 }
 0xe4d   :  { %11418 = vtanh.f32 %v7683_v15 }
 0xe4e   :  { %v7775_v17 = vadd.f32 %v7759_v46, %v7727_v21  ;;  %v7767_v21 = vmul.f32 0.2, %v12734_v16 }
 0xe50   :  { %7858 = vst [vmem:[#allocation13 + $0x30] sm:$0xff] %v7775_v17 }
 0xe51   :  { %v7540_v3 = vpop.f32.mrf.mxu2 }
 0xe52   :  { %v7685_v18 = vpop.f32.mrf.mxu3 }
 0xe53   :  { %v11419_v61 = vpop.eup %11418  ;;  %v7686_v50 = vadd.f32 %v7685_v18, %v7540_v3  ;;  %v7768_v3 = vmul.f32 0.2, %v12736_v48 }
 0xe54   :  { %v7728_v37 = vmul.f32 0.8, %v11419_v61 }
 0xe55   :  { %11420 = vtanh.f32 %v7686_v50 }
 0xe56   :  { %v7776_v33 = vadd.f32 %v7760_v6, %v7728_v37 }
 0xe58   :  { %v10723_v20 = vpack.c.bf16 %v7776_v33, %v7775_v17  ;;  %7859 = vst [vmem:[#allocation13 + $0x38] sm:$0xff] %v7776_v33 }
 0xe59   :  { %v7542_v32 = vpop.f32.mrf.mxu2 }
 0xe5a   :  { %10908 = vst [vmem:[#allocation3 + $0x58] sm:$0xff] %v10723_v20   ;;  %v7687_v54 = vpop.f32.mrf.mxu3 }
 0xe5b   :  { %v11421_v38 = vpop.eup %11420  ;;  %v7688_v1 = vadd.f32 %v7687_v54, %v7542_v32 }
 0xe5c   :  { %v7729_v13 = vmul.f32 0.8, %v11421_v38 }
 0xe5d   :  { %11422 = vtanh.f32 %v7688_v1 }
 0xe5e   :  { %v7777_v12 = vadd.f32 %v7761_v2, %v7729_v13 }
 0xe60   :  { %7860 = vst [vmem:[#allocation13 + $0x40] sm:$0xff] %v7777_v12 }
 0xe61   :  { %v7545_v47 = vpop.f32.mrf.mxu2 }
 0xe62   :  { %v7690_v26 = vpop.f32.mrf.mxu3 }
 0xe63   :  { %v11423_v57 = vpop.eup %11422  ;;  %v7691_v56 = vadd.f32 %v7690_v26, %v7545_v47 }
 0xe64   :  { %v7730_v58 = vmul.f32 0.8, %v11423_v57 }
 0xe65   :  { %11424 = vtanh.f32 %v7691_v56 }
 0xe66   :  { %v7778_v55 = vadd.f32 %v7762_v27, %v7730_v58 }
 0xe68   :  { %v10728_v59 = vpack.c.bf16 %v7778_v55, %v7777_v12  ;;  %7861 = vst [vmem:[#allocation13 + $0x48] sm:$0xff] %v7778_v55 }
 0xe69   :  { %v7547_v10 = vpop.f32.mrf.mxu2 }
 0xe6a   :  { %10909 = vst [vmem:[#allocation3 + $0x60] sm:$0xff] %v10728_v59   ;;  %v7692_v45 = vpop.f32.mrf.mxu3 }
 0xe6b   :  { %v11425_v23 = vpop.eup %11424  ;;  %v7693_v14 = vadd.f32 %v7692_v45, %v7547_v10 }
 0xe6c   :  { %v7731_v0 = vmul.f32 0.8, %v11425_v23 }
 0xe6d   :  { %11426 = vtanh.f32 %v7693_v14 }
 0xe6e   :  { %v7779_v24 = vadd.f32 %v7763_v35, %v7731_v0 }
 0xe70   :  { %7862 = vst [vmem:[#allocation13 + $0x50] sm:$0xff] %v7779_v24 }
 0xe71   :  { %v7550_v22 = vpop.f32.mrf.mxu2 }
 0xe72   :  { %v7695_v39 = vpop.f32.mrf.mxu3 }
 0xe73   :  { %v11427_v36 = vpop.eup %11426  ;;  %v7696_v25 = vadd.f32 %v7695_v39, %v7550_v22 }
 0xe74   :  { %v7732_v30 = vmul.f32 0.8, %v11427_v36 }
 0xe75   :  { %11428 = vtanh.f32 %v7696_v25 }
 0xe76   :  { %v7780_v34 = vadd.f32 %v7764_v4, %v7732_v30 }
 0xe78   :  { %v10733_v19 = vpack.c.bf16 %v7780_v34, %v7779_v24  ;;  %7863 = vst [vmem:[#allocation13 + $0x58] sm:$0xff] %v7780_v34 }
 0xe79   :  { %v7552_v41 = vpop.f32.mrf.mxu2 }
 0xe7a   :  { %10910 = vst [vmem:[#allocation3 + $0x68] sm:$0xff] %v10733_v19   ;;  %v7697_v63 = vpop.f32.mrf.mxu3 }
 0xe7b   :  { %v11429_v62 = vpop.eup %11428  ;;  %v7698_v53 = vadd.f32 %v7697_v63, %v7552_v41 }
 0xe7c   :  { %v7733_v60 = vmul.f32 0.8, %v11429_v62 }
 0xe7d   :  { %11430 = vtanh.f32 %v7698_v53 }
 0xe7e   :  { %v7781_v28 = vadd.f32 %v7765_v51, %v7733_v60 }
 0xe80   :  { %7864 = vst [vmem:[#allocation13 + $0x60] sm:$0xff] %v7781_v28 }
 0xe81   :  { %v7555_v40 = vpop.f32.mrf.mxu2 }
 0xe82   :  { %v7700_v9 = vpop.f32.mrf.mxu3 }
 0xe83   :  { %v11431_v43 = vpop.eup %11430  ;;  %v7701_v44 = vadd.f32 %v7700_v9, %v7555_v40 }
 0xe84   :  { %v7734_v5 = vmul.f32 0.8, %v11431_v43 }
 0xe85   :  { %11432 = vtanh.f32 %v7701_v44 }
 0xe86   :  { %v7782_v8 = vadd.f32 %v7766_v42, %v7734_v5 }
 0xe88   :  { %v10738_v49 = vpack.c.bf16 %v7782_v8, %v7781_v28  ;;  %7865 = vst [vmem:[#allocation13 + $0x68] sm:$0xff] %v7782_v8 }
 0xe89   :  { %v7557_v11 = vpop.f32.mrf.mxu2 }
 0xe8a   :  { %10911 = vst [vmem:[#allocation3 + $0x70] sm:$0xff] %v10738_v49   ;;  %v7702_v52 = vpop.f32.mrf.mxu3 }
 0xe8b   :  { %v11433_v29 = vpop.eup %11432  ;;  %v7703_v15 = vadd.f32 %v7702_v52, %v7557_v11 }
 0xe8c   :  { %v7735_v7 = vmul.f32 0.8, %v11433_v29 }
 0xe8d   :  { %11434 = vtanh.f32 %v7703_v15 }
 0xe8e   :  { %v7783_v46 = vadd.f32 %v7767_v21, %v7735_v7 }
 0xe90   :  { %7866 = vst [vmem:[#allocation13 + $0x70] sm:$0xff] %v7783_v46 }
 0xe93   :  { %v11435_v31 = vpop.eup %11434 }
 0xe94   :  { %v7736_v17 = vmul.f32 0.8, %v11435_v31 }
 0xe96   :  { %v7784_v18 = vadd.f32 %v7768_v3, %v7736_v17 }
 0xe98   :  { %v10743_v61 = vpack.c.bf16 %v7784_v18, %v7783_v46  ;;  %7867 = vst [vmem:[#allocation13 + $0x78] sm:$0xff] %v7784_v18 }
 0xe99   :  { %7880 = dma.vmem_to_hbm [thread:$0]  %s7873_s4, 2048, %s7875_s19, [#allocation6], %s11629_s20, %s11629_s20, %s11630_s21  }
 0xe9a   :  { %10912 = vst [vmem:[#allocation3 + $0x78] sm:$0xff] %v10743_v61  }
 0xe9b   :  { %11618 = dma.done.wait [#allocation6], 2048  }
 0xe9c   :  { %11619 = vsyncadd [#allocation6], 4294965248 }
 0xe9d   :  { %7885 = vsyncpa [#allocation5], 1 }
 0xe9e   :  { %7886 = vsyncpa [#allocation8], 1 }
 0xe9f   :  { %7887 = vsyncpa [#allocation11], 1 }
 0xea0   :  { %7888 = vsyncpa [#allocation6], 1 }

</bundles_post_ra>
